<compile_context>
chip_gen: v7x
topology: tpu7x:2x2x1
jax: 0.10.0
libtpu: 0.0.40
codegen_flags: <defaults>
</compile_context>

<pallas_src>
import functools

import jax
import jax.numpy as jnp
from jax.experimental import pallas as pl
from jax.experimental.pallas import tpu as pltpu

LANE = 128
# Switch conv algo to 9 accumulated per-tap dots at this Cin (per-tap K then
# saturates the 256-deep MXU on v6e/v7x; on v5e 128 would already qualify).
PER_TAP_MIN_CIN = 256


def _round_up(x, m):
    return (x + m - 1) // m * m


def _pad_axis(a, axis, target):
    pad = target - a.shape[axis]
    if pad <= 0:
        return a
    widths = [(0, 0)] * a.ndim
    widths[axis] = (0, pad)
    return jnp.pad(a, widths)


def _vmem_limit_bytes():
    # Generation-aware VMEM budget: leave ~25% headroom for Mosaic internal
    # scratch + double-buffered BlockSpec windows.  v5e/v6e (128 MiB) -> 96 MiB,
    # v7x (64 MiB) -> 48 MiB.
    try:
        cap = int(pltpu.get_tpu_info().vmem_capacity_bytes)
    except Exception:
        cap = 64 * 1024 * 1024
    return min(cap * 3 // 4, 96 * 1024 * 1024)


# ------------------- conv3x3 + bias + ReLU (+ fused 2x2 maxpool) -------------
def _conv3x3_relu_kernel(x_ref, w_ref, b_ref, o_ref, xp_ref, *, pool, per_tap):
    # x_ref : (1, H, W, Cin)    bf16 (Cin = real cin for layer 1, else the
    #                           lane-padded channel count of the prev layer)
    # w_ref : (Kw, Cout)        bf16, 3x3 taps flattened; Kw = 9*Cin padded to 128
    # b_ref : (1, Cout)         f32
    # o_ref : (1, Ho, Wo, Cout) bf16  (Ho = H//2 when the 2x2 pool is fused)
    # xp_ref: (H+2, W+2, Cin)   bf16 VMEM scratch holding the zero-halo image
    _, H, W, Cin = x_ref.shape
    Kw, Cout = w_ref.shape
    K = 9 * Cin

    # Zero only the 1-pixel halo ring: the interior is fully overwritten every
    # grid step, so a full-scratch memset would waste (H+2)(W+2)*Cin stores per
    # image.  Re-zeroing the cheap ring each step keeps this correct under
    # megacore sharding of the batch axis (no reliance on program_id == 0).
    zrow = jnp.zeros((1, W + 2, Cin), xp_ref.dtype)
    zcol = jnp.zeros((H + 2, 1, Cin), xp_ref.dtype)
    xp_ref[0:1, :, :] = zrow
    xp_ref[H + 1:H + 2, :, :] = zrow
    xp_ref[:, 0:1, :] = zcol
    xp_ref[:, W + 1:W + 2, :] = zcol
    xp_ref[1:H + 1, 1:W + 1, :] = x_ref[0]
    xp = xp_ref[...]

    if per_tap:
        # Deep layers: per-tap K = Cin already saturates the MXU contraction
        # depth, so skip the 9x im2col VMEM blow-up and accumulate 9 dots.
        acc = None
        for t in range(9):
            dy, dx = divmod(t, 3)
            tap = xp[dy:dy + H, dx:dx + W, :].reshape(H * W, Cin)
            part = jnp.dot(tap, w_ref[t * Cin:(t + 1) * Cin, :],
                           preferred_element_type=jnp.float32)
            acc = part if acc is None else acc + part
    else:
        # Shallow layers: fuse the 9 taps into ONE MXU matmul via in-VMEM
        # im2col over the REAL Cin; only the flattened K is zero-padded to Kw
        # (layer 1: K=27 -> 128), not the per-tap channel dim.
        cols = [xp[dy:dy + H, dx:dx + W, :].reshape(H * W, Cin)
                for dy in range(3) for dx in range(3)]
        if Kw > K:
            cols.append(jnp.zeros((H * W, Kw - K), xp.dtype))
        acc = jnp.dot(jnp.concatenate(cols, axis=-1), w_ref[...],
                      preferred_element_type=jnp.float32)

    y = jnp.maximum(acc + b_ref[...], 0.0)             # f32 bias + ReLU, (H*W, Cout)

    if pool:
        # Fused 2x2 max-pool without tiny-sublane (., 2, C) layouts:
        #   W-pairs -> 128-aligned lane halves after pairing adjacent rows,
        #   H-pairs -> sublane halves of W-row slabs.  Unit-stride slices only.
        y = y.reshape(H * W // 2, 2 * Cout)
        y = jnp.maximum(y[:, :Cout], y[:, Cout:])               # pool over W
        y = y.reshape(H // 2, W, Cout)
        y = jnp.maximum(y[:, :W // 2, :], y[:, W // 2:, :])     # pool over H
    else:
        y = y.reshape(H, W, Cout)
    o_ref[0] = y.astype(o_ref.dtype)


def conv3x3_relu(x_nhwc, w2d, bias, *, pool):
    N, H, W, Cin = x_nhwc.shape
    Kw, Cout = w2d.shape
    if pool:
        assert H % 2 == 0 and W % 2 == 0, "fused 2x2 max-pool needs even H, W"
    Ho, Wo = (H // 2, W // 2) if pool else (H, W)
    per_tap = Cin >= PER_TAP_MIN_CIN
    if per_tap:
        assert Kw == 9 * Cin

    # TODO(synk): at real VGG scale (224x224, 128+ channels) add a grid axis
    # over row tiles (halo rows via manual DMA from a pl.ANY input) so the
    # input tile + im2col intermediate + output tile fit v7x's 64 MiB VMEM and
    # megacore gets more parallel blocks than grid=(N,).
    # TODO(synk): on v7x the conv/FC weights could be stored fp8 (MXU-native)
    # to halve weight DMA; deliberate numerics change, so not done here.
    flops = 2 * N * H * W * Kw * Cout
    bytes_accessed = 2 * (N * H * W * Cin + Kw * Cout + N * Ho * Wo * Cout) + 4 * Cout

    return pl.pallas_call(
        functools.partial(_conv3x3_relu_kernel, pool=pool, per_tap=per_tap),
        out_shape=jax.ShapeDtypeStruct((N, Ho, Wo, Cout), jnp.bfloat16),
        grid_spec=pltpu.PrefetchScalarGridSpec(
            num_scalar_prefetch=0,
            grid=(N,),
            in_specs=[
                pl.BlockSpec((1, H, W, Cin), lambda n: (n, 0, 0, 0)),
                pl.BlockSpec((Kw, Cout), lambda n: (0, 0)),
                pl.BlockSpec((1, Cout), lambda n: (0, 0)),
            ],
            out_specs=pl.BlockSpec((1, Ho, Wo, Cout), lambda n: (n, 0, 0, 0)),
            scratch_shapes=[pltpu.VMEM((H + 2, W + 2, Cin), jnp.bfloat16)],
        ),
        compiler_params=pltpu.CompilerParams(
            dimension_semantics=("parallel",),
            vmem_limit_bytes=_vmem_limit_bytes(),
        ),
        cost_estimate=pl.CostEstimate(
            flops=flops, transcendentals=0, bytes_accessed=bytes_accessed),
    )(x_nhwc.astype(jnp.bfloat16), w2d, bias)


def maxpool2x2(x_nhwc):
    # TODO(synk): standalone "M" not preceded by a conv (never hit by this cfg)
    # stays in XLA; pools that follow a conv are fused into the conv kernel.
    N, H, W, C = x_nhwc.shape
    return x_nhwc.reshape(N, H // 2, 2, W // 2, 2, C).max(axis=(2, 4))


# ------------- fused classifier: fc1(+ReLU) -> fc2(+ReLU) -> fc3 -------------
def _classifier_kernel(x_ref, w1_ref, b1_ref, w2_hbm, b2_hbm, w3_hbm, b3_hbm,
                       o_ref, acc_ref, w2_v, b2_v, w3_v, b3_v, sem):
    # Grid axis = K tiles of fc1 (the wide reduction).  fc2/fc3 weights live in
    # HBM (pl.ANY) and are streamed into VMEM scratch by DMAs started at k==0;
    # the copies overlap the whole fc1 reduction and are awaited only in the
    # last-k epilogue, where fc2/fc3 run with intermediates held in VMEM.
    k = pl.program_id(0)
    nk = pl.num_programs(0)

    @pl.when(k == 0)
    def _():
        acc_ref[...] = jnp.zeros_like(acc_ref)
        pltpu.make_async_copy(w2_hbm, w2_v, sem.at[0]).start()
        pltpu.make_async_copy(b2_hbm, b2_v, sem.at[1]).start()
        pltpu.make_async_copy(w3_hbm, w3_v, sem.at[2]).start()
        pltpu.make_async_copy(b3_hbm, b3_v, sem.at[3]).start()

    acc_ref[...] += jnp.dot(x_ref[...], w1_ref[...],
                            preferred_element_type=jnp.float32)

    @pl.when(k == nk - 1)
    def _():
        pltpu.make_async_copy(w2_hbm, w2_v, sem.at[0]).wait()
        pltpu.make_async_copy(b2_hbm, b2_v, sem.at[1]).wait()
        pltpu.make_async_copy(w3_hbm, w3_v, sem.at[2]).wait()
        pltpu.make_async_copy(b3_hbm, b3_v, sem.at[3]).wait()
        h1 = jnp.maximum(acc_ref[...] + b1_ref[...], 0.0)          # Dropout = id (eval)
        h2 = jnp.dot(h1.astype(jnp.bfloat16), w2_v[...],
                     preferred_element_type=jnp.float32) + b2_v[...]
        h2 = jnp.maximum(h2, 0.0)                                  # Dropout = id (eval)
        y = jnp.dot(h2.astype(jnp.bfloat16), w3_v[...],
                    preferred_element_type=jnp.float32) + b3_v[...]
        o_ref[...] = y.astype(o_ref.dtype)


def classifier(x_flat, cls):
    w1p, b1p = cls["w1"], cls["b1"]
    w2p, b2p = cls["w2"], cls["b2"]
    w3p, b3p = cls["w3"], cls["b3"]
    num_classes = cls["num_classes"]
    M = x_flat.shape[0]
    Kp, H1 = w1p.shape
    H2 = w2p.shape[1]
    NC = w3p.shape[1]
    Mp = _round_up(max(M, 1), 8)         # sublane-aligned batch rows

    # fc1 K tile: larger tiles amortize per-step overhead (weight-DMA bound at
    # small batch).  Fine on v7x too because w2/w3 are streamed, not resident.
    tk = min(Kp, 1024)
    while Kp % tk:
        tk -= LANE

    # TODO(synk): at real batch sizes add a "parallel" M grid axis alongside
    # the "arbitrary" K axis for megacore / 2-TC parallelism.
    xp = _pad_axis(_pad_axis(x_flat, 1, Kp), 0, Mp).astype(jnp.bfloat16)

    flops = 2 * Mp * (Kp * H1 + H1 * H2 + H2 * NC)
    bytes_accessed = (2 * (Mp * Kp + Kp * H1 + H1 * H2 + H2 * NC)
                      + 4 * (H1 + H2 + NC + Mp * NC))

    out = pl.pallas_call(
        _classifier_kernel,
        out_shape=jax.ShapeDtypeStruct((Mp, NC), jnp.float32),
        grid_spec=pltpu.PrefetchScalarGridSpec(
            num_scalar_prefetch=0,
            grid=(Kp // tk,),
            in_specs=[
                pl.BlockSpec((Mp, tk), lambda k: (0, k)),
                pl.BlockSpec((tk, H1), lambda k: (k, 0)),
                pl.BlockSpec((1, H1), lambda k: (0, 0)),
                pl.BlockSpec(memory_space=pl.ANY),   # w2: streamed via DMA
                pl.BlockSpec(memory_space=pl.ANY),   # b2
                pl.BlockSpec(memory_space=pl.ANY),   # w3
                pl.BlockSpec(memory_space=pl.ANY),   # b3
            ],
            out_specs=pl.BlockSpec((Mp, NC), lambda k: (0, 0)),
            scratch_shapes=[
                pltpu.VMEM((Mp, H1), jnp.float32),   # fc1 accumulator
                pltpu.VMEM((H1, H2), jnp.bfloat16),  # streamed w2
                pltpu.VMEM((1, H2), jnp.float32),    # streamed b2
                pltpu.VMEM((H2, NC), jnp.bfloat16),  # streamed w3
                pltpu.VMEM((1, NC), jnp.float32),    # streamed b3
                pltpu.SemaphoreType.DMA((4,)),
            ],
        ),
        compiler_params=pltpu.CompilerParams(
            dimension_semantics=("arbitrary",),
            vmem_limit_bytes=_vmem_limit_bytes(),
        ),
        cost_estimate=pl.CostEstimate(
            flops=flops, transcendentals=0, bytes_accessed=bytes_accessed),
    )(xp, w1p, b1p, w2p, b2p, w3p, b3p)
    return out[:M, :num_classes]


# ---------------------------------- VGG --------------------------------------
# Scaled-down stand-in for the VGG feature stack; the last two convs use 256
# channels so both conv code paths (im2col fusion and per-tap accumulation)
# are exercised at toy scale.
FEATURE_CFG = [8, "M", 16, "M", 256, 256]
IN_CHANNELS = 3
HIDDEN = 64                       # stands in for 4096
NUM_CLASSES = 10                  # stands in for 1000


def init_params(key, in_spatial):
    params = {"features": [], "classifier": []}
    cin = IN_CHANNELS
    spatial = in_spatial
    for v in FEATURE_CFG:
        if v == "M":
            spatial //= 2
            continue
        key, kw, kb = jax.random.split(key, 3)
        w = jax.random.normal(kw, (3, 3, cin, v), jnp.float32) * 0.1   # HWIO
        b = jax.random.normal(kb, (v,), jnp.float32) * 0.01
        params["features"].append((w, b))
        cin = v
    feat_dim = cin * spatial * spatial       # analog of 512 * 7 * 7
    dims = [feat_dim, HIDDEN, HIDDEN, NUM_CLASSES]
    for i in range(3):
        key, kw, kb = jax.random.split(key, 3)
        w = jax.random.normal(kw, (dims[i], dims[i + 1]), jnp.float32) * 0.05
        b = jax.random.normal(kb, (dims[i + 1],), jnp.float32) * 0.01
        params["classifier"].append((w, b))
    return params


def pack_params(params):
    """One-time weight packing (outside the forward pass): lane-pad, cast to
    bf16 and reshape conv weights to (9*Cin, Cout) matmul blocks."""
    layers = []
    cin_eff = IN_CHANNELS
    conv_idx = 0
    i = 0
    while i < len(FEATURE_CFG):
        v = FEATURE_CFG[i]
        if v == "M":
            layers.append(("pool",))
            i += 1
            continue
        w, b = params["features"][conv_idx]
        conv_idx += 1
        pool = i + 1 < len(FEATURE_CFG) and FEATURE_CFG[i + 1] == "M"
        cout_real = w.shape[3]
        cout = _round_up(cout_real, LANE)
        # Pad the real input channels only up to what the previous layer's
        # kernel actually produces (layer 1 keeps Cin = 3).
        w = _pad_axis(_pad_axis(w, 2, cin_eff), 3, cout)
        k = 9 * cin_eff
        kp = _round_up(k, LANE)              # only layer 1 needs this (27 -> 128)
        w2d = _pad_axis(w.reshape(k, cout), 0, kp).astype(jnp.bfloat16)
        bias = _pad_axis(b, 0, cout).reshape(1, cout).astype(jnp.float32)
        layers.append(("conv", w2d, bias, pool, cout_real))
        cin_eff = cout
        i += 2 if pool else 1

    (w1, b1), (w2, b2), (w3, b3) = params["classifier"]
    num_classes = w3.shape[1]
    kp = _round_up(w1.shape[0], LANE)
    h1 = _round_up(w1.shape[1], LANE)
    h2 = _round_up(w2.shape[1], LANE)
    nc = _round_up(num_classes, LANE)
    cls = {
        "w1": _pad_axis(_pad_axis(w1, 0, kp), 1, h1).astype(jnp.bfloat16),
        "b1": _pad_axis(b1, 0, h1).reshape(1, h1).astype(jnp.float32),
        "w2": _pad_axis(_pad_axis(w2, 0, h1), 1, h2).astype(jnp.bfloat16),
        "b2": _pad_axis(b2, 0, h2).reshape(1, h2).astype(jnp.float32),
        "w3": _pad_axis(_pad_axis(w3, 0, h2), 1, nc).astype(jnp.bfloat16),
        "b3": _pad_axis(b3, 0, nc).reshape(1, nc).astype(jnp.float32),
        "num_classes": num_classes,
    }
    last_real_c = IN_CHANNELS
    for layer in layers:
        if layer[0] == "conv":
            last_real_c = _round_up(layer[4], 1) and layer[4]
    return {"features": layers, "classifier": cls, "last_real_c": last_real_c}


def vgg_forward(packed, x_nchw):
    # features (NHWC inside the kernels; channels live on the 128-lane axis)
    x = jnp.transpose(x_nchw, (0, 2, 3, 1))                 # NCHW -> NHWC
    for layer in packed["features"]:
        if layer[0] == "pool":
            x = maxpool2x2(x)                               # standalone pool (not hit)
        else:
            _, w2d, bias, pool, _ = layer
            x = conv3x3_relu(x, w2d, bias, pool=pool)       # pool fused in-kernel
    n = x.shape[0]
    # torch: x.view(N, -1).unsqueeze(2).unsqueeze(3) -> strip lane padding and
    # flatten in NCHW order; the [N, K, 1, 1] tensor under 1x1-conv FCs is a
    # plain [N, K] matmul input.
    x = x[..., :packed["last_real_c"]]
    x = jnp.transpose(x, (0, 3, 1, 2)).reshape(n, -1)
    # classifier: fc -> ReLU -> Dropout -> fc -> ReLU -> Dropout -> fc, fused
    # into one pallas_call (Dropout is identity in eval).  == out.flatten(1).
    return classifier(x, packed["classifier"])


if __name__ == "__main__":
    key = jax.random.PRNGKey(0)
    key, kx = jax.random.split(key)
    batch, spatial = 2, 16
    x = jax.random.normal(kx, (batch, IN_CHANNELS, spatial, spatial), jnp.float32)
    params = init_params(key, in_spatial=spatial)
    packed = pack_params(params)          # weights packed ONCE, outside forward

    fwd = jax.jit(lambda inp: vgg_forward(packed, inp))
    out = jax.block_until_ready(fwd(x))
    assert out.shape == (batch, NUM_CLASSES), out.shape
    assert out.dtype == jnp.float32
    print("KERNEL_OK")
</pallas_src>

<mosaic_0001>
module attributes {stable_mosaic.version = 11 : i64} {
  func.func @_conv3x3_relu_kernel(%arg0: i32, %arg1: memref<1x8x8x128xbf16, #tpu.memory_space<vmem>>, %arg2: memref<1152x128xbf16, #tpu.memory_space<vmem>>, %arg3: memref<1x128xf32, #tpu.memory_space<vmem>>, %arg4: memref<1x4x4x128xbf16, #tpu.memory_space<vmem>>, %arg5: memref<10x10x128xbf16, #tpu.memory_space<vmem>>) attributes {dimension_semantics = [#tpu.dimension_semantics<parallel>], iteration_bounds = array<i64: 2>, scalar_prefetch = 0 : i64, scratch_operands = 1 : i64, tpu.core_type = #tpu.core_type<tc>, window_params = [{transform_indices = @transform_0, window_bounds = array<i64: 1, 8, 8, 128>}, {pipeline_mode = #tpu.pipeline_mode<synchronous>, transform_indices = @transform_1, window_bounds = array<i64: 1152, 128>}, {pipeline_mode = #tpu.pipeline_mode<synchronous>, transform_indices = @transform_2, window_bounds = array<i64: 1, 128>}, {transform_indices = @transform_3, window_bounds = array<i64: 1, 4, 4, 128>}]} {
    %cst = arith.constant 0.000000e+00 : bf16
    %0 = vector.broadcast %cst : bf16 to vector<1x10x128xbf16>
    %cst_0 = arith.constant 0.000000e+00 : bf16
    %1 = vector.broadcast %cst_0 : bf16 to vector<10x1x128xbf16>
    %c0 = arith.constant 0 : index
    %c0_1 = arith.constant 0 : index
    %c0_2 = arith.constant 0 : index
    %2 = vector.load %arg5[%c0, %c0_1, %c0_2] : memref<10x10x128xbf16, #tpu.memory_space<vmem>>, vector<1x10x128xbf16>
    tpu.vector_store %arg5[%c0, %c0_1, %c0_2], %0 {strides = array<i32>} : memref<10x10x128xbf16, #tpu.memory_space<vmem>>, vector<1x10x128xbf16>,
    %c9 = arith.constant 9 : index
    %c0_3 = arith.constant 0 : index
    %c0_4 = arith.constant 0 : index
    %3 = vector.load %arg5[%c9, %c0_3, %c0_4] : memref<10x10x128xbf16, #tpu.memory_space<vmem>>, vector<1x10x128xbf16>
    tpu.vector_store %arg5[%c9, %c0_3, %c0_4], %0 {strides = array<i32>} : memref<10x10x128xbf16, #tpu.memory_space<vmem>>, vector<1x10x128xbf16>,
    %c0_5 = arith.constant 0 : index
    %c0_6 = arith.constant 0 : index
    %c0_7 = arith.constant 0 : index
    %4 = vector.load %arg5[%c0_5, %c0_6, %c0_7] : memref<10x10x128xbf16, #tpu.memory_space<vmem>>, vector<10x1x128xbf16>
    tpu.vector_store %arg5[%c0_5, %c0_6, %c0_7], %1 {strides = array<i32>} : memref<10x10x128xbf16, #tpu.memory_space<vmem>>, vector<10x1x128xbf16>,
    %c0_8 = arith.constant 0 : index
    %c9_9 = arith.constant 9 : index
    %c0_10 = arith.constant 0 : index
    %5 = vector.load %arg5[%c0_8, %c9_9, %c0_10] : memref<10x10x128xbf16, #tpu.memory_space<vmem>>, vector<10x1x128xbf16>
    tpu.vector_store %arg5[%c0_8, %c9_9, %c0_10], %1 {strides = array<i32>} : memref<10x10x128xbf16, #tpu.memory_space<vmem>>, vector<10x1x128xbf16>,
    %c0_11 = arith.constant 0 : index
    %c0_12 = arith.constant 0 : index
    %c0_13 = arith.constant 0 : index
    %c0_14 = arith.constant 0 : index
    %6 = vector.load %arg1[%c0_11, %c0_12, %c0_13, %c0_14] : memref<1x8x8x128xbf16, #tpu.memory_space<vmem>>, vector<1x8x8x128xbf16>
    %7 = vector.shape_cast %6 : vector<1x8x8x128xbf16> to vector<8x8x128xbf16>
    %c1 = arith.constant 1 : index
    %c1_15 = arith.constant 1 : index
    %c0_16 = arith.constant 0 : index
    %8 = vector.load %arg5[%c1, %c1_15, %c0_16] : memref<10x10x128xbf16, #tpu.memory_space<vmem>>, vector<8x8x128xbf16>
    tpu.vector_store %arg5[%c1, %c1_15, %c0_16], %7 {strides = array<i32>} : memref<10x10x128xbf16, #tpu.memory_space<vmem>>, vector<8x8x128xbf16>,
    %c0_17 = arith.constant 0 : index
    %c0_18 = arith.constant 0 : index
    %c0_19 = arith.constant 0 : index
    %9 = vector.load %arg5[%c0_17, %c0_18, %c0_19] : memref<10x10x128xbf16, #tpu.memory_space<vmem>>, vector<10x10x128xbf16>
    %10 = vector.extract_strided_slice %9 {offsets = [0, 0, 0], sizes = [8, 8, 128], strides = [1, 1, 1]} : vector<10x10x128xbf16> to vector<8x8x128xbf16>
    %11 = vector.shape_cast %10 : vector<8x8x128xbf16> to vector<64x128xbf16>
    %12 = vector.extract_strided_slice %9 {offsets = [0, 1, 0], sizes = [8, 8, 128], strides = [1, 1, 1]} : vector<10x10x128xbf16> to vector<8x8x128xbf16>
    %13 = vector.shape_cast %12 : vector<8x8x128xbf16> to vector<64x128xbf16>
    %14 = vector.extract_strided_slice %9 {offsets = [0, 2, 0], sizes = [8, 8, 128], strides = [1, 1, 1]} : vector<10x10x128xbf16> to vector<8x8x128xbf16>
    %15 = vector.shape_cast %14 : vector<8x8x128xbf16> to vector<64x128xbf16>
    %16 = vector.extract_strided_slice %9 {offsets = [1, 0, 0], sizes = [8, 8, 128], strides = [1, 1, 1]} : vector<10x10x128xbf16> to vector<8x8x128xbf16>
    %17 = vector.shape_cast %16 : vector<8x8x128xbf16> to vector<64x128xbf16>
    %18 = vector.extract_strided_slice %9 {offsets = [1, 1, 0], sizes = [8, 8, 128], strides = [1, 1, 1]} : vector<10x10x128xbf16> to vector<8x8x128xbf16>
    %19 = vector.shape_cast %18 : vector<8x8x128xbf16> to vector<64x128xbf16>
    %20 = vector.extract_strided_slice %9 {offsets = [1, 2, 0], sizes = [8, 8, 128], strides = [1, 1, 1]} : vector<10x10x128xbf16> to vector<8x8x128xbf16>
    %21 = vector.shape_cast %20 : vector<8x8x128xbf16> to vector<64x128xbf16>
    %22 = vector.extract_strided_slice %9 {offsets = [2, 0, 0], sizes = [8, 8, 128], strides = [1, 1, 1]} : vector<10x10x128xbf16> to vector<8x8x128xbf16>
    %23 = vector.shape_cast %22 : vector<8x8x128xbf16> to vector<64x128xbf16>
    %24 = vector.extract_strided_slice %9 {offsets = [2, 1, 0], sizes = [8, 8, 128], strides = [1, 1, 1]} : vector<10x10x128xbf16> to vector<8x8x128xbf16>
    %25 = vector.shape_cast %24 : vector<8x8x128xbf16> to vector<64x128xbf16>
    %26 = vector.extract_strided_slice %9 {offsets = [2, 2, 0], sizes = [8, 8, 128], strides = [1, 1, 1]} : vector<10x10x128xbf16> to vector<8x8x128xbf16>
    %27 = vector.shape_cast %26 : vector<8x8x128xbf16> to vector<64x128xbf16>
    %28 = tpu.concatenate %11, %13, %15, %17, %19, %21, %23, %25, %27 in 1 : vector<64x128xbf16>, vector<64x128xbf16>, vector<64x128xbf16>, vector<64x128xbf16>, vector<64x128xbf16>, vector<64x128xbf16>, vector<64x128xbf16>, vector<64x128xbf16>, vector<64x128xbf16> -> vector<64x1152xbf16>
    %c0_20 = arith.constant 0 : index
    %c0_21 = arith.constant 0 : index
    %29 = vector.load %arg2[%c0_20, %c0_21] : memref<1152x128xbf16, #tpu.memory_space<vmem>>, vector<1152x128xbf16>
    %cst_22 = arith.constant dense<0.000000e+00> : vector<64x128xf32>
    %30 = tpu.matmul %28, %29, %cst_22 {dimension_numbers = #tpu.dot_dimension_numbers<[1], [0], [0], [1], [0, 0, 1, 1], [], []>} : vector<64x1152xbf16>, vector<1152x128xbf16>, vector<64x128xf32> -> vector<64x128xf32>
    %c0_23 = arith.constant 0 : index
    %c0_24 = arith.constant 0 : index
    %31 = vector.load %arg3[%c0_23, %c0_24] : memref<1x128xf32, #tpu.memory_space<vmem>>, vector<1x128xf32>
    %32 = vector.broadcast %31 : vector<1x128xf32> to vector<64x128xf32>
    %33 = arith.addf %30, %32 : vector<64x128xf32>
    %cst_25 = arith.constant 0.000000e+00 : f32
    %34 = vector.broadcast %cst_25 : f32 to vector<64x128xf32>
    %35 = arith.maximumf %33, %34 : vector<64x128xf32>
    %36 = vector.shape_cast %35 : vector<64x128xf32> to vector<32x256xf32>
    %37 = vector.extract_strided_slice %36 {offsets = [0, 0], sizes = [32, 128], strides = [1, 1]} : vector<32x256xf32> to vector<32x128xf32>
    %38 = vector.extract_strided_slice %36 {offsets = [0, 128], sizes = [32, 128], strides = [1, 1]} : vector<32x256xf32> to vector<32x128xf32>
    %39 = arith.maximumf %37, %38 : vector<32x128xf32>
    %40 = vector.shape_cast %39 : vector<32x128xf32> to vector<4x8x128xf32>
    %41 = vector.extract_strided_slice %40 {offsets = [0, 0, 0], sizes = [4, 4, 128], strides = [1, 1, 1]} : vector<4x8x128xf32> to vector<4x4x128xf32>
    %42 = vector.extract_strided_slice %40 {offsets = [0, 4, 0], sizes = [4, 4, 128], strides = [1, 1, 1]} : vector<4x8x128xf32> to vector<4x4x128xf32>
    %43 = arith.maximumf %41, %42 : vector<4x4x128xf32>
    %44 = arith.truncf %43 : vector<4x4x128xf32> to vector<4x4x128xbf16>
    %c0_26 = arith.constant 0 : index
    %c0_27 = arith.constant 0 : index
    %c0_28 = arith.constant 0 : index
    %c0_29 = arith.constant 0 : index
    %45 = vector.load %arg4[%c0_26, %c0_27, %c0_28, %c0_29] : memref<1x4x4x128xbf16, #tpu.memory_space<vmem>>, vector<1x4x4x128xbf16>
    %46 = vector.shape_cast %45 : vector<1x4x4x128xbf16> to vector<4x4x128xbf16>
    %47 = vector.shape_cast %44 : vector<4x4x128xbf16> to vector<1x4x4x128xbf16>
    tpu.vector_store %arg4[%c0_26, %c0_27, %c0_28, %c0_29], %47 {strides = array<i32>} : memref<1x4x4x128xbf16, #tpu.memory_space<vmem>>, vector<1x4x4x128xbf16>,
    return
  }
  func.func @transform_0(%arg0: i32) -> (i32, i32, i32, i32) {
    %c0_i32 = arith.constant 0 : i32
    %c0_i32_0 = arith.constant 0 : i32
    %c0_i32_1 = arith.constant 0 : i32
    %c0_i32_2 = arith.constant 0 : i32
    return %arg0, %c0_i32, %c0_i32_0, %c0_i32_1 : i32, i32, i32, i32
  }
  func.func @transform_1(%arg0: i32) -> (i32, i32) {
    %c0_i32 = arith.constant 0 : i32
    %c0_i32_0 = arith.constant 0 : i32
    %c0_i32_1 = arith.constant 0 : i32
    return %c0_i32, %c0_i32_0 : i32, i32
  }
  func.func @transform_2(%arg0: i32) -> (i32, i32) {
    %c0_i32 = arith.constant 0 : i32
    %c0_i32_0 = arith.constant 0 : i32
    %c0_i32_1 = arith.constant 0 : i32
    return %c0_i32, %c0_i32_0 : i32, i32
  }
  func.func @transform_3(%arg0: i32) -> (i32, i32, i32, i32) {
    %c0_i32 = arith.constant 0 : i32
    %c0_i32_0 = arith.constant 0 : i32
    %c0_i32_1 = arith.constant 0 : i32
    %c0_i32_2 = arith.constant 0 : i32
    return %arg0, %c0_i32, %c0_i32_0, %c0_i32_1 : i32, i32, i32, i32
  }
}

module attributes {stable_mosaic.version = 11 : i64} {
  func.func @_conv3x3_relu_kernel(%arg0: i32, %arg1: memref<1x16x16x3xbf16, #tpu.memory_space<vmem>>, %arg2: memref<128x128xbf16, #tpu.memory_space<vmem>>, %arg3: memref<1x128xf32, #tpu.memory_space<vmem>>, %arg4: memref<1x8x8x128xbf16, #tpu.memory_space<vmem>>, %arg5: memref<18x18x3xbf16, #tpu.memory_space<vmem>>) attributes {dimension_semantics = [#tpu.dimension_semantics<parallel>], iteration_bounds = array<i64: 2>, scalar_prefetch = 0 : i64, scratch_operands = 1 : i64, tpu.core_type = #tpu.core_type<tc>, window_params = [{transform_indices = @transform_0, window_bounds = array<i64: 1, 16, 16, 3>}, {pipeline_mode = #tpu.pipeline_mode<synchronous>, transform_indices = @transform_1, window_bounds = array<i64: 128, 128>}, {pipeline_mode = #tpu.pipeline_mode<synchronous>, transform_indices = @transform_2, window_bounds = array<i64: 1, 128>}, {transform_indices = @transform_3, window_bounds = array<i64: 1, 8, 8, 128>}]} {
    %cst = arith.constant 0.000000e+00 : bf16
    %0 = vector.broadcast %cst : bf16 to vector<1x18x3xbf16>
    %cst_0 = arith.constant 0.000000e+00 : bf16
    %1 = vector.broadcast %cst_0 : bf16 to vector<18x1x3xbf16>
    %c0 = arith.constant 0 : index
    %c0_1 = arith.constant 0 : index
    %c0_2 = arith.constant 0 : index
    %2 = vector.load %arg5[%c0, %c0_1, %c0_2] : memref<18x18x3xbf16, #tpu.memory_space<vmem>>, vector<1x18x3xbf16>
    tpu.vector_store %arg5[%c0, %c0_1, %c0_2], %0 {strides = array<i32>} : memref<18x18x3xbf16, #tpu.memory_space<vmem>>, vector<1x18x3xbf16>,
    %c17 = arith.constant 17 : index
    %c0_3 = arith.constant 0 : index
    %c0_4 = arith.constant 0 : index
    %3 = vector.load %arg5[%c17, %c0_3, %c0_4] : memref<18x18x3xbf16, #tpu.memory_space<vmem>>, vector<1x18x3xbf16>
    tpu.vector_store %arg5[%c17, %c0_3, %c0_4], %0 {strides = array<i32>} : memref<18x18x3xbf16, #tpu.memory_space<vmem>>, vector<1x18x3xbf16>,
    %c0_5 = arith.constant 0 : index
    %c0_6 = arith.constant 0 : index
    %c0_7 = arith.constant 0 : index
    %4 = vector.load %arg5[%c0_5, %c0_6, %c0_7] : memref<18x18x3xbf16, #tpu.memory_space<vmem>>, vector<18x1x3xbf16>
    tpu.vector_store %arg5[%c0_5, %c0_6, %c0_7], %1 {strides = array<i32>} : memref<18x18x3xbf16, #tpu.memory_space<vmem>>, vector<18x1x3xbf16>,
    %c0_8 = arith.constant 0 : index
    %c17_9 = arith.constant 17 : index
    %c0_10 = arith.constant 0 : index
    %5 = vector.load %arg5[%c0_8, %c17_9, %c0_10] : memref<18x18x3xbf16, #tpu.memory_space<vmem>>, vector<18x1x3xbf16>
    tpu.vector_store %arg5[%c0_8, %c17_9, %c0_10], %1 {strides = array<i32>} : memref<18x18x3xbf16, #tpu.memory_space<vmem>>, vector<18x1x3xbf16>,
    %c0_11 = arith.constant 0 : index
    %c0_12 = arith.constant 0 : index
    %c0_13 = arith.constant 0 : index
    %c0_14 = arith.constant 0 : index
    %6 = vector.load %arg1[%c0_11, %c0_12, %c0_13, %c0_14] : memref<1x16x16x3xbf16, #tpu.memory_space<vmem>>, vector<1x16x16x3xbf16>
    %7 = vector.shape_cast %6 : vector<1x16x16x3xbf16> to vector<16x16x3xbf16>
    %c1 = arith.constant 1 : index
    %c1_15 = arith.constant 1 : index
    %c0_16 = arith.constant 0 : index
    %8 = vector.load %arg5[%c1, %c1_15, %c0_16] : memref<18x18x3xbf16, #tpu.memory_space<vmem>>, vector<16x16x3xbf16>
    tpu.vector_store %arg5[%c1, %c1_15, %c0_16], %7 {strides = array<i32>} : memref<18x18x3xbf16, #tpu.memory_space<vmem>>, vector<16x16x3xbf16>,
    %c0_17 = arith.constant 0 : index
    %c0_18 = arith.constant 0 : index
    %c0_19 = arith.constant 0 : index
    %9 = vector.load %arg5[%c0_17, %c0_18, %c0_19] : memref<18x18x3xbf16, #tpu.memory_space<vmem>>, vector<18x18x3xbf16>
    %10 = vector.extract_strided_slice %9 {offsets = [0, 0, 0], sizes = [16, 16, 3], strides = [1, 1, 1]} : vector<18x18x3xbf16> to vector<16x16x3xbf16>
    %11 = vector.shape_cast %10 : vector<16x16x3xbf16> to vector<256x3xbf16>
    %12 = vector.extract_strided_slice %9 {offsets = [0, 1, 0], sizes = [16, 16, 3], strides = [1, 1, 1]} : vector<18x18x3xbf16> to vector<16x16x3xbf16>
    %13 = vector.shape_cast %12 : vector<16x16x3xbf16> to vector<256x3xbf16>
    %14 = vector.extract_strided_slice %9 {offsets = [0, 2, 0], sizes = [16, 16, 3], strides = [1, 1, 1]} : vector<18x18x3xbf16> to vector<16x16x3xbf16>
    %15 = vector.shape_cast %14 : vector<16x16x3xbf16> to vector<256x3xbf16>
    %16 = vector.extract_strided_slice %9 {offsets = [1, 0, 0], sizes = [16, 16, 3], strides = [1, 1, 1]} : vector<18x18x3xbf16> to vector<16x16x3xbf16>
    %17 = vector.shape_cast %16 : vector<16x16x3xbf16> to vector<256x3xbf16>
    %18 = vector.extract_strided_slice %9 {offsets = [1, 1, 0], sizes = [16, 16, 3], strides = [1, 1, 1]} : vector<18x18x3xbf16> to vector<16x16x3xbf16>
    %19 = vector.shape_cast %18 : vector<16x16x3xbf16> to vector<256x3xbf16>
    %20 = vector.extract_strided_slice %9 {offsets = [1, 2, 0], sizes = [16, 16, 3], strides = [1, 1, 1]} : vector<18x18x3xbf16> to vector<16x16x3xbf16>
    %21 = vector.shape_cast %20 : vector<16x16x3xbf16> to vector<256x3xbf16>
    %22 = vector.extract_strided_slice %9 {offsets = [2, 0, 0], sizes = [16, 16, 3], strides = [1, 1, 1]} : vector<18x18x3xbf16> to vector<16x16x3xbf16>
    %23 = vector.shape_cast %22 : vector<16x16x3xbf16> to vector<256x3xbf16>
    %24 = vector.extract_strided_slice %9 {offsets = [2, 1, 0], sizes = [16, 16, 3], strides = [1, 1, 1]} : vector<18x18x3xbf16> to vector<16x16x3xbf16>
    %25 = vector.shape_cast %24 : vector<16x16x3xbf16> to vector<256x3xbf16>
    %26 = vector.extract_strided_slice %9 {offsets = [2, 2, 0], sizes = [16, 16, 3], strides = [1, 1, 1]} : vector<18x18x3xbf16> to vector<16x16x3xbf16>
    %27 = vector.shape_cast %26 : vector<16x16x3xbf16> to vector<256x3xbf16>
    %cst_20 = arith.constant 0.000000e+00 : bf16
    %28 = vector.broadcast %cst_20 : bf16 to vector<256x101xbf16>
    %29 = tpu.concatenate %11, %13, %15, %17, %19, %21, %23, %25, %27, %28 in 1 : vector<256x3xbf16>, vector<256x3xbf16>, vector<256x3xbf16>, vector<256x3xbf16>, vector<256x3xbf16>, vector<256x3xbf16>, vector<256x3xbf16>, vector<256x3xbf16>, vector<256x3xbf16>, vector<256x101xbf16> -> vector<256x128xbf16>
    %c0_21 = arith.constant 0 : index
    %c0_22 = arith.constant 0 : index
    %30 = vector.load %arg2[%c0_21, %c0_22] : memref<128x128xbf16, #tpu.memory_space<vmem>>, vector<128x128xbf16>
    %cst_23 = arith.constant dense<0.000000e+00> : vector<256x128xf32>
    %31 = tpu.matmul %29, %30, %cst_23 {dimension_numbers = #tpu.dot_dimension_numbers<[1], [0], [0], [1], [0, 0, 1, 1], [], []>} : vector<256x128xbf16>, vector<128x128xbf16>, vector<256x128xf32> -> vector<256x128xf32>
    %c0_24 = arith.constant 0 : index
    %c0_25 = arith.constant 0 : index
    %32 = vector.load %arg3[%c0_24, %c0_25] : memref<1x128xf32, #tpu.memory_space<vmem>>, vector<1x128xf32>
    %33 = vector.broadcast %32 : vector<1x128xf32> to vector<256x128xf32>
    %34 = arith.addf %31, %33 : vector<256x128xf32>
    %cst_26 = arith.constant 0.000000e+00 : f32
    %35 = vector.broadcast %cst_26 : f32 to vector<256x128xf32>
    %36 = arith.maximumf %34, %35 : vector<256x128xf32>
    %37 = vector.shape_cast %36 : vector<256x128xf32> to vector<128x256xf32>
    %38 = vector.extract_strided_slice %37 {offsets = [0, 0], sizes = [128, 128], strides = [1, 1]} : vector<128x256xf32> to vector<128x128xf32>
    %39 = vector.extract_strided_slice %37 {offsets = [0, 128], sizes = [128, 128], strides = [1, 1]} : vector<128x256xf32> to vector<128x128xf32>
    %40 = arith.maximumf %38, %39 : vector<128x128xf32>
    %41 = vector.shape_cast %40 : vector<128x128xf32> to vector<8x16x128xf32>
    %42 = vector.extract_strided_slice %41 {offsets = [0, 0, 0], sizes = [8, 8, 128], strides = [1, 1, 1]} : vector<8x16x128xf32> to vector<8x8x128xf32>
    %43 = vector.extract_strided_slice %41 {offsets = [0, 8, 0], sizes = [8, 8, 128], strides = [1, 1, 1]} : vector<8x16x128xf32> to vector<8x8x128xf32>
    %44 = arith.maximumf %42, %43 : vector<8x8x128xf32>
    %45 = arith.truncf %44 : vector<8x8x128xf32> to vector<8x8x128xbf16>
    %c0_27 = arith.constant 0 : index
    %c0_28 = arith.constant 0 : index
    %c0_29 = arith.constant 0 : index
    %c0_30 = arith.constant 0 : index
    %46 = vector.load %arg4[%c0_27, %c0_28, %c0_29, %c0_30] : memref<1x8x8x128xbf16, #tpu.memory_space<vmem>>, vector<1x8x8x128xbf16>
    %47 = vector.shape_cast %46 : vector<1x8x8x128xbf16> to vector<8x8x128xbf16>
    %48 = vector.shape_cast %45 : vector<8x8x128xbf16> to vector<1x8x8x128xbf16>
    tpu.vector_store %arg4[%c0_27, %c0_28, %c0_29, %c0_30], %48 {strides = array<i32>} : memref<1x8x8x128xbf16, #tpu.memory_space<vmem>>, vector<1x8x8x128xbf16>,
    return
  }
  func.func @transform_0(%arg0: i32) -> (i32, i32, i32, i32) {
    %c0_i32 = arith.constant 0 : i32
    %c0_i32_0 = arith.constant 0 : i32
    %c0_i32_1 = arith.constant 0 : i32
    %c0_i32_2 = arith.constant 0 : i32
    return %arg0, %c0_i32, %c0_i32_0, %c0_i32_1 : i32, i32, i32, i32
  }
  func.func @transform_1(%arg0: i32) -> (i32, i32) {
    %c0_i32 = arith.constant 0 : i32
    %c0_i32_0 = arith.constant 0 : i32
    %c0_i32_1 = arith.constant 0 : i32
    return %c0_i32, %c0_i32_0 : i32, i32
  }
  func.func @transform_2(%arg0: i32) -> (i32, i32) {
    %c0_i32 = arith.constant 0 : i32
    %c0_i32_0 = arith.constant 0 : i32
    %c0_i32_1 = arith.constant 0 : i32
    return %c0_i32, %c0_i32_0 : i32, i32
  }
  func.func @transform_3(%arg0: i32) -> (i32, i32, i32, i32) {
    %c0_i32 = arith.constant 0 : i32
    %c0_i32_0 = arith.constant 0 : i32
    %c0_i32_1 = arith.constant 0 : i32
    %c0_i32_2 = arith.constant 0 : i32
    return %arg0, %c0_i32, %c0_i32_0, %c0_i32_1 : i32, i32, i32, i32
  }
}

module attributes {stable_mosaic.version = 11 : i64} {
  func.func @_conv3x3_relu_kernel(%arg0: i32, %arg1: memref<1x4x4x128xbf16, #tpu.memory_space<vmem>>, %arg2: memref<1152x256xbf16, #tpu.memory_space<vmem>>, %arg3: memref<1x256xf32, #tpu.memory_space<vmem>>, %arg4: memref<1x4x4x256xbf16, #tpu.memory_space<vmem>>, %arg5: memref<6x6x128xbf16, #tpu.memory_space<vmem>>) attributes {dimension_semantics = [#tpu.dimension_semantics<parallel>], iteration_bounds = array<i64: 2>, scalar_prefetch = 0 : i64, scratch_operands = 1 : i64, tpu.core_type = #tpu.core_type<tc>, window_params = [{transform_indices = @transform_0, window_bounds = array<i64: 1, 4, 4, 128>}, {pipeline_mode = #tpu.pipeline_mode<synchronous>, transform_indices = @transform_1, window_bounds = array<i64: 1152, 256>}, {pipeline_mode = #tpu.pipeline_mode<synchronous>, transform_indices = @transform_2, window_bounds = array<i64: 1, 256>}, {transform_indices = @transform_3, window_bounds = array<i64: 1, 4, 4, 256>}]} {
    %cst = arith.constant 0.000000e+00 : bf16
    %0 = vector.broadcast %cst : bf16 to vector<1x6x128xbf16>
    %cst_0 = arith.constant 0.000000e+00 : bf16
    %1 = vector.broadcast %cst_0 : bf16 to vector<6x1x128xbf16>
    %c0 = arith.constant 0 : index
    %c0_1 = arith.constant 0 : index
    %c0_2 = arith.constant 0 : index
    %2 = vector.load %arg5[%c0, %c0_1, %c0_2] : memref<6x6x128xbf16, #tpu.memory_space<vmem>>, vector<1x6x128xbf16>
    tpu.vector_store %arg5[%c0, %c0_1, %c0_2], %0 {strides = array<i32>} : memref<6x6x128xbf16, #tpu.memory_space<vmem>>, vector<1x6x128xbf16>,
    %c5 = arith.constant 5 : index
    %c0_3 = arith.constant 0 : index
    %c0_4 = arith.constant 0 : index
    %3 = vector.load %arg5[%c5, %c0_3, %c0_4] : memref<6x6x128xbf16, #tpu.memory_space<vmem>>, vector<1x6x128xbf16>
    tpu.vector_store %arg5[%c5, %c0_3, %c0_4], %0 {strides = array<i32>} : memref<6x6x128xbf16, #tpu.memory_space<vmem>>, vector<1x6x128xbf16>,
    %c0_5 = arith.constant 0 : index
    %c0_6 = arith.constant 0 : index
    %c0_7 = arith.constant 0 : index
    %4 = vector.load %arg5[%c0_5, %c0_6, %c0_7] : memref<6x6x128xbf16, #tpu.memory_space<vmem>>, vector<6x1x128xbf16>
    tpu.vector_store %arg5[%c0_5, %c0_6, %c0_7], %1 {strides = array<i32>} : memref<6x6x128xbf16, #tpu.memory_space<vmem>>, vector<6x1x128xbf16>,
    %c0_8 = arith.constant 0 : index
    %c5_9 = arith.constant 5 : index
    %c0_10 = arith.constant 0 : index
    %5 = vector.load %arg5[%c0_8, %c5_9, %c0_10] : memref<6x6x128xbf16, #tpu.memory_space<vmem>>, vector<6x1x128xbf16>
    tpu.vector_store %arg5[%c0_8, %c5_9, %c0_10], %1 {strides = array<i32>} : memref<6x6x128xbf16, #tpu.memory_space<vmem>>, vector<6x1x128xbf16>,
    %c0_11 = arith.constant 0 : index
    %c0_12 = arith.constant 0 : index
    %c0_13 = arith.constant 0 : index
    %c0_14 = arith.constant 0 : index
    %6 = vector.load %arg1[%c0_11, %c0_12, %c0_13, %c0_14] : memref<1x4x4x128xbf16, #tpu.memory_space<vmem>>, vector<1x4x4x128xbf16>
    %7 = vector.shape_cast %6 : vector<1x4x4x128xbf16> to vector<4x4x128xbf16>
    %c1 = arith.constant 1 : index
    %c1_15 = arith.constant 1 : index
    %c0_16 = arith.constant 0 : index
    %8 = vector.load %arg5[%c1, %c1_15, %c0_16] : memref<6x6x128xbf16, #tpu.memory_space<vmem>>, vector<4x4x128xbf16>
    tpu.vector_store %arg5[%c1, %c1_15, %c0_16], %7 {strides = array<i32>} : memref<6x6x128xbf16, #tpu.memory_space<vmem>>, vector<4x4x128xbf16>,
    %c0_17 = arith.constant 0 : index
    %c0_18 = arith.constant 0 : index
    %c0_19 = arith.constant 0 : index
    %9 = vector.load %arg5[%c0_17, %c0_18, %c0_19] : memref<6x6x128xbf16, #tpu.memory_space<vmem>>, vector<6x6x128xbf16>
    %10 = vector.extract_strided_slice %9 {offsets = [0, 0, 0], sizes = [4, 4, 128], strides = [1, 1, 1]} : vector<6x6x128xbf16> to vector<4x4x128xbf16>
    %11 = vector.shape_cast %10 : vector<4x4x128xbf16> to vector<16x128xbf16>
    %12 = vector.extract_strided_slice %9 {offsets = [0, 1, 0], sizes = [4, 4, 128], strides = [1, 1, 1]} : vector<6x6x128xbf16> to vector<4x4x128xbf16>
    %13 = vector.shape_cast %12 : vector<4x4x128xbf16> to vector<16x128xbf16>
    %14 = vector.extract_strided_slice %9 {offsets = [0, 2, 0], sizes = [4, 4, 128], strides = [1, 1, 1]} : vector<6x6x128xbf16> to vector<4x4x128xbf16>
    %15 = vector.shape_cast %14 : vector<4x4x128xbf16> to vector<16x128xbf16>
    %16 = vector.extract_strided_slice %9 {offsets = [1, 0, 0], sizes = [4, 4, 128], strides = [1, 1, 1]} : vector<6x6x128xbf16> to vector<4x4x128xbf16>
    %17 = vector.shape_cast %16 : vector<4x4x128xbf16> to vector<16x128xbf16>
    %18 = vector.extract_strided_slice %9 {offsets = [1, 1, 0], sizes = [4, 4, 128], strides = [1, 1, 1]} : vector<6x6x128xbf16> to vector<4x4x128xbf16>
    %19 = vector.shape_cast %18 : vector<4x4x128xbf16> to vector<16x128xbf16>
    %20 = vector.extract_strided_slice %9 {offsets = [1, 2, 0], sizes = [4, 4, 128], strides = [1, 1, 1]} : vector<6x6x128xbf16> to vector<4x4x128xbf16>
    %21 = vector.shape_cast %20 : vector<4x4x128xbf16> to vector<16x128xbf16>
    %22 = vector.extract_strided_slice %9 {offsets = [2, 0, 0], sizes = [4, 4, 128], strides = [1, 1, 1]} : vector<6x6x128xbf16> to vector<4x4x128xbf16>
    %23 = vector.shape_cast %22 : vector<4x4x128xbf16> to vector<16x128xbf16>
    %24 = vector.extract_strided_slice %9 {offsets = [2, 1, 0], sizes = [4, 4, 128], strides = [1, 1, 1]} : vector<6x6x128xbf16> to vector<4x4x128xbf16>
    %25 = vector.shape_cast %24 : vector<4x4x128xbf16> to vector<16x128xbf16>
    %26 = vector.extract_strided_slice %9 {offsets = [2, 2, 0], sizes = [4, 4, 128], strides = [1, 1, 1]} : vector<6x6x128xbf16> to vector<4x4x128xbf16>
    %27 = vector.shape_cast %26 : vector<4x4x128xbf16> to vector<16x128xbf16>
    %28 = tpu.concatenate %11, %13, %15, %17, %19, %21, %23, %25, %27 in 1 : vector<16x128xbf16>, vector<16x128xbf16>, vector<16x128xbf16>, vector<16x128xbf16>, vector<16x128xbf16>, vector<16x128xbf16>, vector<16x128xbf16>, vector<16x128xbf16>, vector<16x128xbf16> -> vector<16x1152xbf16>
    %c0_20 = arith.constant 0 : index
    %c0_21 = arith.constant 0 : index
    %29 = vector.load %arg2[%c0_20, %c0_21] : memref<1152x256xbf16, #tpu.memory_space<vmem>>, vector<1152x256xbf16>
    %cst_22 = arith.constant dense<0.000000e+00> : vector<16x256xf32>
    %30 = tpu.matmul %28, %29, %cst_22 {dimension_numbers = #tpu.dot_dimension_numbers<[1], [0], [0], [1], [0, 0, 1, 1], [], []>} : vector<16x1152xbf16>, vector<1152x256xbf16>, vector<16x256xf32> -> vector<16x256xf32>
    %c0_23 = arith.constant 0 : index
    %c0_24 = arith.constant 0 : index
    %31 = vector.load %arg3[%c0_23, %c0_24] : memref<1x256xf32, #tpu.memory_space<vmem>>, vector<1x256xf32>
    %32 = vector.broadcast %31 : vector<1x256xf32> to vector<16x256xf32>
    %33 = arith.addf %30, %32 : vector<16x256xf32>
    %cst_25 = arith.constant 0.000000e+00 : f32
    %34 = vector.broadcast %cst_25 : f32 to vector<16x256xf32>
    %35 = arith.maximumf %33, %34 : vector<16x256xf32>
    %36 = vector.shape_cast %35 : vector<16x256xf32> to vector<4x4x256xf32>
    %37 = arith.truncf %36 : vector<4x4x256xf32> to vector<4x4x256xbf16>
    %c0_26 = arith.constant 0 : index
    %c0_27 = arith.constant 0 : index
    %c0_28 = arith.constant 0 : index
    %c0_29 = arith.constant 0 : index
    %38 = vector.load %arg4[%c0_26, %c0_27, %c0_28, %c0_29] : memref<1x4x4x256xbf16, #tpu.memory_space<vmem>>, vector<1x4x4x256xbf16>
    %39 = vector.shape_cast %38 : vector<1x4x4x256xbf16> to vector<4x4x256xbf16>
    %40 = vector.shape_cast %37 : vector<4x4x256xbf16> to vector<1x4x4x256xbf16>
    tpu.vector_store %arg4[%c0_26, %c0_27, %c0_28, %c0_29], %40 {strides = array<i32>} : memref<1x4x4x256xbf16, #tpu.memory_space<vmem>>, vector<1x4x4x256xbf16>,
    return
  }
  func.func @transform_0(%arg0: i32) -> (i32, i32, i32, i32) {
    %c0_i32 = arith.constant 0 : i32
    %c0_i32_0 = arith.constant 0 : i32
    %c0_i32_1 = arith.constant 0 : i32
    %c0_i32_2 = arith.constant 0 : i32
    return %arg0, %c0_i32, %c0_i32_0, %c0_i32_1 : i32, i32, i32, i32
  }
  func.func @transform_1(%arg0: i32) -> (i32, i32) {
    %c0_i32 = arith.constant 0 : i32
    %c0_i32_0 = arith.constant 0 : i32
    %c0_i32_1 = arith.constant 0 : i32
    return %c0_i32, %c0_i32_0 : i32, i32
  }
  func.func @transform_2(%arg0: i32) -> (i32, i32) {
    %c0_i32 = arith.constant 0 : i32
    %c0_i32_0 = arith.constant 0 : i32
    %c0_i32_1 = arith.constant 0 : i32
    return %c0_i32, %c0_i32_0 : i32, i32
  }
  func.func @transform_3(%arg0: i32) -> (i32, i32, i32, i32) {
    %c0_i32 = arith.constant 0 : i32
    %c0_i32_0 = arith.constant 0 : i32
    %c0_i32_1 = arith.constant 0 : i32
    %c0_i32_2 = arith.constant 0 : i32
    return %arg0, %c0_i32, %c0_i32_0, %c0_i32_1 : i32, i32, i32, i32
  }
}

module attributes {stable_mosaic.version = 11 : i64} {
  func.func @_conv3x3_relu_kernel(%arg0: i32, %arg1: memref<1x4x4x256xbf16, #tpu.memory_space<vmem>>, %arg2: memref<2304x256xbf16, #tpu.memory_space<vmem>>, %arg3: memref<1x256xf32, #tpu.memory_space<vmem>>, %arg4: memref<1x4x4x256xbf16, #tpu.memory_space<vmem>>, %arg5: memref<6x6x256xbf16, #tpu.memory_space<vmem>>) attributes {dimension_semantics = [#tpu.dimension_semantics<parallel>], iteration_bounds = array<i64: 2>, scalar_prefetch = 0 : i64, scratch_operands = 1 : i64, tpu.core_type = #tpu.core_type<tc>, window_params = [{transform_indices = @transform_0, window_bounds = array<i64: 1, 4, 4, 256>}, {pipeline_mode = #tpu.pipeline_mode<synchronous>, transform_indices = @transform_1, window_bounds = array<i64: 2304, 256>}, {pipeline_mode = #tpu.pipeline_mode<synchronous>, transform_indices = @transform_2, window_bounds = array<i64: 1, 256>}, {transform_indices = @transform_3, window_bounds = array<i64: 1, 4, 4, 256>}]} {
    %cst = arith.constant 0.000000e+00 : bf16
    %0 = vector.broadcast %cst : bf16 to vector<1x6x256xbf16>
    %cst_0 = arith.constant 0.000000e+00 : bf16
    %1 = vector.broadcast %cst_0 : bf16 to vector<6x1x256xbf16>
    %c0 = arith.constant 0 : index
    %c0_1 = arith.constant 0 : index
    %c0_2 = arith.constant 0 : index
    %2 = vector.load %arg5[%c0, %c0_1, %c0_2] : memref<6x6x256xbf16, #tpu.memory_space<vmem>>, vector<1x6x256xbf16>
    tpu.vector_store %arg5[%c0, %c0_1, %c0_2], %0 {strides = array<i32>} : memref<6x6x256xbf16, #tpu.memory_space<vmem>>, vector<1x6x256xbf16>,
    %c5 = arith.constant 5 : index
    %c0_3 = arith.constant 0 : index
    %c0_4 = arith.constant 0 : index
    %3 = vector.load %arg5[%c5, %c0_3, %c0_4] : memref<6x6x256xbf16, #tpu.memory_space<vmem>>, vector<1x6x256xbf16>
    tpu.vector_store %arg5[%c5, %c0_3, %c0_4], %0 {strides = array<i32>} : memref<6x6x256xbf16, #tpu.memory_space<vmem>>, vector<1x6x256xbf16>,
    %c0_5 = arith.constant 0 : index
    %c0_6 = arith.constant 0 : index
    %c0_7 = arith.constant 0 : index
    %4 = vector.load %arg5[%c0_5, %c0_6, %c0_7] : memref<6x6x256xbf16, #tpu.memory_space<vmem>>, vector<6x1x256xbf16>
    tpu.vector_store %arg5[%c0_5, %c0_6, %c0_7], %1 {strides = array<i32>} : memref<6x6x256xbf16, #tpu.memory_space<vmem>>, vector<6x1x256xbf16>,
    %c0_8 = arith.constant 0 : index
    %c5_9 = arith.constant 5 : index
    %c0_10 = arith.constant 0 : index
    %5 = vector.load %arg5[%c0_8, %c5_9, %c0_10] : memref<6x6x256xbf16, #tpu.memory_space<vmem>>, vector<6x1x256xbf16>
    tpu.vector_store %arg5[%c0_8, %c5_9, %c0_10], %1 {strides = array<i32>} : memref<6x6x256xbf16, #tpu.memory_space<vmem>>, vector<6x1x256xbf16>,
    %c0_11 = arith.constant 0 : index
    %c0_12 = arith.constant 0 : index
    %c0_13 = arith.constant 0 : index
    %c0_14 = arith.constant 0 : index
    %6 = vector.load %arg1[%c0_11, %c0_12, %c0_13, %c0_14] : memref<1x4x4x256xbf16, #tpu.memory_space<vmem>>, vector<1x4x4x256xbf16>
    %7 = vector.shape_cast %6 : vector<1x4x4x256xbf16> to vector<4x4x256xbf16>
    %c1 = arith.constant 1 : index
    %c1_15 = arith.constant 1 : index
    %c0_16 = arith.constant 0 : index
    %8 = vector.load %arg5[%c1, %c1_15, %c0_16] : memref<6x6x256xbf16, #tpu.memory_space<vmem>>, vector<4x4x256xbf16>
    tpu.vector_store %arg5[%c1, %c1_15, %c0_16], %7 {strides = array<i32>} : memref<6x6x256xbf16, #tpu.memory_space<vmem>>, vector<4x4x256xbf16>,
    %c0_17 = arith.constant 0 : index
    %c0_18 = arith.constant 0 : index
    %c0_19 = arith.constant 0 : index
    %9 = vector.load %arg5[%c0_17, %c0_18, %c0_19] : memref<6x6x256xbf16, #tpu.memory_space<vmem>>, vector<6x6x256xbf16>
    %10 = vector.extract_strided_slice %9 {offsets = [0, 0, 0], sizes = [4, 4, 256], strides = [1, 1, 1]} : vector<6x6x256xbf16> to vector<4x4x256xbf16>
    %11 = vector.shape_cast %10 : vector<4x4x256xbf16> to vector<16x256xbf16>
    %c0_20 = arith.constant 0 : index
    %c0_21 = arith.constant 0 : index
    %12 = vector.load %arg2[%c0_20, %c0_21] : memref<2304x256xbf16, #tpu.memory_space<vmem>>, vector<256x256xbf16>
    %cst_22 = arith.constant dense<0.000000e+00> : vector<16x256xf32>
    %13 = tpu.matmul %11, %12, %cst_22 {dimension_numbers = #tpu.dot_dimension_numbers<[1], [0], [0], [1], [0, 0, 1, 1], [], []>} : vector<16x256xbf16>, vector<256x256xbf16>, vector<16x256xf32> -> vector<16x256xf32>
    %14 = vector.extract_strided_slice %9 {offsets = [0, 1, 0], sizes = [4, 4, 256], strides = [1, 1, 1]} : vector<6x6x256xbf16> to vector<4x4x256xbf16>
    %15 = vector.shape_cast %14 : vector<4x4x256xbf16> to vector<16x256xbf16>
    %c256 = arith.constant 256 : index
    %c0_23 = arith.constant 0 : index
    %16 = vector.load %arg2[%c256, %c0_23] : memref<2304x256xbf16, #tpu.memory_space<vmem>>, vector<256x256xbf16>
    %cst_24 = arith.constant dense<0.000000e+00> : vector<16x256xf32>
    %17 = tpu.matmul %15, %16, %cst_24 {dimension_numbers = #tpu.dot_dimension_numbers<[1], [0], [0], [1], [0, 0, 1, 1], [], []>} : vector<16x256xbf16>, vector<256x256xbf16>, vector<16x256xf32> -> vector<16x256xf32>
    %18 = arith.addf %13, %17 : vector<16x256xf32>
    %19 = vector.extract_strided_slice %9 {offsets = [0, 2, 0], sizes = [4, 4, 256], strides = [1, 1, 1]} : vector<6x6x256xbf16> to vector<4x4x256xbf16>
    %20 = vector.shape_cast %19 : vector<4x4x256xbf16> to vector<16x256xbf16>
    %c512 = arith.constant 512 : index
    %c0_25 = arith.constant 0 : index
    %21 = vector.load %arg2[%c512, %c0_25] : memref<2304x256xbf16, #tpu.memory_space<vmem>>, vector<256x256xbf16>
    %cst_26 = arith.constant dense<0.000000e+00> : vector<16x256xf32>
    %22 = tpu.matmul %20, %21, %cst_26 {dimension_numbers = #tpu.dot_dimension_numbers<[1], [0], [0], [1], [0, 0, 1, 1], [], []>} : vector<16x256xbf16>, vector<256x256xbf16>, vector<16x256xf32> -> vector<16x256xf32>
    %23 = arith.addf %18, %22 : vector<16x256xf32>
    %24 = vector.extract_strided_slice %9 {offsets = [1, 0, 0], sizes = [4, 4, 256], strides = [1, 1, 1]} : vector<6x6x256xbf16> to vector<4x4x256xbf16>
    %25 = vector.shape_cast %24 : vector<4x4x256xbf16> to vector<16x256xbf16>
    %c768 = arith.constant 768 : index
    %c0_27 = arith.constant 0 : index
    %26 = vector.load %arg2[%c768, %c0_27] : memref<2304x256xbf16, #tpu.memory_space<vmem>>, vector<256x256xbf16>
    %cst_28 = arith.constant dense<0.000000e+00> : vector<16x256xf32>
    %27 = tpu.matmul %25, %26, %cst_28 {dimension_numbers = #tpu.dot_dimension_numbers<[1], [0], [0], [1], [0, 0, 1, 1], [], []>} : vector<16x256xbf16>, vector<256x256xbf16>, vector<16x256xf32> -> vector<16x256xf32>
    %28 = arith.addf %23, %27 : vector<16x256xf32>
    %29 = vector.extract_strided_slice %9 {offsets = [1, 1, 0], sizes = [4, 4, 256], strides = [1, 1, 1]} : vector<6x6x256xbf16> to vector<4x4x256xbf16>
    %30 = vector.shape_cast %29 : vector<4x4x256xbf16> to vector<16x256xbf16>
    %c1024 = arith.constant 1024 : index
    %c0_29 = arith.constant 0 : index
    %31 = vector.load %arg2[%c1024, %c0_29] : memref<2304x256xbf16, #tpu.memory_space<vmem>>, vector<256x256xbf16>
    %cst_30 = arith.constant dense<0.000000e+00> : vector<16x256xf32>
    %32 = tpu.matmul %30, %31, %cst_30 {dimension_numbers = #tpu.dot_dimension_numbers<[1], [0], [0], [1], [0, 0, 1, 1], [], []>} : vector<16x256xbf16>, vector<256x256xbf16>, vector<16x256xf32> -> vector<16x256xf32>
    %33 = arith.addf %28, %32 : vector<16x256xf32>
    %34 = vector.extract_strided_slice %9 {offsets = [1, 2, 0], sizes = [4, 4, 256], strides = [1, 1, 1]} : vector<6x6x256xbf16> to vector<4x4x256xbf16>
    %35 = vector.shape_cast %34 : vector<4x4x256xbf16> to vector<16x256xbf16>
    %c1280 = arith.constant 1280 : index
    %c0_31 = arith.constant 0 : index
    %36 = vector.load %arg2[%c1280, %c0_31] : memref<2304x256xbf16, #tpu.memory_space<vmem>>, vector<256x256xbf16>
    %cst_32 = arith.constant dense<0.000000e+00> : vector<16x256xf32>
    %37 = tpu.matmul %35, %36, %cst_32 {dimension_numbers = #tpu.dot_dimension_numbers<[1], [0], [0], [1], [0, 0, 1, 1], [], []>} : vector<16x256xbf16>, vector<256x256xbf16>, vector<16x256xf32> -> vector<16x256xf32>
    %38 = arith.addf %33, %37 : vector<16x256xf32>
    %39 = vector.extract_strided_slice %9 {offsets = [2, 0, 0], sizes = [4, 4, 256], strides = [1, 1, 1]} : vector<6x6x256xbf16> to vector<4x4x256xbf16>
    %40 = vector.shape_cast %39 : vector<4x4x256xbf16> to vector<16x256xbf16>
    %c1536 = arith.constant 1536 : index
    %c0_33 = arith.constant 0 : index
    %41 = vector.load %arg2[%c1536, %c0_33] : memref<2304x256xbf16, #tpu.memory_space<vmem>>, vector<256x256xbf16>
    %cst_34 = arith.constant dense<0.000000e+00> : vector<16x256xf32>
    %42 = tpu.matmul %40, %41, %cst_34 {dimension_numbers = #tpu.dot_dimension_numbers<[1], [0], [0], [1], [0, 0, 1, 1], [], []>} : vector<16x256xbf16>, vector<256x256xbf16>, vector<16x256xf32> -> vector<16x256xf32>
    %43 = arith.addf %38, %42 : vector<16x256xf32>
    %44 = vector.extract_strided_slice %9 {offsets = [2, 1, 0], sizes = [4, 4, 256], strides = [1, 1, 1]} : vector<6x6x256xbf16> to vector<4x4x256xbf16>
    %45 = vector.shape_cast %44 : vector<4x4x256xbf16> to vector<16x256xbf16>
    %c1792 = arith.constant 1792 : index
    %c0_35 = arith.constant 0 : index
    %46 = vector.load %arg2[%c1792, %c0_35] : memref<2304x256xbf16, #tpu.memory_space<vmem>>, vector<256x256xbf16>
    %cst_36 = arith.constant dense<0.000000e+00> : vector<16x256xf32>
    %47 = tpu.matmul %45, %46, %cst_36 {dimension_numbers = #tpu.dot_dimension_numbers<[1], [0], [0], [1], [0, 0, 1, 1], [], []>} : vector<16x256xbf16>, vector<256x256xbf16>, vector<16x256xf32> -> vector<16x256xf32>
    %48 = arith.addf %43, %47 : vector<16x256xf32>
    %49 = vector.extract_strided_slice %9 {offsets = [2, 2, 0], sizes = [4, 4, 256], strides = [1, 1, 1]} : vector<6x6x256xbf16> to vector<4x4x256xbf16>
    %50 = vector.shape_cast %49 : vector<4x4x256xbf16> to vector<16x256xbf16>
    %c2048 = arith.constant 2048 : index
    %c0_37 = arith.constant 0 : index
    %51 = vector.load %arg2[%c2048, %c0_37] : memref<2304x256xbf16, #tpu.memory_space<vmem>>, vector<256x256xbf16>
    %cst_38 = arith.constant dense<0.000000e+00> : vector<16x256xf32>
    %52 = tpu.matmul %50, %51, %cst_38 {dimension_numbers = #tpu.dot_dimension_numbers<[1], [0], [0], [1], [0, 0, 1, 1], [], []>} : vector<16x256xbf16>, vector<256x256xbf16>, vector<16x256xf32> -> vector<16x256xf32>
    %53 = arith.addf %48, %52 : vector<16x256xf32>
    %c0_39 = arith.constant 0 : index
    %c0_40 = arith.constant 0 : index
    %54 = vector.load %arg3[%c0_39, %c0_40] : memref<1x256xf32, #tpu.memory_space<vmem>>, vector<1x256xf32>
    %55 = vector.broadcast %54 : vector<1x256xf32> to vector<16x256xf32>
    %56 = arith.addf %53, %55 : vector<16x256xf32>
    %cst_41 = arith.constant 0.000000e+00 : f32
    %57 = vector.broadcast %cst_41 : f32 to vector<16x256xf32>
    %58 = arith.maximumf %56, %57 : vector<16x256xf32>
    %59 = vector.shape_cast %58 : vector<16x256xf32> to vector<4x4x256xf32>
    %60 = arith.truncf %59 : vector<4x4x256xf32> to vector<4x4x256xbf16>
    %c0_42 = arith.constant 0 : index
    %c0_43 = arith.constant 0 : index
    %c0_44 = arith.constant 0 : index
    %c0_45 = arith.constant 0 : index
    %61 = vector.load %arg4[%c0_42, %c0_43, %c0_44, %c0_45] : memref<1x4x4x256xbf16, #tpu.memory_space<vmem>>, vector<1x4x4x256xbf16>
    %62 = vector.shape_cast %61 : vector<1x4x4x256xbf16> to vector<4x4x256xbf16>
    %63 = vector.shape_cast %60 : vector<4x4x256xbf16> to vector<1x4x4x256xbf16>
    tpu.vector_store %arg4[%c0_42, %c0_43, %c0_44, %c0_45], %63 {strides = array<i32>} : memref<1x4x4x256xbf16, #tpu.memory_space<vmem>>, vector<1x4x4x256xbf16>,
    return
  }
  func.func @transform_0(%arg0: i32) -> (i32, i32, i32, i32) {
    %c0_i32 = arith.constant 0 : i32
    %c0_i32_0 = arith.constant 0 : i32
    %c0_i32_1 = arith.constant 0 : i32
    %c0_i32_2 = arith.constant 0 : i32
    return %arg0, %c0_i32, %c0_i32_0, %c0_i32_1 : i32, i32, i32, i32
  }
  func.func @transform_1(%arg0: i32) -> (i32, i32) {
    %c0_i32 = arith.constant 0 : i32
    %c0_i32_0 = arith.constant 0 : i32
    %c0_i32_1 = arith.constant 0 : i32
    return %c0_i32, %c0_i32_0 : i32, i32
  }
  func.func @transform_2(%arg0: i32) -> (i32, i32) {
    %c0_i32 = arith.constant 0 : i32
    %c0_i32_0 = arith.constant 0 : i32
    %c0_i32_1 = arith.constant 0 : i32
    return %c0_i32, %c0_i32_0 : i32, i32
  }
  func.func @transform_3(%arg0: i32) -> (i32, i32, i32, i32) {
    %c0_i32 = arith.constant 0 : i32
    %c0_i32_0 = arith.constant 0 : i32
    %c0_i32_1 = arith.constant 0 : i32
    %c0_i32_2 = arith.constant 0 : i32
    return %arg0, %c0_i32, %c0_i32_0, %c0_i32_1 : i32, i32, i32, i32
  }
}

module attributes {stable_mosaic.version = 11 : i64} {
  func.func @_classifier_kernel(%arg0: i32, %arg1: memref<8x1024xbf16, #tpu.memory_space<vmem>>, %arg2: memref<1024x128xbf16, #tpu.memory_space<vmem>>, %arg3: memref<1x128xf32, #tpu.memory_space<vmem>>, %arg4: memref<128x128xbf16, #tpu.memory_space<any>>, %arg5: memref<1x128xf32, #tpu.memory_space<any>>, %arg6: memref<128x128xbf16, #tpu.memory_space<any>>, %arg7: memref<1x128xf32, #tpu.memory_space<any>>, %arg8: memref<8x128xf32, #tpu.memory_space<vmem>>, %arg9: memref<8x128xf32, #tpu.memory_space<vmem>>, %arg10: memref<128x128xbf16, #tpu.memory_space<vmem>>, %arg11: memref<1x128xf32, #tpu.memory_space<vmem>>, %arg12: memref<128x128xbf16, #tpu.memory_space<vmem>>, %arg13: memref<1x128xf32, #tpu.memory_space<vmem>>, %arg14: memref<4x!tpu.dma_semaphore, #tpu.memory_space<semaphore_mem>>) attributes {dimension_semantics = [#tpu.dimension_semantics<arbitrary>], iteration_bounds = array<i64: 4>, scalar_prefetch = 0 : i64, scratch_operands = 6 : i64, tpu.core_type = #tpu.core_type<tc>, window_params = [{transform_indices = @transform_0, window_bounds = array<i64: 8, 1024>}, {transform_indices = @transform_1, window_bounds = array<i64: 1024, 128>}, {pipeline_mode = #tpu.pipeline_mode<synchronous>, transform_indices = @transform_2, window_bounds = array<i64: 1, 128>}, {}, {}, {}, {}, {pipeline_mode = #tpu.pipeline_mode<synchronous>, transform_indices = @transform_7, window_bounds = array<i64: 8, 128>}]} {
    %c0_i32 = arith.constant 0 : i32
    %0 = arith.cmpi eq, %arg0, %c0_i32 : i32
    %1 = arith.extui %0 : i1 to i32
    %c0_i32_0 = arith.constant 0 : i32
    %2 = arith.cmpi ne, %1, %c0_i32_0 : i32
    scf.if %2 {
      %cst_9 = arith.constant 0.000000e+00 : f32
      %12 = vector.broadcast %cst_9 : f32 to vector<8x128xf32>
      %c0_10 = arith.constant 0 : index
      %c0_11 = arith.constant 0 : index
      %13 = vector.load %arg9[%c0_10, %c0_11] : memref<8x128xf32, #tpu.memory_space<vmem>>, vector<8x128xf32>
      tpu.vector_store %arg9[%c0_10, %c0_11], %12 {strides = array<i32>} : memref<8x128xf32, #tpu.memory_space<vmem>>, vector<8x128xf32>,
      %c0_i32_12 = arith.constant 0 : i32
      %14 = tpu.memref_slice %arg14[%c0_i32_12] : memref<4x!tpu.dma_semaphore, #tpu.memory_space<semaphore_mem>> -> memref<1x!tpu.dma_semaphore, #tpu.memory_space<semaphore_mem>>
      %15 = tpu.memref_squeeze %14 : memref<1x!tpu.dma_semaphore, #tpu.memory_space<semaphore_mem>> -> memref<!tpu.dma_semaphore, #tpu.memory_space<semaphore_mem>>
      tpu.enqueue_dma source(%arg4 : memref<128x128xbf16, #tpu.memory_space<any>>) target(%arg10 : memref<128x128xbf16, #tpu.memory_space<vmem>>) target_semaphore(%15 : memref<!tpu.dma_semaphore, #tpu.memory_space<semaphore_mem>>)
      %c1_i32 = arith.constant 1 : i32
      %16 = tpu.memref_slice %arg14[%c1_i32] : memref<4x!tpu.dma_semaphore, #tpu.memory_space<semaphore_mem>> -> memref<1x!tpu.dma_semaphore, #tpu.memory_space<semaphore_mem>>
      %17 = tpu.memref_squeeze %16 : memref<1x!tpu.dma_semaphore, #tpu.memory_space<semaphore_mem>> -> memref<!tpu.dma_semaphore, #tpu.memory_space<semaphore_mem>>
      tpu.enqueue_dma source(%arg5 : memref<1x128xf32, #tpu.memory_space<any>>) target(%arg11 : memref<1x128xf32, #tpu.memory_space<vmem>>) target_semaphore(%17 : memref<!tpu.dma_semaphore, #tpu.memory_space<semaphore_mem>>)
      %c2_i32 = arith.constant 2 : i32
      %18 = tpu.memref_slice %arg14[%c2_i32] : memref<4x!tpu.dma_semaphore, #tpu.memory_space<semaphore_mem>> -> memref<1x!tpu.dma_semaphore, #tpu.memory_space<semaphore_mem>>
      %19 = tpu.memref_squeeze %18 : memref<1x!tpu.dma_semaphore, #tpu.memory_space<semaphore_mem>> -> memref<!tpu.dma_semaphore, #tpu.memory_space<semaphore_mem>>
      tpu.enqueue_dma source(%arg6 : memref<128x128xbf16, #tpu.memory_space<any>>) target(%arg12 : memref<128x128xbf16, #tpu.memory_space<vmem>>) target_semaphore(%19 : memref<!tpu.dma_semaphore, #tpu.memory_space<semaphore_mem>>)
      %c3_i32_13 = arith.constant 3 : i32
      %20 = tpu.memref_slice %arg14[%c3_i32_13] : memref<4x!tpu.dma_semaphore, #tpu.memory_space<semaphore_mem>> -> memref<1x!tpu.dma_semaphore, #tpu.memory_space<semaphore_mem>>
      %21 = tpu.memref_squeeze %20 : memref<1x!tpu.dma_semaphore, #tpu.memory_space<semaphore_mem>> -> memref<!tpu.dma_semaphore, #tpu.memory_space<semaphore_mem>>
      tpu.enqueue_dma source(%arg7 : memref<1x128xf32, #tpu.memory_space<any>>) target(%arg13 : memref<1x128xf32, #tpu.memory_space<vmem>>) target_semaphore(%21 : memref<!tpu.dma_semaphore, #tpu.memory_space<semaphore_mem>>)
    } else {
    }
    %c0 = arith.constant 0 : index
    %c0_1 = arith.constant 0 : index
    %3 = vector.load %arg9[%c0, %c0_1] : memref<8x128xf32, #tpu.memory_space<vmem>>, vector<8x128xf32>
    %c0_2 = arith.constant 0 : index
    %c0_3 = arith.constant 0 : index
    %4 = vector.load %arg1[%c0_2, %c0_3] : memref<8x1024xbf16, #tpu.memory_space<vmem>>, vector<8x1024xbf16>
    %c0_4 = arith.constant 0 : index
    %c0_5 = arith.constant 0 : index
    %5 = vector.load %arg2[%c0_4, %c0_5] : memref<1024x128xbf16, #tpu.memory_space<vmem>>, vector<1024x128xbf16>
    %cst = arith.constant dense<0.000000e+00> : vector<8x128xf32>
    %6 = tpu.matmul %4, %5, %cst {dimension_numbers = #tpu.dot_dimension_numbers<[1], [0], [0], [1], [0, 0, 1, 1], [], []>} : vector<8x1024xbf16>, vector<1024x128xbf16>, vector<8x128xf32> -> vector<8x128xf32>
    %7 = arith.addf %3, %6 : vector<8x128xf32>
    %c0_6 = arith.constant 0 : index
    %c0_7 = arith.constant 0 : index
    %8 = vector.load %arg9[%c0_6, %c0_7] : memref<8x128xf32, #tpu.memory_space<vmem>>, vector<8x128xf32>
    tpu.vector_store %arg9[%c0_6, %c0_7], %7 {strides = array<i32>} : memref<8x128xf32, #tpu.memory_space<vmem>>, vector<8x128xf32>,
    %c3_i32 = arith.constant 3 : i32
    %9 = arith.cmpi eq, %arg0, %c3_i32 : i32
    %10 = arith.extui %9 : i1 to i32
    %c0_i32_8 = arith.constant 0 : i32
    %11 = arith.cmpi ne, %10, %c0_i32_8 : i32
    scf.if %11 {
      %c0_i32_9 = arith.constant 0 : i32
      %12 = tpu.memref_slice %arg14[%c0_i32_9] : memref<4x!tpu.dma_semaphore, #tpu.memory_space<semaphore_mem>> -> memref<1x!tpu.dma_semaphore, #tpu.memory_space<semaphore_mem>>
      %13 = tpu.memref_squeeze %12 : memref<1x!tpu.dma_semaphore, #tpu.memory_space<semaphore_mem>> -> memref<!tpu.dma_semaphore, #tpu.memory_space<semaphore_mem>>
      tpu.wait_dma2 semaphore(%13 : memref<!tpu.dma_semaphore, #tpu.memory_space<semaphore_mem>>) src(%arg4 : memref<128x128xbf16, #tpu.memory_space<any>>) dst(%arg10 : memref<128x128xbf16, #tpu.memory_space<vmem>>)
      %c1_i32 = arith.constant 1 : i32
      %14 = tpu.memref_slice %arg14[%c1_i32] : memref<4x!tpu.dma_semaphore, #tpu.memory_space<semaphore_mem>> -> memref<1x!tpu.dma_semaphore, #tpu.memory_space<semaphore_mem>>
      %15 = tpu.memref_squeeze %14 : memref<1x!tpu.dma_semaphore, #tpu.memory_space<semaphore_mem>> -> memref<!tpu.dma_semaphore, #tpu.memory_space<semaphore_mem>>
      tpu.wait_dma2 semaphore(%15 : memref<!tpu.dma_semaphore, #tpu.memory_space<semaphore_mem>>) src(%arg5 : memref<1x128xf32, #tpu.memory_space<any>>) dst(%arg11 : memref<1x128xf32, #tpu.memory_space<vmem>>)
      %c2_i32 = arith.constant 2 : i32
      %16 = tpu.memref_slice %arg14[%c2_i32] : memref<4x!tpu.dma_semaphore, #tpu.memory_space<semaphore_mem>> -> memref<1x!tpu.dma_semaphore, #tpu.memory_space<semaphore_mem>>
      %17 = tpu.memref_squeeze %16 : memref<1x!tpu.dma_semaphore, #tpu.memory_space<semaphore_mem>> -> memref<!tpu.dma_semaphore, #tpu.memory_space<semaphore_mem>>
      tpu.wait_dma2 semaphore(%17 : memref<!tpu.dma_semaphore, #tpu.memory_space<semaphore_mem>>) src(%arg6 : memref<128x128xbf16, #tpu.memory_space<any>>) dst(%arg12 : memref<128x128xbf16, #tpu.memory_space<vmem>>)
      %c3_i32_10 = arith.constant 3 : i32
      %18 = tpu.memref_slice %arg14[%c3_i32_10] : memref<4x!tpu.dma_semaphore, #tpu.memory_space<semaphore_mem>> -> memref<1x!tpu.dma_semaphore, #tpu.memory_space<semaphore_mem>>
      %19 = tpu.memref_squeeze %18 : memref<1x!tpu.dma_semaphore, #tpu.memory_space<semaphore_mem>> -> memref<!tpu.dma_semaphore, #tpu.memory_space<semaphore_mem>>
      tpu.wait_dma2 semaphore(%19 : memref<!tpu.dma_semaphore, #tpu.memory_space<semaphore_mem>>) src(%arg7 : memref<1x128xf32, #tpu.memory_space<any>>) dst(%arg13 : memref<1x128xf32, #tpu.memory_space<vmem>>)
      %c0_11 = arith.constant 0 : index
      %c0_12 = arith.constant 0 : index
      %20 = vector.load %arg9[%c0_11, %c0_12] : memref<8x128xf32, #tpu.memory_space<vmem>>, vector<8x128xf32>
      %c0_13 = arith.constant 0 : index
      %c0_14 = arith.constant 0 : index
      %21 = vector.load %arg3[%c0_13, %c0_14] : memref<1x128xf32, #tpu.memory_space<vmem>>, vector<1x128xf32>
      %22 = vector.broadcast %21 : vector<1x128xf32> to vector<8x128xf32>
      %23 = arith.addf %20, %22 : vector<8x128xf32>
      %cst_15 = arith.constant 0.000000e+00 : f32
      %24 = vector.broadcast %cst_15 : f32 to vector<8x128xf32>
      %25 = arith.maximumf %23, %24 : vector<8x128xf32>
      %26 = arith.truncf %25 : vector<8x128xf32> to vector<8x128xbf16>
      %c0_16 = arith.constant 0 : index
      %c0_17 = arith.constant 0 : index
      %27 = vector.load %arg10[%c0_16, %c0_17] : memref<128x128xbf16, #tpu.memory_space<vmem>>, vector<128x128xbf16>
      %cst_18 = arith.constant dense<0.000000e+00> : vector<8x128xf32>
      %28 = tpu.matmul %26, %27, %cst_18 {dimension_numbers = #tpu.dot_dimension_numbers<[1], [0], [0], [1], [0, 0, 1, 1], [], []>} : vector<8x128xbf16>, vector<128x128xbf16>, vector<8x128xf32> -> vector<8x128xf32>
      %c0_19 = arith.constant 0 : index
      %c0_20 = arith.constant 0 : index
      %29 = vector.load %arg11[%c0_19, %c0_20] : memref<1x128xf32, #tpu.memory_space<vmem>>, vector<1x128xf32>
      %30 = vector.broadcast %29 : vector<1x128xf32> to vector<8x128xf32>
      %31 = arith.addf %28, %30 : vector<8x128xf32>
      %cst_21 = arith.constant 0.000000e+00 : f32
      %32 = vector.broadcast %cst_21 : f32 to vector<8x128xf32>
      %33 = arith.maximumf %31, %32 : vector<8x128xf32>
      %34 = arith.truncf %33 : vector<8x128xf32> to vector<8x128xbf16>
      %c0_22 = arith.constant 0 : index
      %c0_23 = arith.constant 0 : index
      %35 = vector.load %arg12[%c0_22, %c0_23] : memref<128x128xbf16, #tpu.memory_space<vmem>>, vector<128x128xbf16>
      %cst_24 = arith.constant dense<0.000000e+00> : vector<8x128xf32>
      %36 = tpu.matmul %34, %35, %cst_24 {dimension_numbers = #tpu.dot_dimension_numbers<[1], [0], [0], [1], [0, 0, 1, 1], [], []>} : vector<8x128xbf16>, vector<128x128xbf16>, vector<8x128xf32> -> vector<8x128xf32>
      %c0_25 = arith.constant 0 : index
      %c0_26 = arith.constant 0 : index
      %37 = vector.load %arg13[%c0_25, %c0_26] : memref<1x128xf32, #tpu.memory_space<vmem>>, vector<1x128xf32>
      %38 = vector.broadcast %37 : vector<1x128xf32> to vector<8x128xf32>
      %39 = arith.addf %36, %38 : vector<8x128xf32>
      %c0_27 = arith.constant 0 : index
      %c0_28 = arith.constant 0 : index
      %40 = vector.load %arg8[%c0_27, %c0_28] : memref<8x128xf32, #tpu.memory_space<vmem>>, vector<8x128xf32>
      tpu.vector_store %arg8[%c0_27, %c0_28], %39 {strides = array<i32>} : memref<8x128xf32, #tpu.memory_space<vmem>>, vector<8x128xf32>,
    } else {
    }
    return
  }
  func.func @transform_0(%arg0: i32) -> (i32, i32) {
    %c0_i32 = arith.constant 0 : i32
    %c0_i32_0 = arith.constant 0 : i32
    return %c0_i32, %arg0 : i32, i32
  }
  func.func @transform_1(%arg0: i32) -> (i32, i32) {
    %c0_i32 = arith.constant 0 : i32
    %c0_i32_0 = arith.constant 0 : i32
    return %arg0, %c0_i32 : i32, i32
  }
  func.func @transform_2(%arg0: i32) -> (i32, i32) {
    %c0_i32 = arith.constant 0 : i32
    %c0_i32_0 = arith.constant 0 : i32
    %c0_i32_1 = arith.constant 0 : i32
    return %c0_i32, %c0_i32_0 : i32, i32
  }
  func.func @transform_7(%arg0: i32) -> (i32, i32) {
    %c0_i32 = arith.constant 0 : i32
    %c0_i32_0 = arith.constant 0 : i32
    %c0_i32_1 = arith.constant 0 : i32
    return %c0_i32, %c0_i32_0 : i32, i32
  }
}

</mosaic_0001>

<bundles_post_ra>
// kernel: _lambda_.6
= control target key start
LH: loop header
LB: loop body
LE: loop exit
PB: predicated region body
PF: predicated region fallthrough
CT: control target
= control target key end

     0   :  { %8 = vsyncpa [#allocation4], 0  ;;  %s2783_s0 = inlined_call_operand.vmem [shape: bf16[2,8,8,128], index: 0, kind: input, shape index: {}]   ;;  %s2784_s1 = inlined_call_operand.hbm [shape: bf16[1152,128], index: 1, kind: input, shape index: {}]   ;;  %s2785_s2 = inlined_call_operand.hbm [shape: f32[1,128], index: 2, kind: input, shape index: {}]   ;;  %s2786_s3 = inlined_call_operand.vmem [shape: bf16[2,4,4,128], index: 3, kind: output, shape index: {}]  }
   0x1   :  { %9 = vsyncpa [#allocation6], 0  ;;  %s2356_s12 = smov 0  }
   0x2 LB: > { %s2362_s13 = sadd.s32 4294967295, %s2328_s12   ;;  %p1814_p0 = scmp.ge.s32.totalorder %s2328_s12, 1  ;;  %s2328_s12 = sphi %s2356_s12, %s15_s12  }
   0x3   : > { %p114_p1 = scmp.lt.s32.totalorder %s2328_s12, 3  ;;  %s2330_s14 = smov [#allocation3]  }
   0x4   : > { %s126_s15 = sshll.u32 %s2330_s14, 4  ;;  %p2787_p3 = scmp.eq.s32.totalorder %s2362_s13, 0  ;;  %s127_s15 = int_to_ptr.vmem [resolvable:$true] %s126_s15 }
   0x5   : > { %p2366_p2 = pnand %p1814_p0, %p114_p1  ;;  %s2331_s17 = smov [#allocation5]  }
   0x6   : > { %s140_s18 = sshll.u32 %s2331_s17, 4  ;;  %s2258_s22 = scalar_lea.hbm %s2784_s1, 9216  ;;  %s2379_s18 = int_to_ptr.vmem [resolvable:$true] %s140_s18 }
   0x7   : > { %s2789_s16 = scalar_select %p2366_p2, 1, 0 }
   0x8   : > { %p2159_p4 = pneg %p2366_p2  ;;  %p2259_p6 = scmp.ne.s32.totalorder %s2784_s1, %s2258_s22 }
   0x9   : > { %p2265_p10 = scmp.lt.u32.totalorder %s2258_s22, %s2784_s1 }
   0xa   : > { %p2375_p5 = pnand %p2787_p3, %p2159_p4 }
   0xc   : > { %p2260_p7 = pneg %p2375_p5 }
   0xe   : > { %p2261_p8 = pnand %p2260_p7, %p2259_p6 }
  0x10   : > { %p2262_p9 = pneg %p2261_p8 }
  0x12   : > { %p2267_p11 = pnand %p2265_p10, %p2262_p9 }
  0x14   : > { %2270 = shalt.err (!%p2267_p11)
}
  0x15   : > { %s2271_s27 = scalar_lea.vmem %s127_s15, 9216  ;;  %p2279_p1 = scmp.lt.s32.totalorder %s127_s15, %s127_s15 }
  0x16   : > { %p2272_p12 = scmp.ne.s32.totalorder %s127_s15, %s2271_s27  ;;  %p2280_p4 = scmp.lt.s32.totalorder %s2271_s27, %s2271_s27 }
  0x18   : > { %p2274_p13 = pnand %p2272_p12, %p2260_p7  ;;  %p2281_p3 = por %p2280_p4, %p2279_p1 }
  0x1a   : > { %p2275_p0 = pneg %p2274_p13 }
  0x1c   : > { %p2282_p2 = pnand %p2281_p3, %p2275_p0 }
  0x1e   : > { %2285 = shalt.err (!%p2282_p2)
}
  0x1f   : > { %s2332_s28 = smov 64   ;;  %s2333_s29 = smov 4  }
  0x20   : > { %2162 = dma.hbm_to_vmem [thread:$0]  (!%p2375_p5), %s2784_s1, 9216, %s127_s15, [#allocation4], %s2332_s28, %s2332_s28, %s2333_s29  }
  0x21   : > { %s2286_s7 = scalar_lea.hbm %s2785_s2, 16 }
  0x22   : > { %p2287_p6 = scmp.ne.s32.totalorder %s2785_s2, %s2286_s7  ;;  %p2293_p8 = scmp.lt.u32.totalorder %s2286_s7, %s2785_s2 }
  0x24   : > { %p2289_p2 = pnand %p2287_p6, %p2260_p7 }
  0x26   : > { %p2290_p3 = pneg %p2289_p2 }
  0x28   : > { %p2295_p9 = pnand %p2293_p8, %p2290_p3 }
  0x2a   : > { %2298 = shalt.err (!%p2295_p9)
}
  0x2b   : > { %s2299_s14 = scalar_lea.vmem %s2379_s18, 16  ;;  %s2306_s15 = scalar_lea.vmem %s2379_s18, 32 }
  0x2c   : > { %p2300_p10 = scmp.ne.s32.totalorder %s2379_s18, %s2299_s14  ;;  %p2307_p13 = scmp.lt.s32.totalorder %s2379_s18, %s2379_s18 }
  0x2d   : > { %p2308_p0 = scmp.lt.s32.totalorder %s2306_s15, %s2299_s14 }
  0x2e   : > { %p2302_p11 = pnand %p2300_p10, %p2260_p7 }
  0x2f   : > { %p2309_p1 = por %p2308_p0, %p2307_p13 }
  0x30   : > { %p2303_p12 = pneg %p2302_p11 }
  0x32   : > { %p2310_p4 = pnand %p2309_p1, %p2303_p12 }
  0x34   : > { %2313 = shalt.err (!%p2310_p4)
}
  0x35   : > { %2165 = dma.hbm_to_vmem [thread:$0]  (!%p2375_p5), %s2785_s2, 16, %s2379_s18, [#allocation6]  }
  0x36   : > { %p2791_p6 = scmp.ne.s32.totalorder %s2789_s16, 0 }
  0x37   : > { %p2792_p7 = scmp.eq.s32.totalorder (!%p2791_p6), %s2362_s13, 0 }
  0x38   : > { %161 = sbr.rel (%p2791_p6) target bundleno = 425 (0x1a9), region = 32 }
  0x3f   : > { %2319 = dma.done.wait (%p2792_p7), [#allocation4], 9216   ;;  %p2793_p2 = pmov %p2792_p7 }
  0x41   : > { %2321 = vsyncadd (%p2793_p2), [#allocation4], 4294958080  ;;  %p2794_p3 = pmov %p2793_p2 }
  0x42   : > { %p2795_p8 = pmov %p2793_p2 }
  0x43   : > { %2323 = dma.done.wait (%p2794_p3), [#allocation6], 16  }
  0x44   : > { %2325 = vsyncadd (%p2795_p8), [#allocation6], 4294967280  ;;  %v2334_v0 = vmov 0   ;;  %v2184_v1 = vld [vmem:[#allocation3 + $0x40] sm:$0xff]   ;;  %v2188_v5 = vld [vmem:[#allocation3 + $0x48] sm:$0xff]   ;;  %vm205_vm2 = vcmask 1040384  }
  0x45   : > { %200 = vst [vmem:[#allocation2] sm:$0xf] %v2334_v0  ;;  %201 = vst [vmem:[#allocation2 + $0x4] sm:$0x1] %v2334_v0  ;;  %v2185_v2 = vld [vmem:[#allocation3 + $0xc0] sm:$0xff]   ;;  %1939 = vmatprep.subr.bf16.mxu0 %v2184_v1  ;;  %v2189_v6 = vld [vmem:[#allocation3 + $0xc8] sm:$0xff]  }
  0x46   : > { %203 = vst [vmem:[#allocation2 + $0x48] sm:$0xf] %v2334_v0  ;;  %204 = vst [vmem:[#allocation2 + $0x4c] sm:$0x1] %v2334_v0  ;;  %v2186_v3 = vld [vmem:[#allocation3] sm:$0xff]   ;;  %1979 = vmatprep.subr.bf16.mxu1 %v2185_v2  ;;  %v2190_v7 = vld [vmem:[#allocation3 + $0x8] sm:$0xff]  }
  0x47   : > { %v2187_v4 = vld [vmem:[#allocation3 + $0x80] sm:$0xff]   ;;  %1940 = vmatpush3.bf16.msra.mxu0 %v2186_v3  ;;  %v2191_v8 = vld [vmem:[#allocation3 + $0x88] sm:$0xff]   ;;  %v2192_v9 = vld [vmem:[#allocation3 + $0x50] sm:$0xff]   ;;  %vm206_vm0 = vsmask.f32 256  ;;  %p189_p5 = scmp.lt.s32.totalorder %s2362_s13, 1 }
  0x48   : > { %1980 = vmatpush3.bf16.msra.mxu1 %v2187_v4  ;;  %1941 = vmatprep.subr.bf16.mxu0 %v2188_v5  ;;  %v2193_v10 = vld [vmem:[#allocation3 + $0xd0] sm:$0xff]   ;;  %v2196_v13 = vld [vmem:[#allocation3 + $0x58] sm:$0xff]   ;;  %vm238_vm1 = vsmask.f32 7938  ;;  %v2200_v17 = vld [vmem:[#allocation3 + $0x60] sm:$0xff]   ;;  %vm359_vm5 = vcmask 1043456  }
  0x49   : > { %1981 = vmatprep.subr.bf16.mxu1 %v2189_v6  ;;  %v2194_v11 = vld [vmem:[#allocation3 + $0x10] sm:$0xff]   ;;  %v2197_v14 = vld [vmem:[#allocation3 + $0xd8] sm:$0xff]   ;;  %v2201_v18 = vld [vmem:[#allocation3 + $0xe0] sm:$0xff]   ;;  %s2807_s13 = smov (!%p189_p5, %s2362_s13), 1  ;;  %vm429_vm7 = vsmask.f32 3328 }
  0x4a   : > { %v2195_v12 = vld [vmem:[#allocation3 + $0x90] sm:$0xff]   ;;  %v2198_v15 = vld [vmem:[#allocation3 + $0x18] sm:$0xff]   ;;  %v2202_v19 = vld [vmem:[#allocation3 + $0x20] sm:$0xff]   ;;  %s1937_s16 = sshll.u32 %s2807_s13, 5  ;;  %vm430_vm8 = vsmask.f32 7440 }
  0x4b   : > { %1942 = vmatpush3.bf16.msra.mxu0 %v2190_v7  ;;  %v2199_v16 = vld [vmem:[#allocation3 + $0x98] sm:$0xff]   ;;  %v2203_v20 = vld [vmem:[#allocation3 + $0xa0] sm:$0xff]   ;;  %v2204_v21 = vld [vmem:[#allocation3 + $0x68] sm:$0xff]   ;;  %s2457_s21 = scalar_lea.vmem %s2783_s0, %s1937_s16  ;;  %vm560_vm9 = vcmask 1042432   ;;  %vm561_vm10 = vcmask 1046532   ;;  %s1938_s22 = sshll.u32 %s2807_s13, 3 }
  0x4c   : > { %1982 = vmatpush3.bf16.msra.mxu1 %v2191_v8  ;;  %1943 = vmatprep.subr.bf16.mxu0 %v2192_v9  ;;  %v2205_v22 = vld [vmem:[#allocation3 + $0xe8] sm:$0xff]   ;;  %vm2441_vm3 = vmand %vm205_vm2, %vm206_vm0  ;;  %v2208_v26 = vld [vmem:[#allocation3 + $0x70] sm:$0xff]   ;;  %s198_s25 = scalar_lea.vmem %s2786_s3, %s1938_s22 }
  0x4d   : > { %1983 = vmatprep.subr.bf16.mxu1 %v2193_v10  ;;  %v2206_v23 = vld [vmem:[#allocation3 + $0x28] sm:$0xff]   ;;  %vm2446_vm4 = vmand %vm205_vm2, %vm238_vm1  ;;  %v2209_v28 = vld [vmem:[#allocation3 + $0xf0] sm:$0xff]  }
  0x4e   : > { %v2207_v25 = vld [vmem:[#allocation3 + $0xa8] sm:$0xff]   ;;  %v2210_v29 = vld [vmem:[#allocation3 + $0x30] sm:$0xff]   ;;  %v2212_v31 = vld [vmem:[#allocation3 + $0x78] sm:$0xff]  }
  0x4f   : > { %1944 = vmatpush3.bf16.msra.mxu0 %v2194_v11  ;;  %v2211_v30 = vld [vmem:[#allocation3 + $0xb0] sm:$0xff]   ;;  %v2213_v32 = vld [vmem:[#allocation3 + $0xf8] sm:$0xff]   ;;  %v214_v37 = vld [vmem:[#allocation2 + $0x10] sm:$0x1] }
  0x50   : > { %1984 = vmatpush3.bf16.msra.mxu1 %v2195_v12  ;;  %1945 = vmatprep.subr.bf16.mxu0 %v2196_v13  ;;  %v2214_v33 = vld [vmem:[#allocation3 + $0x38] sm:$0xff]   ;;  %v208_v35 = vld [vmem:[#allocation2] sm:$0x1]  ;;  %v215_v40 = vsel %vm2441_vm3, 0, %v214_v37  ;;  %v240_v41 = vld [vmem:[#allocation2 + $0x4] sm:$0x1] }
  0x51   : > { %1985 = vmatprep.subr.bf16.mxu1 %v2197_v14  ;;  %v2215_v34 = vld [vmem:[#allocation3 + $0xb8] sm:$0xff]   ;;  %v209_v38 = vsel %vm2441_vm3, 0, %v208_v35  ;;  %v2218_v42 = vld [vmem:[#allocation3 + $0x140] sm:$0xff]   ;;  %216 = vst [vmem:[#allocation2 + $0x10] sm:$0x1] %v215_v40  ;;  %v241_v43 = vsel %vm2446_vm4, 0, %v240_v41  ;;  %vm2475_vm6 = vmand %vm359_vm5, %vm238_vm1 }
  0x52   : > { %v211_v36 = vld [vmem:[#allocation2 + $0x8] sm:$0x1]  ;;  %210 = vst [vmem:[#allocation2] sm:$0x1] %v209_v38  ;;  %v243_v44 = vld [vmem:[#allocation2 + $0xc] sm:$0x1]  ;;  %vm2506_vm11 = vmor %vm560_vm9, %vm561_vm10 }
  0x53   : > { %1946 = vmatpush3.bf16.msra.mxu0 %v2198_v15  ;;  %v212_v39 = vsel %vm2441_vm3, 0, %v211_v36  ;;  %v246_v45 = vld [vmem:[#allocation2 + $0x14] sm:$0x1]  ;;  %242 = vst [vmem:[#allocation2 + $0x4] sm:$0x1] %v241_v43  ;;  %v244_v47 = vsel %vm2446_vm4, 0, %v243_v44  ;;  %vm2523_vm12 = vmor %vm429_vm7, %vm430_vm8 }
  0x54   : > { %1986 = vmatpush3.bf16.msra.mxu1 %v2199_v16  ;;  %1947 = vmatprep.subr.bf16.mxu0 %v2200_v17  ;;  %213 = vst [vmem:[#allocation2 + $0x8] sm:$0x1] %v212_v39  ;;  %v2219_v46 = vld [vmem:[#allocation3 + $0x1c0] sm:$0xff]   ;;  %v247_v48 = vsel %vm2446_vm4, 0, %v246_v45  ;;  %v270_v49 = vld [vmem:[%s2457_s21] sm:$0xf] }
  0x55   : > { %1987 = vmatprep.subr.bf16.mxu1 %v2201_v18  ;;  %v271_v50 = vld [vmem:[%s2457_s21 + $0x4] sm:$0xf]  ;;  %245 = vst [vmem:[#allocation2 + $0xc] sm:$0x1] %v244_v47  ;;  %248 = vst [vmem:[#allocation2 + $0x14] sm:$0x1] %v247_v48 }
  0x56   : > { %v279_v51 = vshrl.u32 %v270_v49, 16  ;;  %v282_v52 = vshll.u32 %v270_v49, 16  ;;  %v287_v53 = vshrl.u32 %v271_v50, 16  ;;  %v290_v54 = vshll.u32 %v271_v50, 16  ;;  %v217_v15 = vld [vmem:[#allocation2 + $0x18] sm:$0x1] }
  0x57   : > { %1948 = vmatpush3.bf16.msra.mxu0 %v2202_v19  ;;  %v249_v16 = vld [vmem:[#allocation2 + $0x1c] sm:$0x1]  ;;  %v218_v19 = vsel %vm2441_vm3, 0, %v217_v15 }
  0x58   : > { %1988 = vmatpush3.bf16.msra.mxu1 %v2203_v20  ;;  %1949 = vmatprep.subr.bf16.mxu0 %v2204_v21  ;;  %v281_v55 = vrot.slane %v279_v51, 7  ;;  %v289_v56 = vrot.slane %v287_v53, 7  ;;  %v367_v63 = vld [vmem:[#allocation2 + $0x10] sm:$0xf]  ;;  %v250_v20 = vsel %vm2446_vm4, 0, %v249_v16 }
  0x59   : > { %1989 = vmatprep.subr.bf16.mxu1 %v2205_v22  ;;  %v2479_v0 = vld [vmem:[#allocation2] sm:$0xf]  ;;  %v272_v21 = vld [vmem:[%s2457_s21 + $0x8] sm:$0xf]  ;;  %219 = vst [vmem:[#allocation2 + $0x18] sm:$0x1] %v218_v19 }
  0x5a   : > { %v284_v58 = vor.u32 %v282_v52, %v281_v55  ;;  %v285_v59 = vrot.slane %v281_v55, 4  ;;  %v292_v60 = vor.u32 %v290_v54, %v289_v56  ;;  %v293_v61 = vrot.slane %v289_v56, 4  ;;  %v410_v3 = vld [vmem:[#allocation2 + $0x4] sm:$0x1]  ;;  %251 = vst [vmem:[#allocation2 + $0x1c] sm:$0x1] %v250_v20 }
  0x5b   : > { %1950 = vmatpush3.bf16.msra.mxu0 %v2206_v23  ;;  %v361_v62 = vld [vmem:[#allocation2 + $0x8] sm:$0xf]  ;;  %v433_v4 = vshrl.u32 %v2479_v0, 16  ;;  %v436_v5 = vshll.u32 %v2479_v0, 16  ;;  %v442_v8 = vshll.u32 %v410_v3, 16  ;;  %v565_v14 = vrot.slane %v410_v3, 5 }
  0x5c   : > { %1990 = vmatpush3.bf16.msra.mxu1 %v2207_v25  ;;  %1951 = vmatprep.subr.bf16.mxu0 %v2208_v26  ;;  %v362_v1 = vsel %vm2475_vm6, %v284_v58, %v361_v62  ;;  %v368_v2 = vsel %vm2475_vm6, %v292_v60, %v367_v63  ;;  %v364_v6 = vld [vmem:[#allocation2 + $0xc] sm:$0x1]  ;;  %v370_v7 = vld [vmem:[#allocation2 + $0x14] sm:$0x1]  ;;  %v1825_v18 = vrot.slane %v2479_v0, 9  ;;  %v295_v22 = vshrl.u32 %v272_v21, 16 }
  0x5d   : > { %1991 = vmatprep.subr.bf16.mxu1 %v2209_v28  ;;  %363 = vst [vmem:[#allocation2 + $0x8] sm:$0xf] %v362_v1  ;;  %369 = vst [vmem:[#allocation2 + $0x10] sm:$0xf] %v368_v2  ;;  %v365_v9 = vsel %vm2441_vm3, %v285_v59, %v364_v6  ;;  %v371_v10 = vsel %vm2441_vm3, %v293_v61, %v370_v7  ;;  %v435_v11 = vrot.slane %v433_v4, 4  ;;  %v438_v12 = vrot.slane %v436_v5, 5 }
  0x5e   : > { %366 = vst [vmem:[#allocation2 + $0xc] sm:$0x1] %v365_v9  ;;  %372 = vst [vmem:[#allocation2 + $0x14] sm:$0x1] %v371_v10  ;;  %v2491_v13 = vrot.slane %v442_v8, 5  ;;  %v298_v23 = vshll.u32 %v272_v21, 16  ;;  %v566_v47 = vsel %vm2506_vm11, %v1825_v18, %v565_v14 }
  0x5f   : > { %1952 = vmatpush3.bf16.msra.mxu0 %v2210_v29  ;;  %v439_v17 = vor.u32 %v438_v12, %v435_v11  ;;  %v220_v25 = vld [vmem:[#allocation2 + $0x20] sm:$0x1]  ;;  %v273_v26 = vld [vmem:[%s2457_s21 + $0xc] sm:$0xf]  ;;  %v297_v41 = vrot.slane %v295_v22, 7  ;;  %v2221_v59 = vld [vmem:[#allocation3 + $0x180] sm:$0xff]  }
  0x60   : > { %1992 = vmatpush3.bf16.msra.mxu1 %v2211_v30  ;;  %1953 = vmatprep.subr.bf16.mxu0 %v2212_v31  ;;  %v221_v31 = vsel %vm2441_vm3, 0, %v220_v25  ;;  %v373_v60 = vld [vmem:[#allocation2 + $0x18] sm:$0xf]  ;;  %v306_v62 = vshll.u32 %v273_v26, 16  ;;  %v2220_v6 = vld [vmem:[#allocation3 + $0x100] sm:$0xff]   ;;  %v2227_v14 = vld [vmem:[#allocation3 + $0x1d0] sm:$0xff]  }
  0x61   : > { %1993 = vmatprep.subr.bf16.mxu1 %v2213_v32  ;;  %v303_v32 = vshrl.u32 %v273_v26, 16  ;;  %222 = vst [vmem:[#allocation2 + $0x20] sm:$0x1] %v221_v31  ;;  %v440_v38 = vrot.slane %v439_v17, 4  ;;  %v300_v51 = vor.u32 %v298_v23, %v297_v41  ;;  %v301_v54 = vrot.slane %v297_v41, 4  ;;  %v2223_v2 = vld [vmem:[#allocation3 + $0x1c8] sm:$0xff]  }
  0x62   : > { %v376_v61 = vld [vmem:[#allocation2 + $0x1c] sm:$0x1]  ;;  %v2229_v20 = vld [vmem:[#allocation3 + $0x190] sm:$0xff]   ;;  %v2231_v23 = vld [vmem:[#allocation3 + $0x1d8] sm:$0xff]  }
  0x63   : > { %1954 = vmatpush3.bf16.msra.mxu0 %v2214_v33  ;;  %v2529_v55 = vrot.slane %v303_v32, 7  ;;  %v445_v56 = vsel %vm2523_vm12, %v440_v38, %v2491_v13  ;;  %v374_v3 = vsel %vm2475_vm6, %v300_v51, %v373_v60  ;;  %v377_v4 = vsel %vm2441_vm3, %v301_v54, %v376_v61  ;;  %v2225_v7 = vld [vmem:[#allocation3 + $0x188] sm:$0xff]   ;;  %v2226_v22 = vld [vmem:[#allocation3 + $0x150] sm:$0xff]   ;;  %v223_v25 = vld [vmem:[#allocation2 + $0x28] sm:$0x1] }
  0x64   : > { %1994 = vmatpush3.bf16.msra.mxu1 %v2215_v34  ;;  %2019 = vmatprep.subr.bf16.mxu0 %v2218_v42  ;;  %v2500_v28 = vld [vmem:[#allocation2 + $0x8] sm:$0xf]  ;;  %v2502_v29 = vld [vmem:[#allocation2 + $0x10] sm:$0xf]  ;;  %375 = vst [vmem:[#allocation2 + $0x18] sm:$0xf] %v374_v3 }
  0x65   : > { %2059 = vmatprep.subr.bf16.mxu1 %v2219_v46  ;;  %v447_v33 = vshrl.u32 %v2500_v28, 16  ;;  %v450_v34 = vshll.u32 %v2500_v28, 16  ;;  %v461_v35 = vshrl.u32 %v2502_v29, 16  ;;  %v464_v36 = vshll.u32 %v2502_v29, 16  ;;  %v412_v37 = vld [vmem:[#allocation2 + $0xc] sm:$0x1] }
  0x66   : > { %v1847_v39 = vcombine.low %v2500_v28, %v2502_v29  ;;  %v1826_v40 = vrot.slane %v2500_v28, 9  ;;  %v2519_v42 = vld [vmem:[#allocation2 + $0x14] sm:$0x1]  ;;  %v456_v46 = vshll.u32 %v412_v37, 16  ;;  %v569_v50 = vrot.slane %v412_v37, 5  ;;  %v2222_v13 = vld [vmem:[#allocation3 + $0x148] sm:$0xff]  }
  0x67   : > { %v449_v44 = vrot.slane %v447_v33, 4  ;;  %v452_v45 = vrot.slane %v450_v34, 5  ;;  %v463_v48 = vrot.slane %v461_v35, 4  ;;  %v466_v49 = vrot.slane %v464_v36, 5  ;;  %378 = vst [vmem:[#allocation2 + $0x1c] sm:$0x1] %v377_v4 }
  0x68   : > { %1399 = vmatprep.mubr.bf16.mxu1 %v1847_v39  ;;  %v458_v53 = vrot.slane %v456_v46, 5  ;;  %v2536_v58 = vsel %vm2506_vm11, %v1826_v40, %v569_v50  ;;  %v470_v5 = vshll.u32 %v2519_v42, 16  ;;  %v308_v8 = vor.u32 %v306_v62, %v2529_v55  ;;  %v379_v9 = vld [vmem:[#allocation2 + $0x20] sm:$0xf]  ;;  %v252_v26 = vld [vmem:[#allocation2 + $0x24] sm:$0x1] }
  0x69   : > { %v453_v52 = vor.u32 %v452_v45, %v449_v44  ;;  %v1843_v1 = vcombine.low %v566_v47, %v2536_v58  ;;  %v467_v11 = vor.u32 %v466_v49, %v463_v48  ;;  %v1835_v12 = vcombine.low %v2479_v0, %v2500_v28  ;;  %v2224_v0 = vld [vmem:[#allocation3 + $0x108] sm:$0xff]   ;;  %v255_v32 = vld [vmem:[#allocation2 + $0x2c] sm:$0x1]  ;;  %v274_v33 = vld [vmem:[%s2457_s21 + $0x10] sm:$0xf] }
  0x6a   : > { %v380_v16 = vsel %vm2475_vm6, %v308_v8, %v379_v9  ;;  %v1827_v17 = vrot.slane %v2502_v29, 9  ;;  %v573_v18 = vrot.slane %v2519_v42, 5  ;;  %v2556_v19 = vrot.slane %v470_v5, 5  ;;  %v2228_v42 = vld [vmem:[#allocation3 + $0x110] sm:$0xff]   ;;  %v226_v45 = vld [vmem:[#allocation2 + $0x30] sm:$0x1] }
  0x6b   : > { %v454_v63 = vrot.slane %v453_v52, 4  ;;  %1400 = vmatmul.mubr.bf16.vlgmr.msra.gmra.mrb[0].mxu1 %v1843_v1  ;;  %381 = vst [vmem:[#allocation2 + $0x20] sm:$0xf] %v380_v16  ;;  %v468_v21 = vrot.slane %v467_v11, 4  ;;  %v224_v28 = vsel %vm2441_vm3, 0, %v223_v25  ;;  %v253_v31 = vsel %vm2446_vm4, 0, %v252_v26 }
  0x6c   : > { %2060 = vmatpush3.bf16.msra.mxu1 %v2221_v59  ;;  %v415_v34 = vld [vmem:[#allocation2 + $0x18] sm:$0xf]  ;;  %v2565_v36 = vsel %vm2506_vm11, %v1827_v17, %v573_v18  ;;  %225 = vst [vmem:[#allocation2 + $0x28] sm:$0x1] %v224_v28  ;;  %254 = vst [vmem:[#allocation2 + $0x24] sm:$0x1] %v253_v31 }
  0x6d   : > { %v2547_v10 = vsel %vm2523_vm12, %v454_v63, %v458_v53  ;;  %2061 = vmatprep.subr.bf16.mxu1 %v2223_v2  ;;  %v256_v37 = vsel %vm2446_vm4, 0, %v255_v32  ;;  %v311_v38 = vshrl.u32 %v274_v33, 16  ;;  %v475_v39 = vshrl.u32 %v415_v34, 16  ;;  %v2230_v48 = vld [vmem:[#allocation3 + $0x158] sm:$0xff]   ;;  %v275_v52 = vld [vmem:[%s2457_s21 + $0x14] sm:$0xf] }
  0x6e   : > { %v1839_v15 = vcombine.low %v445_v56, %v2547_v10  ;;  %v416_v35 = vld [vmem:[#allocation2 + $0x1c] sm:$0x1]  ;;  %v478_v40 = vshll.u32 %v415_v34, 16  ;;  %257 = vst [vmem:[#allocation2 + $0x2c] sm:$0x1] %v256_v37  ;;  %v309_v44 = vrot.slane %v2529_v55, 4  ;;  %v2589_v11 = vsel %vm2523_vm12, %v468_v21, %v2556_v19 }
  0x6f   : > { %v484_v41 = vshll.u32 %v416_v35, 16  ;;  %v1828_v46 = vrot.slane %v415_v34, 9  ;;  %v577_v47 = vrot.slane %v416_v35, 5  ;;  %v2233_v49 = vld [vmem:[#allocation3 + $0x198] sm:$0xff]   ;;  %v313_v50 = vrot.slane %v311_v38, 7  ;;  %v2235_v1 = vld [vmem:[#allocation3 + $0x1e0] sm:$0xff]  }
  0x70   : > { %1334 = vmatprep.mubr.bf16.mxu0 %v1839_v15  ;;  %2062 = vmatpush3.bf16.msra.mxu1 %v2225_v7  ;;  %v314_v51 = vshll.u32 %v274_v33, 16  ;;  %v477_v53 = vrot.slane %v475_v39, 4  ;;  %v480_v54 = vrot.slane %v478_v40, 5  ;;  %v227_v60 = vsel %vm2441_vm3, 0, %v226_v45  ;;  %v2234_v9 = vld [vmem:[#allocation3 + $0x160] sm:$0xff]   ;;  %v2238_v32 = vld [vmem:[#allocation3 + $0x168] sm:$0xff]  }
  0x71   : > { %1335 = vmatmul.mubr.bf16.vlgmr.msra.gmra.mrb[0].mxu0 %v1835_v12  ;;  %2063 = vmatprep.subr.bf16.mxu1 %v2227_v14  ;;  %v486_v56 = vrot.slane %v484_v41, 5  ;;  %v2578_v61 = vsel %vm2506_vm11, %v1828_v46, %v577_v47  ;;  %v317_v63 = vrot.slane %v313_v50, 4  ;;  %228 = vst [vmem:[#allocation2 + $0x30] sm:$0x1] %v227_v60  ;;  %v319_v7 = vshrl.u32 %v275_v52, 16  ;;  %v2237_v25 = vld [vmem:[#allocation3 + $0x1a0] sm:$0xff]  }
  0x72   : > { %2020 = vmatpush3.bf16.msra.mxu0 %v2220_v6  ;;  %v2571_v59 = vld [vmem:[#allocation2 + $0x20] sm:$0xf]  ;;  %v316_v62 = vor.u32 %v314_v51, %v313_v50  ;;  %v481_v2 = vor.u32 %v480_v54, %v477_v53  ;;  %v2582_v3 = vcombine.low %v2565_v36, %v2578_v61  ;;  %v2232_v6 = vld [vmem:[#allocation3 + $0x118] sm:$0xff]   ;;  %v322_v8 = vshll.u32 %v275_v52, 16  ;;  %v2239_v35 = vld [vmem:[#allocation3 + $0x1e8] sm:$0xff]  }
  0x73   : > { %2021 = vmatprep.subr.bf16.mxu0 %v2222_v13  ;;  %v1848_v55 = vcombine.low %v415_v34, %v2571_v59  ;;  %v489_v4 = vshrl.u32 %v2571_v59, 16  ;;  %v492_v5 = vshll.u32 %v2571_v59, 16  ;;  %v382_v13 = vld [vmem:[#allocation2 + $0x24] sm:$0x1]  ;;  %v385_v14 = vld [vmem:[#allocation2 + $0x28] sm:$0xf]  ;;  %v2603_v21 = vcombine.low %v2502_v29, %v415_v34 }
  0x74   : > { %2064 = vmatpush3.bf16.msra.mxu1 %v2229_v20  ;;  %v482_v12 = vrot.slane %v481_v2, 4  ;;  %v383_v16 = vsel %vm2441_vm3, %v309_v44, %v382_v13  ;;  %v386_v17 = vsel %vm2475_vm6, %v316_v62, %v385_v14  ;;  %v2596_v20 = vrot.slane %v319_v7, 7  ;;  %v2240_v37 = vld [vmem:[#allocation3 + $0x128] sm:$0xff]   ;;  %v2242_v60 = vld [vmem:[#allocation3 + $0x170] sm:$0xff]  }
  0x75   : > { %2065 = vmatprep.subr.bf16.mxu1 %v2231_v23  ;;  %1407 = vmatprep.mubr.bf16.mxu1 %v1848_v55  ;;  %v491_v15 = vrot.slane %v489_v4, 4  ;;  %v388_v18 = vld [vmem:[#allocation2 + $0x2c] sm:$0x1]  ;;  %384 = vst [vmem:[#allocation2 + $0x24] sm:$0x1] %v383_v16  ;;  %v2236_v23 = vld [vmem:[#allocation3 + $0x120] sm:$0xff]   ;;  %v1851_v27 = vcombine.low %v2547_v10, %v2589_v11 }
  0x76   : > { %2022 = vmatpush3.bf16.msra.mxu0 %v2224_v0  ;;  %1408 = vmatmul.mubr.bf16.gmra.mrb[4].mxu1 %v2582_v3  ;;  %v494_v0 = vrot.slane %v492_v5, 5  ;;  %v2600_v19 = vsel %vm2523_vm12, %v482_v12, %v486_v56  ;;  %387 = vst [vmem:[#allocation2 + $0x28] sm:$0xf] %v386_v17  ;;  %v324_v31 = vor.u32 %v322_v8, %v2596_v20  ;;  %v1829_v34 = vrot.slane %v2571_v59, 9  ;;  %v2241_v40 = vld [vmem:[#allocation3 + $0x1a8] sm:$0xff]  }
  0x77   : > { %2023 = vmatprep.subr.bf16.mxu0 %v2226_v22  ;;  %v389_v22 = vsel %vm2441_vm3, %v317_v63, %v388_v18  ;;  %v2609_v26 = vcombine.low %v2589_v11, %v2600_v19  ;;  %v325_v38 = vrot.slane %v2596_v20, 4  ;;  %v229_v41 = vld [vmem:[#allocation2 + $0x38] sm:$0x1]  ;;  %v261_v46 = vld [vmem:[#allocation2 + $0x3c] sm:$0x1] }
  0x78   : > { %2066 = vmatpush3.bf16.msra.mxu1 %v2233_v49  ;;  %390 = vst [vmem:[#allocation2 + $0x2c] sm:$0x1] %v389_v22  ;;  %v495_v28 = vor.u32 %v494_v0, %v491_v15  ;;  %v391_v29 = vld [vmem:[#allocation2 + $0x30] sm:$0xf]  ;;  %v230_v44 = vsel %vm2441_vm3, 0, %v229_v41  ;;  %v262_v50 = vsel %vm2446_vm4, 0, %v261_v46 }
  0x79   : > { %2067 = vmatprep.subr.bf16.mxu1 %v2235_v1  ;;  %1342 = vmatprep.mubr.bf16.mxu0 %v2609_v26  ;;  %v392_v33 = vsel %vm2475_vm6, %v324_v31, %v391_v29  ;;  %v276_v47 = vld [vmem:[%s2457_s21 + $0x18] sm:$0xf]  ;;  %231 = vst [vmem:[#allocation2 + $0x38] sm:$0x1] %v230_v44  ;;  %263 = vst [vmem:[#allocation2 + $0x3c] sm:$0x1] %v262_v50 }
  0x7a   : > { %2024 = vmatpush3.bf16.msra.mxu0 %v2228_v42  ;;  %393 = vst [vmem:[#allocation2 + $0x30] sm:$0xf] %v392_v33  ;;  %v496_v39 = vrot.slane %v495_v28, 4  ;;  %v258_v42 = vld [vmem:[#allocation2 + $0x34] sm:$0x1]  ;;  %v327_v51 = vshrl.u32 %v276_v47, 16 }
  0x7b   : > { %2025 = vmatprep.subr.bf16.mxu0 %v2230_v48  ;;  %1343 = vmatmul.mubr.bf16.gmra.mrb[4].mxu0 %v2603_v21  ;;  %v259_v45 = vsel %vm2446_vm4, 0, %v258_v42  ;;  %v232_v7 = vld [vmem:[#allocation2 + $0x40] sm:$0x1]  ;;  %v330_v14 = vshll.u32 %v276_v47, 16  ;;  %v277_v15 = vld [vmem:[%s2457_s21 + $0x1c] sm:$0xf] }
  0x7c   : > { %2068 = vmatpush3.bf16.msra.mxu1 %v2237_v25  ;;  %v418_v48 = vld [vmem:[#allocation2 + $0x24] sm:$0x1]  ;;  %260 = vst [vmem:[#allocation2 + $0x34] sm:$0x1] %v259_v45  ;;  %v233_v33 = vsel %vm2441_vm3, 0, %v232_v7  ;;  %v335_v42 = vshrl.u32 %v277_v15, 16 }
  0x7d   : > { %2069 = vmatprep.subr.bf16.mxu1 %v2239_v35  ;;  %v419_v49 = vld [vmem:[#allocation2 + $0x28] sm:$0xf]  ;;  %v498_v53 = vshll.u32 %v418_v48, 16  ;;  %v581_v62 = vrot.slane %v418_v48, 5  ;;  %v2243_v25 = vld [vmem:[#allocation3 + $0x1f0] sm:$0xff]   ;;  %v338_v44 = vshll.u32 %v277_v15, 16 }
  0x7e   : > { %2026 = vmatpush3.bf16.msra.mxu0 %v2232_v6  ;;  %v503_v54 = vshrl.u32 %v419_v49, 16  ;;  %v506_v56 = vshll.u32 %v419_v49, 16  ;;  %v1830_v63 = vrot.slane %v419_v49, 9  ;;  %v329_v6 = vrot.slane %v327_v51, 7  ;;  %234 = vst [vmem:[#allocation2 + $0x40] sm:$0x1] %v233_v33 }
  0x7f   : > { %2027 = vmatprep.subr.bf16.mxu0 %v2234_v9  ;;  %v420_v52 = vld [vmem:[#allocation2 + $0x2c] sm:$0x1]  ;;  %v500_v2 = vrot.slane %v498_v53, 5  ;;  %v2629_v12 = vsel %vm2506_vm11, %v1829_v34, %v581_v62  ;;  %v2650_v34 = vcombine.low %v2571_v59, %v419_v49  ;;  %v2244_v45 = vld [vmem:[#allocation3 + $0x130] sm:$0xff]  }
  0x80   : > { %2070 = vmatpush3.bf16.msra.mxu1 %v2241_v40  ;;  %v512_v55 = vshll.u32 %v420_v52, 16  ;;  %v585_v1 = vrot.slane %v420_v52, 5  ;;  %v505_v4 = vrot.slane %v503_v54, 4  ;;  %v508_v5 = vrot.slane %v506_v56, 5  ;;  %v397_v29 = vld [vmem:[#allocation2 + $0x38] sm:$0xf] }
  0x81   : > { %v2625_v9 = vld [vmem:[#allocation2 + $0x30] sm:$0xf]  ;;  %v332_v0 = vor.u32 %v330_v14, %v329_v6  ;;  %v333_v20 = vrot.slane %v329_v6, 4  ;;  %v2645_v28 = vsel %vm2523_vm12, %v496_v39, %v500_v2  ;;  %v400_v39 = vld [vmem:[#allocation2 + $0x3c] sm:$0x1]  ;;  %2071 = vmatprep.subr.bf16.mxu1 %v2243_v25  ;;  %v2246_v48 = vld [vmem:[#allocation3 + $0x178] sm:$0xff]  }
  0x82   : > { %2028 = vmatpush3.bf16.msra.mxu0 %v2236_v23  ;;  %v514_v8 = vrot.slane %v512_v55, 5  ;;  %v2633_v13 = vsel %vm2506_vm11, %v1830_v63, %v585_v1  ;;  %v509_v16 = vor.u32 %v508_v5, %v505_v4  ;;  %v1849_v17 = vcombine.low %v419_v49, %v2625_v9  ;;  %v2247_v50 = vld [vmem:[#allocation3 + $0x1f8] sm:$0xff]   ;;  %v264_v33 = vld [vmem:[#allocation2 + $0x44] sm:$0x1] }
  0x83   : > { %2029 = vmatprep.subr.bf16.mxu0 %v2238_v32  ;;  %v2639_v18 = vcombine.low %v2629_v12, %v2633_v13  ;;  %v517_v22 = vshrl.u32 %v2625_v9, 16  ;;  %v520_v23 = vshll.u32 %v2625_v9, 16  ;;  %v394_v32 = vld [vmem:[#allocation2 + $0x34] sm:$0x1]  ;;  %v401_v59 = vsel %vm2441_vm3, %v333_v20, %v400_v39  ;;  %v2248_v51 = vld [vmem:[#allocation3 + $0x138] sm:$0xff]  }
  0x84   : > { %v510_v31 = vrot.slane %v509_v16, 4  ;;  %1415 = vmatprep.mubr.bf16.mxu1 %v1849_v17  ;;  %v395_v35 = vsel %vm2441_vm3, %v325_v38, %v394_v32  ;;  %v2245_v38 = vld [vmem:[#allocation3 + $0x1b0] sm:$0xff]   ;;  %402 = vst [vmem:[#allocation2 + $0x3c] sm:$0x1] %v401_v59  ;;  %v2667_v49 = vrot.slane %v335_v42, 7  ;;  %v2249_v53 = vld [vmem:[#allocation3 + $0x1b8] sm:$0xff]  }
  0x85   : > { %1416 = vmatmul.mubr.bf16.gmra.mrb[8].mxu1 %v2639_v18  ;;  %v519_v40 = vrot.slane %v517_v22, 4  ;;  %396 = vst [vmem:[#allocation2 + $0x34] sm:$0x1] %v395_v35  ;;  %v522_v47 = vrot.slane %v520_v23, 5  ;;  %v403_v56 = vld [vmem:[#allocation2 + $0x40] sm:$0xf] }
  0x86   : > { %2030 = vmatpush3.bf16.msra.mxu0 %v2240_v37  ;;  %v398_v37 = vsel %vm2475_vm6, %v332_v0, %v397_v29  ;;  %v2659_v41 = vsel %vm2523_vm12, %v510_v31, %v514_v8  ;;  %2072 = vmatpush3.bf16.msra.mxu1 %v2245_v38  ;;  %v340_v52 = vor.u32 %v338_v44, %v2667_v49  ;;  %v1831_v6 = vrot.slane %v2625_v9, 9  ;;  %v235_v29 = vld [vmem:[#allocation2 + $0x48] sm:$0x1]  ;;  %v267_v59 = vld [vmem:[#allocation2 + $0x4c] sm:$0x1] }
  0x87   : > { %2031 = vmatprep.subr.bf16.mxu0 %v2242_v60  ;;  %399 = vst [vmem:[#allocation2 + $0x38] sm:$0xf] %v398_v37  ;;  %v2665_v46 = vcombine.low %v2645_v28, %v2659_v41  ;;  %2073 = vmatprep.subr.bf16.mxu1 %v2247_v50  ;;  %v523_v54 = vor.u32 %v522_v47, %v519_v40  ;;  %v2672_v60 = vld [vmem:[#allocation3 + $0x200] sm:$0xff]   ;;  %v236_v39 = vsel %vm2441_vm3, 0, %v235_v29  ;;  %v265_v40 = vsel %vm2446_vm4, 0, %v264_v33 }
  0x88   : > { %v404_v63 = vsel %vm2475_vm6, %v340_v52, %v403_v56  ;;  %237 = vst [vmem:[#allocation2 + $0x48] sm:$0x1] %v236_v39  ;;  %266 = vst [vmem:[#allocation2 + $0x44] sm:$0x1] %v265_v40  ;;  %v268_v38 = vsel %vm2446_vm4, 0, %v267_v59 }
  0x89   : > { %1350 = vmatprep.mubr.bf16.mxu0 %v2665_v46  ;;  %405 = vst [vmem:[#allocation2 + $0x40] sm:$0xf] %v404_v63  ;;  %v524_v16 = vrot.slane %v523_v54, 4  ;;  %269 = vst [vmem:[#allocation2 + $0x4c] sm:$0x1] %v268_v38  ;;  %v2251_v54 = vld [vmem:[#allocation3 + $0x208] sm:$0xff]  }
  0x8a   : > { %2032 = vmatpush3.bf16.msra.mxu0 %v2244_v45  ;;  %2074 = vmatpush3.bf16.msra.mxu1 %v2249_v53  ;;  %v1862_v59 = vld [vmem:[#allocation5] ss:$0 sm:$0xff] }
  0x8b   : > { %2033 = vmatprep.subr.bf16.mxu0 %v2246_v48  ;;  %1351 = vmatmul.mubr.bf16.gmra.mrb[8].mxu0 %v2650_v34  ;;  %v424_v1 = vld [vmem:[#allocation2 + $0x3c] sm:$0x1]  ;;  %v1855_v48 = vcombine.low %v2536_v58, %v2565_v36 }
  0x8c   : > { %v422_v55 = vld [vmem:[#allocation2 + $0x34] sm:$0x1]  ;;  %2135 = vmatprep.subr.bf16.mxu1 %v2672_v60  ;;  %v540_v7 = vshll.u32 %v424_v1, 16  ;;  %v593_v15 = vrot.slane %v424_v1, 5 }
  0x8d   : > { %v526_v2 = vshll.u32 %v422_v55, 16  ;;  %v589_v8 = vrot.slane %v422_v55, 5  ;;  %v2252_v55 = vld [vmem:[#allocation3 + $0x210] sm:$0xff]  }
  0x8e   : > { %2034 = vmatpush3.bf16.msra.mxu0 %v2248_v51  ;;  %v423_v62 = vld [vmem:[#allocation2 + $0x38] sm:$0xf]  ;;  %v542_v22 = vrot.slane %v540_v7, 5 }
  0x8f   : > { %v531_v4 = vshrl.u32 %v423_v62, 16  ;;  %v534_v5 = vshll.u32 %v423_v62, 16  ;;  %2111 = vmatprep.subr.bf16.mxu0 %v2672_v60  ;;  %v1832_v14 = vrot.slane %v423_v62, 9  ;;  %v528_v17 = vrot.slane %v526_v2, 5  ;;  %v406_v50 = vld [vmem:[#allocation2 + $0x44] sm:$0x1] }
  0x90   : > { %v2681_v23 = vsel %vm2506_vm11, %v1831_v6, %v589_v8  ;;  %v2691_v35 = vld [vmem:[#allocation2 + $0x40] sm:$0xf]  ;;  %v2707_v45 = vcombine.low %v2625_v9, %v423_v62  ;;  %v341_v9 = vrot.slane %v2667_v49, 4  ;;  %v2721_v51 = vld [vmem:[#allocation2 + $0x48] sm:$0xf]  ;;  %v1856_v49 = vcombine.low %v2578_v61, %v2629_v12  ;;  %v2254_v8 = vld [vmem:[#allocation3 + $0x220] sm:$0xff]  }
  0x91   : > { %v533_v57 = vrot.slane %v531_v4, 4  ;;  %v536_v0 = vrot.slane %v534_v5, 5  ;;  %v2685_v25 = vsel %vm2506_vm11, %v1832_v14, %v593_v15  ;;  %v2689_v31 = vsel %vm2523_vm12, %v524_v16, %v528_v17  ;;  %v2255_v16 = vld [vmem:[#allocation3 + $0x228] sm:$0xff]  }
  0x92   : > { %v2695_v37 = vcombine.low %v2681_v23, %v2685_v25  ;;  %v1850_v44 = vcombine.low %v423_v62, %v2691_v35  ;;  %v596_v58 = vshrl.u32 %v2691_v35, 16  ;;  %v407_v36 = vsel %vm2441_vm3, %v341_v9, %v406_v50  ;;  %v2734_v62 = vld [vmem:[#allocation2 + $0x4c] sm:$0x1] }
  0x93   : > { %v537_v20 = vor.u32 %v536_v0, %v533_v57  ;;  %v599_v52 = vshll.u32 %v2691_v35, 16  ;;  %v616_v53 = vshrl.u32 %v2721_v51, 16  ;;  %408 = vst [vmem:[#allocation2 + $0x44] sm:$0x1] %v407_v36  ;;  %v1852_v61 = vcombine.low %v2600_v19, %v2645_v28 }
  0x94   : > { %1423 = vmatprep.mubr.bf16.mxu1 %v1850_v44  ;;  %v598_v10 = vrot.slane %v596_v58, 4  ;;  %v625_v1 = vshll.u32 %v2734_v62, 16  ;;  %v1857_v4 = vcombine.low %v2633_v13, %v2681_v23  ;;  %v1859_v43 = vcombine.low %v2691_v35, %v2721_v51  ;;  %v2257_v23 = vld [vmem:[#allocation3 + $0x238] sm:$0xff]  }
  0x95   : > { %v538_v32 = vrot.slane %v537_v20, 4  ;;  %1424 = vmatmul.mubr.bf16.gmra.mrb[12].mxu1 %v2695_v37  ;;  %v601_v11 = vrot.slane %v599_v52, 5  ;;  %v618_v24 = vrot.slane %v616_v53, 4  ;;  %v1834_v0 = vrot.slane %v2721_v51, 9 }
  0x96   : > { %1529 = vmatprep.mubr.bf16.mxu1 %v2609_v26  ;;  %v619_v26 = vshll.u32 %v2721_v51, 16  ;;  %v627_v7 = vrot.slane %v625_v1, 5  ;;  %v633_v20 = vrot.slane %v2734_v62, 5 }
  0x97   : > { %v2703_v42 = vsel %vm2523_vm12, %v538_v32, %v542_v22  ;;  %v602_v12 = vor.u32 %v601_v11, %v598_v10 }
  0x98   : > { %v1842_v47 = vcombine.low %v2689_v31, %v2703_v42  ;;  %v621_v56 = vrot.slane %v619_v26, 5 }
  0x99   : > { %v603_v19 = vrot.slane %v602_v12, 4 }
  0x9a   : > { %1358 = vmatprep.mubr.bf16.mxu0 %v1842_v47  ;;  %v622_v63 = vor.u32 %v621_v56, %v618_v24 }
  0x9b   : > { %1359 = vmatmul.mubr.bf16.gmra.mrb[12].mxu0 %v2707_v45 }
  0x9c   : > { %1464 = vmatprep.mubr.bf16.mxu0 %v1855_v48  ;;  %v623_v6 = vrot.slane %v622_v63, 4 }
  0x9d   : > { %1530 = vmatmul.mubr.bf16.vlgmr.msra.gmra.mrb[16].mxu1 %v2603_v21  ;;  %v426_v21 = vld [vmem:[#allocation2 + $0x44] sm:$0x1] }
  0x9e   : > { %2143 = vmatpush3.bf16.msra.mxu1 %v2672_v60  ;;  %1537 = vmatprep.mubr.bf16.mxu1 %v2665_v46  ;;  %v605_v2 = vshll.u32 %v426_v21, 16  ;;  %v1833_v46 = vrot.slane %v2691_v35, 9  ;;  %v613_v5 = vrot.slane %v426_v21, 5  ;;  %v628_v15 = vsel %vm2523_vm12, %v623_v6, %v627_v7 }
  0x9f   : > { %2136 = vmatprep.subr.bf16.mxu1 %v2251_v54 }
  0xa0   : > { %v607_v28 = vrot.slane %v605_v2, 5  ;;  %v614_v13 = vsel %vm2506_vm11, %v1833_v46, %v613_v5 }
  0xa1   : > { %v1858_v17 = vcombine.low %v2685_v25, %v614_v13  ;;  %v634_v25 = vsel %vm2506_vm11, %v1834_v0, %v633_v20 }
  0xa2   : > { %2144 = vmatpush3.bf16.msra.mxu1 %v2251_v54  ;;  %v608_v14 = vsel %vm2523_vm12, %v603_v19, %v607_v28 }
  0xa3   : > { %1465 = vmatmul.mubr.bf16.vlgmr.msra.gmra.mrb[16].mxu0 %v1851_v27  ;;  %2137 = vmatprep.subr.bf16.mxu1 %v2252_v55  ;;  %v1860_v57 = vcombine.low %v608_v14, %v628_v15  ;;  %v1854_v22 = vcombine.low %v2703_v42, %v608_v14 }
  0xa4   : > { %2112 = vmatpush3.bf16.msra.mxu0 %v2672_v60  ;;  %1472 = vmatprep.mubr.bf16.mxu0 %v1856_v49  ;;  %v2253_v60 = vld [vmem:[#allocation3 + $0x218] sm:$0xff]  }
  0xa5   : > { %2113 = vmatprep.subr.bf16.mxu0 %v2251_v54  ;;  %1538 = vmatmul.mubr.bf16.gmra.mrb[20].mxu1 %v2650_v34  ;;  %v1853_v34 = vcombine.low %v2659_v41, %v2689_v31  ;;  %v2256_v41 = vld [vmem:[#allocation3 + $0x230] sm:$0xff]   ;;  %v1861_v31 = vcombine.low %v614_v13, %v634_v25 }
  0xa6   : > { %2145 = vmatpush3.bf16.msra.mxu1 %v2252_v55  ;;  %1545 = vmatprep.mubr.bf16.mxu1 %v1842_v47 }
  0xa7   : > { %2138 = vmatprep.subr.bf16.mxu1 %v2253_v60 }
  0xa8   : > { %2114 = vmatpush3.bf16.msra.mxu0 %v2251_v54 }
  0xa9   : > { %2115 = vmatprep.subr.bf16.mxu0 %v2252_v55 }
  0xaa   : > { %2146 = vmatpush3.bf16.msra.mxu1 %v2253_v60 }
  0xab   : > { %1473 = vmatmul.mubr.bf16.gmra.mrb[20].mxu0 %v1852_v61  ;;  %2139 = vmatprep.subr.bf16.mxu1 %v2254_v8 }
  0xac   : > { %2116 = vmatpush3.bf16.msra.mxu0 %v2252_v55  ;;  %1480 = vmatprep.mubr.bf16.mxu0 %v1857_v4 }
  0xad   : > { %2117 = vmatprep.subr.bf16.mxu0 %v2253_v60  ;;  %1546 = vmatmul.mubr.bf16.gmra.mrb[24].mxu1 %v2707_v45 }
  0xae   : > { %2147 = vmatpush3.bf16.msra.mxu1 %v2254_v8  ;;  %1553 = vmatprep.mubr.bf16.mxu1 %v1860_v57 }
  0xaf   : > { %2140 = vmatprep.subr.bf16.mxu1 %v2255_v16 }
  0xb0   : > { %2118 = vmatpush3.bf16.msra.mxu0 %v2253_v60 }
  0xb1   : > { %2119 = vmatprep.subr.bf16.mxu0 %v2254_v8 }
  0xb2   : > { %2148 = vmatpush3.bf16.msra.mxu1 %v2255_v16 }
  0xb3   : > { %1481 = vmatmul.mubr.bf16.gmra.mrb[24].mxu0 %v1853_v34  ;;  %2141 = vmatprep.subr.bf16.mxu1 %v2256_v41 }
  0xb4   : > { %2120 = vmatpush3.bf16.msra.mxu0 %v2254_v8  ;;  %1488 = vmatprep.mubr.bf16.mxu0 %v1858_v17 }
  0xb5   : > { %2121 = vmatprep.subr.bf16.mxu0 %v2255_v16  ;;  %1554 = vmatmul.mubr.bf16.gmra.mrb[28].mxu1 %v1859_v43 }
  0xb6   : > { %2149 = vmatpush3.bf16.msra.mxu1 %v2256_v41  ;;  %2131 = vmatprep.mubr.bf16.mxu1 %v2695_v37 }
  0xb7   : > { %2142 = vmatprep.subr.bf16.mxu1 %v2257_v23 }
  0xb8   : > { %2122 = vmatpush3.bf16.msra.mxu0 %v2255_v16 }
  0xb9   : > { %2123 = vmatprep.subr.bf16.mxu0 %v2256_v41 }
  0xba   : > { %2150 = vmatpush3.bf16.msra.mxu1 %v2257_v23 }
  0xbb   : > { %1489 = vmatmul.mubr.bf16.gmra.mrb[28].mxu0 %v1854_v22 }
  0xbc   : > { %2124 = vmatpush3.bf16.msra.mxu0 %v2256_v41  ;;  %2127 = vmatprep.mubr.bf16.mxu0 %v2582_v3 }
  0xbd   : > { %2125 = vmatprep.subr.bf16.mxu0 %v2257_v23  ;;  %2132 = vmatmul.mubr.bf16.vlgmr.msra.gmra.mrb[32].mxu1 %v1861_v31 }
  0xc0   : > { %2126 = vmatpush3.bf16.msra.mxu0 %v2257_v23 }
  0xc3   : > { %2128 = vmatmul.mubr.bf16.vlgmr.msra.gmra.mrb[32].mxu0 %v2639_v18 }
 0x13e   : > { %v1995_v32 = vpop.f32.mrb[0].mxu1 }
 0x13f   : > { %v1996_v29 = vpop.f32.mrb[1].mxu1 }
 0x140   : > { %v1997_v33 = vadd.f32 %v1996_v29, %v1995_v32  ;;  %v1998_v30 = vpop.f32.mrb[2].mxu1 }
 0x141   : > { %v1999_v35 = vpop.f32.mrb[3].mxu1 }
 0x142   : > { %v2000_v40 = vadd.f32 %v1999_v35, %v1998_v30 }
 0x144   : > { %v1955_v39 = vpop.f32.mrb[0].mxu0 }
 0x145   : > { %v1956_v42 = vpop.f32.mrb[1].mxu0 }
 0x146   : > { %v1957_v44 = vadd.f32 %v1956_v42, %v1955_v39  ;;  %v1958_v45 = vpop.f32.mrb[2].mxu0 }
 0x147   : > { %v1959_v3 = vpop.f32.mrb[3].mxu0 }
 0x148   : > { %v1337_v38 = vadd.f32 %v1957_v44, %v1862_v59  ;;  %v1960_v47 = vadd.f32 %v1959_v3, %v1958_v45 }
 0x149   : > { %v2001_v27 = vpop.f32.mrb[4].mxu1 }
 0x14a   : > { %v1402_v37 = vadd.f32 %v1997_v33, %v1337_v38  ;;  %v1340_v48 = vadd.f32 %v1960_v47, %v1862_v59  ;;  %v2002_v50 = vpop.f32.mrb[5].mxu1 }
 0x14b   : > { %v2003_v18 = vadd.f32 %v2002_v50, %v2001_v27  ;;  %v2004_v51 = vpop.f32.mrb[6].mxu1 }
 0x14c   : > { %v1405_v9 = vadd.f32 %v2000_v40, %v1340_v48  ;;  %v2005_v58 = vpop.f32.mrb[7].mxu1 }
 0x14d   : > { %v2006_v36 = vadd.f32 %v2005_v58, %v2004_v51 }
 0x14e   : > { %v1961_v52 = vpop.f32.mrb[4].mxu0 }
 0x14f   : > { %v1962_v53 = vpop.f32.mrb[5].mxu0 }
 0x150   : > { %v1963_v26 = vadd.f32 %v1962_v53, %v1961_v52  ;;  %v1964_v54 = vpop.f32.mrb[6].mxu0 }
 0x151   : > { %v1965_v49 = vpop.f32.mrb[7].mxu0 }
 0x152   : > { %v1345_v10 = vadd.f32 %v1963_v26, %v1862_v59  ;;  %v1966_v11 = vadd.f32 %v1965_v49, %v1964_v54 }
 0x154   : > { %v1410_v24 = vadd.f32 %v2003_v18, %v1345_v10  ;;  %v1348_v56 = vadd.f32 %v1966_v11, %v1862_v59 }
 0x156   : > { %v1413_v55 = vadd.f32 %v2006_v36, %v1348_v56 }
 0x158   : > { %v2007_v62 = vpop.f32.mrb[8].mxu1 }
 0x159   : > { %v2008_v61 = vpop.f32.mrb[9].mxu1 }
 0x15a   : > { %v2009_v21 = vadd.f32 %v2008_v61, %v2007_v62  ;;  %v2010_v12 = vpop.f32.mrb[10].mxu1 }
 0x15b   : > { %v2011_v63 = vpop.f32.mrb[11].mxu1 }
 0x15c   : > { %v2012_v1 = vadd.f32 %v2011_v63, %v2010_v12 }
 0x15e   : > { %v1967_v60 = vpop.f32.mrb[8].mxu0 }
 0x15f   : > { %v1968_v2 = vpop.f32.mrb[9].mxu0 }
 0x160   : > { %v1969_v4 = vadd.f32 %v1968_v2, %v1967_v60  ;;  %v1970_v46 = vpop.f32.mrb[10].mxu0 }
 0x161   : > { %v1971_v5 = vpop.f32.mrb[11].mxu0 }
 0x162   : > { %v1353_v19 = vadd.f32 %v1969_v4, %v1862_v59  ;;  %v1972_v28 = vadd.f32 %v1971_v5, %v1970_v46 }
 0x164   : > { %v1418_v6 = vadd.f32 %v2009_v21, %v1353_v19  ;;  %v1356_v7 = vadd.f32 %v1972_v28, %v1862_v59 }
 0x166   : > { %v1421_v8 = vadd.f32 %v2012_v1, %v1356_v7 }
 0x168   : > { %v2013_v13 = vpop.f32.mrb[12].mxu1 }
 0x169   : > { %v2014_v14 = vpop.f32.mrb[13].mxu1 }
 0x16a   : > { %v2015_v16 = vadd.f32 %v2014_v14, %v2013_v13  ;;  %v2016_v17 = vpop.f32.mrb[14].mxu1 }
 0x16b   : > { %v2017_v43 = vpop.f32.mrb[15].mxu1 }
 0x16c   : > { %v2018_v20 = vadd.f32 %v2017_v43, %v2016_v17 }
 0x16e   : > { %v1973_v34 = vpop.f32.mrb[12].mxu0 }
 0x16f   : > { %v1974_v15 = vpop.f32.mrb[13].mxu0 }
 0x170   : > { %v1975_v57 = vadd.f32 %v1974_v15, %v1973_v34  ;;  %v1976_v41 = vpop.f32.mrb[14].mxu0  ;;  %v2075_v32 = vpop.f32.mrb[16].mxu1 }
 0x171   : > { %v1977_v0 = vpop.f32.mrb[15].mxu0  ;;  %v2076_v30 = vpop.f32.mrb[17].mxu1 }
 0x172   : > { %v1361_v22 = vadd.f32 %v1975_v57, %v1862_v59  ;;  %v1978_v23 = vadd.f32 %v1977_v0, %v1976_v41  ;;  %v2077_v39 = vadd.f32 %v2076_v30, %v2075_v32  ;;  %v2078_v40 = vpop.f32.mrb[18].mxu1  ;;  %v1638_v57 = vlaneseq }
 0x173   : > { %v2079_v45 = vpop.f32.mrb[19].mxu1 }
 0x174   : > { %v2764_v25 = vadd.f32 %v2015_v16, %v1361_v22  ;;  %v1364_v31 = vadd.f32 %v1978_v23, %v1862_v59  ;;  %v2080_v38 = vadd.f32 %v2079_v45, %v2078_v40  ;;  %v2335_v16 = vmov 1966171168  }
 0x175   : > { %v1636_v17 = vunpack.c.l.s4 %v2335_v16 }
 0x176   : > { %v2766_v29 = vadd.f32 %v2018_v20, %v1364_v31  ;;  %v2035_v33 = vpop.f32.mrb[16].mxu0 }
 0x177   : > { %v2036_v35 = vpop.f32.mrb[17].mxu0 }
 0x178   : > { %v2037_v42 = vadd.f32 %v2036_v35, %v2035_v33  ;;  %v2038_v44 = vpop.f32.mrb[18].mxu0  ;;  %v2081_v18 = vpop.f32.mrb[20].mxu1  ;;  %v1639_v35 = vshrl.u32 %v1638_v57, 7 }
 0x179   : > { %v2039_v3 = vpop.f32.mrb[19].mxu0  ;;  %v2082_v51 = vpop.f32.mrb[21].mxu1 }
 0x17a   : > { %v1467_v47 = vadd.f32 %v2037_v42, %v1402_v37  ;;  %v2040_v48 = vadd.f32 %v2039_v3, %v2038_v44  ;;  %v2083_v52 = vadd.f32 %v2082_v51, %v2081_v18  ;;  %v2084_v53 = vpop.f32.mrb[22].mxu1 }
 0x17b   : > { %v2085_v49 = vpop.f32.mrb[23].mxu1 }
 0x17c   : > { %v1470_v27 = vadd.f32 %v2040_v48, %v1405_v9  ;;  %v2768_v50 = vadd.f32 %v2077_v39, %v1467_v47  ;;  %v2086_v11 = vadd.f32 %v2085_v49, %v2084_v53 }
 0x17e   : > { %v2041_v59 = vpop.f32.mrb[20].mxu0  ;;  %v2770_v58 = vadd.f32 %v2080_v38, %v1470_v27 }
 0x17f   : > { %v2042_v36 = vpop.f32.mrb[21].mxu0 }
 0x180   : > { %v2043_v26 = vadd.f32 %v2042_v36, %v2041_v59  ;;  %v2044_v54 = vpop.f32.mrb[22].mxu0  ;;  %v2087_v9 = vpop.f32.mrb[24].mxu1 }
 0x181   : > { %v2045_v10 = vpop.f32.mrb[23].mxu0  ;;  %v2088_v12 = vpop.f32.mrb[25].mxu1 }
 0x182   : > { %v1475_v56 = vadd.f32 %v2043_v26, %v1410_v24  ;;  %v2046_v62 = vadd.f32 %v2045_v10, %v2044_v54  ;;  %v2089_v60 = vadd.f32 %v2088_v12, %v2087_v9  ;;  %v2090_v2 = vpop.f32.mrb[26].mxu1 }
 0x183   : > { %v2091_v5 = vpop.f32.mrb[27].mxu1 }
 0x184   : > { %v1478_v37 = vadd.f32 %v2046_v62, %v1413_v55  ;;  %v1540_v61 = vadd.f32 %v2083_v52, %v1475_v56  ;;  %v2092_v28 = vadd.f32 %v2091_v5, %v2090_v2 }
 0x186   : > { %v2047_v21 = vpop.f32.mrb[24].mxu0  ;;  %v1543_v63 = vadd.f32 %v2086_v11, %v1478_v37 }
 0x187   : > { %v2048_v1 = vpop.f32.mrb[25].mxu0 }
 0x188   : > { %v2049_v4 = vadd.f32 %v2048_v1, %v2047_v21  ;;  %v2050_v46 = vpop.f32.mrb[26].mxu0  ;;  %v2093_v24 = vpop.f32.mrb[28].mxu1 }
 0x189   : > { %v2051_v19 = vpop.f32.mrb[27].mxu0  ;;  %v2094_v55 = vpop.f32.mrb[29].mxu1 }
 0x18a   : > { %v1483_v7 = vadd.f32 %v2049_v4, %v1418_v6  ;;  %v2052_v13 = vadd.f32 %v2051_v19, %v2050_v46  ;;  %v2095_v0 = vadd.f32 %v2094_v55, %v2093_v24  ;;  %v2096_v20 = vpop.f32.mrb[30].mxu1 }
 0x18b   : > { %v2097_v31 = vpop.f32.mrb[31].mxu1 }
 0x18c   : > { %v1486_v34 = vadd.f32 %v2052_v13, %v1421_v8  ;;  %v1548_v14 = vadd.f32 %v2089_v60, %v1483_v7  ;;  %v2098_v33 = vadd.f32 %v2097_v31, %v2096_v20  ;;  %v1637_v8 = vunpack.c.0.s8 %v1636_v17 }
 0x18e   : > { %v2053_v15 = vpop.f32.mrb[28].mxu0  ;;  %v1551_v41 = vadd.f32 %v2092_v28, %v1486_v34  ;;  %v1640_v45 = vsub.s32 %v1637_v8, %v1639_v35 }
 0x18f   : > { %v2054_v43 = vpop.f32.mrb[29].mxu0 }
 0x190   : > { %v2055_v22 = vadd.f32 %v2054_v43, %v2053_v15  ;;  %v2056_v23 = vpop.f32.mrb[30].mxu0  ;;  %v2133_v42 = vpop.f32.mrb[32].mxu1 }
 0x191   : > { %v2057_v32 = vpop.f32.mrb[31].mxu0  ;;  %v1612_v38 = vpop.f32.mrb[33].mxu1 }
 0x192   : > { %v1491_v6 = vadd.f32 %v2055_v22, %v2764_v25  ;;  %v2058_v30 = vadd.f32 %v2057_v32, %v2056_v23  ;;  %v1613_v18 = vadd.f32 %v1612_v38, %v1548_v14  ;;  %v2134_v59 = vpop.f32.mrb[34].mxu1 }
 0x193   : > { %v1615_v53 = vpop.f32.mrb[35].mxu1 }
 0x194   : > { %v1494_v39 = vadd.f32 %v2058_v30, %v2766_v29  ;;  %v1556_v40 = vadd.f32 %v2095_v0, %v1491_v6  ;;  %v1631_v54 = vmax.f32 %v1613_v18, 0.0  ;;  %v1616_v10 = vadd.f32 %v1615_v53, %v1551_v41 }
 0x196   : > { %v2129_v44 = vpop.f32.mrb[32].mxu0  ;;  %v1621_v3 = vadd.f32 %v2133_v42, %v1556_v40  ;;  %v1559_v47 = vadd.f32 %v2098_v33, %v1494_v39  ;;  %v1669_v9 = vrot.slane %v1631_v54, %v1640_v45  ;;  %v1632_v12 = vmax.f32 %v1616_v10, 0.0 }
 0x197   : > { %v1605_v48 = vadd.f32 %v2129_v44, %v1540_v61  ;;  %v1596_v27 = vpop.f32.mrb[33].mxu0 }
 0x198   : > { %v1633_v51 = vmax.f32 %v1621_v3, 0.0  ;;  %v1597_v36 = vadd.f32 %v1596_v27, %v2768_v50  ;;  %v2130_v25 = vpop.f32.mrb[34].mxu0  ;;  %v1624_v52 = vadd.f32 %v2134_v59, %v1559_v47  ;;  %v1703_v46 = vrot.slane %v1669_v9, 4 }
 0x199   : > { %v1629_v26 = vmax.f32 %v1605_v48, 0.0  ;;  %v1608_v29 = vadd.f32 %v2130_v25, %v1543_v63  ;;  %v1599_v49 = vpop.f32.mrb[35].mxu0  ;;  %v1676_v63 = vrot.slane %v1632_v12, %v1640_v45 }
 0x19a   : > { %v1683_v11 = vrot.slane %v1633_v51, %v1640_v45  ;;  %v1627_v56 = vmax.f32 %v1597_v36, 0.0  ;;  %v1634_v62 = vmax.f32 %v1624_v52, 0.0  ;;  %v1600_v37 = vadd.f32 %v1599_v49, %v2770_v58 }
 0x19b   : > { %v1655_v61 = vrot.slane %v1629_v26, %v1640_v45  ;;  %v1630_v21 = vmax.f32 %v1608_v29, 0.0  ;;  %v1704_v34 = vrot.slane %v1676_v63, 4  ;;  %v1719_v55 = vmax.f32 %v1669_v9, %v1703_v46 }
 0x19c   : > { %v1705_v1 = vrot.slane %v1683_v11, 4  ;;  %v1641_v50 = vrot.slane %v1627_v56, %v1640_v45  ;;  %v1690_v60 = vrot.slane %v1634_v62, %v1640_v45  ;;  %v1628_v2 = vmax.f32 %v1600_v37, 0.0 }
 0x19d   : > { %v1701_v4 = vrot.slane %v1655_v61, 4  ;;  %v1662_v5 = vrot.slane %v1630_v21, %v1640_v45  ;;  %v1720_v17 = vmax.f32 %v1676_v63, %v1704_v34 }
 0x19e   : > { %v1699_v19 = vrot.slane %v1641_v50, 4  ;;  %v1706_v28 = vrot.slane %v1690_v60, 4  ;;  %v1648_v7 = vrot.slane %v1628_v2, %v1640_v45  ;;  %v1721_v14 = vmax.f32 %v1683_v11, %v1705_v1 }
 0x19f   : > { %v1702_v13 = vrot.slane %v1662_v5, 4  ;;  %v1717_v15 = vmax.f32 %v1655_v61, %v1701_v4  ;;  %v1725_v20 = vmax.f32 %v1719_v55, %v1720_v17 }
 0x1a0   : > { %v1722_v58 = vmax.f32 %v1690_v60, %v1706_v28  ;;  %v1700_v24 = vrot.slane %v1648_v7, 4  ;;  %v1715_v57 = vmax.f32 %v1641_v50, %v1699_v19 }
 0x1a1   : > { %v1718_v16 = vmax.f32 %v1662_v5, %v1702_v13  ;;  %v1729_v32 = vpack.c.bf16 %v1725_v20, %v1725_v20 }
 0x1a2   : > { %v1726_v41 = vmax.f32 %v1721_v14, %v1722_v58  ;;  %v1716_v43 = vmax.f32 %v1648_v7, %v1700_v24 }
 0x1a3   : > { %v1724_v0 = vmax.f32 %v1717_v15, %v1718_v16  ;;  %1733 = vst [vmem:[%s198_s25 + $0x4] sm:$0x3] %v1729_v32 }
 0x1a4   : > { %v1730_v22 = vpack.c.bf16 %v1726_v41, %v1726_v41  ;;  %v1723_v23 = vmax.f32 %v1715_v57, %v1716_v43 }
 0x1a5   : > { %v1728_v31 = vpack.c.bf16 %v1724_v0, %v1724_v0 }
 0x1a6   : > { %1734 = vst [vmem:[%s198_s25 + $0x6] sm:$0x3] %v1730_v22  ;;  %v1727_v33 = vpack.c.bf16 %v1723_v23, %v1723_v23 }
 0x1a7   : > { %1732 = vst [vmem:[%s198_s25 + $0x2] sm:$0x3] %v1728_v31 }
 0x1a8   : > { %1731 = vst [vmem:[%s198_s25] sm:$0x3] %v1727_v33 }
 0x1a9 PF: > { %s15_s12 = sadd.s32 1, %s2328_s12  }
 0x1aa   : > { %p12_p9 = scmp.ge.s32.totalorder %s15_s12, 4  }
 0x1ac   :  { %14 = sbr.rel (!%p12_p9) target bundleno = 2 (0x2), region = 73 }
 0x1b3   :  { %1756 = vsyncpa [#allocation4], 1 }
 0x1b4   :  { %1758 = vsyncpa [#allocation4 + $0x1], 1 }
 0x1b5   :  { %1759 = vsyncpa [#allocation6], 1 }

// kernel: _lambda_.7
= control target key start
LH: loop header
LB: loop body
LE: loop exit
PB: predicated region body
PF: predicated region fallthrough
CT: control target
= control target key end

     0   :  { %s2303_s12 = smov 0   ;;  %s2989_s0 = inlined_call_operand.vmem [shape: bf16[2,4,4,128], index: 0, kind: input, shape index: {}]   ;;  %s2990_s1 = inlined_call_operand.vmem [shape: bf16[1152,256], index: 1, kind: input, shape index: {}]   ;;  %s2991_s2 = inlined_call_operand.vmem [shape: f32[1,256], index: 2, kind: input, shape index: {}]   ;;  %s2992_s3 = inlined_call_operand.vmem [shape: bf16[2,4,4,256], index: 3, kind: output, shape index: {}]  }
   0x1 LB: > { %s1845_s13 = sadd.s32 4294967295, %s2279_s12   ;;  %p1849_p0 = scmp.ge.s32.totalorder %s2279_s12, 1  ;;  %s2279_s12 = sphi %s2303_s12, %s13_s12  }
   0x2   : > { %p137_p1 = scmp.lt.s32.totalorder %s2279_s12, 3 }
   0x4   : > { %p138_p2 = pnand %p1849_p0, %p137_p1 }
   0x5   : > { %v2054_v0 = vld [vmem:[%s2990_s1 + $0x4] ss:$8 sps:$4 sm:$0xff] (!%p138_p2)   ;;  %v2281_v2 = vmov (!%p138_p2), 0   ;;  %v2058_v3 = vld [vmem:[%s2990_s1] ss:$8 sps:$4 sm:$0xff] (!%p138_p2)   ;;  %p161_p3 = scmp.lt.s32.totalorder (!%p138_p2), %s1845_s13, 1  ;;  %v314_v47 = vlaneseq (!%p138_p2) }
   0x6   : > { %141 = sbr.rel (%p138_p2) target bundleno = 409 (0x199), region = 32  ;;  %v2056_v1 = vld [vmem:[%s2990_s1 + $0x204] ss:$8 sps:$4 sm:$0xff] (!%p138_p2)   ;;  %172 = vst [vmem:[#allocation2] sm:$0x7] (!%p138_p2), %v2281_v2  ;;  %1495 = vmatprep.subr.bf16.mxu1 (!%p138_p2), %v2054_v0  ;;  %vm175_vm0 = vcmask (!%p138_p2), 1040384  }
   0x7   : > { %174 = vst [vmem:[#allocation2 + $0x14] sm:$0x7] (!%p138_p2), %v2281_v2  ;;  %v2059_v4 = vld [vmem:[%s2990_s1 + $0x200] ss:$8 sps:$4 sm:$0xff] (!%p138_p2)   ;;  %1581 = vmatprep.subr.bf16.mxu0 (!%p138_p2), %v2056_v1  ;;  %v2060_v5 = vld [vmem:[%s2990_s1 + $0x14] ss:$8 sps:$4 sm:$0xff] (!%p138_p2)   ;;  %1496 = vmatpush1.bf16.msra.mxu1 (!%p138_p2), %v2058_v3 }
   0x8   : > { %1582 = vmatpush1.bf16.msra.mxu0 (!%p138_p2), %v2059_v4  ;;  %v2062_v6 = vld [vmem:[%s2990_s1 + $0x214] ss:$8 sps:$4 sm:$0xff] (!%p138_p2)   ;;  %v2064_v7 = vld [vmem:[%s2990_s1 + $0x10] ss:$8 sps:$4 sm:$0xff] (!%p138_p2)   ;;  %1497 = vmatprep.subr.bf16.mxu1 (!%p138_p2), %v2060_v5  ;;  %v2066_v9 = vld [vmem:[%s2990_s1 + $0x24] ss:$8 sps:$4 sm:$0xff] (!%p138_p2)  }
   0x9   : > { %v2065_v8 = vld [vmem:[%s2990_s1 + $0x210] ss:$8 sps:$4 sm:$0xff] (!%p138_p2)   ;;  %1583 = vmatprep.subr.bf16.mxu0 (!%p138_p2), %v2062_v6  ;;  %v2068_v10 = vld [vmem:[%s2990_s1 + $0x224] ss:$8 sps:$4 sm:$0xff] (!%p138_p2)   ;;  %v2070_v11 = vld [vmem:[%s2990_s1 + $0x20] ss:$8 sps:$4 sm:$0xff] (!%p138_p2)  }
   0xa   : > { %v2071_v12 = vld [vmem:[%s2990_s1 + $0x220] ss:$8 sps:$4 sm:$0xff] (!%p138_p2)   ;;  %v2072_v13 = vld [vmem:[%s2990_s1 + $0x34] ss:$8 sps:$4 sm:$0xff] (!%p138_p2)   ;;  %v2076_v15 = vld [vmem:[%s2990_s1 + $0x30] ss:$8 sps:$4 sm:$0xff] (!%p138_p2)  }
   0xb   : > { %1498 = vmatpush1.bf16.msra.mxu1 (!%p138_p2), %v2064_v7  ;;  %v2074_v14 = vld [vmem:[%s2990_s1 + $0x234] ss:$8 sps:$4 sm:$0xff] (!%p138_p2)   ;;  %v2077_v16 = vld [vmem:[%s2990_s1 + $0x230] ss:$8 sps:$4 sm:$0xff] (!%p138_p2)   ;;  %v2078_v17 = vld [vmem:[%s2990_s1 + $0x44] ss:$8 sps:$4 sm:$0xff] (!%p138_p2)  }
   0xc   : > { %1584 = vmatpush1.bf16.msra.mxu0 (!%p138_p2), %v2065_v8  ;;  %1499 = vmatprep.subr.bf16.mxu1 (!%p138_p2), %v2066_v9  ;;  %v2080_v18 = vld [vmem:[%s2990_s1 + $0x244] ss:$8 sps:$4 sm:$0xff] (!%p138_p2)   ;;  %v2082_v19 = vld [vmem:[%s2990_s1 + $0x40] ss:$8 sps:$4 sm:$0xff] (!%p138_p2)   ;;  %v2084_v21 = vld [vmem:[%s2990_s1 + $0x54] ss:$8 sps:$4 sm:$0xff] (!%p138_p2)  }
   0xd   : > { %1585 = vmatprep.subr.bf16.mxu0 %v2068_v10  ;;  %v2083_v20 = vld [vmem:[%s2990_s1 + $0x240] ss:$8 sps:$4 sm:$0xff]   ;;  %v2086_v22 = vld [vmem:[%s2990_s1 + $0x254] ss:$8 sps:$4 sm:$0xff]   ;;  %v2088_v23 = vld [vmem:[%s2990_s1 + $0x50] ss:$8 sps:$4 sm:$0xff]  }
   0xe   : > { %v2089_v24 = vld [vmem:[%s2990_s1 + $0x250] ss:$8 sps:$4 sm:$0xff]   ;;  %v2090_v25 = vld [vmem:[%s2990_s1 + $0x64] ss:$8 sps:$4 sm:$0xff]   ;;  %v2094_v27 = vld [vmem:[%s2990_s1 + $0x60] ss:$8 sps:$4 sm:$0xff]  }
   0xf   : > { %1500 = vmatpush1.bf16.msra.mxu1 %v2070_v11  ;;  %v2092_v26 = vld [vmem:[%s2990_s1 + $0x264] ss:$8 sps:$4 sm:$0xff]   ;;  %v2095_v28 = vld [vmem:[%s2990_s1 + $0x260] ss:$8 sps:$4 sm:$0xff]   ;;  %v2096_v29 = vld [vmem:[%s2990_s1 + $0x74] ss:$8 sps:$4 sm:$0xff]  }
  0x10   : > { %1586 = vmatpush1.bf16.msra.mxu0 %v2071_v12  ;;  %1501 = vmatprep.subr.bf16.mxu1 %v2072_v13  ;;  %v2098_v30 = vld [vmem:[%s2990_s1 + $0x274] ss:$8 sps:$4 sm:$0xff]   ;;  %v2100_v31 = vld [vmem:[%s2990_s1 + $0x70] ss:$8 sps:$4 sm:$0xff]   ;;  %v2102_v33 = vld [vmem:[%s2990_s1 + $0x84] ss:$8 sps:$4 sm:$0xff]  }
  0x11   : > { %1587 = vmatprep.subr.bf16.mxu0 %v2074_v14  ;;  %v2101_v32 = vld [vmem:[%s2990_s1 + $0x270] ss:$8 sps:$4 sm:$0xff]   ;;  %v2104_v34 = vld [vmem:[%s2990_s1 + $0x284] ss:$8 sps:$4 sm:$0xff]   ;;  %v2106_v35 = vld [vmem:[%s2990_s1 + $0x80] ss:$8 sps:$4 sm:$0xff]  }
  0x12   : > { %v2107_v36 = vld [vmem:[%s2990_s1 + $0x280] ss:$8 sps:$4 sm:$0xff]   ;;  %v2108_v37 = vld [vmem:[%s2990_s1 + $0x94] ss:$8 sps:$4 sm:$0xff]   ;;  %s3012_s13 = smov (!%p161_p3, %s1845_s13), 1  ;;  %vm196_vm2 = vcmask 1042434  }
  0x13   : > { %1502 = vmatpush1.bf16.msra.mxu1 %v2076_v15  ;;  %v2110_v38 = vld [vmem:[%s2990_s1 + $0x294] ss:$8 sps:$4 sm:$0xff]   ;;  %v2112_v39 = vld [vmem:[%s2990_s1 + $0x90] ss:$8 sps:$4 sm:$0xff]   ;;  %v2114_v41 = vld [vmem:[%s2990_s1 + $0xa4] ss:$8 sps:$4 sm:$0xff]  }
  0x14   : > { %1588 = vmatpush1.bf16.msra.mxu0 %v2077_v16  ;;  %1503 = vmatprep.subr.bf16.mxu1 %v2078_v17  ;;  %v2113_v40 = vld [vmem:[%s2990_s1 + $0x290] ss:$8 sps:$4 sm:$0xff]   ;;  %v2116_v42 = vld [vmem:[%s2990_s1 + $0x2a4] ss:$8 sps:$4 sm:$0xff]   ;;  %s2022_s23 = sshll.u32 %s3012_s13, 3  ;;  %vm286_vm4 = vcmask 1042432   ;;  %vm2556_vm15 = vmor %vm175_vm0, %vm196_vm2 }
  0x15   : > { %1589 = vmatprep.subr.bf16.mxu0 %v2080_v18  ;;  %vm176_vm1 = vsmask.f32 256  ;;  %v2118_v43 = vld [vmem:[%s2990_s1 + $0xa0] ss:$8 sps:$4 sm:$0xff]   ;;  %vm197_vm3 = vsmask.f32 7946  ;;  %s2493_s17 = scalar_lea.vmem %s2989_s0, %s2022_s23 }
  0x16   : > { %v2119_v44 = vld [vmem:[%s2990_s1 + $0x2a0] ss:$8 sps:$4 sm:$0xff]   ;;  %v2120_v45 = vld [vmem:[%s2990_s1 + $0xb4] ss:$8 sps:$4 sm:$0xff]   ;;  %vm287_vm5 = vsmask.f32 2306  ;;  %vm2466_vm7 = vmand %vm175_vm0, %vm176_vm1 }
  0x17   : > { %1504 = vmatpush1.bf16.msra.mxu1 %v2082_v19  ;;  %v2122_v46 = vld [vmem:[%s2990_s1 + $0x2b4] ss:$8 sps:$4 sm:$0xff]   ;;  %vm343_vm6 = vsmask.f32 1280  ;;  %v2124_v48 = vld [vmem:[%s2990_s1 + $0xb0] ss:$8 sps:$4 sm:$0xff]   ;;  %vm2484_vm9 = vmand %vm196_vm2, %vm197_vm3 }
  0x18   : > { %1590 = vmatpush1.bf16.msra.mxu0 %v2083_v20  ;;  %1505 = vmatprep.subr.bf16.mxu1 %v2084_v21  ;;  %v2125_v49 = vld [vmem:[%s2990_s1 + $0x2b0] ss:$8 sps:$4 sm:$0xff]   ;;  %vm344_vm8 = vsmask.f32 3336  ;;  %v2126_v51 = vld [vmem:[%s2990_s1 + $0xc4] ss:$8 sps:$4 sm:$0xff]   ;;  %vm2538_vm12 = vmand %vm286_vm4, %vm287_vm5 }
  0x19   : > { %1591 = vmatprep.subr.bf16.mxu0 %v2086_v22  ;;  %v2128_v52 = vld [vmem:[%s2990_s1 + $0x2c4] ss:$8 sps:$4 sm:$0xff]   ;;  %v178_v53 = vld [vmem:[#allocation2] sm:$0x1]  ;;  %v184_v55 = vld [vmem:[#allocation2 + $0x8] sm:$0x1] }
  0x1a   : > { %v181_v54 = vld [vmem:[#allocation2 + $0x4] sm:$0x1]  ;;  %v2282_v56 = vmov 1983009808   ;;  %v179_v58 = vsel %vm2466_vm7, 0, %v178_v53  ;;  %v185_v60 = vsel %vm2466_vm7, 0, %v184_v55  ;;  %vm2547_vm13 = vmor %vm343_vm6, %vm344_vm8 }
  0x1b   : > { %1506 = vmatpush1.bf16.msra.mxu1 %v2088_v23  ;;  %v312_v57 = vunpack.c.l.s4 %v2282_v56  ;;  %v182_v59 = vsel %vm2466_vm7, 0, %v181_v54  ;;  %v187_v61 = vld [vmem:[#allocation2 + $0xc] sm:$0x1]  ;;  %180 = vst [vmem:[#allocation2] sm:$0x1] %v179_v58  ;;  %v2497_v3 = vshrl.u32 %v314_v47, 7 }
  0x1c   : > { %1592 = vmatpush1.bf16.msra.mxu0 %v2089_v24  ;;  %1507 = vmatprep.subr.bf16.mxu1 %v2090_v25  ;;  %183 = vst [vmem:[#allocation2 + $0x4] sm:$0x1] %v182_v59  ;;  %186 = vst [vmem:[#allocation2 + $0x8] sm:$0x1] %v185_v60  ;;  %v188_v63 = vsel %vm2466_vm7, 0, %v187_v61  ;;  %vm407_vm10 = vcmask 1044484  }
  0x1d   : > { %1593 = vmatprep.subr.bf16.mxu0 %v2092_v26  ;;  %v190_v0 = vld [vmem:[#allocation2 + $0x10] sm:$0x1]  ;;  %v199_v1 = vld [vmem:[#allocation2] sm:$0x4]  ;;  %189 = vst [vmem:[#allocation2 + $0xc] sm:$0x1] %v188_v63  ;;  %v313_v16 = vunpack.c.0.s8 %v312_v57  ;;  %vm2587_vm0 = vmor %vm2556_vm15, %vm407_vm10 }
  0x1e   : > { %v2130_v4 = vld [vmem:[%s2990_s1 + $0xc0] ss:$8 sps:$4 sm:$0xff]   ;;  %v191_v6 = vsel %vm2466_vm7, 0, %v190_v0  ;;  %v200_v7 = vsel %vm2484_vm9, 0, %v199_v1  ;;  %v202_v8 = vld [vmem:[#allocation2 + $0x4] sm:$0x4] }
  0x1f   : > { %1508 = vmatpush1.bf16.msra.mxu1 %v2094_v27  ;;  %v2131_v5 = vld [vmem:[%s2990_s1 + $0x2c0] ss:$8 sps:$4 sm:$0xff]   ;;  %v2132_v10 = vld [vmem:[%s2990_s1 + $0xd4] ss:$8 sps:$4 sm:$0xff]   ;;  %192 = vst [vmem:[#allocation2 + $0x10] sm:$0x1] %v191_v6 }
  0x20   : > { %1594 = vmatpush1.bf16.msra.mxu0 %v2095_v28  ;;  %1509 = vmatprep.subr.bf16.mxu1 %v2096_v29  ;;  %v205_v9 = vld [vmem:[#allocation2 + $0x8] sm:$0x4]  ;;  %v2134_v11 = vld [vmem:[%s2990_s1 + $0x2d4] ss:$8 sps:$4 sm:$0xff]   ;;  %201 = vst [vmem:[#allocation2] sm:$0x4] %v200_v7 }
  0x21   : > { %1595 = vmatprep.subr.bf16.mxu0 %v2098_v30  ;;  %v203_v12 = vsel %vm2484_vm9, 0, %v202_v8  ;;  %v206_v13 = vsel %vm2484_vm9, 0, %v205_v9  ;;  %v208_v14 = vld [vmem:[#allocation2 + $0xc] sm:$0x4]  ;;  %v211_v15 = vld [vmem:[#allocation2 + $0x10] sm:$0x4] }
  0x22   : > { %204 = vst [vmem:[#allocation2 + $0x4] sm:$0x4] %v203_v12  ;;  %207 = vst [vmem:[#allocation2 + $0x8] sm:$0x4] %v206_v13  ;;  %v209_v17 = vsel %vm2484_vm9, 0, %v208_v14  ;;  %v212_v18 = vsel %vm2484_vm9, 0, %v211_v15 }
  0x23   : > { %1510 = vmatpush1.bf16.msra.mxu1 %v2100_v31  ;;  %v1854_v19 = vld.sshfl [vmem:[%s2493_s17] sm:$0x3 pattern:$0x76325410]  ;;  %210 = vst [vmem:[#allocation2 + $0xc] sm:$0x4] %v209_v17 }
  0x24   : > { %1596 = vmatpush1.bf16.msra.mxu0 %v2101_v32  ;;  %1511 = vmatprep.subr.bf16.mxu1 %v2102_v33  ;;  %213 = vst [vmem:[#allocation2 + $0x10] sm:$0x4] %v212_v18  ;;  %v1855_v20 = vld.sshfl [vmem:[%s2493_s17 + $0x2] sm:$0x3 pattern:$0x76325410]  ;;  %v2543_v33 = vsub.s32 %v313_v16, %v2497_v3 }
  0x25   : > { %1597 = vmatprep.subr.bf16.mxu0 %v2104_v34  ;;  %v254_v21 = vshrl.u32 %v1854_v19, 16  ;;  %v257_v22 = vshll.u32 %v1854_v19, 16  ;;  %vm409_vm11 = vcmask 1046534   ;;  %v2136_v23 = vld [vmem:[%s2990_s1 + $0xd0] ss:$8 sps:$4 sm:$0xff]   ;;  %v261_v26 = vshrl.u32 %v1855_v20, 16 }
  0x26   : > { %v2137_v24 = vld [vmem:[%s2990_s1 + $0x2d0] ss:$8 sps:$4 sm:$0xff]   ;;  %v1856_v25 = vld.sshfl [vmem:[%s2493_s17 + $0x4] sm:$0x3 pattern:$0x76325410]  ;;  %vm2611_vm3 = vmor %vm2587_vm0, %vm409_vm11 }
  0x27   : > { %1512 = vmatpush1.bf16.msra.mxu1 %v2106_v35  ;;  %v264_v27 = vshll.u32 %v1855_v20, 16  ;;  %v2138_v28 = vld [vmem:[%s2990_s1 + $0xe4] ss:$8 sps:$4 sm:$0xff]   ;;  %v256_v30 = vrot.slane %v254_v21, 7  ;;  %v268_v31 = vshrl.u32 %v1856_v25, 16  ;;  %v263_v34 = vrot.slane %v261_v26, 7 }
  0x28   : > { %1598 = vmatpush1.bf16.msra.mxu0 %v2107_v36  ;;  %1513 = vmatprep.subr.bf16.mxu1 %v2108_v37  ;;  %v1857_v29 = vld.sshfl [vmem:[%s2493_s17 + $0x6] sm:$0x3 pattern:$0x76325410]  ;;  %v271_v35 = vshll.u32 %v1856_v25, 16  ;;  %s2023_s6 = sshll.u32 %s3012_s13, 4 }
  0x29   : > { %1599 = vmatprep.subr.bf16.mxu0 %v2110_v38  ;;  %v275_v36 = vshrl.u32 %v1857_v29, 16  ;;  %v278_v37 = vshll.u32 %v1857_v29, 16  ;;  %vm346_vm14 = vsmask.f32 5392  ;;  %v2566_v47 = vld [vmem:[#allocation2] sm:$0x7]  ;;  %s170_s9 = scalar_lea.vmem %s2992_s3, %s2023_s6 }
  0x2a   : > { %v317_v53 = vrot.slane %v2566_v47, %v2543_v33  ;;  %v295_v58 = vld [vmem:[#allocation2 + $0xc] sm:$0x7]  ;;  %v214_v60 = vld [vmem:[#allocation2 + $0x14] sm:$0x4]  ;;  %v2148_v6 = vld [vmem:[%s2990_s1 + $0xf0] ss:$8 sps:$4 sm:$0xff]  }
  0x2b   : > { %1514 = vmatpush1.bf16.msra.mxu1 %v2112_v39  ;;  %v2140_v39 = vld [vmem:[%s2990_s1 + $0x2e4] ss:$8 sps:$4 sm:$0xff]   ;;  %v298_v59 = vld [vmem:[#allocation2 + $0x10] sm:$0x7]  ;;  %v2144_v50 = vld [vmem:[%s2990_s1 + $0xf4] ss:$8 sps:$4 sm:$0xff]  }
  0x2c   : > { %1600 = vmatpush1.bf16.msra.mxu0 %v2113_v40  ;;  %1515 = vmatprep.subr.bf16.mxu1 %v2114_v41  ;;  %v259_v40 = vor.u32 %v257_v22, %v256_v30  ;;  %v270_v41 = vrot.slane %v268_v31, 7  ;;  %v2146_v61 = vld [vmem:[%s2990_s1 + $0x2f4] ss:$8 sps:$4 sm:$0xff]   ;;  %v318_v0 = vcombine.high %v317_v53, %v317_v53  ;;  %v351_v1 = vshrl.u32 %v317_v53, 16  ;;  %vm2601_vm2 = vmor %vm2547_vm13, %vm346_vm14  ;;  %v2149_v62 = vld [vmem:[%s2990_s1 + $0x2f0] ss:$8 sps:$4 sm:$0xff]  }
  0x2d   : > { %1601 = vmatprep.subr.bf16.mxu0 %v2116_v42  ;;  %vm348_vm1 = vsmask.f32 7448  ;;  %v215_v8 = vsel %vm2484_vm9, 0, %v214_v60  ;;  %v1858_v9 = vrot.slane %v317_v53, 9  ;;  %v2152_v18 = vld [vmem:[%s2990_s1 + $0x104] ss:$8 sps:$4 sm:$0xff]  }
  0x2e   : > { %v360_v13 = vshll.u32 %v318_v0, 16  ;;  %216 = vst [vmem:[#allocation2 + $0x14] sm:$0x4] %v215_v8  ;;  %v413_v14 = vrot.slane %v318_v0, 7  ;;  %v2155_v20 = vld [vmem:[%s2990_s1 + $0x304] ss:$8 sps:$4 sm:$0xff]   ;;  %vm2630_vm4 = vmor %vm2601_vm2, %vm348_vm1 }
  0x2f   : > { %1516 = vmatpush1.bf16.msra.mxu1 %v2118_v43  ;;  %v2142_v43 = vld [vmem:[%s2990_s1 + $0xe0] ss:$8 sps:$4 sm:$0xff]   ;;  %v2160_v15 = vld [vmem:[%s2990_s1 + $0x114] ss:$8 sps:$4 sm:$0xff]   ;;  %v2181_v21 = vld [vmem:[%s2990_s1 + $0x344] ss:$8 sps:$4 sm:$0xff]  }
  0x30   : > { %1602 = vmatpush1.bf16.msra.mxu0 %v2119_v44  ;;  %1517 = vmatprep.subr.bf16.mxu1 %v2120_v45  ;;  %v2143_v44 = vld [vmem:[%s2990_s1 + $0x2e0] ss:$8 sps:$4 sm:$0xff]   ;;  %v266_v45 = vor.u32 %v264_v27, %v263_v34  ;;  %v2615_v17 = vrot.slane %v360_v13, 7  ;;  %v2622_v19 = vsel %vm2611_vm3, %v1858_v9, %v413_v14 }
  0x31   : > { %1603 = vmatprep.subr.bf16.mxu0 %v2122_v46  ;;  %v277_v46 = vrot.slane %v275_v36, 7 }
  0x33   : > { %1518 = vmatpush1.bf16.msra.mxu1 %v2124_v48  ;;  %v193_v48 = vld [vmem:[#allocation2 + $0x14] sm:$0x1]  ;;  %v280_v55 = vor.u32 %v278_v37, %v277_v46 }
  0x34   : > { %1604 = vmatpush1.bf16.msra.mxu0 %v2125_v49  ;;  %1519 = vmatprep.subr.bf16.mxu1 %v2126_v51  ;;  %v273_v49 = vor.u32 %v271_v35, %v270_v41  ;;  %v289_v51 = vld [vmem:[#allocation2 + $0x4] sm:$0x7]  ;;  %v194_v54 = vsel %vm2466_vm7, 0, %v193_v48 }
  0x35   : > { %1605 = vmatprep.subr.bf16.mxu0 %v2128_v52  ;;  %v292_v52 = vld [vmem:[#allocation2 + $0x8] sm:$0x7]  ;;  %v290_v56 = vsel %vm2538_vm12, %v259_v40, %v289_v51  ;;  %195 = vst [vmem:[#allocation2 + $0x14] sm:$0x1] %v194_v54  ;;  %v299_v7 = vsel %vm2538_vm12, %v280_v55, %v298_v59 }
  0x36   : > { %v293_v57 = vsel %vm2538_vm12, %v266_v45, %v292_v52  ;;  %291 = vst [vmem:[#allocation2 + $0x4] sm:$0x7] %v290_v56  ;;  %v296_v63 = vsel %vm2538_vm12, %v273_v49, %v295_v58  ;;  %300 = vst [vmem:[#allocation2 + $0x10] sm:$0x7] %v299_v7 }
  0x37   : > { %1520 = vmatpush1.bf16.msra.mxu1 %v2130_v4  ;;  %294 = vst [vmem:[#allocation2 + $0x8] sm:$0x7] %v293_v57  ;;  %v354_v4 = vshll.u32 %v317_v53, 16  ;;  %297 = vst [vmem:[#allocation2 + $0xc] sm:$0x7] %v296_v63 }
  0x38   : > { %1606 = vmatpush1.bf16.msra.mxu0 %v2131_v5  ;;  %1521 = vmatprep.subr.bf16.mxu1 %v2132_v10 }
  0x39   : > { %1607 = vmatprep.subr.bf16.mxu0 %v2134_v11  ;;  %v353_v11 = vrot.slane %v351_v1, 6  ;;  %v356_v12 = vrot.slane %v354_v4, 7 }
  0x3b   : > { %1522 = vmatpush1.bf16.msra.mxu1 %v2136_v23  ;;  %v357_v16 = vor.u32 %v356_v12, %v353_v11 }
  0x3c   : > { %1608 = vmatpush1.bf16.msra.mxu0 %v2137_v24  ;;  %1523 = vmatprep.subr.bf16.mxu1 %v2138_v28 }
  0x3d   : > { %1609 = vmatprep.subr.bf16.mxu0 %v2140_v39  ;;  %v358_v22 = vrot.slane %v357_v16, 2  ;;  %v2634_v23 = vld [vmem:[#allocation2 + $0x4] sm:$0x7]  ;;  %v2655_v42 = vld [vmem:[#allocation2 + $0x10] sm:$0x7] }
  0x3e   : > { %v2636_v24 = vld [vmem:[#allocation2 + $0x8] sm:$0x7]  ;;  %v2638_v25 = vld [vmem:[#allocation2 + $0xc] sm:$0x7]  ;;  %v325_v26 = vrot.slane %v2634_v23, %v2543_v33  ;;  %v481_v30 = vcombine.low %v2566_v47, %v2634_v23  ;;  %v434_v59 = vrot.slane %v2655_v42, %v2543_v33 }
  0x3f   : > { %1524 = vmatpush1.bf16.msra.mxu1 %v2142_v43  ;;  %v333_v27 = vrot.slane %v2636_v24, %v2543_v33  ;;  %v363_v28 = vsel %vm2630_vm4, %v358_v22, %v2615_v17  ;;  %v341_v29 = vrot.slane %v2638_v25, %v2543_v33  ;;  %v482_v31 = vcombine.low %v2636_v24, %v2638_v25 }
  0x40   : > { %1610 = vmatpush1.bf16.msra.mxu0 %v2143_v44  ;;  %1525 = vmatprep.subr.bf16.mxu1 %v2144_v50  ;;  %v535_v32 = vcombine.low %v2634_v23, %v2636_v24  ;;  %v326_v34 = vcombine.high %v325_v26, %v325_v26  ;;  %v365_v36 = vshrl.u32 %v325_v26, 16  ;;  %v368_v37 = vshll.u32 %v325_v26, 16 }
  0x41   : > { %1611 = vmatprep.subr.bf16.mxu0 %v2146_v61  ;;  %v334_v35 = vcombine.high %v333_v27, %v333_v27  ;;  %v342_v38 = vcombine.high %v341_v29, %v341_v29  ;;  %v379_v39 = vshrl.u32 %v333_v27, 16  ;;  %v382_v40 = vshll.u32 %v333_v27, 16 }
  0x42   : > { %v393_v41 = vshrl.u32 %v341_v29, 16  ;;  %v367_v43 = vrot.slane %v365_v36, 6  ;;  %v370_v44 = vrot.slane %v368_v37, 7  ;;  %v374_v45 = vshll.u32 %v326_v34, 16 }
  0x43   : > { %1526 = vmatpush1.bf16.msra.mxu1 %v2148_v6  ;;  %v388_v46 = vshll.u32 %v334_v35, 16  ;;  %v381_v48 = vrot.slane %v379_v39, 6  ;;  %v384_v49 = vrot.slane %v382_v40, 7  ;;  %v396_v52 = vshll.u32 %v341_v29, 16 }
  0x44   : > { %1612 = vmatpush1.bf16.msra.mxu0 %v2149_v62  ;;  %1538 = vmatprep.subr.bf16.mxu1 %v2152_v18  ;;  %v395_v51 = vrot.slane %v393_v41, 6  ;;  %v371_v53 = vor.u32 %v370_v44, %v367_v43  ;;  %v376_v54 = vrot.slane %v374_v45, 7  ;;  %v402_v56 = vshll.u32 %v342_v38, 16  ;;  %v306_v18 = vld [vmem:[#allocation2 + $0x14] sm:$0x7] }
  0x45   : > { %1624 = vmatprep.subr.bf16.mxu0 %v2155_v20  ;;  %v390_v55 = vrot.slane %v388_v46, 7  ;;  %v385_v57 = vor.u32 %v384_v49, %v381_v48  ;;  %v398_v58 = vrot.slane %v396_v52, 7  ;;  %v1859_v60 = vrot.slane %v325_v26, 9 }
  0x46   : > { %v372_v50 = vrot.slane %v371_v53, 2  ;;  %v404_v61 = vrot.slane %v402_v56, 7  ;;  %v417_v63 = vrot.slane %v326_v34, 7  ;;  %v1860_v0 = vrot.slane %v333_v27, 9 }
  0x47   : > { %v386_v1 = vrot.slane %v385_v57, 2  ;;  %v399_v4 = vor.u32 %v398_v58, %v395_v51  ;;  %v435_v5 = vcombine.high %v434_v59, %v434_v59  ;;  %v437_v6 = vshrl.u32 %v434_v59, 16 }
  0x48   : > { %v377_v7 = vsel %vm2630_vm4, %v372_v50, %v376_v54  ;;  %v440_v8 = vshll.u32 %v434_v59, 16  ;;  %v418_v9 = vsel %vm2611_vm3, %v1859_v60, %v417_v63  ;;  %v421_v10 = vrot.slane %v334_v35, 7  ;;  %v2150_v63 = vld [vmem:[%s2990_s1 + $0x100] ss:$8 sps:$4 sm:$0xff]  }
  0x49   : > { %v391_v11 = vsel %vm2630_vm4, %v386_v1, %v390_v55  ;;  %v400_v12 = vrot.slane %v399_v4, 2  ;;  %v439_v13 = vrot.slane %v437_v6, 6  ;;  %v446_v14 = vshll.u32 %v435_v5, 16 }
  0x4a   : > { %v442_v62 = vrot.slane %v440_v8, 7  ;;  %v499_v16 = vcombine.low %v363_v28, %v377_v7  ;;  %v553_v17 = vcombine.low %v377_v7, %v391_v11  ;;  %v422_v20 = vsel %vm2611_vm3, %v1860_v0, %v421_v10  ;;  %v2163_v8 = vld [vmem:[%s2990_s1 + $0x314] ss:$8 sps:$4 sm:$0xff]  }
  0x4b   : > { %v405_v22 = vsel %vm2630_vm4, %v400_v12, %v404_v61  ;;  %v448_v26 = vrot.slane %v446_v14, 7  ;;  %v1861_v27 = vrot.slane %v341_v29, 9  ;;  %v425_v34 = vrot.slane %v342_v38, 7  ;;  %v2158_v12 = vld [vmem:[%s2990_s1 + $0x110] ss:$8 sps:$4 sm:$0xff]  }
  0x4c   : > { %v443_v35 = vor.u32 %v442_v62, %v439_v13  ;;  %v500_v36 = vcombine.low %v391_v11, %v405_v22  ;;  %v507_v37 = vrot.slane %v499_v16, %v2543_v33  ;;  %v1862_v39 = vrot.slane %v434_v59, 9  ;;  %v2161_v13 = vld [vmem:[%s2990_s1 + $0x310] ss:$8 sps:$4 sm:$0xff]   ;;  %v2166_v62 = vld [vmem:[%s2990_s1 + $0x124] ss:$8 sps:$4 sm:$0xff]  }
  0x4d   : > { %v426_v40 = vsel %vm2611_vm3, %v1861_v27, %v425_v34  ;;  %v452_v28 = vrot.slane %v435_v5, 7  ;;  %v461_v41 = vrot.slane %v306_v18, %v2543_v33  ;;  %v517_v43 = vcombine.low %v2622_v19, %v418_v9  ;;  %v2164_v27 = vld [vmem:[%s2990_s1 + $0x120] ss:$8 sps:$4 sm:$0xff]  }
  0x4e   : > { %v444_v44 = vrot.slane %v443_v35, 2  ;;  %v2675_v45 = vrot.slane %v500_v36, %v2543_v33  ;;  %v518_v46 = vcombine.low %v422_v20, %v426_v40  ;;  %v571_v29 = vcombine.low %v418_v9, %v422_v20  ;;  %v2167_v34 = vld [vmem:[%s2990_s1 + $0x320] ss:$8 sps:$4 sm:$0xff]   ;;  %v2172_v35 = vld [vmem:[%s2990_s1 + $0x134] ss:$8 sps:$4 sm:$0xff]  }
  0x4f   : > { %v453_v38 = vsel %vm2611_vm3, %v1862_v39, %v452_v28  ;;  %v462_v48 = vcombine.high %v461_v41, %v461_v41  ;;  %v1863_v49 = vrot.slane %v461_v41, 9  ;;  %v2680_v51 = vrot.slane %v517_v43, %v2543_v33  ;;  %v2173_v28 = vld [vmem:[%s2990_s1 + $0x330] ss:$8 sps:$4 sm:$0xff]   ;;  %v2178_v43 = vld [vmem:[%s2990_s1 + $0x144] ss:$8 sps:$4 sm:$0xff]  }
  0x50   : > { %v2684_v52 = vsel %vm2630_vm4, %v444_v44, %v448_v26  ;;  %v515_v19 = vcombine.low %v507_v37, %v2675_v45  ;;  %v2688_v53 = vrot.slane %v518_v46, %v2543_v33  ;;  %v572_v54 = vcombine.low %v426_v40, %v453_v38  ;;  %v2175_v37 = vld [vmem:[%s2990_s1 + $0x334] ss:$8 sps:$4 sm:$0xff]   ;;  %v2170_v40 = vld [vmem:[%s2990_s1 + $0x130] ss:$8 sps:$4 sm:$0xff]   ;;  %v2176_v46 = vld [vmem:[%s2990_s1 + $0x140] ss:$8 sps:$4 sm:$0xff]  }
  0x51   : > { %v554_v55 = vcombine.low %v405_v22, %v2684_v52  ;;  %v479_v56 = vrot.slane %v462_v48, 7  ;;  %v579_v57 = vrot.slane %v571_v29, %v2543_v33  ;;  %v489_v58 = vrot.slane %v481_v30, %v2543_v33  ;;  %v2153_v30 = vld [vmem:[%s2990_s1 + $0x300] ss:$8 sps:$4 sm:$0xff]  }
  0x52   : > { %1527 = vmatprep.mubr.bf16.mxu1 %v515_v19  ;;  %v586_v59 = vrot.slane %v572_v54, %v2543_v33  ;;  %v2701_v60 = vrot.slane %v482_v31, %v2543_v33  ;;  %v561_v50 = vrot.slane %v553_v17, %v2543_v33  ;;  %v536_v61 = vcombine.low %v2638_v25, %v2655_v42  ;;  %v2179_v29 = vld [vmem:[%s2990_s1 + $0x340] ss:$8 sps:$4 sm:$0xff]   ;;  %v2193_v19 = vld [vmem:[%s2990_s1 + $0x364] ss:$8 sps:$4 sm:$0xff]  }
  0x53   : > { %v480_v47 = vsel %vm2611_vm3, %v1863_v49, %v479_v56  ;;  %v568_v0 = vrot.slane %v554_v55, %v2543_v33  ;;  %v543_v31 = vrot.slane %v535_v32, %v2543_v33  ;;  %v533_v25 = vcombine.low %v2680_v51, %v2688_v53  ;;  %v2182_v49 = vld [vmem:[%s2990_s1 + $0x150] ss:$8 sps:$4 sm:$0xff]   ;;  %v2188_v54 = vld [vmem:[%s2990_s1 + $0x160] ss:$8 sps:$4 sm:$0xff]   ;;  %v2196_v56 = vld [vmem:[%s2990_s1 + $0x174] ss:$8 sps:$4 sm:$0xff]  }
  0x54   : > { %v587_v1 = vcombine.low %v579_v57, %v586_v59  ;;  %v609_v4 = vcombine.low %v453_v38, %v480_v47  ;;  %v497_v5 = vcombine.low %v489_v58, %v2701_v60  ;;  %v550_v6 = vrot.slane %v536_v61, %v2543_v33  ;;  %v2191_v55 = vld [vmem:[%s2990_s1 + $0x360] ss:$8 sps:$4 sm:$0xff]   ;;  %v2199_v57 = vld [vmem:[%s2990_s1 + $0x374] ss:$8 sps:$4 sm:$0xff]   ;;  %v2194_v58 = vld [vmem:[%s2990_s1 + $0x170] ss:$8 sps:$4 sm:$0xff]  }
  0x55   : > { %v569_v7 = vcombine.low %v561_v50, %v568_v0  ;;  %v464_v23 = vshrl.u32 %v461_v41, 16  ;;  %v467_v24 = vshll.u32 %v461_v41, 16  ;;  %v589_v32 = vcombine.low %v2655_v42, %v306_v18  ;;  %v2169_v18 = vld [vmem:[%s2990_s1 + $0x324] ss:$8 sps:$4 sm:$0xff]   ;;  %v2197_v59 = vld [vmem:[%s2990_s1 + $0x370] ss:$8 sps:$4 sm:$0xff]  }
  0x56   : > { %v2731_v9 = vrot.slane %v609_v4, %v2543_v33  ;;  %1613 = vmatprep.mubr.bf16.mxu0 %v587_v1  ;;  %1528 = vmatmul.mubr.bf16.vlgmr.msra.gmra.mrb[0].mxu1 %v497_v5  ;;  %v551_v10 = vcombine.low %v543_v31, %v550_v6  ;;  %v473_v11 = vshll.u32 %v462_v48, 16  ;;  %v2184_v48 = vld [vmem:[%s2990_s1 + $0x154] ss:$8 sps:$4 sm:$0xff]   ;;  %v2202_v50 = vld [vmem:[%s2990_s1 + $0x184] ss:$8 sps:$4 sm:$0xff]  }
  0x57   : > { %1539 = vmatpush1.bf16.msra.mxu1 %v2150_v63  ;;  %1614 = vmatmul.mubr.bf16.vlgmr.msra.gmra.mrb[0].mxu0 %v569_v7  ;;  %v466_v14 = vrot.slane %v464_v23, 6  ;;  %v2740_v42 = vrot.slane %v589_v32, %v2543_v33  ;;  %v469_v16 = vrot.slane %v467_v24, 7  ;;  %v2205_v61 = vld [vmem:[%s2990_s1 + $0x384] ss:$8 sps:$4 sm:$0xff]   ;;  %v2200_v63 = vld [vmem:[%s2990_s1 + $0x180] ss:$8 sps:$4 sm:$0xff]  }
  0x58   : > { %1625 = vmatpush1.bf16.msra.mxu0 %v2153_v30  ;;  %1540 = vmatprep.subr.bf16.mxu1 %v2160_v15  ;;  %v617_v17 = vcombine.low %v2688_v53, %v2731_v9  ;;  %v475_v26 = vrot.slane %v473_v11, 7  ;;  %v2203_v47 = vld [vmem:[%s2990_s1 + $0x380] ss:$8 sps:$4 sm:$0xff]   ;;  %v2208_v30 = vld [vmem:[%s2990_s1 + $0x194] ss:$8 sps:$4 sm:$0xff]  }
  0x59   : > { %1626 = vmatprep.subr.bf16.mxu0 %v2163_v8  ;;  %1570 = vmatprep.mubr.bf16.mxu1 %v551_v10  ;;  %v597_v20 = vcombine.low %v2701_v60, %v2740_v42  ;;  %v470_v22 = vor.u32 %v469_v16, %v466_v14  ;;  %v2211_v0 = vld [vmem:[%s2990_s1 + $0x394] ss:$8 sps:$4 sm:$0xff]   ;;  %v2206_v31 = vld [vmem:[%s2990_s1 + $0x190] ss:$8 sps:$4 sm:$0xff]   ;;  %v2214_v4 = vld [vmem:[%s2990_s1 + $0x1a4] ss:$8 sps:$4 sm:$0xff]  }
  0x5a   : > { %v2209_v1 = vld [vmem:[%s2990_s1 + $0x390] ss:$8 sps:$4 sm:$0xff]   ;;  %v2217_v5 = vld [vmem:[%s2990_s1 + $0x3a4] ss:$8 sps:$4 sm:$0xff]   ;;  %v2212_v15 = vld [vmem:[%s2990_s1 + $0x1a0] ss:$8 sps:$4 sm:$0xff]  }
  0x5b   : > { %1541 = vmatpush1.bf16.msra.mxu1 %v2158_v12  ;;  %v471_v36 = vrot.slane %v470_v22, 2  ;;  %v2215_v6 = vld [vmem:[%s2990_s1 + $0x3a0] ss:$8 sps:$4 sm:$0xff]   ;;  %v2220_v7 = vld [vmem:[%s2990_s1 + $0x1b4] ss:$8 sps:$4 sm:$0xff]  }
  0x5c   : > { %1627 = vmatpush1.bf16.msra.mxu0 %v2161_v13  ;;  %1542 = vmatprep.subr.bf16.mxu1 %v2166_v62  ;;  %v2223_v8 = vld [vmem:[%s2990_s1 + $0x3b4] ss:$8 sps:$4 sm:$0xff]   ;;  %v2218_v23 = vld [vmem:[%s2990_s1 + $0x1b0] ss:$8 sps:$4 sm:$0xff]   ;;  %v2226_v32 = vld [vmem:[%s2990_s1 + $0x1c4] ss:$8 sps:$4 sm:$0xff]  }
  0x5d   : > { %1628 = vmatprep.subr.bf16.mxu0 %v2169_v18  ;;  %v476_v39 = vsel %vm2630_vm4, %v471_v36, %v475_v26  ;;  %v2221_v24 = vld [vmem:[%s2990_s1 + $0x3b0] ss:$8 sps:$4 sm:$0xff]   ;;  %v2229_v10 = vld [vmem:[%s2990_s1 + $0x3c4] ss:$8 sps:$4 sm:$0xff]   ;;  %v2224_v11 = vld [vmem:[%s2990_s1 + $0x1c0] ss:$8 sps:$4 sm:$0xff]  }
  0x5e   : > { %v599_v41 = vcombine.low %v2684_v52, %v476_v39  ;;  %v2190_v52 = vld [vmem:[%s2990_s1 + $0x164] ss:$8 sps:$4 sm:$0xff]   ;;  %v2227_v12 = vld [vmem:[%s2990_s1 + $0x3c0] ss:$8 sps:$4 sm:$0xff]   ;;  %v2232_v13 = vld [vmem:[%s2990_s1 + $0x1d4] ss:$8 sps:$4 sm:$0xff]  }
  0x5f   : > { %1543 = vmatpush1.bf16.msra.mxu1 %v2164_v27  ;;  %v2235_v14 = vld [vmem:[%s2990_s1 + $0x3d4] ss:$8 sps:$4 sm:$0xff]   ;;  %v2230_v62 = vld [vmem:[%s2990_s1 + $0x1d0] ss:$8 sps:$4 sm:$0xff]   ;;  %v2238_v18 = vld [vmem:[%s2990_s1 + $0x1e4] ss:$8 sps:$4 sm:$0xff]  }
  0x60   : > { %1629 = vmatpush1.bf16.msra.mxu0 %v2167_v34  ;;  %1544 = vmatprep.subr.bf16.mxu1 %v2172_v35  ;;  %v606_v44 = vrot.slane %v599_v41, %v2543_v33  ;;  %v2187_v33 = vld [vmem:[%s2990_s1 + $0x354] ss:$8 sps:$4 sm:$0xff]   ;;  %v2233_v16 = vld [vmem:[%s2990_s1 + $0x3d0] ss:$8 sps:$4 sm:$0xff]   ;;  %v2241_v22 = vld [vmem:[%s2990_s1 + $0x3e4] ss:$8 sps:$4 sm:$0xff]  }
  0x61   : > { %1630 = vmatprep.subr.bf16.mxu0 %v2175_v37  ;;  %v2236_v26 = vld [vmem:[%s2990_s1 + $0x1e0] ss:$8 sps:$4 sm:$0xff]   ;;  %v2244_v34 = vld [vmem:[%s2990_s1 + $0x1f4] ss:$8 sps:$4 sm:$0xff]   ;;  %v2242_v36 = vld [vmem:[%s2990_s1 + $0x1f0] ss:$8 sps:$4 sm:$0xff]  }
  0x62   : > { %v607_v38 = vcombine.low %v2675_v45, %v606_v44  ;;  %v2185_v45 = vld [vmem:[%s2990_s1 + $0x350] ss:$8 sps:$4 sm:$0xff]   ;;  %v2239_v27 = vld [vmem:[%s2990_s1 + $0x3e0] ss:$8 sps:$4 sm:$0xff]   ;;  %v2247_v35 = vld [vmem:[%s2990_s1 + $0x3f4] ss:$8 sps:$4 sm:$0xff]  }
  0x63   : > { %1545 = vmatpush1.bf16.msra.mxu1 %v2170_v40  ;;  %v2245_v37 = vld [vmem:[%s2990_s1 + $0x3f0] ss:$8 sps:$4 sm:$0xff]   ;;  %v2251_v39 = vld [vmem:[%s2990_s1 + $0x404] ss:$8 sps:$4 sm:$0xff]   ;;  %v2249_v40 = vld [vmem:[%s2990_s1 + $0x400] ss:$8 sps:$4 sm:$0xff]  }
  0x64   : > { %1631 = vmatpush1.bf16.msra.mxu0 %v2173_v28  ;;  %1546 = vmatprep.subr.bf16.mxu1 %v2178_v43  ;;  %v2254_v28 = vld [vmem:[%s2990_s1 + $0x414] ss:$8 sps:$4 sm:$0xff]   ;;  %v2252_v41 = vld [vmem:[%s2990_s1 + $0x410] ss:$8 sps:$4 sm:$0xff]   ;;  %v2257_v43 = vld [vmem:[%s2990_s1 + $0x424] ss:$8 sps:$4 sm:$0xff]  }
  0x65   : > { %1632 = vmatprep.subr.bf16.mxu0 %v2181_v21  ;;  %1656 = vmatprep.mubr.bf16.mxu0 %v607_v38  ;;  %v2255_v51 = vld [vmem:[%s2990_s1 + $0x420] ss:$8 sps:$4 sm:$0xff]   ;;  %v2260_v60 = vld [vmem:[%s2990_s1 + $0x434] ss:$8 sps:$4 sm:$0xff]   ;;  %v2264_v21 = vld [vmem:[%s2990_s1 + $0x450] ss:$8 sps:$4 sm:$0xff]  }
  0x66   : > { %v2261_v42 = vld [vmem:[%s2990_s1 + $0x440] ss:$8 sps:$4 sm:$0xff]   ;;  %v2269_v44 = vld [vmem:[%s2990_s1 + $0x464] ss:$8 sps:$4 sm:$0xff]   ;;  %v2270_v38 = vld [vmem:[%s2990_s1 + $0x470] ss:$8 sps:$4 sm:$0xff]  }
  0x67   : > { %1547 = vmatpush1.bf16.msra.mxu1 %v2176_v46  ;;  %v2267_v46 = vld [vmem:[%s2990_s1 + $0x460] ss:$8 sps:$4 sm:$0xff]  }
  0x68   : > { %1633 = vmatpush1.bf16.msra.mxu0 %v2179_v29  ;;  %1548 = vmatprep.subr.bf16.mxu1 %v2184_v48  ;;  %v2272_v29 = vld [vmem:[%s2990_s1 + $0x474] ss:$8 sps:$4 sm:$0xff]  }
  0x69   : > { %1634 = vmatprep.subr.bf16.mxu0 %v2187_v33 }
  0x6b   : > { %1549 = vmatpush1.bf16.msra.mxu1 %v2182_v49 }
  0x6c   : > { %1635 = vmatpush1.bf16.msra.mxu0 %v2185_v45  ;;  %1550 = vmatprep.subr.bf16.mxu1 %v2190_v52  ;;  %v767_v52 = vsub.s32 0, %v2497_v3 }
  0x6d   : > { %1636 = vmatprep.subr.bf16.mxu0 %v2193_v19  ;;  %v763_v19 = vld [vmem:[%s2991_s2] sm:$0x3] }
  0x6f   : > { %1551 = vmatpush1.bf16.msra.mxu1 %v2188_v54  ;;  %v771_v54 = vsub.s32 1, %v2497_v3 }
  0x70   : > { %1637 = vmatpush1.bf16.msra.mxu0 %v2191_v55  ;;  %1552 = vmatprep.subr.bf16.mxu1 %v2196_v56  ;;  %v768_v55 = vrot.slane %v763_v19, %v767_v52 }
  0x71   : > { %1638 = vmatprep.subr.bf16.mxu0 %v2199_v57  ;;  %v772_v56 = vrot.slane %v763_v19, %v771_v54 }
  0x73   : > { %1553 = vmatpush1.bf16.msra.mxu1 %v2194_v58 }
  0x74   : > { %1639 = vmatpush1.bf16.msra.mxu0 %v2197_v59  ;;  %1554 = vmatprep.subr.bf16.mxu1 %v2202_v50 }
  0x75   : > { %1640 = vmatprep.subr.bf16.mxu0 %v2205_v61 }
  0x77   : > { %1555 = vmatpush1.bf16.msra.mxu1 %v2200_v63 }
  0x78   : > { %1641 = vmatpush1.bf16.msra.mxu0 %v2203_v47  ;;  %1556 = vmatprep.subr.bf16.mxu1 %v2208_v30 }
  0x79   : > { %1642 = vmatprep.subr.bf16.mxu0 %v2211_v0 }
  0x7b   : > { %1557 = vmatpush1.bf16.msra.mxu1 %v2206_v31 }
  0x7c   : > { %1643 = vmatpush1.bf16.msra.mxu0 %v2209_v1  ;;  %1558 = vmatprep.subr.bf16.mxu1 %v2214_v4 }
  0x7d   : > { %1644 = vmatprep.subr.bf16.mxu0 %v2217_v5 }
  0x7f   : > { %1559 = vmatpush1.bf16.msra.mxu1 %v2212_v15 }
  0x80   : > { %1645 = vmatpush1.bf16.msra.mxu0 %v2215_v6  ;;  %1560 = vmatprep.subr.bf16.mxu1 %v2220_v7 }
  0x81   : > { %1646 = vmatprep.subr.bf16.mxu0 %v2223_v8 }
  0x83   : > { %1561 = vmatpush1.bf16.msra.mxu1 %v2218_v23 }
  0x84   : > { %1647 = vmatpush1.bf16.msra.mxu0 %v2221_v24  ;;  %1562 = vmatprep.subr.bf16.mxu1 %v2226_v32 }
  0x85   : > { %1648 = vmatprep.subr.bf16.mxu0 %v2229_v10 }
  0x87   : > { %1563 = vmatpush1.bf16.msra.mxu1 %v2224_v11 }
  0x88   : > { %1649 = vmatpush1.bf16.msra.mxu0 %v2227_v12  ;;  %1564 = vmatprep.subr.bf16.mxu1 %v2232_v13 }
  0x89   : > { %1650 = vmatprep.subr.bf16.mxu0 %v2235_v14 }
  0x8b   : > { %1565 = vmatpush1.bf16.msra.mxu1 %v2230_v62 }
  0x8c   : > { %1651 = vmatpush1.bf16.msra.mxu0 %v2233_v16  ;;  %1566 = vmatprep.subr.bf16.mxu1 %v2238_v18 }
  0x8d   : > { %1652 = vmatprep.subr.bf16.mxu0 %v2241_v22 }
  0x8f   : > { %1567 = vmatpush1.bf16.msra.mxu1 %v2236_v26 }
  0x90   : > { %1653 = vmatpush1.bf16.msra.mxu0 %v2239_v27  ;;  %1568 = vmatprep.subr.bf16.mxu1 %v2244_v34 }
  0x91   : > { %1654 = vmatprep.subr.bf16.mxu0 %v2247_v35 }
  0x93   : > { %1569 = vmatpush1.bf16.msra.mxu1 %v2242_v36 }
  0x94   : > { %1655 = vmatpush1.bf16.msra.mxu0 %v2245_v37 }
  0x95   : > { %1667 = vmatprep.subr.bf16.mxu0 %v2251_v39 }
  0x96   : > { %1571 = vmatmul.mubr.bf16.vlgmr.msra.gmra.mrb[0].mxu1 %v533_v25  ;;  %v2263_v25 = vld [vmem:[%s2990_s1 + $0x444] ss:$8 sps:$4 sm:$0xff]  }
  0x97   : > { %1657 = vmatmul.mubr.bf16.vlgmr.msra.gmra.mrb[0].mxu0 %v597_v20  ;;  %v2266_v20 = vld [vmem:[%s2990_s1 + $0x454] ss:$8 sps:$4 sm:$0xff]  }
  0x98   : > { %1668 = vmatpush1.bf16.msra.mxu0 %v2249_v40  ;;  %1699 = vmatprep.mubr.bf16.mxu0 %v2281_v2  ;;  %v2258_v2 = vld [vmem:[%s2990_s1 + $0x430] ss:$8 sps:$4 sm:$0xff]  }
  0x99   : > { %1669 = vmatprep.subr.bf16.mxu0 %v2254_v28 }
  0x9c   : > { %1670 = vmatpush1.bf16.msra.mxu0 %v2252_v41 }
  0x9d   : > { %1671 = vmatprep.subr.bf16.mxu0 %v2257_v43 }
  0xa0   : > { %1672 = vmatpush1.bf16.msra.mxu0 %v2255_v51 }
  0xa1   : > { %1673 = vmatprep.subr.bf16.mxu0 %v2260_v60 }
  0xa4   : > { %1674 = vmatpush1.bf16.msra.mxu0 %v2258_v2 }
  0xa5   : > { %1675 = vmatprep.subr.bf16.mxu0 %v2263_v25 }
  0xa8   : > { %1676 = vmatpush1.bf16.msra.mxu0 %v2261_v42 }
  0xa9   : > { %1677 = vmatprep.subr.bf16.mxu0 %v2266_v20 }
  0xac   : > { %1678 = vmatpush1.bf16.msra.mxu0 %v2264_v21 }
  0xad   : > { %1679 = vmatprep.subr.bf16.mxu0 %v2269_v44 }
  0xb0   : > { %1680 = vmatpush1.bf16.msra.mxu0 %v2267_v46 }
  0xb1   : > { %1681 = vmatprep.subr.bf16.mxu0 %v2272_v29 }
  0xb4   : > { %1682 = vmatpush1.bf16.msra.mxu0 %v2270_v38 }
  0xb7   : > { %1700 = vmatmul.mubr.bf16.vlgmr.msra.gmra.mrb[0].mxu0 %v617_v17 }
 0x169   : > { %v1572_v48 = vpop.f32.mrb[0].mxu1 }
 0x16a   : > { %v1574_v33 = vpop.f32.mrb[1].mxu1  ;;  %v2024_v57 = vadd.f32 %v1572_v48, %v768_v55 }
 0x16b   : > { %v1576_v49 = vpop.f32.mrb[2].mxu1  ;;  %v2026_v58 = vadd.f32 %v1574_v33, %v772_v56 }
 0x16c   : > { %v1578_v45 = vpop.f32.mrb[3].mxu1  ;;  %v2028_v53 = vadd.f32 %v1576_v49, %v768_v55 }
 0x16d   : > { %v2030_v50 = vadd.f32 %v1578_v45, %v772_v56 }
 0x18a   : > { %v1701_v59 = vpop.f32.mrb[0].mxu0 }
 0x18b   : > { %v2025_v9 = vadd.f32 %v2024_v57, %v1701_v59  ;;  %v1703_v17 = vpop.f32.mrb[1].mxu0 }
 0x18c   : > { %v2027_v61 = vadd.f32 %v2026_v58, %v1703_v17  ;;  %v1705_v63 = vpop.f32.mrb[2].mxu0 }
 0x18d   : > { %v1710_v47 = vmax.f32 %v2025_v9, 0.0  ;;  %v2029_v30 = vadd.f32 %v2028_v53, %v1705_v63  ;;  %v1707_v0 = vpop.f32.mrb[3].mxu0 }
 0x18e   : > { %v1711_v31 = vmax.f32 %v2027_v61, 0.0  ;;  %v2031_v1 = vadd.f32 %v2030_v50, %v1707_v0 }
 0x18f   : > { %v1712_v4 = vmax.f32 %v2029_v30, 0.0 }
 0x190   : > { %v1718_v5 = vcombine.low %v1710_v47, %v1711_v31  ;;  %v1719_v3 = vcombine.high %v1710_v47, %v1711_v31  ;;  %v2008_v15 = vcombine.low %v1711_v31, %v1711_v31  ;;  %v2009_v6 = vcombine.high %v1711_v31, %v1711_v31 }
 0x191   : > { %v1713_v7 = vmax.f32 %v2031_v1, 0.0 }
 0x192   : > { %v2012_v8 = vpack.c.bf16 %v2008_v15, %v1718_v5  ;;  %v2013_v23 = vpack.c.bf16 %v2009_v6, %v1719_v3 }
 0x193   : > { %v1720_v24 = vcombine.low %v1712_v4, %v1713_v7  ;;  %v1721_v32 = vcombine.high %v1712_v4, %v1713_v7  ;;  %v2010_v10 = vcombine.low %v1713_v7, %v1713_v7  ;;  %v2011_v11 = vcombine.high %v1713_v7, %v1713_v7 }
 0x194   : > { %2016 = vst.sshfl [vmem:[%s170_s9] sm:$0x33 pattern:$0x76325410] %v2012_v8 }
 0x195   : > { %2017 = vst.sshfl [vmem:[%s170_s9 + $0x4] sm:$0x33 pattern:$0x76325410] %v2013_v23  ;;  %v2014_v12 = vpack.c.bf16 %v2010_v10, %v1720_v24  ;;  %v2015_v13 = vpack.c.bf16 %v2011_v11, %v1721_v32 }
 0x197   : > { %2018 = vst.sshfl [vmem:[%s170_s9 + $0x8] sm:$0x33 pattern:$0x76325410] %v2014_v12 }
 0x198   : > { %2019 = vst.sshfl [vmem:[%s170_s9 + $0xc] sm:$0x33 pattern:$0x76325410] %v2015_v13 }
 0x199 PF: > { %s13_s12 = sadd.s32 1, %s2279_s12  }
 0x19a   : > { %p10_p4 = scmp.ge.s32.totalorder %s13_s12, 4  }
 0x19c   :  { %12 = sbr.rel (!%p10_p4) target bundleno = 1 (0x1), region = 64 }

// kernel: _lambda_.5
= control target key start
LH: loop header
LB: loop body
LE: loop exit
PB: predicated region body
PF: predicated region fallthrough
CT: control target
= control target key end

     0   :  { %8 = vsyncpa [#allocation4], 0  ;;  %s5003_s0 = inlined_call_operand.vmem [shape: bf16[2,16,16,3], index: 0, kind: input, shape index: {}]   ;;  %s5004_s1 = inlined_call_operand.hbm [shape: bf16[128,128], index: 1, kind: input, shape index: {}]   ;;  %s5005_s2 = inlined_call_operand.hbm [shape: f32[1,128], index: 2, kind: input, shape index: {}]   ;;  %s5006_s3 = inlined_call_operand.vmem [shape: bf16[2,8,8,128], index: 3, kind: output, shape index: {}]  }
   0x1   :  { %9 = vsyncpa [#allocation6], 0  ;;  %s3348_s12 = smov 0  }
   0x2 LB: > { %s3354_s13 = sadd.s32 4294967295, %s3312_s12   ;;  %p2954_p0 = scmp.ge.s32.totalorder %s3312_s12, 1  ;;  %s3312_s12 = sphi %s3348_s12, %s15_s12  }
   0x3   : > { %p114_p1 = scmp.lt.s32.totalorder %s3312_s12, 3  ;;  %s3314_s14 = smov [#allocation3]  }
   0x4   : > { %s126_s15 = sshll.u32 %s3314_s14, 4  ;;  %p5007_p3 = scmp.eq.s32.totalorder %s3354_s13, 0  ;;  %s127_s15 = int_to_ptr.vmem [resolvable:$true] %s126_s15 }
   0x5   : > { %p3358_p2 = pnand %p2954_p0, %p114_p1  ;;  %s3315_s17 = smov [#allocation5]  }
   0x6   : > { %s140_s18 = sshll.u32 %s3315_s17, 4  ;;  %s3242_s22 = scalar_lea.hbm %s5004_s1, 1024  ;;  %s3371_s18 = int_to_ptr.vmem [resolvable:$true] %s140_s18 }
   0x7   : > { %s5018_s16 = scalar_select %p3358_p2, 1, 0 }
   0x8   : > { %p3185_p4 = pneg %p3358_p2  ;;  %p3243_p6 = scmp.ne.s32.totalorder %s5004_s1, %s3242_s22 }
   0x9   : > { %p3249_p10 = scmp.lt.u32.totalorder %s3242_s22, %s5004_s1 }
   0xa   : > { %p3367_p5 = pnand %p5007_p3, %p3185_p4 }
   0xc   : > { %p3244_p7 = pneg %p3367_p5 }
   0xe   : > { %p3245_p8 = pnand %p3244_p7, %p3243_p6 }
  0x10   : > { %p3246_p9 = pneg %p3245_p8 }
  0x12   : > { %p3251_p11 = pnand %p3249_p10, %p3246_p9 }
  0x14   : > { %3254 = shalt.err (!%p3251_p11)
}
  0x15   : > { %s3255_s27 = scalar_lea.vmem %s127_s15, 1024  ;;  %p3263_p1 = scmp.lt.s32.totalorder %s127_s15, %s127_s15 }
  0x16   : > { %p3256_p12 = scmp.ne.s32.totalorder %s127_s15, %s3255_s27  ;;  %p3264_p4 = scmp.lt.s32.totalorder %s3255_s27, %s3255_s27 }
  0x18   : > { %p3258_p13 = pnand %p3256_p12, %p3244_p7  ;;  %p3265_p3 = por %p3264_p4, %p3263_p1 }
  0x1a   : > { %p3259_p0 = pneg %p3258_p13 }
  0x1c   : > { %p3266_p2 = pnand %p3265_p3, %p3259_p0 }
  0x1e   : > { %3269 = shalt.err (!%p3266_p2)
}
  0x1f   : > { %s3316_s28 = smov 64   ;;  %s3317_s29 = smov 4  }
  0x20   : > { %3188 = dma.hbm_to_vmem [thread:$0]  (!%p3367_p5), %s5004_s1, 1024, %s127_s15, [#allocation4], %s3316_s28, %s3316_s28, %s3317_s29  }
  0x21   : > { %s3270_s7 = scalar_lea.hbm %s5005_s2, 16 }
  0x22   : > { %p3271_p6 = scmp.ne.s32.totalorder %s5005_s2, %s3270_s7  ;;  %p3277_p8 = scmp.lt.u32.totalorder %s3270_s7, %s5005_s2 }
  0x24   : > { %p3273_p2 = pnand %p3271_p6, %p3244_p7 }
  0x26   : > { %p3274_p3 = pneg %p3273_p2 }
  0x28   : > { %p3279_p9 = pnand %p3277_p8, %p3274_p3 }
  0x2a   : > { %3282 = shalt.err (!%p3279_p9)
}
  0x2b   : > { %s3283_s14 = scalar_lea.vmem %s3371_s18, 16  ;;  %s3290_s15 = scalar_lea.vmem %s3371_s18, 32 }
  0x2c   : > { %p3284_p10 = scmp.ne.s32.totalorder %s3371_s18, %s3283_s14  ;;  %p3291_p13 = scmp.lt.s32.totalorder %s3371_s18, %s3371_s18 }
  0x2d   : > { %p3292_p0 = scmp.lt.s32.totalorder %s3290_s15, %s3283_s14 }
  0x2e   : > { %p3286_p11 = pnand %p3284_p10, %p3244_p7 }
  0x2f   : > { %p3293_p1 = por %p3292_p0, %p3291_p13 }
  0x30   : > { %p3287_p12 = pneg %p3286_p11 }
  0x32   : > { %p3294_p4 = pnand %p3293_p1, %p3287_p12 }
  0x34   : > { %3297 = shalt.err (!%p3294_p4)
}
  0x35   : > { %3191 = dma.hbm_to_vmem [thread:$0]  (!%p3367_p5), %s5005_s2, 16, %s3371_s18, [#allocation6]  }
  0x36   : > { %p5020_p6 = scmp.ne.s32.totalorder %s5018_s16, 0 }
  0x38   : > { %161 = sbr.rel (%p5020_p6) target bundleno = 720 (0x2d0), region = 32 }
  0x3f   : > { %p5021_p7 = scmp.eq.s32.totalorder %s3354_s13, 0 }
  0x41   : > { %3303 = dma.done.wait (%p5021_p7), [#allocation4], 1024   ;;  %p5022_p2 = pmov %p5021_p7 }
  0x43   : > { %3305 = vsyncadd (%p5022_p2), [#allocation4], 4294966272  ;;  %p5023_p3 = pmov %p5022_p2 }
  0x44   : > { %p5024_p8 = pmov %p5022_p2 }
  0x45   : > { %3307 = dma.done.wait (%p5023_p3), [#allocation6], 16  }
  0x46   : > { %3309 = vsyncadd (%p5024_p8), [#allocation6], 4294967280  ;;  %vm200_vm0 = vcmask 19456   ;;  %vm203_vm1 = vcmask 16384   ;;  %v3318_v0 = vmov 0   ;;  %p189_p5 = scmp.lt.s32.totalorder %s3354_s13, 1 }
  0x47   : > { %201 = vst.msk [vmem:[#allocation2] sm:$0xf] %vm200_vm0, %v3318_v0  ;;  %202 = vst.msk [vmem:[#allocation2 + $0x4] sm:$0xf] %vm200_vm0, %v3318_v0  ;;  %vm210_vm2 = vsmask.f32 256 }
  0x48   : > { %204 = vst.msk [vmem:[#allocation2 + $0x8] sm:$0x1] %vm203_vm1, %v3318_v0  ;;  %208 = vst.msk [vmem:[#allocation2 + $0xd4] sm:$0x1] %vm203_vm1, %v3318_v0  ;;  %vm266_vm3 = vsmask.f32 7938 }
  0x49   : > { %206 = vst.msk [vmem:[#allocation2 + $0xcc] sm:$0xf] %vm200_vm0, %v3318_v0  ;;  %207 = vst.msk [vmem:[#allocation2 + $0xd0] sm:$0xf] %vm200_vm0, %v3318_v0  ;;  %s5057_s13 = smov (!%p189_p5, %s3354_s13), 1  ;;  %vm1280_vm6 = vcmask 1042432  }
  0x4a   : > { %vm3440_vm4 = vmand %vm203_vm1, %vm210_vm2  ;;  %s3064_s16 = sshll.u32 %s5057_s13, 7  ;;  %vm354_vm7 = vsmask.f32 4368  ;;  %v239_v3 = vld [vmem:[#allocation2 + $0x6c] sm:$0x1]  ;;  %vm1281_vm8 = vcmask 1046532  }
  0x4b   : > { %vm3445_vm5 = vmand %vm203_vm1, %vm266_vm3  ;;  %s3453_s21 = scalar_lea.vmem %s5003_s0, %s3064_s16  ;;  %v215_v4 = vld [vmem:[#allocation2 + $0xc] sm:$0x1]  ;;  %v242_v5 = vld [vmem:[#allocation2 + $0x78] sm:$0x1]  ;;  %v240_v12 = vsel %vm3440_vm4, 0, %v239_v3  ;;  %s3319_s22 = smov 6  }
  0x4c   : > { %v338_v13 = vld [vmem:[%s3453_s21 + $0x40] sm:$0xf]  ;;  %241 = vst [vmem:[#allocation2 + $0x6c] sm:$0x1] %v240_v12  ;;  %v339_v14 = vld [vmem:[%s3453_s21 + $0x44] sm:$0xf]  ;;  %vm3481_vm9 = vmor %vm210_vm2, %vm354_vm7 }
  0x4d   : > { %v493_v15 = vshrl.u32 %v338_v13, 16  ;;  %v496_v16 = vshll.u32 %v338_v13, 16  ;;  %v216_v17 = vsel %vm3440_vm4, 0, %v215_v4  ;;  %v243_v18 = vsel %vm3440_vm4, 0, %v242_v5  ;;  %v322_v21 = vld [vmem:[%s3453_s21] sm:$0xf]  ;;  %vm3488_vm10 = vmand %vm200_vm0, %vm266_vm3 }
  0x4e   : > { %v212_v6 = vld [vmem:[#allocation2] sm:$0x1]  ;;  %v3455_v8 = vld [vmem:[#allocation2 + $0x4] sm:$0xf]  ;;  %v501_v19 = vshrl.u32 %v339_v14, 16  ;;  %v504_v20 = vshll.u32 %v339_v14, 16  ;;  %vm3499_vm11 = vmor %vm1280_vm6, %vm1281_vm8 }
  0x4f   : > { %v268_v7 = vld [vmem:[#allocation2 + $0x8] sm:$0x1]  ;;  %v213_v9 = vsel %vm3440_vm4, 0, %v212_v6  ;;  %v1285_v11 = vrot.slane %v3455_v8, 5  ;;  %217 = vst [vmem:[#allocation2 + $0xc] sm:$0x1] %v216_v17 }
  0x50   : > { %v269_v10 = vsel %vm3445_vm5, 0, %v268_v7  ;;  %214 = vst [vmem:[#allocation2] sm:$0x1] %v213_v9  ;;  %244 = vst [vmem:[#allocation2 + $0x78] sm:$0x1] %v243_v18  ;;  %v858_v22 = vshll.u32 %v3455_v8, 16 }
  0x51   : > { %270 = vst [vmem:[#allocation2 + $0x8] sm:$0x1] %v269_v10  ;;  %v1287_v23 = vrot.slane %v1285_v11, 4  ;;  %v495_v24 = vrot.slane %v493_v15, 7  ;;  %v323_v25 = vld [vmem:[%s3453_s21 + $0x4] sm:$0xf] }
  0x52   : > { %v357_v26 = vshrl.u32 %v322_v21, 16  ;;  %v360_v27 = vshll.u32 %v322_v21, 16  ;;  %v3475_v28 = vrot.slane %v501_v19, 7  ;;  %v365_v29 = vshrl.u32 %v323_v25, 16  ;;  %v340_v31 = vld [vmem:[%s3453_s21 + $0x48] sm:$0xf] }
  0x53   : > { %v368_v30 = vshll.u32 %v323_v25, 16  ;;  %v862_v32 = vshrl.u32 %v3455_v8, 16  ;;  %v498_v34 = vor.u32 %v496_v16, %v495_v24  ;;  %v499_v35 = vrot.slane %v495_v24, 4  ;;  %v341_v37 = vld [vmem:[%s3453_s21 + $0x4c] sm:$0xf]  ;;  %s3320_s23 = smov 9  }
  0x54   : > { %v359_v36 = vrot.slane %v357_v26, 7  ;;  %v510_v38 = vshrl.u32 %v340_v31, 16  ;;  %v506_v40 = vor.u32 %v504_v20, %v3475_v28  ;;  %v3493_v41 = vrot.slane %v365_v29, 7  ;;  %v735_v52 = vld [vmem:[#allocation2 + $0x6c] sm:$0xf]  ;;  %s3321_s24 = smov 3  }
  0x55   : > { %v513_v42 = vshll.u32 %v340_v31, 16  ;;  %v3495_v43 = vrot.slane %v858_v22, 5  ;;  %v518_v48 = vshrl.u32 %v341_v37, 16  ;;  %v736_v56 = vsel %vm3488_vm10, %v498_v34, %v735_v52  ;;  %v218_v58 = vld [vmem:[#allocation2 + $0x18] sm:$0x1]  ;;  %s3322_s25 = smov 15  }
  0x56   : > { %v362_v45 = vor.u32 %v360_v27, %v359_v36  ;;  %v363_v46 = vrot.slane %v359_v36, 4  ;;  %v512_v47 = vrot.slane %v510_v38, 7  ;;  %v507_v51 = vsel %vm3481_vm9, %v499_v35, %v506_v40  ;;  %v679_v57 = vld [vmem:[#allocation2 + $0xc] sm:$0xf]  ;;  %737 = vst [vmem:[#allocation2 + $0x6c] sm:$0xf] %v736_v56 }
  0x57   : > { %v3503_v49 = vld [vmem:[#allocation2] sm:$0xf]  ;;  %v370_v53 = vor.u32 %v368_v30, %v3493_v41  ;;  %738 = vst.msk [vmem:[#allocation2 + $0x70] sm:$0xf] %vm200_vm0, %v507_v51  ;;  %v742_v62 = vld [vmem:[#allocation2 + $0x78] sm:$0xf] }
  0x58   : > { %v3505_v50 = vld [vmem:[#allocation2 + $0x8] sm:$0x1]  ;;  %v2965_v54 = vrot.slane %v3503_v49, 9  ;;  %v680_v60 = vsel %vm3488_vm10, %v362_v45, %v679_v57  ;;  %v515_v61 = vor.u32 %v513_v42, %v512_v47  ;;  %v325_v0 = vld [vmem:[%s3453_s21 + $0xc] sm:$0xf]  ;;  %v516_v5 = vrot.slane %v512_v47, 4 }
  0x59   : > { %v1288_v55 = vrot.slane %v3505_v50, 5  ;;  %v371_v59 = vsel %vm3481_vm9, %v363_v46, %v370_v53  ;;  %v324_v63 = vld [vmem:[%s3453_s21 + $0x8] sm:$0xf]  ;;  %681 = vst [vmem:[#allocation2 + $0xc] sm:$0xf] %v680_v60  ;;  %v3528_v6 = vrot.slane %v518_v48, 7 }
  0x5a   : > { %v1286_v3 = vsel %vm3499_vm11, %v2965_v54, %v1285_v11  ;;  %682 = vst.msk [vmem:[#allocation2 + $0x10] sm:$0xf] %vm200_vm0, %v371_v59  ;;  %v236_v7 = vld [vmem:[#allocation2 + $0x60] sm:$0x1]  ;;  %v292_v9 = vld [vmem:[#allocation2 + $0x68] sm:$0x1]  ;;  %v743_v13 = vsel %vm3488_vm10, %v515_v61, %v742_v62 }
  0x5b   : > { %v1289_v4 = vsel %vm3499_vm11, %v1287_v23, %v1288_v55  ;;  %v521_v12 = vshll.u32 %v341_v37, 16  ;;  %v219_v11 = vsel %vm3440_vm4, 0, %v218_v58  ;;  %v508_v14 = vrot.slane %v3475_v28, 4  ;;  %744 = vst [vmem:[#allocation2 + $0x78] sm:$0xf] %v743_v13  ;;  %s3323_s26 = smov 12  }
  0x5c   : > { %v3015_v10 = vcombine.low %v1286_v3, %v1289_v4  ;;  %220 = vst [vmem:[#allocation2 + $0x18] sm:$0x1] %v219_v11  ;;  %v374_v15 = vshrl.u32 %v324_v63, 16  ;;  %v377_v16 = vshll.u32 %v324_v63, 16  ;;  %v382_v17 = vshrl.u32 %v325_v0, 16  ;;  %s3324_s27 = smov 18  }
  0x5d   : > { %v336_v18 = vld [vmem:[%s3453_s21 + $0x38] sm:$0xf]  ;;  %v523_v19 = vor.u32 %v521_v12, %v3528_v6  ;;  %v385_v20 = vshll.u32 %v325_v0, 16  ;;  %v237_v21 = vsel %vm3440_vm4, 0, %v236_v7  ;;  %v293_v22 = vsel %vm3445_vm5, 0, %v292_v9  ;;  %s3325_s28 = smov 21  }
  0x5e   : > { %1639 = vrot.lane.b32.xlu0 %v3015_v10, %s3319_s22  ;;  %v337_v23 = vld [vmem:[%s3453_s21 + $0x3c] sm:$0xf]  ;;  %v868_v24 = vshll.u32 %v3505_v50, 16  ;;  %v372_v25 = vrot.slane %v3493_v41, 4  ;;  %v376_v26 = vrot.slane %v374_v15, 7  ;;  %v3545_v27 = vrot.slane %v382_v17, 7 }
  0x5f   : > { %238 = vst [vmem:[#allocation2 + $0x60] sm:$0x1] %v237_v21  ;;  %294 = vst [vmem:[#allocation2 + $0x68] sm:$0x1] %v293_v22  ;;  %v3547_v29 = vld [vmem:[#allocation2 + $0x70] sm:$0xf]  ;;  %v524_v30 = vsel %vm3481_vm9, %v516_v5, %v523_v19 }
  0x60   : > { %v525_v31 = vrot.slane %v3528_v6, 4  ;;  %v476_v34 = vshrl.u32 %v336_v18, 16  ;;  %v479_v35 = vshll.u32 %v336_v18, 16  ;;  %v3552_v36 = vld [vmem:[#allocation2 + $0x6c] sm:$0xf]  ;;  %v379_v37 = vor.u32 %v377_v16, %v376_v26  ;;  %s3326_s29 = smov 24  }
  0x61   : > { %745 = vst.msk [vmem:[#allocation2 + $0x7c] sm:$0xf] %vm200_vm0, %v524_v30  ;;  %v380_v38 = vrot.slane %v376_v26, 4  ;;  %v387_v40 = vor.u32 %v385_v20, %v3545_v27  ;;  %v484_v42 = vshrl.u32 %v337_v23, 16  ;;  %vm845_vm12 = vsmask.f32 3328 }
  0x62   : > { %vm846_vm13 = vsmask.f32 7440  ;;  %v3558_v45 = vcombine.low %v3552_v36, %v3547_v29  ;;  %v3560_v46 = vld [vmem:[#allocation2 + $0xc] sm:$0xf]  ;;  %v3562_v47 = vld [vmem:[#allocation2 + $0x10] sm:$0xf] }
  0x63   : > { %v487_v48 = vshll.u32 %v337_v23, 16  ;;  %v849_v51 = vshrl.u32 %v3503_v49, 16  ;;  %v1078_v52 = vshrl.u32 %v3547_v29, 16  ;;  %v1065_v53 = vshrl.u32 %v3552_v36, 16  ;;  %v295_v56 = vld [vmem:[#allocation2 + $0x74] sm:$0x1]  ;;  %vm3625_vm14 = vmor %vm845_vm12, %vm846_vm13 }
  0x64   : > { %v1068_v54 = vshll.u32 %v3552_v36, 16  ;;  %v3570_v55 = vcombine.low %v3560_v46, %v3562_v47  ;;  %1690 = vrot.lane.b32.xlu1 %v3558_v45, %s3320_s23  ;;  %v873_v57 = vshrl.u32 %v3560_v46, 16  ;;  %v876_v58 = vshll.u32 %v3560_v46, 16  ;;  %v686_v60 = vld [vmem:[#allocation2 + $0x18] sm:$0xf]  ;;  %s3065_s30 = sshll.u32 %s5057_s13, 5 }
  0x65   : > { %v388_v59 = vsel %vm3481_vm9, %v380_v38, %v387_v40  ;;  %v478_v61 = vrot.slane %v476_v34, 7  ;;  %v886_v62 = vshrl.u32 %v3562_v47, 16  ;;  %v3581_v63 = vld [vmem:[#allocation2 + $0x78] sm:$0xf]  ;;  %v389_v0 = vrot.slane %v3545_v27, 4  ;;  %s4962_s6 = scalar_lea.vmem %s5006_s3, %s3065_s30 }
  0x66   : > { %1674 = vrot.lane.b32.xlu0 %v3570_v55, %s3320_s23  ;;  %v687_v3 = vsel %vm3488_vm10, %v379_v37, %v686_v60  ;;  %689 = vst.msk [vmem:[#allocation2 + $0x1c] sm:$0xf] %vm200_vm0, %v388_v59  ;;  %v486_v4 = vrot.slane %v484_v42, 7  ;;  %v271_v5 = vld [vmem:[#allocation2 + $0x14] sm:$0x1]  ;;  %v1089_v7 = vshrl.u32 %v3581_v63, 16 }
  0x67   : > { %688 = vst [vmem:[#allocation2 + $0x18] sm:$0xf] %v687_v3  ;;  %v481_v9 = vor.u32 %v479_v35, %v478_v61  ;;  %v482_v10 = vrot.slane %v478_v61, 4  ;;  %v728_v12 = vld [vmem:[#allocation2 + $0x60] sm:$0xf]  ;;  %v852_v16 = vshll.u32 %v3503_v49, 16 }
  0x68   : > { %v732_v13 = vld [vmem:[#allocation2 + $0x68] sm:$0x1]  ;;  %v489_v11 = vor.u32 %v487_v48, %v486_v4  ;;  %v491_v15 = vrot.slane %v486_v4, 4  ;;  %v864_v17 = vrot.slane %v862_v32, 4  ;;  %v298_v18 = vld [vmem:[#allocation2 + $0x80] sm:$0x1] }
  0x69   : > { %v3591_v19 = vld [vmem:[#allocation2 + $0x7c] sm:$0xf]  ;;  %v1092_v20 = vshll.u32 %v3581_v63, 16  ;;  %v729_v21 = vsel %vm3488_vm10, %v481_v9, %v728_v12  ;;  %v851_v22 = vrot.slane %v849_v51, 4  ;;  %v296_v23 = vsel %vm3445_vm5, 0, %v295_v56 }
  0x6a   : > { %v3600_v26 = vcombine.low %v3581_v63, %v3591_v19  ;;  %v490_v30 = vsel %vm3481_vm9, %v482_v10, %v489_v11  ;;  %730 = vst [vmem:[#allocation2 + $0x60] sm:$0xf] %v729_v21  ;;  %v733_v32 = vsel %vm3440_vm4, %v491_v15, %v732_v13  ;;  %297 = vst [vmem:[#allocation2 + $0x74] sm:$0x1] %v296_v23  ;;  %v2974_v34 = vrot.slane %v3552_v36, 9 }
  0x6b   : > { %731 = vst.msk [vmem:[#allocation2 + $0x64] sm:$0xf] %vm200_vm0, %v490_v30  ;;  %734 = vst [vmem:[#allocation2 + $0x68] sm:$0x1] %v733_v32  ;;  %v854_v35 = vrot.slane %v852_v16, 5  ;;  %v865_v37 = vor.u32 %v864_v17, %v3495_v43  ;;  %v1348_v38 = vrot.slane %v3547_v29, 5 }
  0x6c   : > { %5035 = vst [vmem:[#allocation9_spill] sm:$0xff] %v3600_v26  ;;  %v272_v40 = vsel %vm3445_vm5, 0, %v271_v5  ;;  %1692 = vrot.lane.b32.xlu1 %v3600_v26, %s3320_s23  ;;  %v870_v42 = vrot.slane %v868_v24, 5  ;;  %v2966_v48 = vrot.slane %v3560_v46, 9  ;;  %v1292_v51 = vrot.slane %v3562_v47, 5 }
  0x6d   : > { %273 = vst [vmem:[#allocation2 + $0x14] sm:$0x1] %v272_v40  ;;  %v299_v56 = vsel %vm3445_vm5, 0, %v298_v18  ;;  %v274_v59 = vld [vmem:[#allocation2 + $0x20] sm:$0x1]  ;;  %v1102_v60 = vshrl.u32 %v3591_v19, 16  ;;  %v855_v50 = vor.u32 %v854_v35, %v851_v22  ;;  %v3635_v10 = vsel %vm3499_vm11, %v2974_v34, %v1348_v38 }
  0x6e   : > { %v3621_v61 = vld [vmem:[#allocation2 + $0x1c] sm:$0xf]  ;;  %v866_v24 = vrot.slane %v865_v37, 4  ;;  %300 = vst [vmem:[#allocation2 + $0x80] sm:$0x1] %v299_v56  ;;  %v2975_v4 = vrot.slane %v3581_v63, 9  ;;  %v3646_v16 = vsel %vm3499_vm11, %v2966_v48, %v1292_v51 }
  0x6f   : > { %v3630_v5 = vld [vmem:[#allocation2 + $0x18] sm:$0xf]  ;;  %v910_v9 = vshrl.u32 %v3621_v61, 16  ;;  %v3637_v12 = vrot.slane %v1348_v38, 4  ;;  %v1355_v13 = vrot.slane %v3591_v19, 5  ;;  %v856_v15 = vrot.slane %v855_v50, 4 }
  0x70   : > { %v3642_v11 = vcombine.low %v3630_v5, %v3621_v61  ;;  %v3648_v17 = vrot.slane %v1292_v51, 4  ;;  %v897_v18 = vshrl.u32 %v3630_v5, 16  ;;  %v900_v21 = vshll.u32 %v3630_v5, 16 }
  0x71   : > { %v871_v22 = vsel %vm3625_vm14, %v866_v24, %v870_v42  ;;  %v275_v23 = vsel %vm3445_vm5, 0, %v274_v59  ;;  %v3658_v30 = vld [vmem:[#allocation2 + $0x60] sm:$0xf]  ;;  %v861_v32 = vsel %vm3625_vm14, %v856_v15, %v3495_v43  ;;  %v739_v34 = vld [vmem:[#allocation2 + $0x74] sm:$0x1]  ;;  %v3665_v35 = vsel %vm3499_vm11, %v2975_v4, %v1355_v13 }
  0x72   : > { %1676 = vrot.lane.b32.xlu0 %v3642_v11, %s3320_s23  ;;  %v3667_v37 = vrot.slane %v1355_v13, 4  ;;  %276 = vst [vmem:[#allocation2 + $0x20] sm:$0x1] %v275_v23  ;;  %v3671_v40 = vld [vmem:[#allocation2 + $0x64] sm:$0xf]  ;;  %v2973_v48 = vrot.slane %v3658_v30, 9  ;;  %v2999_v51 = vcombine.low %v861_v32, %v871_v22  ;;  %v740_v43 = vsel %vm3440_vm4, %v508_v14, %v739_v34 }
  0x73   : > { %v817_v42 = vld [vmem:[#allocation2 + $0x68] sm:$0x1]  ;;  %v875_v56 = vrot.slane %v873_v57, 4  ;;  %v1341_v59 = vrot.slane %v3671_v40, 5  ;;  %741 = vst [vmem:[#allocation2 + $0x74] sm:$0x1] %v740_v43 }
  0x74   : > { %v1344_v50 = vrot.slane %v817_v42, 5  ;;  %v683_v24 = vld [vmem:[#allocation2 + $0x14] sm:$0x1]  ;;  %v2967_v4 = vrot.slane %v3630_v5, 9  ;;  %v1299_v13 = vrot.slane %v3621_v61, 5  ;;  %v878_v14 = vrot.slane %v876_v58, 5 }
  0x75   : > { %v684_v28 = vsel %vm3440_vm4, %v372_v25, %v683_v24  ;;  %v746_v15 = vld [vmem:[#allocation2 + $0x80] sm:$0x1]  ;;  %v882_v57 = vshll.u32 %v3562_v47, 16  ;;  %v888_v22 = vrot.slane %v886_v62, 4  ;;  %v1342_v23 = vsel %vm3499_vm11, %v2973_v48, %v1341_v59 }
  0x76   : > { %v1343_v32 = vrot.slane %v1341_v59, 4  ;;  %1559 = vrot.lane.b32.xlu0 %v2999_v51, %s3321_s24  ;;  %685 = vst [vmem:[#allocation2 + $0x14] sm:$0x1] %v684_v28  ;;  %v747_v41 = vsel %vm3440_vm4, %v525_v31, %v746_v15  ;;  %v1041_v25 = vshrl.u32 %v3658_v30, 16  ;;  %v879_v46 = vor.u32 %v878_v14, %v875_v56 }
  0x77   : > { %748 = vst [vmem:[#allocation2 + $0x80] sm:$0x1] %v747_v41  ;;  %v3700_v58 = vrot.slane %v882_v57, 5  ;;  %v1044_v47 = vshll.u32 %v3658_v30, 16  ;;  %v1050_v62 = vshll.u32 %v3671_v40, 16  ;;  %v1054_v51 = vshrl.u32 %v3671_v40, 16 }
  0x78   : > { %v1345_v34 = vsel %vm3499_vm11, %v1343_v32, %v1344_v50  ;;  %v1043_v48 = vrot.slane %v1041_v25, 4  ;;  %v1060_v6 = vshll.u32 %v817_v42, 16  ;;  %v1300_v59 = vsel %vm3499_vm11, %v2967_v4, %v1299_v13 }
  0x79   : > { %v3707_v43 = vcombine.low %v1342_v23, %v1345_v34  ;;  %v690_v31 = vld [vmem:[#allocation2 + $0x20] sm:$0x1]  ;;  %v889_v56 = vor.u32 %v888_v22, %v3700_v58  ;;  %v1046_v24 = vrot.slane %v1044_v47, 5  ;;  %v1301_v15 = vrot.slane %v1299_v13, 4 }
  0x7a   : > { %v691_v28 = vsel %vm3440_vm4, %v389_v0, %v690_v31  ;;  %v1052_v50 = vrot.slane %v1050_v62, 5  ;;  %v1056_v14 = vrot.slane %v1054_v51, 4  ;;  %v820_v42 = vld [vmem:[#allocation2 + $0x74] sm:$0x1]  ;;  %v880_v57 = vrot.slane %v879_v46, 4 }
  0x7b   : > { %1655 = vrot.lane.b32.xlu1 %v3707_v43, %s3319_s22  ;;  %692 = vst [vmem:[#allocation2 + $0x20] sm:$0x1] %v691_v28  ;;  %v1047_v23 = vor.u32 %v1046_v24, %v1043_v48  ;;  %v1062_v32 = vrot.slane %v1060_v6, 5  ;;  %v1067_v4 = vrot.slane %v1065_v53, 4  ;;  %v1351_v22 = vrot.slane %v820_v42, 5 }
  0x7c   : > { %v1057_v41 = vor.u32 %v1056_v14, %v1052_v50  ;;  %v1070_v27 = vrot.slane %v1068_v54, 5  ;;  %v1074_v0 = vshll.u32 %v3547_v29, 16  ;;  %v890_v25 = vrot.slane %v889_v56, 4 }
  0x7d   : > { %v796_v13 = vld [vmem:[#allocation2 + $0x14] sm:$0x1]  ;;  %v1048_v47 = vrot.slane %v1047_v23, 4  ;;  %v1080_v62 = vrot.slane %v1078_v52, 4  ;;  %v1084_v34 = vshll.u32 %v820_v42, 16  ;;  %v1352_v46 = vsel %vm3499_vm11, %v3637_v12, %v1351_v22 }
  0x7e   : > { %v1295_v48 = vrot.slane %v796_v13, 5  ;;  %v3728_v53 = vld [vmem:[#allocation2 + $0x80] sm:$0x1]  ;;  %v892_v51 = vshll.u32 %v796_v13, 16  ;;  %v1058_v6 = vrot.slane %v1057_v41, 4  ;;  %v3731_v36 = vcombine.low %v3635_v10, %v1352_v46 }
  0x7f   : > { %v1358_v54 = vrot.slane %v3728_v53, 5  ;;  %v1053_v31 = vsel %vm3625_vm14, %v1048_v47, %v1052_v50  ;;  %v1071_v29 = vor.u32 %v1070_v27, %v1067_v4  ;;  %v3741_v24 = vrot.slane %v1074_v0, 5  ;;  %v221_v27 = vld [vmem:[#allocation2 + $0x24] sm:$0x1] }
  0x80   : > { %5038 = vst [vmem:[#allocation10_spill] sm:$0xff] %v3731_v36  ;;  %v1296_v52 = vsel %vm3499_vm11, %v3648_v17, %v1295_v48  ;;  %v894_v56 = vrot.slane %v892_v51, 5  ;;  %v1063_v12 = vsel %vm3625_vm14, %v1058_v6, %v1062_v32  ;;  %1657 = vrot.lane.b32.xlu1 %v3731_v36, %s3319_s22  ;;  %v885_v50 = vsel %vm3625_vm14, %v880_v57, %v3700_v58 }
  0x81   : > { %v3016_v10 = vcombine.low %v3646_v16, %v1296_v52  ;;  %v1359_v28 = vsel %vm3499_vm11, %v3667_v37, %v1358_v54  ;;  %v899_v17 = vrot.slane %v897_v18, 4  ;;  %v3757_v23 = vcombine.low %v1053_v31, %v1063_v12 }
  0x82   : > { %v3755_v14 = vcombine.low %v3665_v35, %v1359_v28  ;;  %v799_v42 = vld [vmem:[#allocation2 + $0x20] sm:$0x1]  ;;  %v3759_v32 = vrot.slane %v1071_v29, 4  ;;  %v1081_v16 = vor.u32 %v1080_v62, %v3741_v24  ;;  %v895_v4 = vsel %vm3625_vm14, %v890_v25, %v894_v56  ;;  %v326_v62 = vld [vmem:[%s3453_s21 + $0x10] sm:$0xf] }
  0x83   : > { %1641 = vrot.lane.b32.xlu0 %v3016_v10, %s3319_s22  ;;  %v1302_v37 = vrot.slane %v799_v42, 5  ;;  %v3765_v58 = vrot.slane %v1084_v34, 5  ;;  %v902_v18 = vrot.slane %v900_v21, 5  ;;  %v906_v57 = vshll.u32 %v3621_v61, 16  ;;  %v3228_v34 = vld [vmem:[#allocation3] sm:$0xff]  }
  0x84   : > { %v1082_v35 = vrot.slane %v1081_v16, 4  ;;  %v912_v22 = vrot.slane %v910_v9, 4  ;;  %v916_v41 = vshll.u32 %v799_v42, 16  ;;  %1760 = vrot.lane.b32.xlu1 %v3731_v36, %s3322_s25  ;;  %v1091_v5 = vrot.slane %v1089_v7, 4  ;;  %3113 = vmatprep.subr.bf16.mxu0 %v3228_v34  ;;  %v342_v29 = vld [vmem:[%s3453_s21 + $0x50] sm:$0xf] }
  0x85   : > { %v1303_v0 = vsel %vm3499_vm11, %v1301_v15, %v1302_v37  ;;  %v903_v13 = vor.u32 %v902_v18, %v899_v17  ;;  %v1094_v21 = vrot.slane %v1092_v20, 5  ;;  %v3782_v61 = vcombine.low %v885_v50, %v895_v4  ;;  %v327_v15 = vld [vmem:[%s3453_s21 + $0x14] sm:$0xf]  ;;  %3161 = vmatprep.subr.bf16.mxu1 %v3228_v34  ;;  %3114 = vmatpush3.bf16.msra.mxu0 %v3228_v34  ;;  %v277_v28 = vld [vmem:[#allocation2 + $0x2c] sm:$0x1]  ;;  %v3230_v50 = vld [vmem:[#allocation3 + $0x8] sm:$0xff]  }
  0x86   : > { %v3780_v25 = vcombine.low %v1300_v59, %v1303_v0  ;;  %v1077_v9 = vsel %vm3625_vm14, %v3759_v32, %v3741_v24  ;;  %v3788_v47 = vrot.slane %v906_v57, 5  ;;  %v918_v46 = vrot.slane %v916_v41, 5  ;;  %v245_v59 = vld [vmem:[#allocation2 + $0x84] sm:$0x1]  ;;  %3169 = vmatpush3.bf16.msra.mxu1 %v3228_v34  ;;  %v224_v57 = vld [vmem:[#allocation2 + $0x30] sm:$0x1]  ;;  %3115 = vmatprep.subr.bf16.mxu0 %v3230_v50 }
  0x87   : > { %1744 = vrot.lane.b32.xlu0 %v3016_v10, %s3322_s25  ;;  %v904_v7 = vrot.slane %v903_v13, 4  ;;  %v1095_v63 = vor.u32 %v1094_v21, %v1091_v5  ;;  %v1098_v20 = vshll.u32 %v3591_v19, 16  ;;  %v1104_v51 = vrot.slane %v1102_v60, 4  ;;  %v3814_v10 = vld [vmem:[%s3453_s21 + $0x54] sm:$0xf]  ;;  %3162 = vmatprep.subr.bf16.mxu1 %v3230_v50 }
  0x88   : > { %v913_v48 = vor.u32 %v912_v22, %v3788_v47  ;;  %v1108_v6 = vshll.u32 %v3728_v53, 16  ;;  %v222_v54 = vsel %vm3440_vm4, 0, %v221_v27  ;;  %1762 = vrot.lane.b32.xlu1 %v3755_v14, %s3322_s25  ;;  %v1087_v31 = vsel %vm3625_vm14, %v1082_v35, %v3765_v58  ;;  %v301_v35 = vld [vmem:[#allocation2 + $0x8c] sm:$0x1]  ;;  %v3832_v13 = vld [vmem:[%s3453_s21 + $0x18] sm:$0xf] }
  0x89   : > { %v909_v19 = vsel %vm3625_vm14, %v904_v7, %v3788_v47  ;;  %v3808_v60 = vrot.slane %v1098_v20, 5  ;;  %223 = vst [vmem:[#allocation2 + $0x24] sm:$0x1] %v222_v54  ;;  %v391_v53 = vshrl.u32 %v326_v62, 16  ;;  %v3811_v56 = vrot.slane %v1095_v63, 4  ;;  %3116 = vmatpush3.bf16.msra.mxu0 %v3230_v50  ;;  %v3232_v7 = vld [vmem:[#allocation3 + $0x10] sm:$0xff]  }
  0x8a   : > { %v914_v52 = vrot.slane %v913_v48, 4  ;;  %v394_v12 = vshll.u32 %v326_v62, 16  ;;  %v399_v24 = vshrl.u32 %v327_v15, 16  ;;  %v3819_v42 = vrot.slane %v1108_v6, 5  ;;  %v3835_v5 = vld [vmem:[%s3453_s21 + $0x1c] sm:$0xf]  ;;  %3170 = vmatpush3.bf16.msra.mxu1 %v3230_v50  ;;  %3117 = vmatprep.subr.bf16.mxu0 %v3232_v7 }
  0x8b   : > { %1746 = vrot.lane.b32.xlu0 %v3780_v25, %s3322_s25  ;;  %v1105_v17 = vor.u32 %v1104_v51, %v3808_v60  ;;  %v393_v32 = vrot.slane %v391_v53, 7  ;;  %v402_v16 = vshll.u32 %v327_v15, 16  ;;  %v246_v58 = vsel %vm3440_vm4, 0, %v245_v59  ;;  %v248_v15 = vld [vmem:[#allocation2 + $0x90] sm:$0x1]  ;;  %3163 = vmatprep.subr.bf16.mxu1 %v3232_v7 }
  0x8c   : > { %v919_v37 = vsel %vm3625_vm14, %v914_v52, %v918_v46  ;;  %v3823_v4 = vrot.slane %v399_v24, 7  ;;  %v527_v18 = vshrl.u32 %v342_v29, 16  ;;  %1561 = vrot.lane.b32.xlu1 %v3782_v61, %s3321_s24  ;;  %v3829_v22 = vcombine.low %v1077_v9, %v1087_v31  ;;  %247 = vst [vmem:[#allocation2 + $0x84] sm:$0x1] %v246_v58  ;;  %v3843_v34 = vld [vmem:[%s3453_s21 + $0x58] sm:$0xf] }
  0x8d   : > { %v1106_v41 = vrot.slane %v1105_v17, 4  ;;  %v396_v27 = vor.u32 %v394_v12, %v393_v32  ;;  %v397_v0 = vrot.slane %v393_v32, 4  ;;  %v1101_v21 = vsel %vm3625_vm14, %v3811_v56, %v3808_v60  ;;  %v3854_v48 = vld [vmem:[%s3453_s21 + $0x5c] sm:$0xf]  ;;  %3118 = vmatpush3.bf16.msra.mxu0 %v3232_v7  ;;  %v3233_v50 = vld [vmem:[#allocation3 + $0x18] sm:$0xff]  }
  0x8e   : > { %5039 = vst [vmem:[#allocation11_spill] sm:$0xff] %v3829_v22  ;;  %v404_v47 = vor.u32 %v402_v16, %v3823_v4  ;;  %v529_v62 = vrot.slane %v527_v18, 7  ;;  %v530_v9 = vshll.u32 %v342_v29, 16  ;;  %v3847_v46 = vcombine.low %v909_v19, %v919_v37  ;;  %3171 = vmatpush3.bf16.msra.mxu1 %v3232_v7  ;;  %3119 = vmatprep.subr.bf16.mxu0 %v3233_v50 }
  0x8f   : > { %1575 = vrot.lane.b32.xlu0 %v3757_v23, %s3321_s24  ;;  %v535_v63 = vshrl.u32 %v3814_v10, 16  ;;  %v538_v20 = vshll.u32 %v3814_v10, 16  ;;  %v278_v59 = vsel %vm3445_vm5, 0, %v277_v28  ;;  %v1111_v51 = vsel %vm3625_vm14, %v1106_v41, %v3819_v42  ;;  %v280_v28 = vld [vmem:[#allocation2 + $0x38] sm:$0x1]  ;;  %3164 = vmatprep.subr.bf16.mxu1 %v3233_v50 }
  0x90   : > { %v405_v6 = vsel %vm3481_vm9, %v397_v0, %v404_v47  ;;  %v693_v54 = vld [vmem:[#allocation2 + $0x24] sm:$0xf]  ;;  %v532_v31 = vor.u32 %v530_v9, %v529_v62  ;;  %v533_v19 = vrot.slane %v529_v62, 4  ;;  %279 = vst [vmem:[#allocation2 + $0x2c] sm:$0x1] %v278_v59  ;;  %1577 = vrot.lane.b32.xlu1 %v3829_v22, %s3321_s24  ;;  %v302_v29 = vsel %vm3445_vm5, 0, %v301_v35 }
  0x91   : > { %v694_v60 = vsel %vm3488_vm10, %v396_v27, %v693_v54  ;;  %696 = vst.msk [vmem:[#allocation2 + $0x28] sm:$0xf] %vm200_vm0, %v405_v6  ;;  %v3866_v53 = vrot.slane %v535_v63, 7  ;;  %v225_v52 = vsel %vm3440_vm4, 0, %v224_v57  ;;  %v406_v56 = vrot.slane %v3823_v4, 4  ;;  %3120 = vmatpush3.bf16.msra.mxu0 %v3233_v50  ;;  %v3234_v62 = vld [vmem:[#allocation3 + $0x20] sm:$0xff]  }
  0x92   : > { %695 = vst [vmem:[#allocation2 + $0x24] sm:$0xf] %v694_v60  ;;  %303 = vst [vmem:[#allocation2 + $0x8c] sm:$0x1] %v302_v29  ;;  %v408_v12 = vshrl.u32 %v3832_v13, 16  ;;  %v416_v24 = vshrl.u32 %v3835_v5, 16  ;;  %v3883_v37 = vcombine.low %v1101_v21, %v1111_v51  ;;  %3172 = vmatpush3.bf16.msra.mxu1 %v3233_v50  ;;  %3121 = vmatprep.subr.bf16.mxu0 %v3234_v62 }
  0x93   : > { %226 = vst [vmem:[#allocation2 + $0x30] sm:$0x1] %v225_v52  ;;  %v419_v10 = vshll.u32 %v3835_v5, 16  ;;  %1709 = vrot.lane.b32.xlu0 %v3782_v61, %s3323_s26  ;;  %v540_v17 = vor.u32 %v538_v20, %v3866_v53  ;;  %v411_v42 = vshll.u32 %v3832_v13, 16  ;;  %v249_v32 = vsel %vm3440_vm4, 0, %v248_v15  ;;  %3165 = vmatprep.subr.bf16.mxu1 %v3234_v62 }
  0x94   : > { %v544_v16 = vshrl.u32 %v3843_v34, 16  ;;  %v749_v4 = vld [vmem:[#allocation2 + $0x84] sm:$0xf]  ;;  %v410_v58 = vrot.slane %v408_v12, 7  ;;  %v3885_v18 = vrot.slane %v416_v24, 7  ;;  %v552_v35 = vshrl.u32 %v3854_v48, 16  ;;  %1725 = vrot.lane.b32.xlu1 %v3829_v22, %s3323_s26 }
  0x95   : > { %250 = vst [vmem:[#allocation2 + $0x90] sm:$0x1] %v249_v32  ;;  %v541_v61 = vsel %vm3481_vm9, %v533_v19, %v540_v17  ;;  %v750_v57 = vsel %vm3488_vm10, %v532_v31, %v749_v4  ;;  %v555_v27 = vshll.u32 %v3854_v48, 16  ;;  %v304_v0 = vld [vmem:[#allocation2 + $0x98] sm:$0x1]  ;;  %v542_v5 = vrot.slane %v3866_v53, 4  ;;  %3122 = vmatpush3.bf16.msra.mxu0 %v3234_v62 }
  0x96   : > { %v3894_v41 = vrot.slane %v544_v16, 7  ;;  %v227_v13 = vld [vmem:[#allocation2 + $0x3c] sm:$0x1]  ;;  %751 = vst [vmem:[#allocation2 + $0x84] sm:$0xf] %v750_v57  ;;  %v414_v21 = vrot.slane %v410_v58, 4  ;;  %v421_v47 = vor.u32 %v419_v10, %v3885_v18  ;;  %v413_v15 = vor.u32 %v411_v42, %v410_v58  ;;  %3173 = vmatpush3.bf16.msra.mxu1 %v3234_v62 }
  0x97   : > { %752 = vst.msk [vmem:[#allocation2 + $0x88] sm:$0xf] %vm200_vm0, %v541_v61  ;;  %1711 = vrot.lane.b32.xlu0 %v3847_v46, %s3323_s26  ;;  %v697_v9 = vld [vmem:[#allocation2 + $0x2c] sm:$0x1]  ;;  %v3903_v63 = vrot.slane %v552_v35, 7  ;;  %v281_v20 = vsel %vm3445_vm5, 0, %v280_v28  ;;  %v3927_v52 = vcombine.low %v3658_v30, %v3671_v40 }
  0x98   : > { %v550_v7 = vrot.slane %v3894_v41, 4  ;;  %v3907_v59 = vld [vmem:[#allocation2 + $0x28] sm:$0xf]  ;;  %v698_v48 = vsel %vm3440_vm4, %v406_v56, %v697_v9  ;;  %v422_v51 = vsel %vm3481_vm9, %v414_v21, %v421_v47  ;;  %282 = vst [vmem:[#allocation2 + $0x38] sm:$0x1] %v281_v20  ;;  %v305_v6 = vsel %vm3445_vm5, 0, %v304_v0  ;;  %1727 = vrot.lane.b32.xlu1 %v3883_v37, %s3323_s26 }
  0x99   : > { %v228_v54 = vsel %vm3440_vm4, 0, %v227_v13  ;;  %v3919_v31 = vld [vmem:[#allocation2 + $0x24] sm:$0xf]  ;;  %v934_v19 = vshrl.u32 %v3907_v59, 16  ;;  %699 = vst [vmem:[#allocation2 + $0x2c] sm:$0x1] %v698_v48  ;;  %v557_v29 = vor.u32 %v555_v27, %v3903_v63 }
  0x9a   : > { %v930_v60 = vshll.u32 %v3907_v59, 16  ;;  %v753_v53 = vld [vmem:[#allocation2 + $0x8c] sm:$0x1]  ;;  %703 = vst.msk [vmem:[#allocation2 + $0x34] sm:$0xf] %vm200_vm0, %v422_v51  ;;  %v921_v56 = vshrl.u32 %v3919_v31, 16  ;;  %v3937_v50 = vcombine.low %v3919_v31, %v3907_v59 }
  0x9b   : > { %306 = vst [vmem:[#allocation2 + $0x98] sm:$0x1] %v305_v6  ;;  %229 = vst [vmem:[#allocation2 + $0x3c] sm:$0x1] %v228_v54  ;;  %v924_v12 = vshll.u32 %v3919_v31, 16  ;;  %v754_v24 = vsel %vm3440_vm4, %v542_v5, %v753_v53  ;;  %v3235_v28 = vld [vmem:[#allocation3 + $0x28] sm:$0xff]   ;;  %1779 = vrot.lane.b32.xlu0 %v3642_v11, %s3324_s27  ;;  %v558_v4 = vsel %vm3481_vm9, %v550_v7, %v557_v29 }
  0x9c   : > { %v700_v10 = vld [vmem:[#allocation2 + $0x30] sm:$0xf]  ;;  %5040 = vst [vmem:[#allocation12_spill] sm:$0xff] %v3937_v50  ;;  %v3939_v30 = vrot.slane %v930_v60, 5  ;;  %v936_v40 = vrot.slane %v934_v19, 4  ;;  %v547_v17 = vshll.u32 %v3843_v34, 16  ;;  %3123 = vmatprep.subr.bf16.mxu0 %v3235_v28  ;;  %3166 = vmatprep.subr.bf16.mxu1 %v3235_v28 }
  0x9d   : > { %755 = vst [vmem:[#allocation2 + $0x8c] sm:$0x1] %v754_v24  ;;  %v923_v42 = vrot.slane %v921_v56, 4  ;;  %v926_v32 = vrot.slane %v924_v12, 5  ;;  %v701_v16 = vsel %vm3488_vm10, %v413_v15, %v700_v10  ;;  %1795 = vrot.lane.b32.xlu1 %v3600_v26, %s3324_s27  ;;  %v3948_v58 = vld [vmem:[#allocation2 + $0x84] sm:$0xf]  ;;  %3124 = vmatpush3.bf16.msra.mxu0 %v3235_v28 }
  0x9e   : > { %v3950_v35 = vld [vmem:[#allocation2 + $0x88] sm:$0xf]  ;;  %v937_v61 = vor.u32 %v936_v40, %v3939_v30  ;;  %702 = vst [vmem:[#allocation2 + $0x30] sm:$0xf] %v701_v16  ;;  %759 = vst.msk [vmem:[#allocation2 + $0x94] sm:$0xf] %vm200_vm0, %v558_v4  ;;  %3174 = vmatpush3.bf16.msra.mxu1 %v3235_v28  ;;  %v549_v7 = vor.u32 %v547_v17, %v3894_v41 }
  0x9f   : > { %v1113_v34 = vshrl.u32 %v3948_v58, 16  ;;  %v1116_v57 = vshll.u32 %v3948_v58, 16  ;;  %v1126_v27 = vshrl.u32 %v3950_v35, 16  ;;  %v3959_v0 = vcombine.low %v3948_v58, %v3950_v35  ;;  %v3236_v13 = vld [vmem:[#allocation3 + $0x30] sm:$0xff]   ;;  %1781 = vrot.lane.b32.xlu0 %v3937_v50, %s3324_s27  ;;  %v756_v54 = vld [vmem:[#allocation2 + $0x90] sm:$0xf] }
  0xa0   : > { %v927_v5 = vor.u32 %v926_v32, %v923_v42  ;;  %v1122_v21 = vshll.u32 %v3950_v35, 16  ;;  %v3964_v47 = vld [vmem:[#allocation2 + $0x2c] sm:$0x1]  ;;  %3125 = vmatprep.subr.bf16.mxu0 %v3236_v13  ;;  %3167 = vmatprep.subr.bf16.mxu1 %v3236_v13  ;;  %v938_v48 = vrot.slane %v937_v61, 4  ;;  %v3238_v12 = vld [vmem:[#allocation3 + $0x38] sm:$0xff]   ;;  %v1306_v10 = vrot.slane %v3907_v59, 5 }
  0xa1   : > { %5041 = vst [vmem:[#allocation13_spill] sm:$0xff] %v3959_v0  ;;  %v1115_v62 = vrot.slane %v1113_v34, 4  ;;  %v1118_v9 = vrot.slane %v1116_v57, 5  ;;  %v1128_v15 = vrot.slane %v1126_v27, 4  ;;  %1797 = vrot.lane.b32.xlu1 %v3959_v0, %s3324_s27  ;;  %v940_v51 = vshll.u32 %v3964_v47, 16  ;;  %3126 = vmatpush3.bf16.msra.mxu0 %v3236_v13 }
  0xa2   : > { %v928_v20 = vrot.slane %v927_v5, 4  ;;  %v1124_v6 = vrot.slane %v1122_v21, 5  ;;  %3175 = vmatpush3.bf16.msra.mxu1 %v3236_v13  ;;  %v423_v28 = vrot.slane %v3885_v18, 4  ;;  %v757_v40 = vsel %vm3488_vm10, %v549_v7, %v756_v54  ;;  %v704_v16 = vld [vmem:[#allocation2 + $0x38] sm:$0x1]  ;;  %3127 = vmatprep.subr.bf16.mxu0 %v3238_v12 }
  0xa3   : > { %v1119_v60 = vor.u32 %v1118_v9, %v1115_v62  ;;  %1814 = vrot.lane.b32.xlu0 %v3847_v46, %s3325_s28  ;;  %v942_v53 = vrot.slane %v940_v51, 5  ;;  %v559_v32 = vrot.slane %v3903_v63, 4  ;;  %758 = vst [vmem:[#allocation2 + $0x90] sm:$0xf] %v757_v40  ;;  %v760_v4 = vld [vmem:[#allocation2 + $0x98] sm:$0x1]  ;;  %3168 = vmatprep.subr.bf16.mxu1 %v3238_v12 }
  0xa4   : > { %v826_v19 = vld [vmem:[#allocation2 + $0x8c] sm:$0x1]  ;;  %v933_v41 = vsel %vm3625_vm14, %v928_v20, %v3939_v30  ;;  %v1129_v29 = vor.u32 %v1128_v15, %v1124_v6  ;;  %v1362_v34 = vrot.slane %v3950_v35, 5  ;;  %v705_v57 = vsel %vm3440_vm4, %v423_v28, %v704_v16  ;;  %v330_v27 = vld [vmem:[%s3453_s21 + $0x20] sm:$0xf] }
  0xa5   : > { %v1132_v56 = vshll.u32 %v826_v19, 16  ;;  %v1120_v24 = vrot.slane %v1119_v60, 4  ;;  %1830 = vrot.lane.b32.xlu1 %v3883_v37, %s3325_s28  ;;  %v943_v17 = vsel %vm3625_vm14, %v938_v48, %v942_v53  ;;  %3128 = vmatpush3.bf16.msra.mxu0 %v3238_v12  ;;  %v2968_v13 = vrot.slane %v3919_v31, 9  ;;  %706 = vst [vmem:[#allocation2 + $0x38] sm:$0x1] %v705_v57 }
  0xa6   : > { %v1130_v42 = vrot.slane %v1129_v29, 4  ;;  %v3984_v59 = vcombine.low %v933_v41, %v943_v17  ;;  %3176 = vmatpush3.bf16.msra.mxu1 %v3238_v12  ;;  %v1308_v5 = vrot.slane %v1306_v10, 4  ;;  %v1309_v21 = vrot.slane %v3964_v47, 5  ;;  %v331_v20 = vld [vmem:[%s3453_s21 + $0x24] sm:$0xf] }
  0xa7   : > { %v1134_v30 = vrot.slane %v1132_v56, 5  ;;  %v1125_v18 = vsel %vm3625_vm14, %v1120_v24, %v1124_v6  ;;  %v761_v35 = vsel %vm3440_vm4, %v559_v32, %v760_v4  ;;  %v2976_v62 = vrot.slane %v3948_v58, 9  ;;  %v4014_v48 = vld [vmem:[#allocation2 + $0x30] sm:$0xf]  ;;  %v4016_v58 = vld [vmem:[#allocation2 + $0x34] sm:$0xf] }
  0xa8   : > { %1816 = vrot.lane.b32.xlu0 %v3984_v59, %s3325_s28  ;;  %762 = vst [vmem:[#allocation2 + $0x98] sm:$0x1] %v761_v35  ;;  %v1364_v9 = vrot.slane %v1362_v34, 4  ;;  %v1365_v15 = vrot.slane %v826_v19, 5  ;;  %v425_v7 = vshrl.u32 %v330_v27, 16  ;;  %v1307_v31 = vsel %vm3499_vm11, %v2968_v13, %v1306_v10 }
  0xa9   : > { %v1135_v61 = vsel %vm3625_vm14, %v1130_v42, %v1134_v30  ;;  %v1310_v47 = vsel %vm3499_vm11, %v1308_v5, %v1309_v21  ;;  %v428_v51 = vshll.u32 %v330_v27, 16  ;;  %v1363_v6 = vsel %vm3499_vm11, %v2976_v62, %v1362_v34  ;;  %v4033_v24 = vld [vmem:[#allocation2 + $0x94] sm:$0xf]  ;;  %v707_v42 = vld [vmem:[#allocation2 + $0x3c] sm:$0xf] }
  0xaa   : > { %v3993_v63 = vcombine.low %v1125_v18, %v1135_v61  ;;  %v1366_v54 = vsel %vm3499_vm11, %v1364_v9, %v1365_v15  ;;  %v427_v19 = vrot.slane %v425_v7, 7  ;;  %v4024_v60 = vcombine.low %v1307_v31, %v1310_v47  ;;  %v346_v30 = vld [vmem:[%s3453_s21 + $0x60] sm:$0xf]  ;;  %v347_v32 = vld [vmem:[%s3453_s21 + $0x64] sm:$0xf] }
  0xab   : > { %v433_v41 = vshrl.u32 %v331_v20, 16  ;;  %v945_v53 = vshrl.u32 %v4014_v48, 16  ;;  %v958_v29 = vshrl.u32 %v4016_v58, 16  ;;  %v4030_v56 = vcombine.low %v1363_v6, %v1366_v54  ;;  %v283_v16 = vld [vmem:[#allocation2 + $0x44] sm:$0x1] }
  0xac   : > { %1832 = vrot.lane.b32.xlu1 %v3993_v63, %s3325_s28  ;;  %1849 = vrot.lane.b32.xlu0 %v3780_v25, %s3326_s29  ;;  %v948_v12 = vshll.u32 %v4014_v48, 16  ;;  %v430_v10 = vor.u32 %v428_v51, %v427_v19  ;;  %v431_v40 = vrot.slane %v427_v19, 4  ;;  %v436_v17 = vshll.u32 %v331_v20, 16  ;;  %v230_v57 = vld [vmem:[#allocation2 + $0x48] sm:$0x1] }
  0xad   : > { %v4035_v28 = vrot.slane %v433_v41, 7  ;;  %v1150_v18 = vshrl.u32 %v4033_v24, 16  ;;  %v4042_v4 = vrot.slane %v945_v53, 4  ;;  %v954_v61 = vshll.u32 %v4016_v58, 16  ;;  %v4048_v27 = vld [vmem:[#allocation2 + $0x90] sm:$0xf] }
  0xae   : > { %v4050_v13 = vrot.slane %v948_v12, 5  ;;  %v4052_v5 = vrot.slane %v958_v29, 4  ;;  %v708_v21 = vsel %vm3488_vm10, %v430_v10, %v707_v42  ;;  %v1146_v62 = vshll.u32 %v4033_v24, 16  ;;  %v332_v31 = vld [vmem:[%s3453_s21 + $0x28] sm:$0xf] }
  0xaf   : > { %v438_v34 = vor.u32 %v436_v17, %v4035_v28  ;;  %709 = vst [vmem:[#allocation2 + $0x3c] sm:$0xf] %v708_v21  ;;  %v561_v15 = vshrl.u32 %v346_v30, 16  ;;  %v564_v7 = vshll.u32 %v346_v30, 16  ;;  %v569_v47 = vshrl.u32 %v347_v32, 16 }
  0xb0   : > { %1865 = vrot.lane.b32.xlu1 %v3755_v14, %s3326_s29  ;;  %1563 = vrot.lane.b32.xlu0 %v3847_v46, %s3321_s24  ;;  %v251_v46 = vld [vmem:[#allocation2 + $0x9c] sm:$0x1]  ;;  %v572_v20 = vshll.u32 %v347_v32, 16  ;;  %v284_v51 = vsel %vm3445_vm5, 0, %v283_v16  ;;  %v333_v54 = vld [vmem:[%s3453_s21 + $0x2c] sm:$0xf] }
  0xb1   : > { %v252_v35 = vsel %vm3440_vm4, 0, %v251_v46  ;;  %v439_v9 = vsel %vm3481_vm9, %v431_v40, %v438_v34  ;;  %v1137_v19 = vshrl.u32 %v4048_v27, 16  ;;  %v4071_v41 = vrot.slane %v954_v61, 5  ;;  %285 = vst [vmem:[#allocation2 + $0x44] sm:$0x1] %v284_v51 }
  0xb2   : > { %253 = vst [vmem:[#allocation2 + $0x9c] sm:$0x1] %v252_v35  ;;  %710 = vst.msk [vmem:[#allocation2 + $0x40] sm:$0xf] %vm200_vm0, %v439_v9  ;;  %v4073_v53 = vrot.slane %v1150_v18, 4  ;;  %v563_v29 = vrot.slane %v561_v15, 7 }
  0xb3   : > { %v1140_v12 = vshll.u32 %v4048_v27, 16  ;;  %v571_v10 = vrot.slane %v569_v47, 7  ;;  %v231_v46 = vsel %vm3440_vm4, 0, %v230_v57  ;;  %v442_v40 = vshrl.u32 %v332_v31, 16  ;;  %v254_v17 = vld [vmem:[#allocation2 + $0xa8] sm:$0x1] }
  0xb4   : > { %1579 = vrot.lane.b32.xlu1 %v3883_v37, %s3321_s24  ;;  %1851 = vrot.lane.b32.xlu0 %v4024_v60, %s3326_s29  ;;  %v307_v37 = vld [vmem:[#allocation2 + $0xa4] sm:$0x1]  ;;  %v566_v42 = vor.u32 %v564_v7, %v563_v29  ;;  %v567_v30 = vrot.slane %v563_v29, 4  ;;  %232 = vst [vmem:[#allocation2 + $0x48] sm:$0x1] %v231_v46  ;;  %v445_v32 = vshll.u32 %v332_v31, 16 }
  0xb5   : > { %v308_v6 = vsel %vm3445_vm5, 0, %v307_v37  ;;  %v450_v16 = vshrl.u32 %v333_v54, 16  ;;  %v4082_v37 = vrot.slane %v1146_v62, 5  ;;  %v574_v18 = vor.u32 %v572_v20, %v571_v10  ;;  %v348_v21 = vld [vmem:[%s3453_s21 + $0x68] sm:$0xf] }
  0xb6   : > { %309 = vst [vmem:[#allocation2 + $0xa4] sm:$0x1] %v308_v6  ;;  %v444_v61 = vrot.slane %v442_v40, 7  ;;  %v453_v34 = vshll.u32 %v333_v54, 16  ;;  %v440_v35 = vrot.slane %v4035_v28, 4  ;;  %v576_v9 = vrot.slane %v571_v10, 4 }
  0xb7   : > { %v4086_v57 = vrot.slane %v450_v16, 7  ;;  %v255_v15 = vsel %vm3440_vm4, 0, %v254_v17  ;;  %v4092_v7 = vld [vmem:[#allocation2 + $0x38] sm:$0x1]  ;;  %v575_v62 = vsel %vm3481_vm9, %v567_v30, %v574_v18  ;;  %v1142_v20 = vrot.slane %v1140_v12, 5 }
  0xb8   : > { %1867 = vrot.lane.b32.xlu1 %v4030_v56, %s3326_s29  ;;  %1565 = vrot.lane.b32.xlu0 %v3984_v59, %s3321_s24  ;;  %v448_v47 = vrot.slane %v444_v61, 4  ;;  %256 = vst [vmem:[#allocation2 + $0xa8] sm:$0x1] %v255_v15  ;;  %766 = vst.msk [vmem:[#allocation2 + $0xa0] sm:$0xf] %vm200_vm0, %v575_v62  ;;  %v447_v51 = vor.u32 %v445_v32, %v444_v61  ;;  %v578_v6 = vshrl.u32 %v348_v21, 16 }
  0xb9   : > { %v763_v31 = vld [vmem:[#allocation2 + $0x9c] sm:$0xf]  ;;  %v961_v54 = vor.u32 %v4052_v5, %v4071_v41  ;;  %v711_v29 = vld [vmem:[#allocation2 + $0x44] sm:$0x1]  ;;  %v455_v10 = vor.u32 %v453_v34, %v4086_v57  ;;  %v964_v46 = vshll.u32 %v4092_v7, 16  ;;  %vm1881_vm15 = vcmask 23552  }
  0xba   : > { %v764_v28 = vsel %vm3488_vm10, %v566_v42, %v763_v31  ;;  %v712_v40 = vsel %vm3440_vm4, %v440_v35, %v711_v29  ;;  %v349_v42 = vld [vmem:[%s3453_s21 + $0x6c] sm:$0xf]  ;;  %v580_v61 = vrot.slane %v578_v6, 7  ;;  %vm1963_vm1 = vcmask 72704  }
  0xbb   : > { %765 = vst [vmem:[#allocation2 + $0x9c] sm:$0xf] %v764_v28  ;;  %713 = vst [vmem:[#allocation2 + $0x44] sm:$0x1] %v712_v40  ;;  %v456_v5 = vsel %vm3481_vm9, %v448_v47, %v455_v10  ;;  %v714_v30 = vld [vmem:[#allocation2 + $0x48] sm:$0xf] }
  0xbc   : > { %1581 = vrot.lane.b32.xlu1 %v3993_v63, %s3321_s24  ;;  %1643 = vrot.lane.b32.xlu0 %v3780_v25, %s3319_s22  ;;  %v1139_v25 = vrot.slane %v1137_v19, 4  ;;  %v4105_v19 = vld [vmem:[#allocation2 + $0x98] sm:$0x1]  ;;  %v715_v18 = vsel %vm3488_vm10, %v447_v51, %v714_v30  ;;  %717 = vst.msk [vmem:[#allocation2 + $0x4c] sm:$0xf] %vm200_vm0, %v456_v5  ;;  %v586_v34 = vshrl.u32 %v349_v42, 16 }
  0xbd   : > { %v767_v12 = vld [vmem:[#allocation2 + $0xa4] sm:$0x1]  ;;  %v1156_v16 = vshll.u32 %v4105_v19, 16  ;;  %716 = vst [vmem:[#allocation2 + $0x48] sm:$0xf] %v715_v18  ;;  %v962_v35 = vrot.slane %v961_v54, 4 }
  0xbe   : > { %v768_v17 = vsel %vm3440_vm4, %v576_v9, %v767_v12  ;;  %v1143_v32 = vor.u32 %v1142_v20, %v1139_v25  ;;  %v966_v9 = vrot.slane %v964_v46, 5  ;;  %v4134_v25 = vcombine.low %v4048_v27, %v4033_v24 }
  0xbf   : > { %769 = vst [vmem:[#allocation2 + $0xa4] sm:$0x1] %v768_v17  ;;  %v770_v62 = vld [vmem:[#allocation2 + $0xa8] sm:$0xf]  ;;  %v1158_v20 = vrot.slane %v1156_v16, 5  ;;  %v1313_v28 = vrot.slane %v4016_v58, 5 }
  0xc0   : > { %1659 = vrot.lane.b32.xlu1 %v3755_v14, %s3319_s22  ;;  %1645 = vrot.lane.b32.xlu0 %v4024_v60, %s3319_s22  ;;  %v951_v14 = vor.u32 %v4050_v13, %v4042_v4  ;;  %v581_v4 = vshll.u32 %v348_v21, 16  ;;  %v1153_v13 = vor.u32 %v4073_v53, %v4082_v37  ;;  %v4128_v53 = vcombine.low %v4014_v48, %v4016_v58  ;;  %v4174_v30 = vld [vmem:[#allocation2 + $0xa0] sm:$0xf] }
  0xc1   : > { %5043 = vst [vmem:[#allocation15_spill] sm:$0xff] %v4134_v25  ;;  %v1144_v31 = vrot.slane %v1143_v32, 4  ;;  %v4139_v51 = vrot.slane %v586_v34, 7  ;;  %v589_v6 = vshll.u32 %v349_v42, 16  ;;  %v967_v54 = vsel %vm3625_vm14, %v962_v35, %v966_v9  ;;  %v4162_v42 = vld [vmem:[#allocation2 + $0x3c] sm:$0xf] }
  0xc2   : > { %5042 = vst [vmem:[#allocation14_spill] sm:$0xff] %v4128_v53  ;;  %v952_v21 = vrot.slane %v951_v14, 4  ;;  %v583_v15 = vor.u32 %v581_v4, %v580_v61  ;;  %v1154_v47 = vrot.slane %v1153_v13, 4  ;;  %v2969_v58 = vrot.slane %v4014_v48, 9  ;;  %v4165_v4 = vld [vmem:[#allocation2 + $0x40] sm:$0xf] }
  0xc3   : > { %v1369_v12 = vrot.slane %v4033_v24, 5  ;;  %v1149_v10 = vsel %vm3625_vm14, %v1144_v31, %v4082_v37  ;;  %v1315_v46 = vrot.slane %v1313_v28, 4  ;;  %v1316_v40 = vrot.slane %v4092_v7, 5  ;;  %v286_v13 = vld [vmem:[#allocation2 + $0x50] sm:$0x1] }
  0xc4   : > { %1661 = vrot.lane.b32.xlu1 %v4030_v56, %s3319_s22  ;;  %1678 = vrot.lane.b32.xlu0 %v3937_v50, %s3320_s23  ;;  %v957_v14 = vsel %vm3625_vm14, %v952_v21, %v4071_v41  ;;  %v771_v29 = vsel %vm3488_vm10, %v583_v15, %v770_v62  ;;  %v1159_v41 = vsel %vm3625_vm14, %v1154_v47, %v1158_v20  ;;  %v584_v48 = vrot.slane %v580_v61, 4  ;;  %v233_v20 = vld [vmem:[#allocation2 + $0x54] sm:$0x1]  ;;  %v4365_v33 = vld [vmem:[#allocation2 + $0x4c] sm:$0xf] }
  0xc5   : > { %772 = vst [vmem:[#allocation2 + $0xa8] sm:$0xf] %v771_v29  ;;  %v4160_v17 = vcombine.low %v957_v14, %v967_v54  ;;  %v591_v24 = vor.u32 %v589_v6, %v4139_v51  ;;  %v4169_v37 = vcombine.low %v1149_v10, %v1159_v41  ;;  %v1314_v7 = vsel %vm3499_vm11, %v2969_v58, %v1313_v28  ;;  %v334_v28 = vld [vmem:[%s3453_s21 + $0x30] sm:$0xf] }
  0xc6   : > { %v1371_v5 = vrot.slane %v1369_v12, 4  ;;  %v1317_v32 = vsel %vm3499_vm11, %v1315_v46, %v1316_v40  ;;  %v1372_v16 = vrot.slane %v4105_v19, 5  ;;  %v969_v18 = vshrl.u32 %v4162_v42, 16  ;;  %v335_v46 = vld [vmem:[%s3453_s21 + $0x34] sm:$0xf] }
  0xc7   : > { %v972_v61 = vshll.u32 %v4162_v42, 16  ;;  %v982_v34 = vshrl.u32 %v4165_v4, 16  ;;  %v978_v21 = vshll.u32 %v4165_v4, 16  ;;  %v592_v35 = vsel %vm3481_vm9, %v584_v48, %v591_v24 }
  0xc8   : > { %1694 = vrot.lane.b32.xlu1 %v3959_v0, %s3320_s23  ;;  %1680 = vrot.lane.b32.xlu0 %v4128_v53, %s3320_s23  ;;  %v287_v19 = vsel %vm3445_vm5, 0, %v286_v13  ;;  %v1174_v9 = vshrl.u32 %v4174_v30, 16  ;;  %v1170_v15 = vshll.u32 %v4174_v30, 16  ;;  %773 = vst.msk [vmem:[#allocation2 + $0xac] sm:$0xf] %vm200_vm0, %v592_v35  ;;  %v4196_v62 = vcombine.low %v1314_v7, %v1317_v32 }
  0xc9   : > { %288 = vst [vmem:[#allocation2 + $0x50] sm:$0x1] %v287_v19  ;;  %v1373_v6 = vsel %vm3499_vm11, %v1371_v5, %v1372_v16  ;;  %v971_v29 = vrot.slane %v969_v18, 4  ;;  %v974_v58 = vrot.slane %v972_v61, 5  ;;  %v4209_v10 = vrot.slane %v978_v21, 5 }
  0xca   : > { %v457_v41 = vrot.slane %v4086_v57, 4  ;;  %v4213_v40 = vrot.slane %v1170_v15, 5  ;;  %v1176_v48 = vrot.slane %v1174_v9, 4  ;;  %v234_v24 = vsel %vm3440_vm4, 0, %v233_v20  ;;  %v257_v15 = vld [vmem:[#allocation2 + $0xb4] sm:$0x1] }
  0xcb   : > { %v459_v13 = vshrl.u32 %v334_v28, 16  ;;  %v593_v5 = vrot.slane %v4139_v51, 4  ;;  %235 = vst [vmem:[#allocation2 + $0x54] sm:$0x1] %v234_v24  ;;  %v462_v57 = vshll.u32 %v334_v28, 16  ;;  %v467_v61 = vshrl.u32 %v335_v46, 16 }
  0xcc   : > { %1696 = vrot.lane.b32.xlu1 %v4134_v25, %s3320_s23  ;;  %1713 = vrot.lane.b32.xlu0 %v3984_v59, %s3323_s26  ;;  %v2977_v59 = vrot.slane %v4048_v27, 9  ;;  %v4184_v27 = vld [vmem:[#allocation2 + $0x9c] sm:$0xf]  ;;  %v470_v21 = vshll.u32 %v335_v46, 16  ;;  %v1177_v51 = vor.u32 %v1176_v48, %v4213_v40  ;;  %v1006_v1 = vshrl.u32 %v4365_v33, 16 }
  0xcd   : > { %v1161_v14 = vshrl.u32 %v4184_v27, 16  ;;  %v1164_v54 = vshll.u32 %v4184_v27, 16  ;;  %v461_v18 = vrot.slane %v459_v13, 7  ;;  %v4236_v28 = vrot.slane %v467_v61, 7 }
  0xce   : > { %v1370_v31 = vsel %vm3499_vm11, %v2977_v59, %v1369_v12  ;;  %v984_v12 = vrot.slane %v982_v34, 4  ;;  %v4223_v59 = vld [vmem:[#allocation2 + $0xa4] sm:$0x1]  ;;  %v4250_v46 = vcombine.low %v4184_v27, %v4174_v30  ;;  %v1327_v38 = vrot.slane %v4365_v33, 5 }
  0xcf   : > { %v4219_v7 = vcombine.low %v1370_v31, %v1373_v6  ;;  %v1163_v32 = vrot.slane %v1161_v14, 4  ;;  %v1166_v16 = vrot.slane %v1164_v54, 5  ;;  %v1180_v19 = vshll.u32 %v4223_v59, 16  ;;  %v350_v6 = vld [vmem:[%s3453_s21 + $0x70] sm:$0xf] }
  0xd0   : > { %1729 = vrot.lane.b32.xlu1 %v3993_v63, %s3323_s26  ;;  %v310_v63 = vld [vmem:[#allocation2 + $0xb0] sm:$0x1]  ;;  %1715 = vrot.lane.b32.xlu0 %v4160_v17, %s3323_s26  ;;  %v465_v20 = vrot.slane %v461_v18, 4  ;;  %v4241_v14 = vcombine.low %v4162_v42, %v4165_v4  ;;  %5045 = vst [vmem:[#allocation17_spill] sm:$0xff] %v4250_v46  ;;  %v472_v13 = vor.u32 %v470_v21, %v4236_v28  ;;  %v595_v21 = vshrl.u32 %v350_v6, 16 }
  0xd1   : > { %v311_v47 = vsel %vm3445_vm5, 0, %v310_v63  ;;  %v975_v63 = vor.u32 %v974_v58, %v971_v29  ;;  %v718_v34 = vld [vmem:[#allocation2 + $0x50] sm:$0x1]  ;;  %v1167_v54 = vor.u32 %v1166_v16, %v1163_v32  ;;  %v351_v58 = vld [vmem:[%s3453_s21 + $0x74] sm:$0xf]  ;;  %v4254_v16 = vpop.permute.xlu0 %1639  ;;  %v1182_v61 = vrot.slane %v1180_v19, 5 }
  0xd2   : > { %312 = vst [vmem:[#allocation2 + $0xb0] sm:$0x1] %v311_v47  ;;  %v719_v9 = vsel %vm3440_vm4, %v457_v41, %v718_v34  ;;  %v464_v47 = vor.u32 %v462_v57, %v461_v18  ;;  %5044 = vst [vmem:[#allocation16_spill] sm:$0xff] %v4241_v14  ;;  %v313_v41 = vld [vmem:[#allocation2 + $0xbc] sm:$0x1]  ;;  %v1178_v18 = vrot.slane %v1177_v51, 4 }
  0xd3   : > { %720 = vst [vmem:[#allocation2 + $0x50] sm:$0x1] %v719_v9  ;;  %v976_v48 = vrot.slane %v975_v63, 4  ;;  %v260_v57 = vld [vmem:[#allocation2 + $0xc0] sm:$0x1]  ;;  %v258_v9 = vsel %vm3440_vm4, 0, %v257_v15  ;;  %v473_v63 = vsel %vm3481_vm9, %v465_v20, %v472_v13 }
  0xd4   : > { %1731 = vrot.lane.b32.xlu1 %v4169_v37, %s3323_s26  ;;  %1748 = vrot.lane.b32.xlu0 %v4024_v60, %s3322_s25  ;;  %v4221_v60 = vld [vmem:[#allocation2 + $0x44] sm:$0x1]  ;;  %v352_v32 = vld [vmem:[%s3453_s21 + $0x78] sm:$0xf]  ;;  %v721_v34 = vld [vmem:[#allocation2 + $0x54] sm:$0xf] }
  0xd5   : > { %v988_v35 = vshll.u32 %v4221_v60, 16  ;;  %259 = vst [vmem:[#allocation2 + $0xb4] sm:$0x1] %v258_v9  ;;  %724 = vst.msk [vmem:[#allocation2 + $0x58] sm:$0xf] %vm200_vm0, %v473_v63  ;;  %v606_v51 = vshll.u32 %v351_v58, 16 }
  0xd6   : > { %v597_v15 = vrot.slane %v595_v21, 7  ;;  %v261_v20 = vsel %vm3440_vm4, 0, %v260_v57  ;;  %v474_v63 = vrot.slane %v4236_v28, 4  ;;  %v615_v21 = vshll.u32 %v352_v32, 16 }
  0xd7   : > { %262 = vst [vmem:[#allocation2 + $0xc0] sm:$0x1] %v261_v20  ;;  %vm1996_vm2 = vcmask 97280   ;;  %vm2029_vm3 = vcmask 121856   ;;  %vm2128_vm6 = vcmask 195584   ;;  %vm2161_vm7 = vcmask 220160  }
  0xd8   : > { %1764 = vrot.lane.b32.xlu1 %v4030_v56, %s3322_s25  ;;  %1750 = vrot.lane.b32.xlu0 %v4196_v62, %s3322_s25  ;;  %v985_v56 = vor.u32 %v984_v12, %v4209_v10  ;;  %v289_v12 = vld [vmem:[#allocation2 + $0x5c] sm:$0x1]  ;;  %v4282_v9 = vpop.permute.xlu0 %1674 }
  0xd9   : > { %v774_v31 = vld [vmem:[#allocation2 + $0xb0] sm:$0x1]  ;;  %v290_v19 = vsel %vm3445_vm5, 0, %v289_v12  ;;  %v4278_v12 = vpop.permute.xlu1 %1690 }
  0xda   : > { %v775_v29 = vsel %vm3440_vm4, %v593_v5, %v774_v31  ;;  %v986_v24 = vrot.slane %v985_v56, 4  ;;  %v990_v5 = vrot.slane %v988_v35, 5  ;;  %v722_v56 = vsel %vm3488_vm10, %v464_v47, %v721_v34  ;;  %291 = vst [vmem:[#allocation2 + $0x5c] sm:$0x1] %v290_v19 }
  0xdb   : > { %776 = vst [vmem:[#allocation2 + $0xb0] sm:$0x1] %v775_v29  ;;  %v598_v31 = vshll.u32 %v350_v6, 16  ;;  %v1168_v29 = vrot.slane %v1167_v54, 4  ;;  %723 = vst [vmem:[#allocation2 + $0x54] sm:$0xf] %v722_v56  ;;  %v981_v54 = vsel %vm3625_vm14, %v976_v48, %v4209_v10  ;;  %v1183_v10 = vsel %vm3625_vm14, %v1178_v18, %v1182_v61 }
  0xdc   : > { %1766 = vrot.lane.b32.xlu1 %v4219_v7, %s3322_s25  ;;  %1783 = vrot.lane.b32.xlu0 %v4128_v53, %s3324_s27  ;;  %v603_v35 = vshrl.u32 %v351_v58, 16  ;;  %v314_v47 = vsel %vm3445_vm5, 0, %v313_v41  ;;  %v612_v6 = vshrl.u32 %v352_v32, 16  ;;  %v991_v58 = vsel %vm3625_vm14, %v986_v24, %v990_v5  ;;  %v353_v24 = vld [vmem:[%s3453_s21 + $0x7c] sm:$0xf] }
  0xdd   : > { %315 = vst [vmem:[#allocation2 + $0xbc] sm:$0x1] %v314_v47  ;;  %v600_v41 = vor.u32 %v598_v31, %v597_v15  ;;  %v601_v34 = vrot.slane %v597_v15, 4  ;;  %v1173_v57 = vsel %vm3625_vm14, %v1168_v29, %v4213_v40  ;;  %v4292_v5 = vcombine.low %v981_v54, %v991_v58  ;;  %v777_v40 = vld [vmem:[#allocation2 + $0xb4] sm:$0xf] }
  0xde   : > { %v605_v13 = vrot.slane %v603_v35, 7  ;;  %v614_v56 = vrot.slane %v612_v6, 7  ;;  %v1320_v31 = vrot.slane %v4165_v4, 5  ;;  %v4300_v18 = vcombine.low %v1173_v57, %v1183_v10  ;;  %v316_v57 = vld [vmem:[#allocation2 + $0xc8] sm:$0x1] }
  0xdf   : > { %v778_v29 = vsel %vm3488_vm10, %v600_v41, %v777_v40  ;;  %v620_v28 = vshrl.u32 %v353_v24, 16  ;;  %v1376_v4 = vrot.slane %v4174_v30, 5  ;;  %v2970_v6 = vrot.slane %v4162_v42, 9 }
  0xe0   : > { %1799 = vrot.lane.b32.xlu1 %v4134_v25, %s3324_s27  ;;  %1785 = vrot.lane.b32.xlu0 %v4241_v14, %s3324_s27  ;;  %v608_v48 = vor.u32 %v606_v51, %v605_v13  ;;  %v610_v61 = vrot.slane %v605_v13, 4  ;;  %v4305_v51 = vpop.permute.xlu1 %1692  ;;  %779 = vst [vmem:[#allocation2 + $0xb4] sm:$0xf] %v778_v29  ;;  %v617_v47 = vor.u32 %v615_v21, %v614_v56  ;;  %v1322_v54 = vrot.slane %v1320_v31, 4  ;;  %v784_v13 = vld [vmem:[#allocation2 + $0xc0] sm:$0xf] }
  0xe1   : > { %v725_v32 = vld [vmem:[#allocation2 + $0x5c] sm:$0x1]  ;;  %v1323_v58 = vrot.slane %v4221_v60, 5  ;;  %v622_v41 = vrot.slane %v620_v28, 7  ;;  %v2978_v10 = vrot.slane %v4184_v27, 9  ;;  %v1321_v21 = vsel %vm3499_vm11, %v2970_v6, %v1320_v31 }
  0xe2   : > { %v609_v35 = vsel %vm3481_vm9, %v601_v34, %v608_v48  ;;  %v726_v19 = vsel %vm3440_vm4, %v474_v63, %v725_v32  ;;  %v623_v34 = vshll.u32 %v353_v24, 16  ;;  %v1378_v48 = vrot.slane %v1376_v4, 4  ;;  %v263_v29 = vld [vmem:[#allocation2 + $0xcc] sm:$0x1]  ;;  %v319_v6 = vld [vmem:[#allocation2 + $0xd4] sm:$0x1] }
  0xe3   : > { %780 = vst.msk [vmem:[#allocation2 + $0xb8] sm:$0xf] %vm200_vm0, %v609_v35  ;;  %727 = vst [vmem:[#allocation2 + $0x5c] sm:$0x1] %v726_v19  ;;  %v1379_v63 = vrot.slane %v4223_v59, 5  ;;  %v785_v42 = vsel %vm3488_vm10, %v617_v47, %v784_v13  ;;  %v1324_v24 = vsel %vm3499_vm11, %v1322_v54, %v1323_v58  ;;  %v317_v27 = vsel %vm3445_vm5, 0, %v316_v57 }
  0xe4   : > { %1801 = vrot.lane.b32.xlu1 %v4250_v46, %s3324_s27  ;;  %1818 = vrot.lane.b32.xlu0 %v4160_v17, %s3325_s28  ;;  %v781_v15 = vld [vmem:[#allocation2 + $0xbc] sm:$0x1]  ;;  %v4312_v20 = vpop.permute.xlu0 %1676  ;;  %786 = vst [vmem:[#allocation2 + $0xc0] sm:$0xf] %v785_v42  ;;  %v618_v59 = vrot.slane %v614_v56, 4  ;;  %v625_v35 = vor.u32 %v623_v34, %v622_v41  ;;  %v1377_v40 = vsel %vm3499_vm11, %v2978_v10, %v1376_v4  ;;  %v627_v32 = vrot.slane %v622_v41, 4 }
  0xe5   : > { %v782_v30 = vsel %vm3440_vm4, %v610_v61, %v781_v15  ;;  %318 = vst [vmem:[#allocation2 + $0xc8] sm:$0x1] %v317_v27  ;;  %v1380_v31 = vsel %vm3499_vm11, %v1378_v48, %v1379_v63  ;;  %v4344_v61 = vcombine.low %v1321_v21, %v1324_v24  ;;  %v4361_v15 = vld [vmem:[#allocation2 + $0x48] sm:$0xf]  ;;  %v1002_v57 = vshll.u32 %v4365_v33, 16 }
  0xe6   : > { %783 = vst [vmem:[#allocation2 + $0xbc] sm:$0x1] %v782_v30  ;;  %v4348_v56 = vcombine.low %v1377_v40, %v1380_v31  ;;  %v626_v28 = vsel %vm3481_vm9, %v618_v59, %v625_v35  ;;  %v993_v58 = vshrl.u32 %v4361_v15, 16  ;;  %v4374_v13 = vld [vmem:[#allocation2 + $0xa8] sm:$0xf]  ;;  %v996_v34 = vshll.u32 %v4361_v15, 16 }
  0xe7   : > { %787 = vst.msk [vmem:[#allocation2 + $0xc4] sm:$0xf] %vm200_vm0, %v626_v28  ;;  %v4376_v30 = vld [vmem:[#allocation2 + $0xac] sm:$0xf]  ;;  %v320_v10 = vsel %vm3445_vm5, 0, %v319_v6  ;;  %v1185_v63 = vshrl.u32 %v4374_v13, 16 }
  0xe8   : > { %1834 = vrot.lane.b32.xlu1 %v4169_v37, %s3325_s28  ;;  %1820 = vrot.lane.b32.xlu0 %v4292_v5, %s3325_s28  ;;  %v4336_v39 = vpop.permute.xlu0 %1559  ;;  %321 = vst [vmem:[#allocation2 + $0xd4] sm:$0x1] %v320_v10  ;;  %v1188_v42 = vshll.u32 %v4374_v13, 16  ;;  %v1198_v21 = vshrl.u32 %v4376_v30, 16  ;;  %v1194_v24 = vshll.u32 %v4376_v30, 16  ;;  %v995_v2 = vrot.slane %v993_v58, 4 }
  0xe9   : > { %v998_v59 = vrot.slane %v996_v34, 5  ;;  %v1004_v35 = vrot.slane %v1002_v57, 5  ;;  %v1008_v40 = vrot.slane %v1006_v1, 4  ;;  %v811_v31 = vld [vmem:[#allocation2 + $0x50] sm:$0x1]  ;;  %v1187_v28 = vrot.slane %v1185_v63, 4 }
  0xea   : > { %v1012_v34 = vshll.u32 %v811_v31, 16  ;;  %v4413_v63 = vcombine.low %v4361_v15, %v4365_v33  ;;  %v4451_v53 = vld [vmem:[#allocation2 + $0x54] sm:$0xf]  ;;  %vm1930_vm0 = vcmask 48128   ;;  %vm2095_vm5 = vcmask 171008  }
  0xeb   : > { %v999_v6 = vor.u32 %v998_v59, %v995_v2  ;;  %v1009_v58 = vor.u32 %v1008_v40, %v1004_v35  ;;  %v4421_v59 = vcombine.low %v4374_v13, %v4376_v30 }
  0xec   : > { %1836 = vrot.lane.b32.xlu1 %v4300_v18, %s3325_s28  ;;  %1853 = vrot.lane.b32.xlu0 %v4196_v62, %s3326_s29  ;;  %v1014_v2 = vrot.slane %v1012_v34, 5 }
  0xed   : > { %v4326_v60 = vpop.permute.xlu1 %1655 }
  0xf0   : > { %1869 = vrot.lane.b32.xlu1 %v4219_v7, %s3326_s29  ;;  %1567 = vrot.lane.b32.xlu0 %v4160_v17, %s3321_s24  ;;  %v264_v17 = vsel %vm3440_vm4, 0, %v263_v29 }
  0xf1   : > { %265 = vst [vmem:[#allocation2 + $0xcc] sm:$0x1] %v264_v17  ;;  %v1196_v17 = vrot.slane %v1194_v24, 5  ;;  %v1010_v24 = vrot.slane %v1009_v58, 4 }
  0xf2   : > { %v4352_v19 = vpop.permute.xlu1 %1657 }
  0xf3   : > { %v1015_v34 = vsel %vm3625_vm14, %v1010_v24, %v1014_v2  ;;  %v2979_v24 = vrot.slane %v4374_v13, 9 }
  0xf4   : > { %1583 = vrot.lane.b32.xlu1 %v4169_v37, %s3321_s24  ;;  %1855 = vrot.lane.b32.xlu0 %v4344_v61, %s3326_s29  ;;  %v788_v37 = vld [vmem:[#allocation2 + $0xc8] sm:$0x1] }
  0xf5   : > { %v4359_v4 = vpop.permute.xlu0 %1641  ;;  %v789_v47 = vsel %vm3440_vm4, %v627_v32, %v788_v37  ;;  %v1190_v32 = vrot.slane %v1188_v42, 5  ;;  %v1200_v37 = vrot.slane %v1198_v21, 4  ;;  %v1000_v21 = vrot.slane %v999_v6, 4 }
  0xf6   : > { %v4369_v54 = vpop.permute.xlu1 %1760  ;;  %790 = vst [vmem:[#allocation2 + $0xc8] sm:$0x1] %v789_v47  ;;  %vm2062_vm4 = vcmask 146432  }
  0xf7   : > { %v1191_v1 = vor.u32 %v1190_v32, %v1187_v28  ;;  %v1201_v57 = vor.u32 %v1200_v37, %v1196_v17  ;;  %v1005_v58 = vsel %vm3625_vm14, %v1000_v21, %v1004_v35  ;;  %v1329_v21 = vrot.slane %v1327_v38, 4 }
  0xf8   : > { %1871 = vrot.lane.b32.xlu1 %v4348_v56, %s3326_s29  ;;  %1569 = vrot.lane.b32.xlu0 %v4292_v5, %s3321_s24  ;;  %v4446_v35 = vcombine.low %v1005_v58, %v1015_v34 }
  0xf9   : > { %v4378_v41 = vpop.permute.xlu0 %1744  ;;  %v1192_v28 = vrot.slane %v1191_v1, 4  ;;  %v1202_v32 = vrot.slane %v1201_v57, 4 }
  0xfa   : > { %v4387_v48 = vpop.permute.xlu1 %1762 }
  0xfb   : > { %v1197_v57 = vsel %vm3625_vm14, %v1192_v28, %v1196_v17  ;;  %v4457_v17 = vld [vmem:[#allocation2 + $0x58] sm:$0xf] }
  0xfc   : > { %1585 = vrot.lane.b32.xlu1 %v4300_v18, %s3321_s24  ;;  %1647 = vrot.lane.b32.xlu0 %v4196_v62, %s3319_s22  ;;  %v835_v62 = vld [vmem:[#allocation2 + $0xb0] sm:$0x1]  ;;  %v4465_v28 = vld [vmem:[#allocation2 + $0xb8] sm:$0xf] }
  0xfd   : > { %v4395_v27 = vpop.permute.xlu0 %1746  ;;  %v1204_v10 = vshll.u32 %v835_v62, 16  ;;  %v1386_v25 = vrot.slane %v835_v62, 5 }
  0xfe   : > { %v4399_v29 = vpop.permute.xlu1 %1561 }
  0xff   : > { %v1206_v37 = vrot.slane %v1204_v10, 5  ;;  %v2971_v10 = vrot.slane %v4361_v15, 9 }
 0x100   : > { %1663 = vrot.lane.b32.xlu1 %v4219_v7, %s3319_s22  ;;  %1649 = vrot.lane.b32.xlu0 %v4344_v61, %s3319_s22 }
 0x101   : > { %v4403_v47 = vpop.permute.xlu0 %1575  ;;  %v1207_v33 = vsel %vm3625_vm14, %v1202_v32, %v1206_v37  ;;  %v1328_v13 = vsel %vm3499_vm11, %v2971_v10, %v1327_v38  ;;  %v1017_v32 = vshrl.u32 %v4451_v53, 16  ;;  %v1020_v37 = vshll.u32 %v4451_v53, 16 }
 0x102   : > { %v4407_v7 = vpop.permute.xlu1 %1577  ;;  %v4455_v15 = vcombine.low %v1197_v57, %v1207_v33  ;;  %v5046_v38 = vcombine.low %v3503_v49, %v3455_v8  ;;  %v1030_v33 = vshrl.u32 %v4457_v17, 16  ;;  %v1026_v10 = vshll.u32 %v4457_v17, 16 }
 0x103   : > { %v1222_v8 = vshrl.u32 %v4465_v28, 16  ;;  %v1218_v49 = vshll.u32 %v4465_v28, 16 }
 0x104   : > { %1665 = vrot.lane.b32.xlu1 %v4348_v56, %s3319_s22  ;;  %1682 = vrot.lane.b32.xlu0 %v4241_v14, %s3320_s23  ;;  %v1884_v58 = vsel %vm1881_vm15, %v5046_v38, %v4336_v39  ;;  %v4505_v0 = vrot.slane %v1026_v10, 5  ;;  %v1032_v50 = vrot.slane %v1030_v33, 4 }
 0x105   : > { %v4415_v42 = vpop.permute.xlu0 %1709  ;;  %v1932_v38 = vsel %vm1930_vm0, %v1884_v58, %v4254_v16 }
 0x106   : > { %v4423_v40 = vpop.permute.xlu1 %1725 }
 0x108   : > { %1698 = vrot.lane.b32.xlu1 %v4250_v46, %s3320_s23  ;;  %1684 = vrot.lane.b32.xlu0 %v4413_v63, %s3320_s23  ;;  %v1383_v46 = vrot.slane %v4376_v30, 5  ;;  %v1330_v30 = vrot.slane %v811_v31, 5  ;;  %v4463_v31 = vld [vmem:[#allocation2 + $0xb4] sm:$0xf] }
 0x109   : > { %v4428_v6 = vpop.permute.xlu0 %1711 }
 0x10a   : > { %v4437_v1 = vpop.permute.xlu1 %1727  ;;  %v1385_v14 = vrot.slane %v1383_v46, 4  ;;  %v1384_v62 = vsel %vm3499_vm11, %v2979_v24, %v1383_v46  ;;  %v1209_v46 = vshrl.u32 %v4463_v31, 16  ;;  %v1022_v24 = vrot.slane %v1020_v37, 5  ;;  %v4519_v37 = vld [vmem:[#allocation2 + $0xbc] sm:$0x1] }
 0x10c   : > { %1700 = vrot.lane.b32.xlu1 %v4421_v59, %s3320_s23  ;;  %1717 = vrot.lane.b32.xlu0 %v4292_v5, %s3323_s26  ;;  %v1387_v57 = vsel %vm3499_vm11, %v1385_v14, %v1386_v25  ;;  %v1908_v25 = vsel %vm1881_vm15, %v3927_v52, %v4403_v47  ;;  %v4509_v47 = vld [vmem:[#allocation2 + $0x5c] sm:$0x1]  ;;  %v1211_v26 = vrot.slane %v1209_v46, 4 }
 0x10d   : > { %v4449_v2 = vpop.permute.xlu0 %1779  ;;  %v4503_v22 = vcombine.low %v1384_v62, %v1387_v57  ;;  %v1965_v62 = vsel %vm1963_vm1, %v1932_v38, %v4282_v9  ;;  %v1033_v57 = vor.u32 %v1032_v50, %v4505_v0  ;;  %v1887_v9 = vsel %vm1881_vm15, %v3570_v55, %v4399_v29 }
 0x10e   : > { %v1998_v58 = vsel %vm1996_vm2, %v1965_v62, %v4415_v42  ;;  %v4537_v50 = vcombine.low %v4451_v53, %v4457_v17  ;;  %v1228_v55 = vshll.u32 %v4519_v37, 16 }
 0x10f   : > { %v4459_v5 = vpop.permute.xlu1 %1795  ;;  %v2031_v29 = vsel %vm2029_vm3, %v1998_v58, %v4378_v41 }
 0x110   : > { %1733 = vrot.lane.b32.xlu1 %v4300_v18, %s3323_s26  ;;  %1719 = vrot.lane.b32.xlu0 %v4446_v35, %s3323_s26  ;;  %v1331_v18 = vsel %vm3499_vm11, %v1329_v21, %v1330_v30  ;;  %v1212_v21 = vshll.u32 %v4463_v31, 16  ;;  %v1019_v30 = vrot.slane %v1017_v32, 4  ;;  %v1948_v32 = vsel %vm1930_vm0, %v1908_v25, %v4326_v60 }
 0x111   : > { %v4480_v34 = vpop.permute.xlu0 %1781  ;;  %v4499_v14 = vcombine.low %v1328_v13, %v1331_v18  ;;  %v4511_v13 = vrot.slane %v1218_v49, 5  ;;  %v1224_v18 = vrot.slane %v1222_v8, 4  ;;  %v1036_v60 = vshll.u32 %v4509_v47, 16 }
 0x112   : > { %v1981_v33 = vsel %vm1963_vm1, %v1948_v32, %v4278_v12  ;;  %v1911_v12 = vsel %vm1881_vm15, %v3558_v45, %v4407_v7  ;;  %v1934_v49 = vsel %vm1930_vm0, %v1887_v9, %v4359_v4  ;;  %v2064_v25 = vsel %vm2062_vm4, %v2031_v29, %v4449_v2 }
 0x113   : > { %v4492_v39 = vpop.permute.xlu1 %1797  ;;  %v2014_v42 = vsel %vm1996_vm2, %v1981_v33, %v4423_v40  ;;  %v4549_v40 = vcombine.low %v4463_v31, %v4465_v28  ;;  %v1038_v7 = vrot.slane %v1036_v60, 5  ;;  %v1950_v32 = vsel %vm1930_vm0, %v1911_v12, %v4352_v19 }
 0x114   : > { %1735 = vrot.lane.b32.xlu1 %v4455_v15, %s3323_s26  ;;  %1752 = vrot.lane.b32.xlu0 %v4344_v61, %s3322_s25  ;;  %v1214_v61 = vrot.slane %v1212_v21, 5  ;;  %v1225_v21 = vor.u32 %v1224_v18, %v4511_v13  ;;  %v2047_v41 = vsel %vm2029_vm3, %v2014_v42, %v4369_v54  ;;  %v1230_v62 = vrot.slane %v1228_v55, 5 }
 0x115   : > { %v1815_v36 = vpop.permute.xlu0 %1814  ;;  %v2080_v4 = vsel %vm2062_vm4, %v2047_v41, %v4459_v5  ;;  %v1967_v54 = vsel %vm1963_vm1, %v1934_v49, %v4312_v20  ;;  %v2972_v29 = vrot.slane %v4451_v53, 9  ;;  %v1337_v49 = vrot.slane %v4509_v47, 5 }
 0x116   : > { %v1215_v46 = vor.u32 %v1214_v61, %v1211_v26  ;;  %v1226_v18 = vrot.slane %v1225_v21, 4  ;;  %v2000_v19 = vsel %vm1996_vm2, %v1967_v54, %v4428_v6 }
 0x117   : > { %v1831_v16 = vpop.permute.xlu1 %1830 }
 0x118   : > { %1768 = vrot.lane.b32.xlu1 %v4348_v56, %s3322_s25  ;;  %1754 = vrot.lane.b32.xlu0 %v4499_v14, %s3322_s25  ;;  %v1023_v56 = vor.u32 %v1022_v24, %v1019_v30  ;;  %v1034_v30 = vrot.slane %v1033_v57, 4  ;;  %v2097_v24 = vsel %vm2095_vm5, %v2064_v25, %v1815_v36  ;;  %v1216_v61 = vrot.slane %v1215_v46, 4 }
 0x119   : > { %v2113_v36 = vsel %vm2095_vm5, %v2080_v4, %v1831_v16  ;;  %v1983_v16 = vsel %vm1963_vm1, %v1950_v32, %v4305_v51  ;;  %v1231_v60 = vsel %vm3625_vm14, %v1226_v18, %v1230_v62  ;;  %v2033_v51 = vsel %vm2029_vm3, %v2000_v19, %v4395_v27  ;;  %v839_v4 = vld [vmem:[#allocation2 + $0xc0] sm:$0xf] }
 0x11a   : > { %v1817_v10 = vpop.permute.xlu0 %1816  ;;  %v1024_v8 = vrot.slane %v1023_v56, 4  ;;  %v1039_v20 = vsel %vm3625_vm14, %v1034_v30, %v1038_v7  ;;  %v2016_v6 = vsel %vm1996_vm2, %v1983_v16, %v4437_v1  ;;  %v2066_v1 = vsel %vm2062_vm4, %v2033_v51, %v4480_v34 }
 0x11b   : > { %v1334_v46 = vrot.slane %v4457_v17, 5  ;;  %v2099_v21 = vsel %vm2095_vm5, %v2066_v1, %v1817_v10  ;;  %v1390_v34 = vrot.slane %v4465_v28, 5  ;;  %v2980_v28 = vrot.slane %v4463_v31, 9 }
 0x11c   : > { %1770 = vrot.lane.b32.xlu1 %v4503_v22, %s3322_s25  ;;  %1787 = vrot.lane.b32.xlu0 %v4413_v63, %s3324_s27  ;;  %v1029_v5 = vsel %vm3625_vm14, %v1024_v8, %v4505_v0  ;;  %v1221_v0 = vsel %vm3625_vm14, %v1216_v61, %v4511_v13  ;;  %v2049_v13 = vsel %vm2029_vm3, %v2016_v6, %v4387_v48  ;;  %v1393_v25 = vrot.slane %v4519_v37, 5 }
 0x11d   : > { %v4599_v33 = vcombine.low %v1029_v5, %v1039_v20  ;;  %v4609_v27 = vcombine.low %v1221_v0, %v1231_v60  ;;  %v2082_v55 = vsel %vm2062_vm4, %v2049_v13, %v4492_v39  ;;  %v1336_v8 = vrot.slane %v1334_v46, 4  ;;  %v841_v60 = vld [vmem:[#allocation2 + $0xc8] sm:$0x1] }
 0x11e   : > { %v1833_v26 = vpop.permute.xlu1 %1832  ;;  %v1850_v38 = vpop.permute.xlu0 %1849  ;;  %v1335_v53 = vsel %vm3499_vm11, %v2972_v29, %v1334_v46  ;;  %v1391_v31 = vsel %vm3499_vm11, %v2980_v28, %v1390_v34  ;;  %v1396_v62 = vshrl.u32 %v839_v4, 16  ;;  %v1399_v54 = vshll.u32 %v839_v4, 16 }
 0x11f   : > { %v2130_v2 = vsel %vm2128_vm6, %v2097_v24, %v1850_v38  ;;  %v2115_v17 = vsel %vm2095_vm5, %v2082_v55, %v1833_v26  ;;  %v1392_v26 = vrot.slane %v1390_v34, 4  ;;  %v1338_v47 = vsel %vm3499_vm11, %v1336_v8, %v1337_v49 }
 0x120   : > { %1803 = vrot.lane.b32.xlu1 %v4421_v59, %s3324_s27  ;;  %1789 = vrot.lane.b32.xlu0 %v4537_v50, %s3324_s27  ;;  %v4649_v24 = vcombine.low %v1335_v53, %v1338_v47  ;;  %v1398_v5 = vrot.slane %v1396_v62, 4  ;;  %v1401_v20 = vrot.slane %v1399_v54, 5  ;;  %v1415_v46 = vshll.u32 %v841_v60, 16  ;;  %v4715_v47 = vld [vmem:[#allocation2 + $0xd0] sm:$0xf] }
 0x121   : > { %3129 = vmatprep.mubr.msk.bf16.mxu0 %vm2161_vm7, %v2130_v2  ;;  %v1394_v37 = vsel %vm3499_vm11, %v1392_v26, %v1393_v25  ;;  %v840_v2 = vld [vmem:[#allocation2 + $0xc4] sm:$0xf]  ;;  %v2981_v26 = vrot.slane %v839_v4, 9  ;;  %v1427_v53 = vrot.slane %v841_v60, 5 }
 0x122   : > { %v1866_v56 = vpop.permute.xlu1 %1865  ;;  %v4581_v57 = vpop.permute.xlu0 %1563  ;;  %v4655_v61 = vcombine.low %v1391_v31, %v1394_v37  ;;  %v1424_v29 = vrot.slane %v840_v2, 5  ;;  %v4719_v37 = vld [vmem:[#allocation2 + $0xcc] sm:$0xf] }
 0x123   : > { %v2146_v58 = vsel %vm2128_vm6, %v2113_v36, %v1866_v56  ;;  %v1409_v36 = vshrl.u32 %v840_v2, 16  ;;  %v1405_v56 = vshll.u32 %v840_v2, 16  ;;  %v1430_v54 = vshrl.u32 %v4719_v37, 16 }
 0x124   : > { %1805 = vrot.lane.b32.xlu1 %v4549_v40, %s3324_s27  ;;  %3145 = vmatprep.mubr.msk.bf16.mxu1 %vm2161_vm7, %v2146_v58  ;;  %v1426_v25 = vrot.slane %v1424_v29, 4 }
 0x125   : > { %1822 = vrot.lane.b32.xlu0 %v4446_v35, %s3325_s28  ;;  %v1407_v16 = vrot.slane %v1405_v56, 5  ;;  %v1411_v6 = vrot.slane %v1409_v36, 4  ;;  %v1433_v36 = vshll.u32 %v4719_v37, 16  ;;  %v1432_v60 = vrot.slane %v1430_v54, 4 }
 0x126   : > { %v4597_v9 = vpop.permute.xlu1 %1579  ;;  %v1852_v42 = vpop.permute.xlu0 %1851  ;;  %v1428_v62 = vsel %vm3499_vm11, %v1426_v25, %v1427_v53 }
 0x127   : > { %v2132_v12 = vsel %vm2128_vm6, %v2099_v21, %v1852_v42  ;;  %v1412_v1 = vor.u32 %v1411_v6, %v1407_v16  ;;  %v4695_v21 = vcombine.low %v839_v4, %v840_v2  ;;  %v1439_v2 = vshll.u32 %v4715_v47, 16 }
 0x128   : > { %1838 = vrot.lane.b32.xlu1 %v4455_v15, %s3325_s28  ;;  %3130 = vmatmul.mubr.msk.bf16.vlgmr.msra.gmra.mrb[0].mxu0 %vm2161_vm7, %v2132_v12  ;;  %v1417_v12 = vrot.slane %v1415_v46, 5  ;;  %v1425_v4 = vsel %vm3499_vm11, %v2981_v26, %v1424_v29  ;;  %v4746_v46 = vld [vmem:[#allocation2 + $0xd4] sm:$0x1] }
 0x129   : > { %1824 = vrot.lane.b32.xlu0 %v4599_v33, %s3325_s28  ;;  %v1413_v55 = vrot.slane %v1412_v1, 4  ;;  %v1890_v1 = vsel %vm1881_vm15, %v3642_v11, %v4581_v57 }
 0x12a   : > { %v1868_v48 = vpop.permute.xlu1 %1867  ;;  %v4622_v39 = vpop.permute.xlu0 %1565 }
 0x12b   : > { %v2148_v10 = vsel %vm2128_vm6, %v2115_v17, %v1868_v48 }
 0x12c   : > { %1840 = vrot.lane.b32.xlu1 %v4609_v27, %s3325_s28  ;;  %3146 = vmatmul.mubr.msk.bf16.vlgmr.msra.gmra.mrb[0].mxu1 %vm2161_vm7, %v2148_v10  ;;  %v1418_v10 = vsel %vm3625_vm14, %v1413_v55, %v1417_v12 }
 0x12d   : > { %1857 = vrot.lane.b32.xlu0 %v4499_v14, %s3326_s29 }
 0x12e   : > { %v4631_v30 = vpop.permute.xlu1 %1581  ;;  %v4637_v7 = vpop.permute.xlu0 %1643 }
 0x130   : > { %1873 = vrot.lane.b32.xlu1 %v4503_v22, %s3326_s29 }
 0x131   : > { %1571 = vrot.lane.b32.xlu0 %v4446_v35, %s3321_s24 }
 0x132   : > { %v4647_v41 = vpop.permute.xlu1 %1659  ;;  %v4651_v38 = vpop.permute.xlu0 %1645 }
 0x134   : > { %1587 = vrot.lane.b32.xlu1 %v4455_v15, %s3321_s24 }
 0x135   : > { %1859 = vrot.lane.b32.xlu0 %v4649_v24, %s3326_s29 }
 0x136   : > { %v4659_v18 = vpop.permute.xlu1 %1661  ;;  %v4661_v32 = vpop.permute.xlu0 %1678 }
 0x138   : > { %1875 = vrot.lane.b32.xlu1 %v4655_v61, %s3326_s29 }
 0x139   : > { %1573 = vrot.lane.b32.xlu0 %v4599_v33, %s3321_s24 }
 0x13a   : > { %v4667_v35 = vpop.permute.xlu1 %1694  ;;  %v4669_v15 = vpop.permute.xlu0 %1680 }
 0x13c   : > { %1589 = vrot.lane.b32.xlu1 %v4609_v27, %s3321_s24 }
 0x13d   : > { %1651 = vrot.lane.b32.xlu0 %v4499_v14, %s3319_s22  ;;  %v1402_v14 = vor.u32 %v1401_v20, %v1398_v5  ;;  %v4739_v20 = vcombine.low %v1425_v4, %v1428_v62 }
 0x13e   : > { %v4675_v19 = vpop.permute.xlu1 %1696  ;;  %v4677_v58 = vpop.permute.xlu0 %1713 }
 0x13f   : > { %v1403_v42 = vrot.slane %v1402_v14, 4  ;;  %v1435_v14 = vrot.slane %v1433_v36, 5  ;;  %v5049_v36 = vld [vmem:[#allocation13_spill] sm:$0xff] }
 0x140   : > { %1667 = vrot.lane.b32.xlu1 %v4503_v22, %s3319_s22 }
 0x141   : > { %1653 = vrot.lane.b32.xlu0 %v4649_v24, %s3319_s22  ;;  %v1408_v48 = vsel %vm3625_vm14, %v1403_v42, %v1407_v16  ;;  %v1441_v16 = vrot.slane %v1439_v2, 5  ;;  %v1936_v42 = vsel %vm1930_vm0, %v1890_v1, %v4637_v7  ;;  %v1436_v29 = vor.u32 %v1435_v14, %v1432_v60 }
 0x142   : > { %v4683_v0 = vpop.permute.xlu1 %1729  ;;  %v4685_v51 = vpop.permute.xlu0 %1715  ;;  %v4713_v28 = vcombine.low %v1408_v48, %v1418_v10  ;;  %v1969_v12 = vsel %vm1963_vm1, %v1936_v42, %v4661_v32  ;;  %v1449_v7 = vshll.u32 %v4746_v46, 16 }
 0x143   : > { %v2002_v10 = vsel %vm1996_vm2, %v1969_v12, %v4677_v58  ;;  %v1437_v4 = vrot.slane %v1436_v29, 4 }
 0x144   : > { %1669 = vrot.lane.b32.xlu1 %v4655_v61, %s3319_s22 }
 0x145   : > { %1686 = vrot.lane.b32.xlu0 %v4537_v50, %s3320_s23  ;;  %v1442_v14 = vsel %vm3625_vm14, %v1437_v4, %v1441_v16 }
 0x146   : > { %v4691_v22 = vpop.permute.xlu1 %1731  ;;  %v1749_v13 = vpop.permute.xlu0 %1748 }
 0x147   : > { %v2035_v26 = vsel %vm2029_vm3, %v2002_v10, %v1749_v13 }
 0x148   : > { %1702 = vrot.lane.b32.xlu1 %v4549_v40, %s3320_s23 }
 0x149   : > { %1688 = vrot.lane.b32.xlu0 %v3927_v52, %s3320_s23 }
 0x14a   : > { %v1765_v34 = vpop.permute.xlu1 %1764  ;;  %v4699_v17 = vpop.permute.xlu0 %1750 }
 0x14c   : > { %1704 = vrot.lane.b32.xlu1 %v4695_v21, %s3320_s23 }
 0x14d   : > { %1721 = vrot.lane.b32.xlu0 %v4599_v33, %s3323_s26 }
 0x14e   : > { %v4709_v8 = vpop.permute.xlu1 %1766  ;;  %v1784_v49 = vpop.permute.xlu0 %1783 }
 0x150   : > { %1737 = vrot.lane.b32.xlu1 %v4609_v27, %s3323_s26  ;;  %v1443_v27 = vshrl.u32 %v4715_v47, 16 }
 0x151   : > { %1723 = vrot.lane.b32.xlu0 %v3757_v23, %s3323_s26 }
 0x152   : > { %v1800_v31 = vpop.permute.xlu1 %1799  ;;  %v4721_v33 = vpop.permute.xlu0 %1785  ;;  %v1445_v6 = vrot.slane %v1443_v27, 4 }
 0x154   : > { %1739 = vrot.lane.b32.xlu1 %v4713_v28, %s3323_s26  ;;  %v1446_v11 = vor.u32 %v1445_v6, %v1441_v16 }
 0x155   : > { %1756 = vrot.lane.b32.xlu0 %v4649_v24, %s3322_s25 }
 0x156   : > { %v4735_v56 = vpop.permute.xlu1 %1801  ;;  %v1819_v5 = vpop.permute.xlu0 %1818  ;;  %v1447_v13 = vrot.slane %v1446_v11, 4 }
 0x158   : > { %1772 = vrot.lane.b32.xlu1 %v4655_v61, %s3322_s25  ;;  %v5047_v61 = vld [vmem:[#allocation9_spill] sm:$0xff] }
 0x159   : > { %1758 = vrot.lane.b32.xlu0 %v3707_v43, %s3322_s25  ;;  %v1914_v55 = vsel %vm1881_vm15, %v5047_v61, %v4597_v9 }
 0x15a   : > { %v1835_v24 = vpop.permute.xlu1 %1834  ;;  %v1821_v48 = vpop.permute.xlu0 %1820  ;;  %v1952_v57 = vsel %vm1930_vm0, %v1914_v55, %v4647_v41  ;;  %v2068_v41 = vsel %vm2062_vm4, %v2035_v26, %v1784_v49  ;;  %v5048_v49 = vld [vmem:[#allocation12_spill] sm:$0xff] }
 0x15b   : > { %v1985_v9 = vsel %vm1963_vm1, %v1952_v57, %v4667_v35  ;;  %v2101_v58 = vsel %vm2095_vm5, %v2068_v41, %v1819_v5  ;;  %v3034_v35 = vcombine.low %v4719_v37, %v4715_v47  ;;  %v1917_v5 = vsel %vm1881_vm15, %v5049_v36, %v4631_v30  ;;  %v5051_v57 = vld [vmem:[#allocation10_spill] sm:$0xff] }
 0x15c   : > { %1774 = vrot.lane.b32.xlu1 %v4739_v20, %s3322_s25  ;;  %v2018_v25 = vsel %vm1996_vm2, %v1985_v9, %v4683_v0  ;;  %v1451_v0 = vrot.slane %v1449_v7, 5  ;;  %v1954_v60 = vsel %vm1930_vm0, %v1917_v5, %v4659_v18 }
 0x15d   : > { %1791 = vrot.lane.b32.xlu0 %v3927_v52, %s3324_s27  ;;  %v2051_v53 = vsel %vm2029_vm3, %v2018_v25, %v1765_v34  ;;  %v1893_v34 = vsel %vm1881_vm15, %v5048_v49, %v4622_v39  ;;  %v5052_v49 = vld [vmem:[#allocation14_spill] sm:$0xff] }
 0x15e   : > { %v1837_v32 = vpop.permute.xlu1 %1836  ;;  %v1854_v27 = vpop.permute.xlu0 %1853  ;;  %v2084_v52 = vsel %vm2062_vm4, %v2051_v53, %v1800_v31  ;;  %v1938_v54 = vsel %vm1930_vm0, %v1893_v34, %v4651_v38  ;;  %v1452_v30 = vsel %vm3625_vm14, %v1447_v13, %v1451_v0 }
 0x15f   : > { %v2134_v2 = vsel %vm2128_vm6, %v2101_v58, %v1854_v27  ;;  %v2117_v62 = vsel %vm2095_vm5, %v2084_v52, %v1835_v24  ;;  %v1971_v39 = vsel %vm1963_vm1, %v1938_v54, %v4669_v15  ;;  %v1987_v15 = vsel %vm1963_vm1, %v1954_v60, %v4675_v19  ;;  %v5053_v54 = vld [vmem:[#allocation15_spill] sm:$0xff] }
 0x160   : > { %1807 = vrot.lane.b32.xlu1 %v4695_v21, %s3324_s27  ;;  %3133 = vmatprep.mubr.msk.bf16.mxu0 %vm2161_vm7, %v2134_v2  ;;  %v2004_v38 = vsel %vm1996_vm2, %v1971_v39, %v4685_v51  ;;  %v2020_v18 = vsel %vm1996_vm2, %v1987_v15, %v4691_v22  ;;  %v3035_v19 = vcombine.low %v1442_v14, %v1452_v30  ;;  %v2982_v22 = vrot.slane %v4719_v37, 9 }
 0x161   : > { %1793 = vrot.lane.b32.xlu0 %v3558_v45, %s3324_s27  ;;  %v1458_v45 = vrot.slane %v4715_v47, 5  ;;  %v2037_v1 = vsel %vm2029_vm3, %v2004_v38, %v4699_v17  ;;  %v2053_v3 = vsel %vm2029_vm3, %v2020_v18, %v4709_v8  ;;  %v5050_v8 = vld [vmem:[#allocation11_spill] sm:$0xff] }
 0x162   : > { %v1870_v21 = vpop.permute.xlu1 %1869  ;;  %v1568_v6 = vpop.permute.xlu0 %1567  ;;  %v2070_v51 = vsel %vm2062_vm4, %v2037_v1, %v4721_v33  ;;  %v1461_v33 = vrot.slane %v4746_v46, 5 }
 0x163   : > { %v2150_v31 = vsel %vm2128_vm6, %v2117_v62, %v1870_v21  ;;  %v2103_v16 = vsel %vm2095_vm5, %v2070_v51, %v1821_v48  ;;  %v1460_v17 = vrot.slane %v1458_v45, 4  ;;  %v1459_v37 = vsel %vm3499_vm11, %v2982_v22, %v1458_v45 }
 0x164   : > { %1809 = vrot.lane.b32.xlu1 %v3034_v35, %s3324_s27  ;;  %3149 = vmatprep.mubr.msk.bf16.mxu1 %vm2161_vm7, %v2150_v31  ;;  %v1896_v34 = vsel %vm1881_vm15, %v5052_v49, %v1568_v6 }
 0x165   : > { %1826 = vrot.lane.b32.xlu0 %v3757_v23, %s3325_s28  ;;  %v2086_v23 = vsel %vm2062_vm4, %v2053_v3, %v4735_v56  ;;  %v1462_v56 = vsel %vm3499_vm11, %v1460_v17, %v1461_v33  ;;  %v5054_v3 = vld [vmem:[#allocation16_spill] sm:$0xff] }
 0x166   : > { %v1584_v47 = vpop.permute.xlu1 %1583  ;;  %v1856_v24 = vpop.permute.xlu0 %1855  ;;  %v2119_v61 = vsel %vm2095_vm5, %v2086_v23, %v1837_v32  ;;  %v3036_v11 = vcombine.low %v1459_v37, %v1462_v56 }
 0x167   : > { %v2136_v42 = vsel %vm2128_vm6, %v2103_v16, %v1856_v24  ;;  %v1920_v31 = vsel %vm1881_vm15, %v5053_v54, %v1584_v47 }
 0x168   : > { %1842 = vrot.lane.b32.xlu1 %v4713_v28, %s3325_s28  ;;  %3134 = vmatmul.mubr.msk.bf16.gmra.mrb[4].mxu0 %vm2161_vm7, %v2136_v42  ;;  %v5055_v42 = vld [vmem:[#allocation17_spill] sm:$0xff] }
 0x169   : > { %1828 = vrot.lane.b32.xlu0 %v5050_v8, %s3325_s28 }
 0x16a   : > { %v1872_v55 = vpop.permute.xlu1 %1871  ;;  %v1570_v12 = vpop.permute.xlu0 %1569 }
 0x16b   : > { %v2152_v28 = vsel %vm2128_vm6, %v2119_v61, %v1872_v55  ;;  %v1899_v16 = vsel %vm1881_vm15, %v5054_v3, %v1570_v12 }
 0x16c   : > { %1844 = vrot.lane.b32.xlu1 %v3035_v19, %s3325_s28  ;;  %3150 = vmatmul.mubr.msk.bf16.gmra.mrb[4].mxu1 %vm2161_vm7, %v2152_v28 }
 0x16d   : > { %1861 = vrot.lane.b32.xlu0 %v3707_v43, %s3326_s29 }
 0x16e   : > { %v1586_v46 = vpop.permute.xlu1 %1585  ;;  %v1648_v48 = vpop.permute.xlu0 %1647 }
 0x16f   : > { %v1940_v21 = vsel %vm1930_vm0, %v1896_v34, %v1648_v48  ;;  %v1923_v22 = vsel %vm1881_vm15, %v5055_v42, %v1586_v46 }
 0x170   : > { %1877 = vrot.lane.b32.xlu1 %v4739_v20, %s3326_s29 }
 0x171   : > { %1863 = vrot.lane.b32.xlu0 %v5051_v57, %s3326_s29 }
 0x172   : > { %v1664_v10 = vpop.permute.xlu1 %1663  ;;  %v1650_v29 = vpop.permute.xlu0 %1649 }
 0x173   : > { %v1956_v39 = vsel %vm1930_vm0, %v1920_v31, %v1664_v10  ;;  %v1942_v17 = vsel %vm1930_vm0, %v1899_v16, %v1650_v29 }
 0x174   : > { %1879 = vrot.lane.b32.xlu1 %v3036_v11, %s3326_s29 }
 0x176   : > { %v1666_v7 = vpop.permute.xlu1 %1665  ;;  %v1683_v9 = vpop.permute.xlu0 %1682 }
 0x177   : > { %v1973_v36 = vsel %vm1963_vm1, %v1940_v21, %v1683_v9  ;;  %v1958_v8 = vsel %vm1930_vm0, %v1923_v22, %v1666_v7 }
 0x17a   : > { %v1699_v44 = vpop.permute.xlu1 %1698  ;;  %v1685_v26 = vpop.permute.xlu0 %1684 }
 0x17b   : > { %v1989_v60 = vsel %vm1963_vm1, %v1956_v39, %v1699_v44  ;;  %v1975_v33 = vsel %vm1963_vm1, %v1942_v17, %v1685_v26 }
 0x17e   : > { %v1701_v32 = vpop.permute.xlu1 %1700  ;;  %v1718_v25 = vpop.permute.xlu0 %1717 }
 0x17f   : > { %v2006_v45 = vsel %vm1996_vm2, %v1973_v36, %v1718_v25  ;;  %v1991_v28 = vsel %vm1963_vm1, %v1958_v8, %v1701_v32 }
 0x182   : > { %v1734_v43 = vpop.permute.xlu1 %1733  ;;  %v1720_v41 = vpop.permute.xlu0 %1719 }
 0x183   : > { %v2022_v6 = vsel %vm1996_vm2, %v1989_v60, %v1734_v43  ;;  %v2008_v55 = vsel %vm1996_vm2, %v1975_v33, %v1720_v41 }
 0x186   : > { %v1736_v53 = vpop.permute.xlu1 %1735  ;;  %v1753_v58 = vpop.permute.xlu0 %1752 }
 0x187   : > { %v2039_v38 = vsel %vm2029_vm3, %v2006_v45, %v1753_v58  ;;  %v2024_v56 = vsel %vm1996_vm2, %v1991_v28, %v1736_v53 }
 0x18a   : > { %v1769_v27 = vpop.permute.xlu1 %1768  ;;  %v1755_v20 = vpop.permute.xlu0 %1754 }
 0x18b   : > { %v2055_v15 = vsel %vm2029_vm3, %v2022_v6, %v1769_v27  ;;  %v2041_v12 = vsel %vm2029_vm3, %v2008_v55, %v1755_v20 }
 0x18e   : > { %v1771_v35 = vpop.permute.xlu1 %1770  ;;  %v1788_v13 = vpop.permute.xlu0 %1787 }
 0x18f   : > { %v2072_v30 = vsel %vm2062_vm4, %v2039_v38, %v1788_v13  ;;  %v2057_v46 = vsel %vm2029_vm3, %v2024_v56, %v1771_v35 }
 0x192   : > { %v1804_v52 = vpop.permute.xlu1 %1803  ;;  %v1790_v2 = vpop.permute.xlu0 %1789 }
 0x193   : > { %v2088_v18 = vsel %vm2062_vm4, %v2055_v15, %v1804_v52  ;;  %v2074_v48 = vsel %vm2062_vm4, %v2041_v12, %v1790_v2 }
 0x196   : > { %v1806_v4 = vpop.permute.xlu1 %1805 }
 0x197   : > { %v1823_v0 = vpop.permute.xlu0 %1822  ;;  %v2090_v10 = vsel %vm2062_vm4, %v2057_v46, %v1806_v4 }
 0x198   : > { %v2105_v1 = vsel %vm2095_vm5, %v2072_v30, %v1823_v0 }
 0x19a   : > { %v1839_v62 = vpop.permute.xlu1 %1838 }
 0x19b   : > { %v1825_v5 = vpop.permute.xlu0 %1824  ;;  %v2121_v24 = vsel %vm2095_vm5, %v2088_v18, %v1839_v62 }
 0x19c   : > { %v2107_v11 = vsel %vm2095_vm5, %v2074_v48, %v1825_v5 }
 0x19e   : > { %v1841_v14 = vpop.permute.xlu1 %1840 }
 0x19f   : > { %v1858_v47 = vpop.permute.xlu0 %1857  ;;  %v2123_v7 = vsel %vm2095_vm5, %v2090_v10, %v1841_v14 }
 0x1a0   : > { %v2138_v51 = vsel %vm2128_vm6, %v2105_v1, %v1858_v47 }
 0x1a1   : > { %3137 = vmatprep.mubr.msk.bf16.mxu0 %vm2161_vm7, %v2138_v51 }
 0x1a2   : > { %v1874_v19 = vpop.permute.xlu1 %1873 }
 0x1a3   : > { %v2154_v23 = vsel %vm2128_vm6, %v2121_v24, %v1874_v19  ;;  %v1572_v61 = vpop.permute.xlu0 %1571 }
 0x1a4   : > { %3153 = vmatprep.mubr.msk.bf16.mxu1 %vm2161_vm7, %v2154_v23  ;;  %v1902_v39 = vsel %vm1881_vm15, %v4413_v63, %v1572_v61 }
 0x1a6   : > { %v1588_v37 = vpop.permute.xlu1 %1587 }
 0x1a7   : > { %v1860_v57 = vpop.permute.xlu0 %1859  ;;  %v1926_v38 = vsel %vm1881_vm15, %v4421_v59, %v1588_v37 }
 0x1a8   : > { %v2140_v29 = vsel %vm2128_vm6, %v2107_v11, %v1860_v57 }
 0x1a9   : > { %3138 = vmatmul.mubr.msk.bf16.gmra.mrb[8].mxu0 %vm2161_vm7, %v2140_v29 }
 0x1aa   : > { %v1876_v9 = vpop.permute.xlu1 %1875 }
 0x1ab   : > { %v2156_v44 = vsel %vm2128_vm6, %v2123_v7, %v1876_v9  ;;  %v1574_v26 = vpop.permute.xlu0 %1573  ;;  %v3327_v9 = vmov 1966171168  }
 0x1ac   : > { %3154 = vmatmul.mubr.msk.bf16.gmra.mrb[8].mxu1 %vm2161_vm7, %v2156_v44  ;;  %v1905_v1 = vsel %vm1881_vm15, %v4537_v50, %v1574_v26  ;;  %v2460_v44 = vunpack.c.l.s4 %v3327_v9  ;;  %v2462_v26 = vlaneseq }
 0x1ae   : > { %v1590_v32 = vpop.permute.xlu1 %1589 }
 0x1af   : > { %v1652_v25 = vpop.permute.xlu0 %1651  ;;  %v1929_v16 = vsel %vm1881_vm15, %v4549_v40, %v1590_v32  ;;  %v2461_v32 = vunpack.c.0.s8 %v2460_v44 }
 0x1b0   : > { %v1944_v60 = vsel %vm1930_vm0, %v1902_v39, %v1652_v25  ;;  %v2463_v25 = vshrl.u32 %v2462_v26, 7 }
 0x1b2   : > { %v1668_v43 = vpop.permute.xlu1 %1667 }
 0x1b3   : > { %v1654_v41 = vpop.permute.xlu0 %1653  ;;  %v1960_v30 = vsel %vm1930_vm0, %v1926_v38, %v1668_v43  ;;  %v4922_v43 = vld [vmem:[#allocation5] ss:$0 sm:$0xff] }
 0x1b4   : > { %v1946_v51 = vsel %vm1930_vm0, %v1905_v1, %v1654_v41 }
 0x1b6   : > { %v1670_v53 = vpop.permute.xlu1 %1669 }
 0x1b7   : > { %v1687_v58 = vpop.permute.xlu0 %1686  ;;  %v1962_v23 = vsel %vm1930_vm0, %v1929_v16, %v1670_v53 }
 0x1b8   : > { %v1977_v14 = vsel %vm1963_vm1, %v1944_v60, %v1687_v58  ;;  %v4925_v58 = vsub.s32 %v2461_v32, %v2463_v25 }
 0x1ba   : > { %v1703_v27 = vpop.permute.xlu1 %1702 }
 0x1bb   : > { %v1689_v20 = vpop.permute.xlu0 %1688  ;;  %v1993_v47 = vsel %vm1963_vm1, %v1960_v30, %v1703_v27 }
 0x1bc   : > { %v1979_v24 = vsel %vm1963_vm1, %v1946_v51, %v1689_v20 }
 0x1be   : > { %v1705_v35 = vpop.permute.xlu1 %1704 }
 0x1bf   : > { %v1722_v13 = vpop.permute.xlu0 %1721  ;;  %v1995_v61 = vsel %vm1963_vm1, %v1962_v23, %v1705_v35 }
 0x1c0   : > { %v2010_v15 = vsel %vm1996_vm2, %v1977_v14, %v1722_v13 }
 0x1c2   : > { %v1738_v52 = vpop.permute.xlu1 %1737 }
 0x1c3   : > { %v1724_v2 = vpop.permute.xlu0 %1723  ;;  %v2026_v3 = vsel %vm1996_vm2, %v1993_v47, %v1738_v52 }
 0x1c4   : > { %v2012_v42 = vsel %vm1996_vm2, %v1979_v24, %v1724_v2 }
 0x1c6   : > { %v1740_v4 = vpop.permute.xlu1 %1739 }
 0x1c7   : > { %v1757_v0 = vpop.permute.xlu0 %1756  ;;  %v2028_v28 = vsel %vm1996_vm2, %v1995_v61, %v1740_v4 }
 0x1c8   : > { %v2043_v63 = vsel %vm2029_vm3, %v2010_v15, %v1757_v0 }
 0x1ca   : > { %v1773_v49 = vpop.permute.xlu1 %1772 }
 0x1cb   : > { %v1759_v34 = vpop.permute.xlu0 %1758  ;;  %v2059_v19 = vsel %vm2029_vm3, %v2026_v3, %v1773_v49 }
 0x1cc   : > { %v2045_v8 = vsel %vm2029_vm3, %v2012_v42, %v1759_v34 }
 0x1ce   : > { %v1775_v62 = vpop.permute.xlu1 %1774 }
 0x1cf   : > { %v1792_v21 = vpop.permute.xlu0 %1791  ;;  %v2061_v56 = vsel %vm2029_vm3, %v2028_v28, %v1775_v62 }
 0x1d0   : > { %v2076_v59 = vsel %vm2062_vm4, %v2043_v63, %v1792_v21 }
 0x1d2   : > { %v1808_v54 = vpop.permute.xlu1 %1807 }
 0x1d3   : > { %v1794_v31 = vpop.permute.xlu0 %1793  ;;  %v2092_v22 = vsel %vm2062_vm4, %v2059_v19, %v1808_v54 }
 0x1d4   : > { %v2078_v12 = vsel %vm2062_vm4, %v2045_v8, %v1794_v31 }
 0x1d6   : > { %v1810_v36 = vpop.permute.xlu1 %1809 }
 0x1d7   : > { %v1827_v5 = vpop.permute.xlu0 %1826  ;;  %v2094_v11 = vsel %vm2062_vm4, %v2061_v56, %v1810_v36 }
 0x1d8   : > { %v2109_v50 = vsel %vm2095_vm5, %v2076_v59, %v1827_v5 }
 0x1da   : > { %v1843_v45 = vpop.permute.xlu1 %1842 }
 0x1db   : > { %v1829_v6 = vpop.permute.xlu0 %1828  ;;  %v2125_v40 = vsel %vm2095_vm5, %v2092_v22, %v1843_v45 }
 0x1dc   : > { %v2111_v48 = vsel %vm2095_vm5, %v2078_v12, %v1829_v6 }
 0x1de   : > { %v1845_v18 = vpop.permute.xlu1 %1844 }
 0x1df   : > { %v1862_v17 = vpop.permute.xlu0 %1861  ;;  %v2127_v10 = vsel %vm2095_vm5, %v2094_v11, %v1845_v18 }
 0x1e0   : > { %v2142_v33 = vsel %vm2128_vm6, %v2109_v50, %v1862_v17 }
 0x1e1   : > { %3141 = vmatprep.mubr.msk.bf16.mxu0 %vm2161_vm7, %v2142_v33 }
 0x1e2   : > { %v1878_v55 = vpop.permute.xlu1 %1877 }
 0x1e3   : > { %v2158_v37 = vsel %vm2128_vm6, %v2125_v40, %v1878_v55  ;;  %v1864_v46 = vpop.permute.xlu0 %1863 }
 0x1e4   : > { %3157 = vmatprep.mubr.msk.bf16.mxu1 %vm2161_vm7, %v2158_v37  ;;  %v2144_v57 = vsel %vm2128_vm6, %v2111_v48, %v1864_v46 }
 0x1e5   : > { %3142 = vmatmul.mubr.msk.bf16.gmra.mrb[12].mxu0 %vm2161_vm7, %v2144_v57 }
 0x1e6   : > { %v1880_v29 = vpop.permute.xlu1 %1879 }
 0x1e7   : > { %v2160_v7 = vsel %vm2128_vm6, %v2127_v10, %v1880_v29 }
 0x1e8   : > { %3158 = vmatmul.mubr.msk.bf16.gmra.mrb[12].mxu1 %vm2161_vm7, %v2160_v7 }
 0x1fb   : > { %v3131_v41 = vpop.f32.mrb[0].mxu0 }
 0x1fc   : > { %v2309_v53 = vadd.f32 %v3131_v41, %v4922_v43  ;;  %v2300_v27 = vpop.f32.mrb[1].mxu0 }
 0x1fd   : > { %v2301_v20 = vadd.f32 %v4922_v43, %v2300_v27  ;;  %v3132_v35 = vpop.f32.mrb[2].mxu0 }
 0x1fe   : > { %v2429_v52 = vmax.f32 %v2309_v53, 0.0  ;;  %v2312_v2 = vadd.f32 %v3132_v35, %v4922_v43  ;;  %v2303_v4 = vpop.f32.mrb[3].mxu0 }
 0x1ff   : > { %v3147_v13 = vpop.f32.mrb[0].mxu1  ;;  %v2427_v34 = vmax.f32 %v2301_v20, 0.0  ;;  %v2304_v62 = vadd.f32 %v4922_v43, %v2303_v4 }
 0x200   : > { %v2373_v0 = vadd.f32 %v3147_v13, %v4922_v43  ;;  %v2364_v49 = vpop.f32.mrb[1].mxu1  ;;  %v2479_v31 = vrot.slane %v2429_v52, %v4925_v58  ;;  %v2430_v36 = vmax.f32 %v2312_v2, 0.0 }
 0x201   : > { %v2365_v21 = vadd.f32 %v4922_v43, %v2364_v49  ;;  %v3148_v54 = vpop.f32.mrb[2].mxu1  ;;  %v2465_v60 = vrot.slane %v2427_v34, %v4925_v58  ;;  %v2428_v38 = vmax.f32 %v2304_v62, 0.0 }
 0x202   : > { %v2445_v5 = vmax.f32 %v2373_v0, 0.0  ;;  %v2376_v39 = vadd.f32 %v3148_v54, %v4922_v43  ;;  %v2367_v45 = vpop.f32.mrb[3].mxu1  ;;  %v2717_v30 = vrot.slane %v2479_v31, 4  ;;  %v2486_v15 = vrot.slane %v2430_v36, %v4925_v58 }
 0x203   : > { %v2443_v14 = vmax.f32 %v2365_v21, 0.0  ;;  %v2368_v6 = vadd.f32 %v4922_v43, %v2367_v45  ;;  %v2715_v63 = vrot.slane %v2465_v60, 4  ;;  %v2472_v18 = vrot.slane %v2428_v38, %v4925_v58 }
 0x204   : > { %v2591_v1 = vrot.slane %v2445_v5, %v4925_v58  ;;  %v2446_v47 = vmax.f32 %v2376_v39, 0.0  ;;  %v2781_v59 = vmax.f32 %v2479_v31, %v2717_v30  ;;  %v2718_v16 = vrot.slane %v2486_v15, 4 }
 0x205   : > { %v2577_v51 = vrot.slane %v2443_v14, %v4925_v58  ;;  %v2444_v3 = vmax.f32 %v2368_v6, 0.0  ;;  %v2779_v50 = vmax.f32 %v2465_v60, %v2715_v63  ;;  %v2716_v17 = vrot.slane %v2472_v18, 4 }
 0x206   : > { %v2733_v24 = vrot.slane %v2591_v1, 4  ;;  %v2598_v19 = vrot.slane %v2446_v47, %v4925_v58  ;;  %v2782_v22 = vmax.f32 %v2486_v15, %v2718_v16 }
 0x207   : > { %v2731_v23 = vrot.slane %v2577_v51, 4  ;;  %v2584_v42 = vrot.slane %v2444_v3, %v4925_v58  ;;  %v2811_v8 = vmax.f32 %v2779_v50, %v2781_v59  ;;  %v2780_v40 = vmax.f32 %v2472_v18, %v2716_v17 }
 0x208   : > { %v2797_v33 = vmax.f32 %v2591_v1, %v2733_v24  ;;  %v2734_v61 = vrot.slane %v2598_v19, 4 }
 0x209   : > { %v2795_v55 = vmax.f32 %v2577_v51, %v2731_v23  ;;  %v2732_v28 = vrot.slane %v2584_v42, 4  ;;  %v2812_v37 = vmax.f32 %v2780_v40, %v2782_v22 }
 0x20a   : > { %v2798_v12 = vmax.f32 %v2598_v19, %v2734_v61 }
 0x20b   : > { %v2819_v56 = vmax.f32 %v2795_v55, %v2797_v33  ;;  %v2796_v48 = vmax.f32 %v2584_v42, %v2732_v28  ;;  %v2843_v46 = vcombine.low %v2811_v8, %v2812_v37 }
 0x20d   : > { %v2820_v11 = vmax.f32 %v2796_v48, %v2798_v12 }
 0x20f   : > { %v2847_v57 = vcombine.low %v2819_v56, %v2820_v11 }
 0x23b   : > { %v3135_v10 = vpop.f32.mrb[4].mxu0 }
 0x23c   : > { %v2325_v29 = vadd.f32 %v3135_v10, %v4922_v43  ;;  %v2316_v7 = vpop.f32.mrb[5].mxu0 }
 0x23d   : > { %v2317_v9 = vadd.f32 %v4922_v43, %v2316_v7  ;;  %v3136_v44 = vpop.f32.mrb[6].mxu0 }
 0x23e   : > { %v2433_v32 = vmax.f32 %v2325_v29, 0.0  ;;  %v2328_v25 = vadd.f32 %v3136_v44, %v4922_v43  ;;  %v2319_v41 = vpop.f32.mrb[7].mxu0 }
 0x23f   : > { %v3151_v26 = vpop.f32.mrb[4].mxu1  ;;  %v2431_v20 = vmax.f32 %v2317_v9, 0.0  ;;  %v2320_v35 = vadd.f32 %v4922_v43, %v2319_v41 }
 0x240   : > { %v2389_v53 = vadd.f32 %v3151_v26, %v4922_v43  ;;  %v2380_v27 = vpop.f32.mrb[5].mxu1  ;;  %v2507_v2 = vrot.slane %v2433_v32, %v4925_v58  ;;  %v2434_v4 = vmax.f32 %v2328_v25, 0.0 }
 0x241   : > { %v2381_v13 = vadd.f32 %v4922_v43, %v2380_v27  ;;  %v3152_v52 = vpop.f32.mrb[6].mxu1  ;;  %v2493_v62 = vrot.slane %v2431_v20, %v4925_v58  ;;  %v2432_v21 = vmax.f32 %v2320_v35, 0.0 }
 0x242   : > { %v2449_v0 = vmax.f32 %v2389_v53, 0.0  ;;  %v2392_v49 = vadd.f32 %v3152_v52, %v4922_v43  ;;  %v2383_v34 = vpop.f32.mrb[7].mxu1  ;;  %v2721_v36 = vrot.slane %v2507_v2, 4  ;;  %v2514_v5 = vrot.slane %v2434_v4, %v4925_v58 }
 0x243   : > { %v2447_v54 = vmax.f32 %v2381_v13, 0.0  ;;  %v2384_v31 = vadd.f32 %v4922_v43, %v2383_v34  ;;  %v2719_v60 = vrot.slane %v2493_v62, 4  ;;  %v2500_v38 = vrot.slane %v2432_v21, %v4925_v58 }
 0x244   : > { %v2619_v39 = vrot.slane %v2449_v0, %v4925_v58  ;;  %v2450_v45 = vmax.f32 %v2392_v49, 0.0  ;;  %v2785_v30 = vmax.f32 %v2507_v2, %v2721_v36  ;;  %v2722_v15 = vrot.slane %v2514_v5, 4 }
 0x245   : > { %v2605_v14 = vrot.slane %v2447_v54, %v4925_v58  ;;  %v2448_v6 = vmax.f32 %v2384_v31, 0.0  ;;  %v2783_v63 = vmax.f32 %v2493_v62, %v2719_v60  ;;  %v2720_v18 = vrot.slane %v2500_v38, 4 }
 0x246   : > { %v2737_v1 = vrot.slane %v2619_v39, 4  ;;  %v2626_v47 = vrot.slane %v2450_v45, %v4925_v58  ;;  %v2786_v59 = vmax.f32 %v2514_v5, %v2722_v15 }
 0x247   : > { %v2735_v51 = vrot.slane %v2605_v14, 4  ;;  %v2612_v3 = vrot.slane %v2448_v6, %v4925_v58  ;;  %v2813_v19 = vmax.f32 %v2783_v63, %v2785_v30  ;;  %v2784_v50 = vmax.f32 %v2500_v38, %v2720_v18 }
 0x248   : > { %v2801_v16 = vmax.f32 %v2619_v39, %v2737_v1  ;;  %v2738_v24 = vrot.slane %v2626_v47, 4 }
 0x249   : > { %v2799_v17 = vmax.f32 %v2605_v14, %v2735_v51  ;;  %v2736_v23 = vrot.slane %v2612_v3, 4  ;;  %v2814_v22 = vmax.f32 %v2784_v50, %v2786_v59 }
 0x24a   : > { %v2802_v42 = vmax.f32 %v2626_v47, %v2738_v24 }
 0x24b   : > { %v2821_v33 = vmax.f32 %v2799_v17, %v2801_v16  ;;  %v2800_v61 = vmax.f32 %v2612_v3, %v2736_v23  ;;  %v2844_v8 = vcombine.low %v2813_v19, %v2814_v22 }
 0x24d   : > { %v2822_v40 = vmax.f32 %v2800_v61, %v2802_v42  ;;  %v3069_v55 = vpack.c.bf16 %v2844_v8, %v2843_v46 }
 0x24f   : > { %v2848_v28 = vcombine.low %v2821_v33, %v2822_v40  ;;  %3070 = vst [vmem:[%s4962_s6] sm:$0xff] %v3069_v55  }
 0x251   : > { %v3079_v12 = vpack.c.bf16 %v2848_v28, %v2847_v57 }
 0x253   : > { %3087 = vst [vmem:[%s4962_s6 + $0x10] sm:$0xff] %v3079_v12  }
 0x27c   : > { %v3139_v37 = vpop.f32.mrb[8].mxu0 }
 0x27d   : > { %v2341_v56 = vadd.f32 %v3139_v37, %v4922_v43  ;;  %v2332_v48 = vpop.f32.mrb[9].mxu0 }
 0x27e   : > { %v2333_v11 = vadd.f32 %v4922_v43, %v2332_v48  ;;  %v3140_v10 = vpop.f32.mrb[10].mxu0 }
 0x27f   : > { %v3155_v29 = vpop.f32.mrb[8].mxu1  ;;  %v2437_v7 = vmax.f32 %v2341_v56, 0.0  ;;  %v2344_v9 = vadd.f32 %v3140_v10, %v4922_v43  ;;  %v2335_v44 = vpop.f32.mrb[11].mxu0 }
 0x280   : > { %v2405_v26 = vadd.f32 %v3155_v29, %v4922_v43  ;;  %v2396_v32 = vpop.f32.mrb[9].mxu1  ;;  %v2435_v46 = vmax.f32 %v2333_v11, 0.0  ;;  %v2336_v25 = vadd.f32 %v4922_v43, %v2335_v44 }
 0x281   : > { %v2397_v57 = vadd.f32 %v4922_v43, %v2396_v32  ;;  %v3156_v41 = vpop.f32.mrb[10].mxu1  ;;  %v2535_v53 = vrot.slane %v2437_v7, %v4925_v58  ;;  %v2438_v27 = vmax.f32 %v2344_v9, 0.0 }
 0x282   : > { %v2453_v20 = vmax.f32 %v2405_v26, 0.0  ;;  %v2408_v35 = vadd.f32 %v3156_v41, %v4922_v43  ;;  %v2399_v13 = vpop.f32.mrb[11].mxu1  ;;  %v2521_v52 = vrot.slane %v2435_v46, %v4925_v58  ;;  %v2436_v2 = vmax.f32 %v2336_v25, 0.0 }
 0x283   : > { %v2451_v4 = vmax.f32 %v2397_v57, 0.0  ;;  %v2400_v0 = vadd.f32 %v4922_v43, %v2399_v13  ;;  %v2725_v49 = vrot.slane %v2535_v53, 4  ;;  %v2542_v34 = vrot.slane %v2438_v27, %v4925_v58 }
 0x284   : > { %v2647_v62 = vrot.slane %v2453_v20, %v4925_v58  ;;  %v2454_v21 = vmax.f32 %v2408_v35, 0.0  ;;  %v2723_v54 = vrot.slane %v2521_v52, 4  ;;  %v2528_v31 = vrot.slane %v2436_v2, %v4925_v58 }
 0x285   : > { %v2633_v36 = vrot.slane %v2451_v4, %v4925_v58  ;;  %v2452_v5 = vmax.f32 %v2400_v0, 0.0  ;;  %v2789_v39 = vmax.f32 %v2535_v53, %v2725_v49  ;;  %v2726_v45 = vrot.slane %v2542_v34, 4 }
 0x286   : > { %v2741_v60 = vrot.slane %v2647_v62, 4  ;;  %v2654_v38 = vrot.slane %v2454_v21, %v4925_v58  ;;  %v2787_v14 = vmax.f32 %v2521_v52, %v2723_v54  ;;  %v2724_v6 = vrot.slane %v2528_v31, 4 }
 0x287   : > { %v2739_v30 = vrot.slane %v2633_v36, 4  ;;  %v2640_v15 = vrot.slane %v2452_v5, %v4925_v58  ;;  %v2790_v1 = vmax.f32 %v2542_v34, %v2726_v45 }
 0x288   : > { %v2805_v47 = vmax.f32 %v2647_v62, %v2741_v60  ;;  %v2742_v63 = vrot.slane %v2654_v38, 4  ;;  %v2815_v18 = vmax.f32 %v2787_v14, %v2789_v39  ;;  %v2788_v51 = vmax.f32 %v2528_v31, %v2724_v6 }
 0x289   : > { %v2803_v3 = vmax.f32 %v2633_v36, %v2739_v30  ;;  %v2740_v59 = vrot.slane %v2640_v15, 4 }
 0x28a   : > { %v2806_v16 = vmax.f32 %v2654_v38, %v2742_v63  ;;  %v2816_v24 = vmax.f32 %v2788_v51, %v2790_v1 }
 0x28b   : > { %v2823_v19 = vmax.f32 %v2803_v3, %v2805_v47  ;;  %v2804_v50 = vmax.f32 %v2640_v15, %v2740_v59 }
 0x28c   : > { %v2845_v17 = vcombine.low %v2815_v18, %v2816_v24 }
 0x28d   : > { %v2824_v23 = vmax.f32 %v2804_v50, %v2806_v16 }
 0x28f   : > { %v2849_v42 = vcombine.low %v2823_v19, %v2824_v23 }
 0x2b8   : > { %v3143_v22 = vpop.f32.mrb[12].mxu0 }
 0x2b9   : > { %v2357_v33 = vadd.f32 %v3143_v22, %v4922_v43  ;;  %v2348_v61 = vpop.f32.mrb[13].mxu0 }
 0x2ba   : > { %v2349_v8 = vadd.f32 %v4922_v43, %v2348_v61  ;;  %v3144_v40 = vpop.f32.mrb[14].mxu0 }
 0x2bb   : > { %v3159_v55 = vpop.f32.mrb[12].mxu1  ;;  %v2441_v28 = vmax.f32 %v2357_v33, 0.0  ;;  %v2360_v12 = vadd.f32 %v3144_v40, %v4922_v43  ;;  %v2351_v37 = vpop.f32.mrb[15].mxu0 }
 0x2bc   : > { %v2421_v56 = vadd.f32 %v3159_v55, %v4922_v43  ;;  %v2412_v48 = vpop.f32.mrb[13].mxu1  ;;  %v2439_v11 = vmax.f32 %v2349_v8, 0.0  ;;  %v2352_v10 = vadd.f32 %v4922_v43, %v2351_v37 }
 0x2bd   : > { %v2413_v29 = vadd.f32 %v4922_v43, %v2412_v48  ;;  %v3160_v7 = vpop.f32.mrb[14].mxu1  ;;  %v2563_v9 = vrot.slane %v2441_v28, %v4925_v58  ;;  %v2442_v44 = vmax.f32 %v2360_v12, 0.0 }
 0x2be   : > { %v2457_v26 = vmax.f32 %v2421_v56, 0.0  ;;  %v2424_v32 = vadd.f32 %v3160_v7, %v4922_v43  ;;  %v2415_v46 = vpop.f32.mrb[15].mxu1  ;;  %v2549_v25 = vrot.slane %v2439_v11, %v4925_v58  ;;  %v2440_v57 = vmax.f32 %v2352_v10, 0.0 }
 0x2bf   : > { %v2455_v41 = vmax.f32 %v2413_v29, 0.0  ;;  %v2416_v53 = vadd.f32 %v4922_v43, %v2415_v46  ;;  %v2729_v27 = vrot.slane %v2563_v9, 4  ;;  %v2570_v20 = vrot.slane %v2442_v44, %v4925_v58 }
 0x2c0   : > { %v2675_v35 = vrot.slane %v2457_v26, %v4925_v58  ;;  %v2458_v13 = vmax.f32 %v2424_v32, 0.0  ;;  %v2727_v52 = vrot.slane %v2549_v25, 4  ;;  %v2556_v2 = vrot.slane %v2440_v57, %v4925_v58 }
 0x2c1   : > { %v2661_v4 = vrot.slane %v2455_v41, %v4925_v58  ;;  %v2456_v0 = vmax.f32 %v2416_v53, 0.0  ;;  %v2793_v49 = vmax.f32 %v2563_v9, %v2729_v27  ;;  %v2730_v34 = vrot.slane %v2570_v20, 4 }
 0x2c2   : > { %v2745_v62 = vrot.slane %v2675_v35, 4  ;;  %v2682_v21 = vrot.slane %v2458_v13, %v4925_v58  ;;  %v2791_v54 = vmax.f32 %v2549_v25, %v2727_v52  ;;  %v2728_v31 = vrot.slane %v2556_v2, 4 }
 0x2c3   : > { %v2743_v43 = vrot.slane %v2661_v4, 4  ;;  %v2668_v36 = vrot.slane %v2456_v0, %v4925_v58  ;;  %v2794_v5 = vmax.f32 %v2570_v20, %v2730_v34 }
 0x2c4   : > { %v2809_v39 = vmax.f32 %v2675_v35, %v2745_v62  ;;  %v2746_v45 = vrot.slane %v2682_v21, 4  ;;  %v2817_v60 = vmax.f32 %v2791_v54, %v2793_v49  ;;  %v2792_v38 = vmax.f32 %v2556_v2, %v2728_v31 }
 0x2c5   : > { %v2807_v14 = vmax.f32 %v2661_v4, %v2743_v43  ;;  %v2744_v6 = vrot.slane %v2668_v36, 4 }
 0x2c6   : > { %v2810_v30 = vmax.f32 %v2682_v21, %v2746_v45  ;;  %v2818_v15 = vmax.f32 %v2792_v38, %v2794_v5 }
 0x2c7   : > { %v2825_v1 = vmax.f32 %v2807_v14, %v2809_v39  ;;  %v2808_v47 = vmax.f32 %v2668_v36, %v2744_v6 }
 0x2c8   : > { %v2846_v63 = vcombine.low %v2817_v60, %v2818_v15 }
 0x2c9   : > { %v2826_v18 = vmax.f32 %v2808_v47, %v2810_v30 }
 0x2ca   : > { %v3074_v51 = vpack.c.bf16 %v2846_v63, %v2845_v17 }
 0x2cb   : > { %v2850_v3 = vcombine.low %v2825_v1, %v2826_v18 }
 0x2cc   : > { %3086 = vst [vmem:[%s4962_s6 + $0x8] sm:$0xff] %v3074_v51  }
 0x2cd   : > { %v3084_v59 = vpack.c.bf16 %v2850_v3, %v2849_v42 }
 0x2cf   : > { %3088 = vst [vmem:[%s4962_s6 + $0x18] sm:$0xff] %v3084_v59  }
 0x2d0 PF: > { %s15_s12 = sadd.s32 1, %s3312_s12  }
 0x2d1   : > { %p12_p9 = scmp.ge.s32.totalorder %s15_s12, 4  }
 0x2d3   :  { %14 = sbr.rel (!%p12_p9) target bundleno = 2 (0x2), region = 73 }
 0x2da   :  { %2896 = vsyncpa [#allocation4], 1 }
 0x2db   :  { %2898 = vsyncpa [#allocation4 + $0x1], 1 }
 0x2dc   :  { %2899 = vsyncpa [#allocation6], 1 }

// kernel: _lambda_.9
= control target key start
LH: loop header
LB: loop body
LE: loop exit
PB: predicated region body
PF: predicated region fallthrough
CT: control target
= control target key end

     0   :  { %s1724_s24 = smov 0   ;;  %s1879_s0 = inlined_call_operand.vmem [shape: bf16[8,4096], index: 0, kind: input, shape index: {}]   ;;  %s1880_s1 = inlined_call_operand.vmem [shape: bf16[4096,128], index: 1, kind: input, shape index: {}]   ;;  %s1881_s2 = inlined_call_operand.vmem [shape: f32[1,128], index: 2, kind: input, shape index: {}]   ;;  %s1882_s3 = inlined_call_operand.vmem [shape: bf16[128,128], index: 3, kind: input, shape index: {}]   ;;  %s1883_s4 = inlined_call_operand.vmem [shape: f32[1,128], index: 4, kind: input, shape index: {}]   ;;  %s1884_s5 = inlined_call_operand.vmem [shape: bf16[128,128], index: 5, kind: input, shape index: {}]   ;;  %s1885_s6 = inlined_call_operand.vmem [shape: f32[1,128], index: 6, kind: input, shape index: {}]   ;;  %s1886_s7 = inlined_call_operand.vmem [shape: f32[8,128], index: 7, kind: output, shape index: {}]  }
   0x1 LB: > { %s1730_s25 = sadd.s32 4294967295, %s1679_s24   ;;  %p1348_p0 = scmp.ge.s32.totalorder %s1679_s24, 1  ;;  %s1679_s24 = sphi %s1724_s24, %s17_s24  }
   0x2   : > { %p148_p1 = scmp.lt.s32.totalorder %s1679_s24, 5 }
   0x4   : > { %p149_p2 = pnand %p1348_p0, %p148_p1 }
   0x5   : > { %s1349_s26 = sshll.u32 (!%p149_p2), %s1730_s25, 3  ;;  %s1351_s27 = sshll.u32 (!%p149_p2), %s1730_s25, 7 }
   0x6   : > { %152 = sbr.rel (%p149_p2) target bundleno = 795 (0x31b), region = 32  ;;  %p173_p3 = scmp.lt.s32.totalorder (!%p149_p2), %s1349_s26, 31 }
   0x7   : > { %p179_p4 = scmp.lt.s32.totalorder (!%p149_p2), %s1351_s27, 511  ;;  %p1353_p5 = scmp.ne.s32.totalorder (!%p149_p2), %s1730_s25, 0 }
   0xd   : > { %s1888_s26 = smov (!%p173_p3, %s1349_s26), 31  ;;  %s1890_s27 = smov (!%p179_p4, %s1351_s27), 511 }
   0xe   : > { %s1350_s28 = sshll.u32 %s1888_s26, 2  ;;  %s1352_s9 = sshll.u32 %s1890_s27, 2  ;;  %v222_v0 = vld [vmem:[%s1882_s3] sm:$0xff] (!%p1353_p5)  ;;  %v224_v1 = vld [vmem:[%s1882_s3 + $0x8] sm:$0xff] (!%p1353_p5)  ;;  %v226_v2 = vld [vmem:[%s1882_s3 + $0x10] sm:$0xff] (!%p1353_p5)  ;;  %v1681_v3 = vmov (!%p1353_p5), 0.0  }
   0xf   : > { %s1739_s8 = scalar_lea.vmem %s1879_s0, %s1350_s28  ;;  %s1744_s12 = scalar_lea.vmem %s1880_s1, %s1352_s9  ;;  %189 = vst [vmem:[#allocation2] sm:$0xff] (!%p1353_p5), %v1681_v3  ;;  %223 = vst [vmem:[#allocation3] sm:$0xff] (!%p1353_p5), %v222_v0  ;;  %v228_v4 = vld [vmem:[%s1882_s3 + $0x18] sm:$0xff] (!%p1353_p5)  ;;  %v230_v5 = vld [vmem:[%s1882_s3 + $0x20] sm:$0xff] (!%p1353_p5) }
  0x10   : > { %188 = sbr.rel (%p1353_p5) target bundleno = 33 (0x21), region = 36  ;;  %225 = vst [vmem:[#allocation3 + $0x8] sm:$0xff] (!%p1353_p5), %v224_v1  ;;  %227 = vst [vmem:[#allocation3 + $0x10] sm:$0xff] (!%p1353_p5), %v226_v2  ;;  %v232_v6 = vld [vmem:[%s1882_s3 + $0x28] sm:$0xff] (!%p1353_p5)  ;;  %v234_v7 = vld [vmem:[%s1882_s3 + $0x30] sm:$0xff] (!%p1353_p5) }
  0x11   : > { %229 = vst [vmem:[#allocation3 + $0x18] sm:$0xff] (!%p1353_p5), %v228_v4  ;;  %231 = vst [vmem:[#allocation3 + $0x20] sm:$0xff] (!%p1353_p5), %v230_v5  ;;  %v236_v8 = vld [vmem:[%s1882_s3 + $0x38] sm:$0xff] (!%p1353_p5) }
  0x12   : > { %233 = vst [vmem:[#allocation3 + $0x28] sm:$0xff] (!%p1353_p5), %v232_v6  ;;  %235 = vst [vmem:[#allocation3 + $0x30] sm:$0xff] (!%p1353_p5), %v234_v7 }
  0x13   : > { %237 = vst [vmem:[#allocation3 + $0x38] sm:$0xff] (!%p1353_p5), %v236_v8 }
  0x17   : > { %245 = vsyncadd [#allocation7], 1024  ;;  %v264_v9 = vld [vmem:[%s1883_s4] sm:$0x1] }
  0x18   : > { %265 = vst [vmem:[#allocation4] sm:$0x1] %v264_v9 }
  0x19   : > { %290 = vsyncadd [#allocation7 + $0x1], 16  ;;  %v324_v10 = vld [vmem:[%s1884_s5] sm:$0xff]  ;;  %v326_v11 = vld [vmem:[%s1884_s5 + $0x8] sm:$0xff] }
  0x1a   : > { %325 = vst [vmem:[#allocation5] sm:$0xff] %v324_v10  ;;  %327 = vst [vmem:[#allocation5 + $0x8] sm:$0xff] %v326_v11  ;;  %v328_v12 = vld [vmem:[%s1884_s5 + $0x10] sm:$0xff]  ;;  %v330_v13 = vld [vmem:[%s1884_s5 + $0x18] sm:$0xff] }
  0x1b   : > { %v332_v14 = vld [vmem:[%s1884_s5 + $0x20] sm:$0xff]  ;;  %329 = vst [vmem:[#allocation5 + $0x10] sm:$0xff] %v328_v12  ;;  %331 = vst [vmem:[#allocation5 + $0x18] sm:$0xff] %v330_v13  ;;  %v334_v15 = vld [vmem:[%s1884_s5 + $0x28] sm:$0xff] }
  0x1c   : > { %333 = vst [vmem:[#allocation5 + $0x20] sm:$0xff] %v332_v14  ;;  %v336_v16 = vld [vmem:[%s1884_s5 + $0x30] sm:$0xff]  ;;  %v338_v17 = vld [vmem:[%s1884_s5 + $0x38] sm:$0xff]  ;;  %335 = vst [vmem:[#allocation5 + $0x28] sm:$0xff] %v334_v15 }
  0x1d   : > { %337 = vst [vmem:[#allocation5 + $0x30] sm:$0xff] %v336_v16  ;;  %339 = vst [vmem:[#allocation5 + $0x38] sm:$0xff] %v338_v17 }
  0x1e   : > { %347 = vsyncadd [#allocation7 + $0x2], 1024  ;;  %v366_v18 = vld [vmem:[%s1885_s6] sm:$0x1] }
  0x1f   : > { %367 = vst [vmem:[#allocation6] sm:$0x1] %v366_v18 }
  0x20   : > { %392 = vsyncadd [#allocation7 + $0x3], 16 }
  0x21 PF: > { %v1593_v19 = vld [vmem:[%s1744_s12 + $0x40] sm:$0xff]   ;;  %v1597_v23 = vld [vmem:[%s1744_s12 + $0x48] sm:$0xff]   ;;  %v1601_v27 = vld [vmem:[%s1744_s12 + $0x50] sm:$0xff]   ;;  %p1426_p6 = scmp.ne.s32.totalorder %s1730_s25, 3 }
  0x22   : > { %v1594_v20 = vld [vmem:[%s1744_s12 + $0xc0] sm:$0xff]   ;;  %1436 = vmatprep.subr.bf16.mxu0 %v1593_v19  ;;  %v1598_v24 = vld [vmem:[%s1744_s12 + $0xc8] sm:$0xff]   ;;  %v1602_v28 = vld [vmem:[%s1744_s12 + $0xd0] sm:$0xff]  }
  0x23   : > { %v1595_v21 = vld [vmem:[%s1744_s12] sm:$0xff]   ;;  %1458 = vmatprep.subr.bf16.mxu1 %v1594_v20  ;;  %v1599_v25 = vld [vmem:[%s1744_s12 + $0x8] sm:$0xff]   ;;  %v1603_v29 = vld [vmem:[%s1744_s12 + $0x10] sm:$0xff]  }
  0x24   : > { %v1596_v22 = vld [vmem:[%s1744_s12 + $0x80] sm:$0xff]   ;;  %1437 = vmatpush3.bf16.msra.mxu0 %v1595_v21  ;;  %v1600_v26 = vld [vmem:[%s1744_s12 + $0x88] sm:$0xff]   ;;  %v1604_v30 = vld [vmem:[%s1744_s12 + $0x90] sm:$0xff]  }
  0x25   : > { %1459 = vmatpush3.bf16.msra.mxu1 %v1596_v22  ;;  %1438 = vmatprep.subr.bf16.mxu0 %v1597_v23  ;;  %v1605_v31 = vld [vmem:[%s1744_s12 + $0x58] sm:$0xff]   ;;  %v1609_v35 = vld [vmem:[%s1744_s12 + $0x60] sm:$0xff]   ;;  %v1613_v39 = vld [vmem:[%s1744_s12 + $0x68] sm:$0xff]  }
  0x26   : > { %1460 = vmatprep.subr.bf16.mxu1 %v1598_v24  ;;  %v1606_v32 = vld [vmem:[%s1744_s12 + $0xd8] sm:$0xff]   ;;  %v1610_v36 = vld [vmem:[%s1744_s12 + $0xe0] sm:$0xff]   ;;  %v1614_v40 = vld [vmem:[%s1744_s12 + $0xe8] sm:$0xff]  }
  0x27   : > { %v1607_v33 = vld [vmem:[%s1744_s12 + $0x18] sm:$0xff]   ;;  %v1611_v37 = vld [vmem:[%s1744_s12 + $0x20] sm:$0xff]   ;;  %v1615_v41 = vld [vmem:[%s1744_s12 + $0x28] sm:$0xff]  }
  0x28   : > { %1439 = vmatpush3.bf16.msra.mxu0 %v1599_v25  ;;  %v1608_v34 = vld [vmem:[%s1744_s12 + $0x98] sm:$0xff]   ;;  %v1612_v38 = vld [vmem:[%s1744_s12 + $0xa0] sm:$0xff]   ;;  %v1616_v42 = vld [vmem:[%s1744_s12 + $0xa8] sm:$0xff]  }
  0x29   : > { %1461 = vmatpush3.bf16.msra.mxu1 %v1600_v26  ;;  %1440 = vmatprep.subr.bf16.mxu0 %v1601_v27  ;;  %v1617_v43 = vld [vmem:[%s1744_s12 + $0x70] sm:$0xff]   ;;  %v1621_v47 = vld [vmem:[%s1744_s12 + $0x78] sm:$0xff]   ;;  %v394_v51 = vld [vmem:[%s1739_s8] sm:$0xff] }
  0x2a   : > { %1462 = vmatprep.subr.bf16.mxu1 %v1602_v28  ;;  %v1618_v44 = vld [vmem:[%s1744_s12 + $0xf0] sm:$0xff]   ;;  %v1622_v48 = vld [vmem:[%s1744_s12 + $0xf8] sm:$0xff]   ;;  %v395_v52 = vld [vmem:[%s1739_s8 + $0x8] sm:$0xff]  ;;  %v1354_v53 = vcombine.low %v394_v51, %v394_v51  ;;  %v1355_v54 = vcombine.high %v394_v51, %v394_v51 }
  0x2b   : > { %v1619_v45 = vld [vmem:[%s1744_s12 + $0x30] sm:$0xff]   ;;  %v1623_v49 = vld [vmem:[%s1744_s12 + $0x38] sm:$0xff]   ;;  %v1356_v55 = vcombine.low %v395_v52, %v395_v52  ;;  %v1357_v56 = vcombine.high %v395_v52, %v395_v52  ;;  %v1629_v57 = vld [vmem:[%s1744_s12 + $0x140] sm:$0xff]  }
  0x2c   : > { %1441 = vmatpush3.bf16.msra.mxu0 %v1603_v29  ;;  %v1620_v46 = vld [vmem:[%s1744_s12 + $0xb0] sm:$0xff]   ;;  %v1624_v50 = vld [vmem:[%s1744_s12 + $0xb8] sm:$0xff]   ;;  %v1630_v58 = vld [vmem:[%s1744_s12 + $0x1c0] sm:$0xff]   ;;  %970 = vmatprep.mubr.bf16.mxu0 %v1355_v54 }
  0x2d   : > { %1463 = vmatpush3.bf16.msra.mxu1 %v1604_v30  ;;  %1442 = vmatprep.subr.bf16.mxu0 %v1605_v31  ;;  %v1631_v59 = vld [vmem:[%s1744_s12 + $0x100] sm:$0xff]   ;;  %v1633_v61 = vld [vmem:[%s1744_s12 + $0x148] sm:$0xff]   ;;  %v1637_v1 = vld [vmem:[%s1744_s12 + $0x150] sm:$0xff]  }
  0x2e   : > { %1464 = vmatprep.subr.bf16.mxu1 %v1606_v32  ;;  %1010 = vmatprep.mubr.bf16.mxu1 %v1357_v56  ;;  %v1632_v60 = vld [vmem:[%s1744_s12 + $0x180] sm:$0xff]   ;;  %v1634_v62 = vld [vmem:[%s1744_s12 + $0x1c8] sm:$0xff]   ;;  %v1638_v2 = vld [vmem:[%s1744_s12 + $0x1d0] sm:$0xff]  }
  0x2f   : > { %v1635_v63 = vld [vmem:[%s1744_s12 + $0x108] sm:$0xff]   ;;  %v1639_v3 = vld [vmem:[%s1744_s12 + $0x110] sm:$0xff]   ;;  %v1641_v5 = vld [vmem:[%s1744_s12 + $0x158] sm:$0xff]  }
  0x30   : > { %1443 = vmatpush3.bf16.msra.mxu0 %v1607_v33  ;;  %v1636_v0 = vld [vmem:[%s1744_s12 + $0x188] sm:$0xff]   ;;  %v1640_v4 = vld [vmem:[%s1744_s12 + $0x190] sm:$0xff]   ;;  %v1642_v6 = vld [vmem:[%s1744_s12 + $0x1d8] sm:$0xff]  }
  0x31   : > { %1465 = vmatpush3.bf16.msra.mxu1 %v1608_v34  ;;  %1444 = vmatprep.subr.bf16.mxu0 %v1609_v35  ;;  %v1643_v7 = vld [vmem:[%s1744_s12 + $0x118] sm:$0xff]   ;;  %v1645_v9 = vld [vmem:[%s1744_s12 + $0x160] sm:$0xff]   ;;  %v1649_v13 = vld [vmem:[%s1744_s12 + $0x168] sm:$0xff]  }
  0x32   : > { %1466 = vmatprep.subr.bf16.mxu1 %v1610_v36  ;;  %v1644_v8 = vld [vmem:[%s1744_s12 + $0x198] sm:$0xff]   ;;  %v1646_v10 = vld [vmem:[%s1744_s12 + $0x1e0] sm:$0xff]   ;;  %v1650_v14 = vld [vmem:[%s1744_s12 + $0x1e8] sm:$0xff]  }
  0x33   : > { %v1647_v11 = vld [vmem:[%s1744_s12 + $0x120] sm:$0xff]   ;;  %v1651_v15 = vld [vmem:[%s1744_s12 + $0x128] sm:$0xff]   ;;  %v1653_v17 = vld [vmem:[%s1744_s12 + $0x170] sm:$0xff]  }
  0x34   : > { %1445 = vmatpush3.bf16.msra.mxu0 %v1611_v37  ;;  %v1648_v12 = vld [vmem:[%s1744_s12 + $0x1a0] sm:$0xff]   ;;  %v1652_v16 = vld [vmem:[%s1744_s12 + $0x1a8] sm:$0xff]   ;;  %v1654_v18 = vld [vmem:[%s1744_s12 + $0x1f0] sm:$0xff]  }
  0x35   : > { %1467 = vmatpush3.bf16.msra.mxu1 %v1612_v38  ;;  %1446 = vmatprep.subr.bf16.mxu0 %v1613_v39  ;;  %v1655_v19 = vld [vmem:[%s1744_s12 + $0x130] sm:$0xff]   ;;  %v1657_v21 = vld [vmem:[%s1744_s12 + $0x178] sm:$0xff]  }
  0x36   : > { %1468 = vmatprep.subr.bf16.mxu1 %v1614_v40  ;;  %v1656_v20 = vld [vmem:[%s1744_s12 + $0x1b0] sm:$0xff]   ;;  %v1658_v22 = vld [vmem:[%s1744_s12 + $0x1f8] sm:$0xff]  }
  0x37   : > { %v1659_v23 = vld [vmem:[%s1744_s12 + $0x138] sm:$0xff]   ;;  %v396_v25 = vld [vmem:[%s1739_s8 + $0x10] sm:$0xff] }
  0x38   : > { %1447 = vmatpush3.bf16.msra.mxu0 %v1615_v41  ;;  %v1660_v24 = vld [vmem:[%s1744_s12 + $0x1b8] sm:$0xff]   ;;  %v1358_v26 = vcombine.low %v396_v25, %v396_v25  ;;  %v1359_v27 = vcombine.high %v396_v25, %v396_v25 }
  0x39   : > { %1469 = vmatpush3.bf16.msra.mxu1 %v1616_v42  ;;  %1448 = vmatprep.subr.bf16.mxu0 %v1617_v43  ;;  %v397_v28 = vld [vmem:[%s1739_s8 + $0x18] sm:$0xff] }
  0x3a   : > { %1470 = vmatprep.subr.bf16.mxu1 %v1618_v44  ;;  %v1360_v29 = vcombine.low %v397_v28, %v397_v28  ;;  %v1361_v30 = vcombine.high %v397_v28, %v397_v28 }
  0x3c   : > { %1449 = vmatpush3.bf16.msra.mxu0 %v1619_v45 }
  0x3d   : > { %1471 = vmatpush3.bf16.msra.mxu1 %v1620_v46  ;;  %1450 = vmatprep.subr.bf16.mxu0 %v1621_v47 }
  0x3e   : > { %1472 = vmatprep.subr.bf16.mxu1 %v1622_v48 }
  0x40   : > { %1451 = vmatpush3.bf16.msra.mxu0 %v1623_v49 }
  0x41   : > { %1473 = vmatpush3.bf16.msra.mxu1 %v1624_v50  ;;  %1480 = vmatprep.subr.bf16.mxu0 %v1629_v57 }
  0x42   : > { %1502 = vmatprep.subr.bf16.mxu1 %v1630_v58 }
  0x43   : > { %971 = vmatmul.mubr.bf16.vlgmr.msra.gmra.mrb[0].mxu0 %v1354_v53  ;;  %v393_v53 = vld [vmem:[#allocation2] sm:$0xff] }
  0x44   : > { %1011 = vmatmul.mubr.bf16.vlgmr.msra.gmra.mrb[0].mxu1 %v1356_v55  ;;  %1481 = vmatpush3.bf16.msra.mxu0 %v1631_v59 }
  0x45   : > { %1503 = vmatpush3.bf16.msra.mxu1 %v1632_v60  ;;  %1482 = vmatprep.subr.bf16.mxu0 %v1633_v61 }
  0x46   : > { %1504 = vmatprep.subr.bf16.mxu1 %v1634_v62  ;;  %1050 = vmatprep.mubr.bf16.mxu0 %v1359_v27 }
  0x47   : > { %1090 = vmatprep.mubr.bf16.mxu1 %v1361_v30 }
  0x48   : > { %1483 = vmatpush3.bf16.msra.mxu0 %v1635_v63 }
  0x49   : > { %1505 = vmatpush3.bf16.msra.mxu1 %v1636_v0  ;;  %1484 = vmatprep.subr.bf16.mxu0 %v1637_v1 }
  0x4a   : > { %1506 = vmatprep.subr.bf16.mxu1 %v1638_v2 }
  0x4c   : > { %1485 = vmatpush3.bf16.msra.mxu0 %v1639_v3 }
  0x4d   : > { %1507 = vmatpush3.bf16.msra.mxu1 %v1640_v4  ;;  %1486 = vmatprep.subr.bf16.mxu0 %v1641_v5 }
  0x4e   : > { %1508 = vmatprep.subr.bf16.mxu1 %v1642_v6 }
  0x50   : > { %1487 = vmatpush3.bf16.msra.mxu0 %v1643_v7 }
  0x51   : > { %1509 = vmatpush3.bf16.msra.mxu1 %v1644_v8  ;;  %1488 = vmatprep.subr.bf16.mxu0 %v1645_v9 }
  0x52   : > { %1510 = vmatprep.subr.bf16.mxu1 %v1646_v10 }
  0x54   : > { %1489 = vmatpush3.bf16.msra.mxu0 %v1647_v11 }
  0x55   : > { %1511 = vmatpush3.bf16.msra.mxu1 %v1648_v12  ;;  %1490 = vmatprep.subr.bf16.mxu0 %v1649_v13 }
  0x56   : > { %1512 = vmatprep.subr.bf16.mxu1 %v1650_v14 }
  0x58   : > { %1491 = vmatpush3.bf16.msra.mxu0 %v1651_v15 }
  0x59   : > { %1513 = vmatpush3.bf16.msra.mxu1 %v1652_v16  ;;  %1492 = vmatprep.subr.bf16.mxu0 %v1653_v17 }
  0x5a   : > { %1514 = vmatprep.subr.bf16.mxu1 %v1654_v18 }
  0x5c   : > { %1493 = vmatpush3.bf16.msra.mxu0 %v1655_v19 }
  0x5d   : > { %1515 = vmatpush3.bf16.msra.mxu1 %v1656_v20  ;;  %1494 = vmatprep.subr.bf16.mxu0 %v1657_v21 }
  0x5e   : > { %1516 = vmatprep.subr.bf16.mxu1 %v1658_v22 }
  0x60   : > { %1495 = vmatpush3.bf16.msra.mxu0 %v1659_v23 }
  0x61   : > { %1517 = vmatpush3.bf16.msra.mxu1 %v1660_v24 }
  0x63   : > { %1051 = vmatmul.mubr.bf16.vlgmr.msra.gmra.mrb[4].mxu0 %v1358_v26 }
  0x64   : > { %1091 = vmatmul.mubr.bf16.vlgmr.msra.gmra.mrb[4].mxu1 %v1360_v29 }
 0x116   : > { %v1452_v31 = vpop.f32.mrb[0].mxu0 }
 0x117   : > { %v1474_v32 = vpop.f32.mrb[0].mxu1  ;;  %v1453_v33 = vpop.f32.mrb[1].mxu0 }
 0x118   : > { %v1475_v34 = vpop.f32.mrb[1].mxu1  ;;  %v1454_v35 = vadd.f32 %v1453_v33, %v1452_v31  ;;  %v1455_v37 = vpop.f32.mrb[2].mxu0 }
 0x119   : > { %v1476_v36 = vadd.f32 %v1475_v34, %v1474_v32  ;;  %v1477_v38 = vpop.f32.mrb[2].mxu1  ;;  %v1456_v39 = vpop.f32.mrb[3].mxu0 }
 0x11a   : > { %v1478_v40 = vpop.f32.mrb[3].mxu1 }
 0x11b   : > { %v1013_v41 = vadd.f32 %v1476_v36, %v1454_v35 }
 0x136   : > { %v1496_v42 = vpop.f32.mrb[4].mxu0 }
 0x137   : > { %v1518_v43 = vpop.f32.mrb[4].mxu1  ;;  %v1497_v44 = vpop.f32.mrb[5].mxu0 }
 0x138   : > { %v1519_v45 = vpop.f32.mrb[5].mxu1  ;;  %v1498_v46 = vadd.f32 %v1497_v44, %v1496_v42  ;;  %v1499_v48 = vpop.f32.mrb[6].mxu0 }
 0x139   : > { %v1520_v47 = vadd.f32 %v1519_v45, %v1518_v43  ;;  %v1521_v49 = vpop.f32.mrb[6].mxu1  ;;  %v1500_v50 = vpop.f32.mrb[7].mxu0 }
 0x13a   : > { %v1522_v51 = vpop.f32.mrb[7].mxu1  ;;  %v1053_v52 = vadd.f32 %v1498_v46, %v1013_v41  ;;  %1103 = sbr.rel (%p1426_p6) target bundleno = 795 (0x31b), region = 168 }
 0x13c   : > { %v1093_v54 = vadd.f32 %v1520_v47, %v1053_v52 }
 0x13e   : > { %v1098_v55 = vadd.f32 %v1093_v54, %v393_v53 }
 0x140   : > { %1099 = vst [vmem:[#allocation2] sm:$0xff] %v1098_v55 }
 0x141   : > { %1669 = dma.done.wait [#allocation7], 1024 }
 0x142   : > { %1670 = vsyncadd [#allocation7], 4294966272 }
 0x143   : > { %1671 = dma.done.wait [#allocation7 + $0x1], 16 }
 0x144   : > { %1672 = vsyncadd [#allocation7 + $0x1], 4294967280 }
 0x145   : > { %1673 = dma.done.wait [#allocation7 + $0x2], 1024 }
 0x146   : > { %1674 = vsyncadd [#allocation7 + $0x2], 4294966272 }
 0x147   : > { %1675 = dma.done.wait [#allocation7 + $0x3], 16 }
 0x148   : > { %1676 = vsyncadd [#allocation7 + $0x3], 4294967280  ;;  %v1682_v56 = vmov 0.0   ;;  %vm1683_vm0 = vmmov 0   ;;  %v1129_v57 = vld [vmem:[#allocation3] sm:$0xff]  ;;  %v1130_v58 = vld [vmem:[#allocation3 + $0x8] sm:$0xff] }
 0x149   : > { %1542 = vmatprep.subr.bf16.mxu0 %v1682_v56  ;;  %1558 = vmatprep.mubr.msk.bf16.mxu0 %vm1683_vm0, %v1682_v56  ;;  %v1186_v59 = vld [vmem:[#allocation5] sm:$0xff]  ;;  %v1187_v60 = vld [vmem:[#allocation5 + $0x8] sm:$0xff]  ;;  %v1188_v62 = vld [vmem:[#allocation5 + $0x10] sm:$0xff] }
 0x14a   : > { %1562 = vmatprep.subr.bf16.mxu1 %v1682_v56  ;;  %1578 = vmatprep.mubr.msk.bf16.mxu1 %vm1683_vm0, %v1682_v56  ;;  %v1131_v61 = vld [vmem:[#allocation3 + $0x10] sm:$0xff]  ;;  %v1132_v63 = vld [vmem:[#allocation3 + $0x18] sm:$0xff]  ;;  %v1133_v1 = vld [vmem:[#allocation3 + $0x20] sm:$0xff] }
 0x14b   : > { %1543 = vmatpush3.bf16.msra.mxu0 %v1129_v57  ;;  %1563 = vmatpush3.bf16.msra.mxu1 %v1186_v59  ;;  %v1189_v0 = vld [vmem:[#allocation5 + $0x18] sm:$0xff]  ;;  %v1427_v3 = vld [vmem:[%s1881_s2] ss:$0 sm:$0xff]  ;;  %v1190_v4 = vld [vmem:[#allocation5 + $0x20] sm:$0xff] }
 0x14c   : > { %1544 = vmatprep.subr.bf16.mxu0 %v1682_v56  ;;  %1564 = vmatprep.subr.bf16.mxu1 %v1682_v56  ;;  %v1118_v2 = vld [vmem:[#allocation2] sm:$0xff]  ;;  %v1134_v5 = vld [vmem:[#allocation3 + $0x28] sm:$0xff]  ;;  %v1135_v8 = vld [vmem:[#allocation3 + $0x30] sm:$0xff] }
 0x14d   : > { %v1126_v6 = vadd.f32 %v1427_v3, %v1118_v2  ;;  %v1191_v7 = vld [vmem:[#allocation5 + $0x28] sm:$0xff]  ;;  %v1136_v10 = vld [vmem:[#allocation3 + $0x38] sm:$0xff]  ;;  %v1428_v14 = vld [vmem:[#allocation4] ss:$0 sm:$0xff] }
 0x14e   : > { %v1192_v12 = vld [vmem:[#allocation5 + $0x30] sm:$0xff]  ;;  %v1193_v13 = vld [vmem:[#allocation5 + $0x38] sm:$0xff]  ;;  %v1429_v22 = vld [vmem:[#allocation6] ss:$0 sm:$0xff] }
 0x14f   : > { %1545 = vmatpush3.bf16.msra.mxu0 %v1130_v58  ;;  %1565 = vmatpush3.bf16.msra.mxu1 %v1187_v60  ;;  %v1127_v9 = vmax.f32 %v1126_v6, 0.0 }
 0x150   : > { %1546 = vmatprep.subr.bf16.mxu0 %v1682_v56  ;;  %1566 = vmatprep.subr.bf16.mxu1 %v1682_v56 }
 0x151   : > { %v1128_v11 = vpack.c.bf16 %v1127_v9, %v1127_v9 }
 0x153   : > { %1547 = vmatpush3.bf16.msra.mxu0 %v1131_v61  ;;  %1567 = vmatpush3.bf16.msra.mxu1 %v1188_v62 }
 0x154   : > { %1548 = vmatprep.subr.bf16.mxu0 %v1682_v56  ;;  %1568 = vmatprep.subr.bf16.mxu1 %v1682_v56 }
 0x157   : > { %1549 = vmatpush3.bf16.msra.mxu0 %v1132_v63  ;;  %1569 = vmatpush3.bf16.msra.mxu1 %v1189_v0 }
 0x158   : > { %1550 = vmatprep.subr.bf16.mxu0 %v1682_v56  ;;  %1570 = vmatprep.subr.bf16.mxu1 %v1682_v56 }
 0x15b   : > { %1551 = vmatpush3.bf16.msra.mxu0 %v1133_v1  ;;  %1571 = vmatpush3.bf16.msra.mxu1 %v1190_v4 }
 0x15c   : > { %1552 = vmatprep.subr.bf16.mxu0 %v1682_v56  ;;  %1572 = vmatprep.subr.bf16.mxu1 %v1682_v56 }
 0x15f   : > { %1553 = vmatpush3.bf16.msra.mxu0 %v1134_v5  ;;  %1573 = vmatpush3.bf16.msra.mxu1 %v1191_v7 }
 0x160   : > { %1554 = vmatprep.subr.bf16.mxu0 %v1682_v56  ;;  %1574 = vmatprep.subr.bf16.mxu1 %v1682_v56 }
 0x163   : > { %1555 = vmatpush3.bf16.msra.mxu0 %v1135_v8  ;;  %1575 = vmatpush3.bf16.msra.mxu1 %v1192_v12 }
 0x164   : > { %1556 = vmatprep.subr.bf16.mxu0 %v1682_v56  ;;  %1576 = vmatprep.subr.bf16.mxu1 %v1682_v56 }
 0x167   : > { %1557 = vmatpush3.bf16.msra.mxu0 %v1136_v10  ;;  %1577 = vmatpush3.bf16.msra.mxu1 %v1193_v13 }
 0x16a   : > { %1559 = vmatmul.mubr.bf16.vlgmr.msra.gmra.mrb[0].mxu0 %v1128_v11 }
 0x23d   : > { %v1178_v15 = vpop.f32.mrb[0].mxu0 }
 0x23e   : > { %v1179_v16 = vadd.f32 %v1428_v14, %v1178_v15  ;;  %v1560_v17 = vpop.f32.mrb[1].mxu0 }
 0x23f   : > { %v1181_v18 = vpop.f32.mrb[2].mxu0 }
 0x240   : > { %v1184_v19 = vmax.f32 %v1179_v16, 0.0  ;;  %v1561_v20 = vpop.f32.mrb[3].mxu0 }
 0x242   : > { %v1185_v21 = vpack.c.bf16 %v1184_v19, %v1184_v19 }
 0x244   : > { %1579 = vmatmul.mubr.bf16.vlgmr.msra.gmra.mrb[0].mxu1 %v1185_v21 }
 0x317   : > { %v1235_v23 = vpop.f32.mrb[0].mxu1 }
 0x318   : > { %v1236_v24 = vadd.f32 %v1429_v22, %v1235_v23  ;;  %v1580_v25 = vpop.f32.mrb[1].mxu1 }
 0x319   : > { %v1238_v26 = vpop.f32.mrb[2].mxu1 }
 0x31a   : > { %1241 = vst [vmem:[%s1886_s7] sm:$0xff] %v1236_v24  ;;  %v1581_v27 = vpop.f32.mrb[3].mxu1 }
 0x31b PF: > { %s17_s24 = sadd.s32 1, %s1679_s24  }
 0x31c   : > { %p14_p7 = scmp.ge.s32.totalorder %s17_s24, 6  }
 0x31e   :  { %16 = sbr.rel (!%p14_p7) target bundleno = 1 (0x1), region = 242 }
 0x325   :  { %1253 = vsyncmov [#allocation7] }
 0x328   :  { %s1254_s11 = vpop.sfrf %1253 }
 0x329   :  { %p1432_p8 = scmp.ne.s32.totalorder %s1254_s11, 0 }
 0x32b   :  { %1258 = shalt.err (%p1432_p8)  }
 0x32c   :  { %1260 = vsyncmov [#allocation7 + $0x1] }
 0x32f   :  { %s1261_s13 = vpop.sfrf %1260 }
 0x330   :  { %p1433_p9 = scmp.ne.s32.totalorder %s1261_s13, 0 }
 0x332   :  { %1265 = shalt.err (%p1433_p9)  }
 0x333   :  { %1267 = vsyncmov [#allocation7 + $0x2] }
 0x336   :  { %s1268_s14 = vpop.sfrf %1267 }
 0x337   :  { %p1434_p10 = scmp.ne.s32.totalorder %s1268_s14, 0 }
 0x339   :  { %1272 = shalt.err (%p1434_p10)  }
 0x33a   :  { %1274 = vsyncmov [#allocation7 + $0x3] }
 0x33d   :  { %s1275_s15 = vpop.sfrf %1274 }
 0x33e   :  { %p1435_p11 = scmp.ne.s32.totalorder %s1275_s15, 0 }
 0x340   :  { %1279 = shalt.err (%p1435_p11)  }

// kernel: _lambda_.8
= control target key start
LH: loop header
LB: loop body
LE: loop exit
PB: predicated region body
PF: predicated region fallthrough
CT: control target
= control target key end

     0   :  { %s3779_s12 = smov 0   ;;  %s4969_s0 = inlined_call_operand.vmem [shape: bf16[2,4,4,256], index: 0, kind: input, shape index: {}]   ;;  %s4970_s1 = inlined_call_operand.vmem [shape: bf16[2304,256], index: 1, kind: input, shape index: {}]   ;;  %s4971_s2 = inlined_call_operand.vmem [shape: f32[1,256], index: 2, kind: input, shape index: {}]   ;;  %s4972_s3 = inlined_call_operand.vmem [shape: bf16[2,4,4,256], index: 3, kind: output, shape index: {}]  }
   0x1 LB: > { %s2941_s13 = sadd.s32 4294967295, %s3755_s12   ;;  %p2945_p0 = scmp.ge.s32.totalorder %s3755_s12, 1  ;;  %s3755_s12 = sphi %s3779_s12, %s13_s12  }
   0x2   : > { %p137_p1 = scmp.lt.s32.totalorder %s3755_s12, 3 }
   0x4   : > { %p138_p2 = pnand %p2945_p0, %p137_p1 }
   0x5   : > { %v3312_v0 = vld [vmem:[%s4970_s1 + $0x104] ss:$8 sps:$4 sm:$0xff] (!%p138_p2)   ;;  %v3757_v2 = vmov (!%p138_p2), 0   ;;  %v3316_v3 = vld [vmem:[%s4970_s1 + $0x100] ss:$8 sps:$4 sm:$0xff] (!%p138_p2)   ;;  %p161_p3 = scmp.lt.s32.totalorder (!%p138_p2), %s2941_s13, 1 }
   0x6   : > { %141 = sbr.rel (%p138_p2) target bundleno = 568 (0x238), region = 32  ;;  %v3314_v1 = vld [vmem:[%s4970_s1 + $0x404] ss:$8 sps:$4 sm:$0xff] (!%p138_p2)   ;;  %172 = vst [vmem:[#allocation2] sm:$0x77] (!%p138_p2), %v3757_v2  ;;  %662 = vmatprep.subr.bf16.mxu1 (!%p138_p2), %v3312_v0  ;;  %vm175_vm0 = vcmask (!%p138_p2), 1040384  }
   0x7   : > { %174 = vst [vmem:[#allocation2 + $0x28] sm:$0x77] (!%p138_p2), %v3757_v2  ;;  %v3317_v4 = vld [vmem:[%s4970_s1 + $0x400] ss:$8 sps:$4 sm:$0xff] (!%p138_p2)   ;;  %1700 = vmatprep.subr.bf16.mxu0 (!%p138_p2), %v3314_v1  ;;  %v3318_v5 = vld [vmem:[%s4970_s1 + $0x114] ss:$8 sps:$4 sm:$0xff] (!%p138_p2)   ;;  %663 = vmatpush1.bf16.msra.mxu1 (!%p138_p2), %v3316_v3 }
   0x8   : > { %1701 = vmatpush1.bf16.msra.mxu0 (!%p138_p2), %v3317_v4  ;;  %v3320_v6 = vld [vmem:[%s4970_s1 + $0x414] ss:$8 sps:$4 sm:$0xff] (!%p138_p2)   ;;  %v3322_v7 = vld [vmem:[%s4970_s1 + $0x110] ss:$8 sps:$4 sm:$0xff] (!%p138_p2)   ;;  %664 = vmatprep.subr.bf16.mxu1 (!%p138_p2), %v3318_v5  ;;  %v3324_v9 = vld [vmem:[%s4970_s1 + $0x124] ss:$8 sps:$4 sm:$0xff] (!%p138_p2)  }
   0x9   : > { %v3323_v8 = vld [vmem:[%s4970_s1 + $0x410] ss:$8 sps:$4 sm:$0xff] (!%p138_p2)   ;;  %1702 = vmatprep.subr.bf16.mxu0 (!%p138_p2), %v3320_v6  ;;  %v3326_v10 = vld [vmem:[%s4970_s1 + $0x424] ss:$8 sps:$4 sm:$0xff] (!%p138_p2)   ;;  %v3328_v11 = vld [vmem:[%s4970_s1 + $0x120] ss:$8 sps:$4 sm:$0xff] (!%p138_p2)  }
   0xa   : > { %v3329_v12 = vld [vmem:[%s4970_s1 + $0x420] ss:$8 sps:$4 sm:$0xff] (!%p138_p2)   ;;  %v3330_v13 = vld [vmem:[%s4970_s1 + $0x134] ss:$8 sps:$4 sm:$0xff] (!%p138_p2)   ;;  %v3334_v15 = vld [vmem:[%s4970_s1 + $0x130] ss:$8 sps:$4 sm:$0xff] (!%p138_p2)  }
   0xb   : > { %665 = vmatpush1.bf16.msra.mxu1 (!%p138_p2), %v3322_v7  ;;  %v3332_v14 = vld [vmem:[%s4970_s1 + $0x434] ss:$8 sps:$4 sm:$0xff] (!%p138_p2)   ;;  %v3335_v16 = vld [vmem:[%s4970_s1 + $0x430] ss:$8 sps:$4 sm:$0xff] (!%p138_p2)   ;;  %v3336_v17 = vld [vmem:[%s4970_s1 + $0x144] ss:$8 sps:$4 sm:$0xff] (!%p138_p2)  }
   0xc   : > { %1703 = vmatpush1.bf16.msra.mxu0 (!%p138_p2), %v3323_v8  ;;  %666 = vmatprep.subr.bf16.mxu1 (!%p138_p2), %v3324_v9  ;;  %v3338_v18 = vld [vmem:[%s4970_s1 + $0x444] ss:$8 sps:$4 sm:$0xff] (!%p138_p2)   ;;  %v3340_v19 = vld [vmem:[%s4970_s1 + $0x140] ss:$8 sps:$4 sm:$0xff] (!%p138_p2)   ;;  %v3342_v21 = vld [vmem:[%s4970_s1 + $0x154] ss:$8 sps:$4 sm:$0xff] (!%p138_p2)  }
   0xd   : > { %1704 = vmatprep.subr.bf16.mxu0 %v3326_v10  ;;  %v3341_v20 = vld [vmem:[%s4970_s1 + $0x440] ss:$8 sps:$4 sm:$0xff]   ;;  %v3344_v22 = vld [vmem:[%s4970_s1 + $0x454] ss:$8 sps:$4 sm:$0xff]   ;;  %v3346_v23 = vld [vmem:[%s4970_s1 + $0x150] ss:$8 sps:$4 sm:$0xff]  }
   0xe   : > { %v3347_v24 = vld [vmem:[%s4970_s1 + $0x450] ss:$8 sps:$4 sm:$0xff]   ;;  %v3348_v25 = vld [vmem:[%s4970_s1 + $0x164] ss:$8 sps:$4 sm:$0xff]   ;;  %v3352_v27 = vld [vmem:[%s4970_s1 + $0x160] ss:$8 sps:$4 sm:$0xff]  }
   0xf   : > { %667 = vmatpush1.bf16.msra.mxu1 %v3328_v11  ;;  %v3350_v26 = vld [vmem:[%s4970_s1 + $0x464] ss:$8 sps:$4 sm:$0xff]   ;;  %v3353_v28 = vld [vmem:[%s4970_s1 + $0x460] ss:$8 sps:$4 sm:$0xff]   ;;  %v3354_v29 = vld [vmem:[%s4970_s1 + $0x174] ss:$8 sps:$4 sm:$0xff]  }
  0x10   : > { %1705 = vmatpush1.bf16.msra.mxu0 %v3329_v12  ;;  %668 = vmatprep.subr.bf16.mxu1 %v3330_v13  ;;  %v3356_v30 = vld [vmem:[%s4970_s1 + $0x474] ss:$8 sps:$4 sm:$0xff]   ;;  %v3358_v31 = vld [vmem:[%s4970_s1 + $0x170] ss:$8 sps:$4 sm:$0xff]   ;;  %v3360_v33 = vld [vmem:[%s4970_s1 + $0x184] ss:$8 sps:$4 sm:$0xff]  }
  0x11   : > { %1706 = vmatprep.subr.bf16.mxu0 %v3332_v14  ;;  %v3359_v32 = vld [vmem:[%s4970_s1 + $0x470] ss:$8 sps:$4 sm:$0xff]   ;;  %v3362_v34 = vld [vmem:[%s4970_s1 + $0x484] ss:$8 sps:$4 sm:$0xff]   ;;  %v3364_v35 = vld [vmem:[%s4970_s1 + $0x180] ss:$8 sps:$4 sm:$0xff]  }
  0x12   : > { %v3365_v36 = vld [vmem:[%s4970_s1 + $0x480] ss:$8 sps:$4 sm:$0xff]   ;;  %v3366_v37 = vld [vmem:[%s4970_s1 + $0x194] ss:$8 sps:$4 sm:$0xff]   ;;  %s4990_s13 = smov (!%p161_p3, %s2941_s13), 1  ;;  %vm178_vm2 = vcmask 1044484  }
  0x13   : > { %669 = vmatpush1.bf16.msra.mxu1 %v3334_v15  ;;  %v3368_v38 = vld [vmem:[%s4970_s1 + $0x494] ss:$8 sps:$4 sm:$0xff]   ;;  %v3370_v39 = vld [vmem:[%s4970_s1 + $0x190] ss:$8 sps:$4 sm:$0xff]   ;;  %v3372_v41 = vld [vmem:[%s4970_s1 + $0x1a4] ss:$8 sps:$4 sm:$0xff]  }
  0x14   : > { %1707 = vmatpush1.bf16.msra.mxu0 %v3335_v16  ;;  %670 = vmatprep.subr.bf16.mxu1 %v3336_v17  ;;  %v3371_v40 = vld [vmem:[%s4970_s1 + $0x490] ss:$8 sps:$4 sm:$0xff]   ;;  %v3374_v42 = vld [vmem:[%s4970_s1 + $0x4a4] ss:$8 sps:$4 sm:$0xff]   ;;  %vm176_vm1 = vsmask.f32 256 }
  0x15   : > { %1708 = vmatprep.subr.bf16.mxu0 %v3338_v18  ;;  %s3268_s23 = sshll.u32 %s4990_s13, 4  ;;  %vm179_vm3 = vsmask.f32 4352  ;;  %v3376_v43 = vld [vmem:[%s4970_s1 + $0x1a0] ss:$8 sps:$4 sm:$0xff]   ;;  %vm200_vm4 = vcmask 1042434   ;;  %vm177_vm8 = vmand %vm175_vm0, %vm176_vm1 }
  0x16   : > { %v3377_v44 = vld [vmem:[%s4970_s1 + $0x4a0] ss:$8 sps:$4 sm:$0xff]   ;;  %vm203_vm5 = vcmask 1046534   ;;  %v3378_v45 = vld [vmem:[%s4970_s1 + $0x1b4] ss:$8 sps:$4 sm:$0xff]   ;;  %vm180_vm10 = vmand %vm178_vm2, %vm179_vm3  ;;  %vm294_vm11 = vcmask 1042432   ;;  %s3953_s17 = scalar_lea.vmem %s4969_s0, %s3268_s23 }
  0x17   : > { %671 = vmatpush1.bf16.msra.mxu1 %v3340_v19  ;;  %vm201_vm6 = vsmask.f32 7946  ;;  %v3380_v46 = vld [vmem:[%s4970_s1 + $0x4b4] ss:$8 sps:$4 sm:$0xff]   ;;  %vm204_vm7 = vsmask.f32 7962  ;;  %vm3955_vm13 = vmor %vm180_vm10, %vm177_vm8 }
  0x18   : > { %1709 = vmatpush1.bf16.msra.mxu0 %v3341_v20  ;;  %672 = vmatprep.subr.bf16.mxu1 %v3342_v21  ;;  %v3382_v47 = vld [vmem:[%s4970_s1 + $0x1b0] ss:$8 sps:$4 sm:$0xff]   ;;  %vm295_vm9 = vsmask.f32 2306  ;;  %v3384_v49 = vld [vmem:[%s4970_s1 + $0x1c4] ss:$8 sps:$4 sm:$0xff]   ;;  %vm3969_vm15 = vmand %vm200_vm4, %vm201_vm6 }
  0x19   : > { %1710 = vmatprep.subr.bf16.mxu0 %v3344_v22  ;;  %v3383_v48 = vld [vmem:[%s4970_s1 + $0x4b0] ss:$8 sps:$4 sm:$0xff]   ;;  %v3386_v50 = vld [vmem:[%s4970_s1 + $0x4c4] ss:$8 sps:$4 sm:$0xff]   ;;  %vm297_vm12 = vcmask 1046532   ;;  %vm205_vm1 = vmand %vm203_vm5, %vm204_vm7 }
  0x1a   : > { %v182_v51 = vld [vmem:[#allocation2] sm:$0x11]  ;;  %v185_v52 = vld [vmem:[#allocation2 + $0x8] sm:$0x11]  ;;  %v188_v54 = vld [vmem:[#allocation2 + $0x10] sm:$0x11] }
  0x1b   : > { %673 = vmatpush1.bf16.msra.mxu1 %v3346_v23  ;;  %v191_v55 = vld [vmem:[#allocation2 + $0x18] sm:$0x11]  ;;  %vm298_vm14 = vsmask.f32 6418  ;;  %v183_v56 = vsel %vm3955_vm13, 0, %v182_v51  ;;  %v186_v57 = vsel %vm3955_vm13, 0, %v185_v52  ;;  %vm3989_vm8 = vmor %vm205_vm1, %vm3969_vm15 }
  0x1c   : > { %1711 = vmatpush1.bf16.msra.mxu0 %v3347_v24  ;;  %674 = vmatprep.subr.bf16.mxu1 %v3348_v25  ;;  %v189_v58 = vsel %vm3955_vm13, 0, %v188_v54  ;;  %v192_v59 = vsel %vm3955_vm13, 0, %v191_v55  ;;  %v207_v61 = vld [vmem:[#allocation2] sm:$0x44]  ;;  %184 = vst [vmem:[#allocation2] sm:$0x11] %v183_v56  ;;  %vm4005_vm7 = vmand %vm294_vm11, %vm295_vm9 }
  0x1d   : > { %1712 = vmatprep.subr.bf16.mxu0 %v3350_v26  ;;  %v3388_v62 = vld [vmem:[%s4970_s1 + $0x1c0] ss:$8 sps:$4 sm:$0xff]   ;;  %187 = vst [vmem:[#allocation2 + $0x8] sm:$0x11] %v186_v57  ;;  %190 = vst [vmem:[#allocation2 + $0x10] sm:$0x11] %v189_v58 }
  0x1e   : > { %v3389_v63 = vld [vmem:[%s4970_s1 + $0x4c0] ss:$8 sps:$4 sm:$0xff]   ;;  %193 = vst [vmem:[#allocation2 + $0x18] sm:$0x11] %v192_v59  ;;  %v213_v1 = vld [vmem:[#allocation2 + $0x10] sm:$0x44]  ;;  %vm299_vm15 = vmand %vm297_vm12, %vm298_vm14 }
  0x1f   : > { %675 = vmatpush1.bf16.msra.mxu1 %v3352_v27  ;;  %v210_v0 = vld [vmem:[#allocation2 + $0x8] sm:$0x44]  ;;  %vm387_vm3 = vsmask.f32 1280  ;;  %vm388_vm6 = vsmask.f32 3336  ;;  %vm4026_vm9 = vmor %vm299_vm15, %vm4005_vm7 }
  0x20   : > { %1713 = vmatpush1.bf16.msra.mxu0 %v3353_v28  ;;  %676 = vmatprep.subr.bf16.mxu1 %v3354_v29  ;;  %v3390_v2 = vld [vmem:[%s4970_s1 + $0x1d4] ss:$8 sps:$4 sm:$0xff]   ;;  %v2950_v6 = vld.sshfl [vmem:[%s3953_s17] sm:$0x33 pattern:$0x76325410]  ;;  %vm4061_vm11 = vmor %vm387_vm3, %vm388_vm6 }
  0x21   : > { %1714 = vmatprep.subr.bf16.mxu0 %v3356_v30  ;;  %v3392_v3 = vld [vmem:[%s4970_s1 + $0x4d4] ss:$8 sps:$4 sm:$0xff]   ;;  %v208_v7 = vsel %vm3989_vm8, 0, %v207_v61  ;;  %v211_v8 = vsel %vm3989_vm8, 0, %v210_v0  ;;  %v214_v9 = vsel %vm3989_vm8, 0, %v213_v1  ;;  %v262_v12 = vshrl.u32 %v2950_v6, 16  ;;  %vm928_vm1 = vmor %vm175_vm0, %vm200_vm4 }
  0x22   : > { %v216_v5 = vld [vmem:[#allocation2 + $0x18] sm:$0x44]  ;;  %209 = vst [vmem:[#allocation2] sm:$0x44] %v208_v7  ;;  %212 = vst [vmem:[#allocation2 + $0x8] sm:$0x44] %v211_v8 }
  0x23   : > { %677 = vmatpush1.bf16.msra.mxu1 %v3358_v31  ;;  %v217_v10 = vsel %vm3989_vm8, 0, %v216_v5  ;;  %215 = vst [vmem:[#allocation2 + $0x10] sm:$0x44] %v214_v9  ;;  %v265_v13 = vshll.u32 %v2950_v6, 16  ;;  %vm390_vm10 = vsmask.f32 5392  ;;  %vm929_vm3 = vmor %vm928_vm1, %vm178_vm2 }
  0x24   : > { %1715 = vmatpush1.bf16.msra.mxu0 %v3359_v32  ;;  %678 = vmatprep.subr.bf16.mxu1 %v3360_v33  ;;  %218 = vst [vmem:[#allocation2 + $0x18] sm:$0x44] %v217_v10  ;;  %v2951_v11 = vld.sshfl [vmem:[%s3953_s17 + $0x4] sm:$0x33 pattern:$0x76325410]  ;;  %vm4168_vm0 = vmor %vm929_vm3, %vm203_vm5 }
  0x25   : > { %1716 = vmatprep.subr.bf16.mxu0 %v3362_v34  ;;  %v3394_v15 = vld [vmem:[%s4970_s1 + $0x1d0] ss:$8 sps:$4 sm:$0xff]   ;;  %v2952_v17 = vld.sshfl [vmem:[%s3953_s17 + $0x8] sm:$0x33 pattern:$0x76325410] }
  0x26   : > { %v3395_v16 = vld [vmem:[%s4970_s1 + $0x4d0] ss:$8 sps:$4 sm:$0xff]   ;;  %v269_v18 = vshrl.u32 %v2951_v11, 16  ;;  %v272_v19 = vshll.u32 %v2951_v11, 16  ;;  %v3396_v20 = vld [vmem:[%s4970_s1 + $0x1e4] ss:$8 sps:$4 sm:$0xff]  }
  0x27   : > { %679 = vmatpush1.bf16.msra.mxu1 %v3364_v35  ;;  %v264_v21 = vrot.slane %v262_v12, 7  ;;  %v276_v22 = vshrl.u32 %v2952_v17, 16  ;;  %v279_v23 = vshll.u32 %v2952_v17, 16  ;;  %v3398_v24 = vld [vmem:[%s4970_s1 + $0x4e4] ss:$8 sps:$4 sm:$0xff]  }
  0x28   : > { %1717 = vmatpush1.bf16.msra.mxu0 %v3365_v36  ;;  %680 = vmatprep.subr.bf16.mxu1 %v3366_v37  ;;  %v271_v25 = vrot.slane %v269_v18, 7  ;;  %v194_v26 = vld [vmem:[#allocation2 + $0x20] sm:$0x11]  ;;  %v197_v31 = vld [vmem:[#allocation2 + $0x28] sm:$0x11] }
  0x29   : > { %1718 = vmatprep.subr.bf16.mxu0 %v3368_v38  ;;  %v267_v27 = vor.u32 %v265_v13, %v264_v21  ;;  %v278_v28 = vrot.slane %v276_v22, 7  ;;  %v195_v30 = vsel %vm3955_vm13, 0, %v194_v26  ;;  %v219_v32 = vld [vmem:[#allocation2 + $0x20] sm:$0x44]  ;;  %v198_v36 = vsel %vm3955_vm13, 0, %v197_v31  ;;  %vm391_vm13 = vmor %vm4061_vm11, %vm390_vm10 }
  0x2a   : > { %v3400_v33 = vld [vmem:[%s4970_s1 + $0x1e0] ss:$8 sps:$4 sm:$0xff]   ;;  %v274_v35 = vor.u32 %v272_v19, %v271_v25  ;;  %196 = vst [vmem:[#allocation2 + $0x20] sm:$0x11] %v195_v30  ;;  %v220_v37 = vsel %vm3989_vm8, 0, %v219_v32 }
  0x2b   : > { %681 = vmatpush1.bf16.msra.mxu1 %v3370_v39  ;;  %v3401_v34 = vld [vmem:[%s4970_s1 + $0x4e0] ss:$8 sps:$4 sm:$0xff]   ;;  %v3402_v39 = vld [vmem:[%s4970_s1 + $0x1f4] ss:$8 sps:$4 sm:$0xff]   ;;  %199 = vst [vmem:[#allocation2 + $0x28] sm:$0x11] %v198_v36 }
  0x2c   : > { %1719 = vmatpush1.bf16.msra.mxu0 %v3371_v40  ;;  %682 = vmatprep.subr.bf16.mxu1 %v3372_v41  ;;  %v222_v38 = vld [vmem:[#allocation2 + $0x28] sm:$0x44]  ;;  %v3404_v40 = vld [vmem:[%s4970_s1 + $0x4f4] ss:$8 sps:$4 sm:$0xff]   ;;  %v281_v41 = vor.u32 %v279_v23, %v278_v28  ;;  %221 = vst [vmem:[#allocation2 + $0x20] sm:$0x44] %v220_v37 }
  0x2d   : > { %1720 = vmatprep.subr.bf16.mxu0 %v3374_v42  ;;  %v223_v42 = vsel %vm3989_vm8, 0, %v222_v38  ;;  %v4057_v53 = vld.sshfl [vmem:[#allocation2] sm:$0x5f pattern:$0x76325410] }
  0x2e   : > { %224 = vst [vmem:[#allocation2 + $0x28] sm:$0x44] %v223_v42  ;;  %v4067_v56 = vcombine.high %v4057_v53, %v4057_v53  ;;  %v395_v57 = vshrl.u32 %v4057_v53, 16  ;;  %v398_v58 = vshll.u32 %v4057_v53, 16  ;;  %v3406_v60 = vld [vmem:[%s4970_s1 + $0x1f0] ss:$8 sps:$4 sm:$0xff]  }
  0x2f   : > { %683 = vmatpush1.bf16.msra.mxu1 %v3376_v43  ;;  %v2953_v43 = vld.sshfl [vmem:[%s3953_s17 + $0xc] sm:$0x33 pattern:$0x76325410]  ;;  %vm392_vm12 = vsmask.f32 7448  ;;  %s170_s17 = scalar_lea.vmem %s4972_s3, %s3268_s23 }
  0x30   : > { %1721 = vmatpush1.bf16.msra.mxu0 %v3377_v44  ;;  %684 = vmatprep.subr.bf16.mxu1 %v3378_v45  ;;  %v301_v44 = vld [vmem:[#allocation2 + $0x8] sm:$0x77]  ;;  %v304_v45 = vld [vmem:[#allocation2 + $0x10] sm:$0x77]  ;;  %v283_v55 = vshrl.u32 %v2953_v43, 16  ;;  %v286_v59 = vshll.u32 %v2953_v43, 16  ;;  %vm4090_vm14 = vmor %vm391_vm13, %vm392_vm12 }
  0x31   : > { %1722 = vmatprep.subr.bf16.mxu0 %v3380_v46  ;;  %v307_v46 = vld [vmem:[#allocation2 + $0x18] sm:$0x77]  ;;  %v305_v51 = vsel %vm4026_vm9, %v274_v35, %v304_v45  ;;  %v400_v0 = vrot.slane %v398_v58, 7  ;;  %v404_v1 = vshll.u32 %v4067_v56, 16  ;;  %v3410_v4 = vld [vmem:[%s4970_s1 + $0x4] ss:$8 sps:$4 sm:$0xff]  }
  0x32   : > { %v308_v52 = vsel %vm4026_vm9, %v281_v41, %v307_v46  ;;  %306 = vst [vmem:[#allocation2 + $0x10] sm:$0x77] %v305_v51  ;;  %v285_v61 = vrot.slane %v283_v55, 7  ;;  %v3413_v6 = vld [vmem:[%s4970_s1 + $0x504] ss:$8 sps:$4 sm:$0xff]  }
  0x33   : > { %685 = vmatpush1.bf16.msra.mxu1 %v3382_v47  ;;  %v3758_v47 = vmov 1983009808   ;;  %309 = vst [vmem:[#allocation2 + $0x18] sm:$0x77] %v308_v52  ;;  %v406_v8 = vrot.slane %v404_v1, 7 }
  0x34   : > { %1723 = vmatpush1.bf16.msra.mxu0 %v3383_v48  ;;  %686 = vmatprep.subr.bf16.mxu1 %v3384_v49  ;;  %v485_v48 = vunpack.c.l.s4 %v3758_v47  ;;  %v487_v49 = vlaneseq  ;;  %v288_v5 = vor.u32 %v286_v59, %v285_v61  ;;  %v310_v9 = vld [vmem:[#allocation2 + $0x20] sm:$0x77] }
  0x35   : > { %1724 = vmatprep.subr.bf16.mxu0 %v3386_v50  ;;  %v302_v50 = vsel %vm4026_vm9, %v267_v27, %v301_v44  ;;  %v4096_v13 = vld.sshfl [vmem:[#allocation2 + $0x28] sm:$0x5f pattern:$0x76325410] }
  0x36   : > { %303 = vst [vmem:[#allocation2 + $0x8] sm:$0x77] %v302_v50  ;;  %v311_v11 = vsel %vm4026_vm9, %v288_v5, %v310_v9  ;;  %v2271_v17 = vshrl.u32 %v4096_v13, 16  ;;  %v2274_v18 = vshll.u32 %v4096_v13, 16 }
  0x37   : > { %687 = vmatpush1.bf16.msra.mxu1 %v3388_v62  ;;  %v3407_v62 = vld [vmem:[%s4970_s1 + $0x4f0] ss:$8 sps:$4 sm:$0xff]   ;;  %312 = vst [vmem:[#allocation2 + $0x20] sm:$0x77] %v311_v11 }
  0x38   : > { %1725 = vmatpush1.bf16.msra.mxu0 %v3389_v63  ;;  %688 = vmatprep.subr.bf16.mxu1 %v3390_v2  ;;  %v397_v63 = vrot.slane %v395_v57, 6  ;;  %v486_v2 = vunpack.c.0.s8 %v485_v48  ;;  %v2273_v54 = vrot.slane %v2271_v17, 6  ;;  %v2276_v59 = vrot.slane %v2274_v18, 7 }
  0x39   : > { %1726 = vmatprep.subr.bf16.mxu0 %v3392_v3  ;;  %v4081_v3 = vshrl.u32 %v487_v49, 7  ;;  %v4109_v19 = vld.sshfl [vmem:[#allocation2 + $0x10] sm:$0x5f pattern:$0x76325410] }
  0x3a   : > { %v401_v7 = vor.u32 %v400_v0, %v397_v63  ;;  %v4123_v25 = vcombine.high %v4109_v19, %v4109_v19  ;;  %v423_v26 = vshrl.u32 %v4109_v19, 16  ;;  %v426_v27 = vshll.u32 %v4109_v19, 16 }
  0x3b   : > { %689 = vmatpush1.bf16.msra.mxu1 %v3394_v15  ;;  %v4101_v15 = vsub.s32 %v486_v2, %v4081_v3  ;;  %v2277_v2 = vor.u32 %v2276_v59, %v2273_v54 }
  0x3c   : > { %1727 = vmatpush1.bf16.msra.mxu0 %v3395_v16  ;;  %690 = vmatprep.subr.bf16.mxu1 %v3396_v20  ;;  %v402_v12 = vrot.slane %v401_v7, 2  ;;  %v4105_v16 = vcombine.high %v4096_v13, %v4096_v13  ;;  %v432_v35 = vshll.u32 %v4123_v25, 16 }
  0x3d   : > { %1728 = vmatprep.subr.bf16.mxu0 %v3398_v24  ;;  %v4098_v14 = vld.sshfl [vmem:[#allocation2 + $0x8] sm:$0x5f pattern:$0x76325410]  ;;  %v2278_v9 = vrot.slane %v2277_v2, 2 }
  0x3e   : > { %v4113_v20 = vcombine.high %v4098_v14, %v4098_v14  ;;  %v407_v21 = vsel %vm4090_vm14, %v402_v12, %v406_v8  ;;  %v409_v22 = vshrl.u32 %v4098_v14, 16  ;;  %v412_v23 = vshll.u32 %v4098_v14, 16  ;;  %v4119_v24 = vld.sshfl [vmem:[#allocation2 + $0x18] sm:$0x5f pattern:$0x76325410] }
  0x3f   : > { %691 = vmatpush1.bf16.msra.mxu1 %v3400_v33  ;;  %v705_v28 = vcombine.low %v4057_v53, %v4098_v14  ;;  %v4131_v29 = vcombine.high %v4119_v24, %v4119_v24  ;;  %v425_v33 = vrot.slane %v423_v26, 6  ;;  %v437_v36 = vshrl.u32 %v4119_v24, 16  ;;  %v4138_v44 = vld.sshfl [vmem:[#allocation2 + $0x20] sm:$0x5f pattern:$0x76325410] }
  0x40   : > { %1729 = vmatpush1.bf16.msra.mxu0 %v3401_v34  ;;  %692 = vmatprep.subr.bf16.mxu1 %v3402_v39  ;;  %v411_v30 = vrot.slane %v409_v22, 6  ;;  %v414_v31 = vrot.slane %v412_v23, 7  ;;  %v418_v32 = vshll.u32 %v4113_v20, 16  ;;  %v428_v34 = vrot.slane %v426_v27, 7  ;;  %v3431_v2 = vld [vmem:[%s4970_s1 + $0x534] ss:$8 sps:$4 sm:$0xff]  }
  0x41   : > { %1730 = vmatprep.subr.bf16.mxu0 %v3404_v40  ;;  %v440_v39 = vshll.u32 %v4119_v24, 16  ;;  %v446_v40 = vshll.u32 %v4131_v29, 16  ;;  %v434_v42 = vrot.slane %v432_v35, 7  ;;  %v439_v43 = vrot.slane %v437_v36, 6  ;;  %v3695_v23 = vld [vmem:[%s4970_s1 + $0x7f4] ss:$8 sps:$4 sm:$0xff]  }
  0x42   : > { %v415_v37 = vor.u32 %v414_v31, %v411_v30  ;;  %v420_v38 = vrot.slane %v418_v32, 7  ;;  %v429_v41 = vor.u32 %v428_v34, %v425_v33  ;;  %v706_v45 = vcombine.low %v4109_v19, %v4119_v24 }
  0x43   : > { %693 = vmatpush1.bf16.msra.mxu1 %v3406_v60  ;;  %v442_v47 = vrot.slane %v440_v39, 7  ;;  %v448_v48 = vrot.slane %v446_v40, 7  ;;  %v4144_v49 = vcombine.high %v4138_v44, %v4138_v44  ;;  %v1475_v51 = vshrl.u32 %v4138_v44, 16 }
  0x44   : > { %1731 = vmatpush1.bf16.msra.mxu0 %v3407_v62  ;;  %885 = vmatprep.subr.bf16.mxu1 %v3410_v4  ;;  %v416_v46 = vrot.slane %v415_v37, 2  ;;  %v430_v50 = vrot.slane %v429_v41, 2  ;;  %v1478_v52 = vshll.u32 %v4138_v44, 16  ;;  %v4157_v7 = vrot.slane %v705_v28, %v4101_v15  ;;  %v3408_v37 = vld [vmem:[%s4970_s1] ss:$8 sps:$4 sm:$0xff]  }
  0x45   : > { %1963 = vmatprep.subr.bf16.mxu0 %v3413_v6  ;;  %v443_v57 = vor.u32 %v442_v47, %v439_v43  ;;  %v1484_v58 = vshll.u32 %v4144_v49, 16  ;;  %v1477_v62 = vrot.slane %v1475_v51, 6  ;;  %v2280_v6 = vshll.u32 %v4105_v16, 16  ;;  %v3411_v47 = vld [vmem:[%s4970_s1 + $0x500] ss:$8 sps:$4 sm:$0xff]  }
  0x46   : > { %v421_v55 = vsel %vm4090_vm14, %v416_v46, %v420_v38  ;;  %v435_v60 = vsel %vm4090_vm14, %v430_v50, %v434_v42  ;;  %v1480_v63 = vrot.slane %v1478_v52, 7  ;;  %v4163_v11 = vrot.slane %v706_v45, %v4101_v15  ;;  %v3422_v52 = vld [vmem:[%s4970_s1 + $0x24] ss:$8 sps:$4 sm:$0xff]  }
  0x47   : > { %v482_v61 = vcombine.low %v407_v21, %v421_v55  ;;  %v444_v0 = vrot.slane %v443_v57, 2  ;;  %v1520_v1 = vcombine.low %v421_v55, %v435_v60  ;;  %v1486_v5 = vrot.slane %v1484_v58, 7  ;;  %v3417_v58 = vld [vmem:[%s4970_s1 + $0x510] ss:$8 sps:$4 sm:$0xff]  }
  0x48   : > { %v1481_v4 = vor.u32 %v1480_v63, %v1477_v62  ;;  %v2282_v21 = vrot.slane %v2280_v6, 7  ;;  %v3023_v26 = vrot.slane %v4098_v14, 9  ;;  %v721_v27 = vcombine.low %v4157_v7, %v4163_v11  ;;  %v3428_v62 = vld [vmem:[%s4970_s1 + $0x34] ss:$8 sps:$4 sm:$0xff]   ;;  %v3432_v6 = vld [vmem:[%s4970_s1 + $0x40] ss:$8 sps:$4 sm:$0xff]  }
  0x49   : > { %v449_v8 = vsel %vm4090_vm14, %v444_v0, %v448_v48  ;;  %v490_v17 = vrot.slane %v482_v61, %v4101_v15  ;;  %v1528_v22 = vrot.slane %v1520_v1, %v4101_v15  ;;  %v937_v32 = vrot.slane %v4113_v20, 7  ;;  %v3419_v48 = vld [vmem:[%s4970_s1 + $0x514] ss:$8 sps:$4 sm:$0xff]   ;;  %v3425_v61 = vld [vmem:[%s4970_s1 + $0x524] ss:$8 sps:$4 sm:$0xff]  }
  0x4a   : > { %v483_v12 = vcombine.low %v435_v60, %v449_v8  ;;  %v1482_v18 = vrot.slane %v1481_v4, 2  ;;  %v2283_v31 = vsel %vm4090_vm14, %v2278_v9, %v2282_v21  ;;  %v722_v14 = vcombine.high %v4157_v7, %v4163_v11  ;;  %v3423_v0 = vld [vmem:[%s4970_s1 + $0x520] ss:$8 sps:$4 sm:$0xff]   ;;  %v3426_v1 = vld [vmem:[%s4970_s1 + $0x30] ss:$8 sps:$4 sm:$0xff]  }
  0x4b   : > { %v3024_v35 = vrot.slane %v4109_v19, 9  ;;  %v4195_v10 = vsel %vm4168_vm0, %v3023_v26, %v937_v32  ;;  %v941_v20 = vrot.slane %v4123_v25, 7  ;;  %v3416_v19 = vld [vmem:[%s4970_s1 + $0x14] ss:$8 sps:$4 sm:$0xff]   ;;  %v3025_v40 = vrot.slane %v4119_v24, 9 }
  0x4c   : > { %v4176_v28 = vrot.slane %v483_v12, %v4101_v15  ;;  %v1487_v30 = vsel %vm4090_vm14, %v1482_v18, %v1486_v5  ;;  %v945_v41 = vrot.slane %v4131_v29, 7  ;;  %v2050_v42 = vcombine.low %v4138_v44, %v4096_v13  ;;  %v3434_v4 = vld [vmem:[%s4970_s1 + $0x44] ss:$8 sps:$4 sm:$0xff]   ;;  %v3429_v5 = vld [vmem:[%s4970_s1 + $0x530] ss:$8 sps:$4 sm:$0xff]  }
  0x4d   : > { %v1521_v33 = vcombine.low %v449_v8, %v1487_v30  ;;  %v4183_v34 = vcombine.low %v1487_v30, %v2283_v31  ;;  %v4208_v43 = vsel %vm4168_vm0, %v3024_v35, %v941_v20  ;;  %v3123_v25 = vrot.slane %v4138_v44, 9  ;;  %v3414_v44 = vld [vmem:[%s4970_s1 + $0x10] ss:$8 sps:$4 sm:$0xff]   ;;  %v3437_v8 = vld [vmem:[%s4970_s1 + $0x544] ss:$8 sps:$4 sm:$0xff]  }
  0x4e   : > { %v499_v36 = vcombine.high %v490_v17, %v4176_v28  ;;  %v498_v38 = vcombine.low %v490_v17, %v4176_v28  ;;  %v1749_v45 = vrot.slane %v4144_v49, 7  ;;  %v4217_v29 = vsel %vm4168_vm0, %v3025_v40, %v945_v41  ;;  %v3440_v9 = vld [vmem:[%s4970_s1 + $0x54] ss:$8 sps:$4 sm:$0xff]   ;;  %v3435_v12 = vld [vmem:[%s4970_s1 + $0x540] ss:$8 sps:$4 sm:$0xff]  }
  0x4f   : > { %v1535_v39 = vrot.slane %v1521_v33, %v4101_v15  ;;  %v1783_v13 = vcombine.low %v4195_v10, %v4208_v43  ;;  %v3022_v50 = vrot.slane %v4057_v53, 9  ;;  %v4233_v51 = vrot.slane %v2050_v42, %v4101_v15  ;;  %v3438_v17 = vld [vmem:[%s4970_s1 + $0x50] ss:$8 sps:$4 sm:$0xff]   ;;  %v3443_v18 = vld [vmem:[%s4970_s1 + $0x554] ss:$8 sps:$4 sm:$0xff]  }
  0x50   : > { %694 = vmatprep.mubr.bf16.mxu1 %v499_v36  ;;  %v4229_v49 = vsel %vm4168_vm0, %v3123_v25, %v1749_v45  ;;  %v933_v57 = vrot.slane %v4067_v56, 7  ;;  %v3420_v56 = vld [vmem:[%s4970_s1 + $0x20] ss:$8 sps:$4 sm:$0xff]   ;;  %v3446_v21 = vld [vmem:[%s4970_s1 + $0x64] ss:$8 sps:$4 sm:$0xff]  }
  0x51   : > { %v1537_v46 = vcombine.high %v1528_v22, %v1535_v39  ;;  %695 = vmatmul.mubr.bf16.vlgmr.msra.gmra.mrb[0].mxu1 %v498_v38  ;;  %v1536_v24 = vcombine.low %v1528_v22, %v1535_v39  ;;  %v1784_v54 = vcombine.low %v4217_v29, %v4229_v49  ;;  %v4241_v55 = vrot.slane %v1783_v13, %v4101_v15  ;;  %v3441_v22 = vld [vmem:[%s4970_s1 + $0x550] ss:$8 sps:$4 sm:$0xff]   ;;  %v3444_v26 = vld [vmem:[%s4970_s1 + $0x60] ss:$8 sps:$4 sm:$0xff]   ;;  %v3449_v30 = vld [vmem:[%s4970_s1 + $0x564] ss:$8 sps:$4 sm:$0xff]  }
  0x52   : > { %886 = vmatpush1.bf16.msra.mxu1 %v3408_v37  ;;  %917 = vmatprep.mubr.bf16.mxu1 %v722_v14  ;;  %v2058_v53 = vcombine.low %v4163_v11, %v4233_v51  ;;  %v4254_v60 = vsel %vm4168_vm0, %v3022_v50, %v933_v57  ;;  %v3452_v31 = vld [vmem:[%s4970_s1 + $0x74] ss:$8 sps:$4 sm:$0xff]   ;;  %v3447_v32 = vld [vmem:[%s4970_s1 + $0x560] ss:$8 sps:$4 sm:$0xff]   ;;  %v3450_v33 = vld [vmem:[%s4970_s1 + $0x70] ss:$8 sps:$4 sm:$0xff]  }
  0x53   : > { %1732 = vmatprep.mubr.bf16.mxu0 %v1537_v46  ;;  %887 = vmatprep.subr.bf16.mxu1 %v3416_v19  ;;  %v4250_v59 = vrot.slane %v1784_v54, %v4101_v15  ;;  %v3455_v14 = vld [vmem:[%s4970_s1 + $0x574] ss:$8 sps:$4 sm:$0xff]   ;;  %v3458_v35 = vld [vmem:[%s4970_s1 + $0x84] ss:$8 sps:$4 sm:$0xff]   ;;  %v3453_v36 = vld [vmem:[%s4970_s1 + $0x570] ss:$8 sps:$4 sm:$0xff]  }
  0x54   : > { %1733 = vmatmul.mubr.bf16.vlgmr.msra.gmra.mrb[0].mxu0 %v1536_v24  ;;  %v3456_v37 = vld [vmem:[%s4970_s1 + $0x80] ss:$8 sps:$4 sm:$0xff]   ;;  %v3461_v38 = vld [vmem:[%s4970_s1 + $0x584] ss:$8 sps:$4 sm:$0xff]   ;;  %v3464_v20 = vld [vmem:[%s4970_s1 + $0x94] ss:$8 sps:$4 sm:$0xff]  }
  0x55   : > { %1964 = vmatpush1.bf16.msra.mxu0 %v3411_v47  ;;  %v1800_v63 = vcombine.high %v4241_v55, %v4250_v59  ;;  %v3459_v39 = vld [vmem:[%s4970_s1 + $0x580] ss:$8 sps:$4 sm:$0xff]   ;;  %v3462_v19 = vld [vmem:[%s4970_s1 + $0x90] ss:$8 sps:$4 sm:$0xff]   ;;  %v3467_v40 = vld [vmem:[%s4970_s1 + $0x594] ss:$8 sps:$4 sm:$0xff]  }
  0x56   : > { %1965 = vmatprep.subr.bf16.mxu0 %v3419_v48  ;;  %888 = vmatpush1.bf16.msra.mxu1 %v3414_v44  ;;  %v3470_v41 = vld [vmem:[%s4970_s1 + $0xa4] ss:$8 sps:$4 sm:$0xff]   ;;  %v3465_v42 = vld [vmem:[%s4970_s1 + $0x590] ss:$8 sps:$4 sm:$0xff]   ;;  %v3468_v25 = vld [vmem:[%s4970_s1 + $0xa0] ss:$8 sps:$4 sm:$0xff]  }
  0x57   : > { %889 = vmatprep.subr.bf16.mxu1 %v3422_v52  ;;  %1995 = vmatprep.mubr.bf16.mxu0 %v1800_v63  ;;  %v3473_v45 = vld [vmem:[%s4970_s1 + $0x5a4] ss:$8 sps:$4 sm:$0xff]   ;;  %v3476_v46 = vld [vmem:[%s4970_s1 + $0xb4] ss:$8 sps:$4 sm:$0xff]   ;;  %v3471_v47 = vld [vmem:[%s4970_s1 + $0x5a0] ss:$8 sps:$4 sm:$0xff]  }
  0x58   : > { %v3474_v24 = vld [vmem:[%s4970_s1 + $0xb0] ss:$8 sps:$4 sm:$0xff]   ;;  %v3479_v13 = vld [vmem:[%s4970_s1 + $0x5b4] ss:$8 sps:$4 sm:$0xff]   ;;  %v3482_v44 = vld [vmem:[%s4970_s1 + $0xc4] ss:$8 sps:$4 sm:$0xff]  }
  0x59   : > { %1966 = vmatpush1.bf16.msra.mxu0 %v3417_v58  ;;  %v3477_v48 = vld [vmem:[%s4970_s1 + $0x5b0] ss:$8 sps:$4 sm:$0xff]   ;;  %v3480_v50 = vld [vmem:[%s4970_s1 + $0xc0] ss:$8 sps:$4 sm:$0xff]   ;;  %v3485_v52 = vld [vmem:[%s4970_s1 + $0x5c4] ss:$8 sps:$4 sm:$0xff]  }
  0x5a   : > { %1967 = vmatprep.subr.bf16.mxu0 %v3425_v61  ;;  %890 = vmatpush1.bf16.msra.mxu1 %v3420_v56  ;;  %v3488_v54 = vld [vmem:[%s4970_s1 + $0xd4] ss:$8 sps:$4 sm:$0xff]   ;;  %v3483_v57 = vld [vmem:[%s4970_s1 + $0x5c0] ss:$8 sps:$4 sm:$0xff]   ;;  %v3486_v58 = vld [vmem:[%s4970_s1 + $0xd0] ss:$8 sps:$4 sm:$0xff]  }
  0x5b   : > { %891 = vmatprep.subr.bf16.mxu1 %v3428_v62  ;;  %v3491_v56 = vld [vmem:[%s4970_s1 + $0x5d4] ss:$8 sps:$4 sm:$0xff]   ;;  %v3494_v61 = vld [vmem:[%s4970_s1 + $0xe4] ss:$8 sps:$4 sm:$0xff]   ;;  %v3489_v62 = vld [vmem:[%s4970_s1 + $0x5d0] ss:$8 sps:$4 sm:$0xff]  }
  0x5c   : > { %v3492_v63 = vld [vmem:[%s4970_s1 + $0xe0] ss:$8 sps:$4 sm:$0xff]   ;;  %v3513_v7 = vld [vmem:[%s4970_s1 + $0x610] ss:$8 sps:$4 sm:$0xff]  }
  0x5d   : > { %1968 = vmatpush1.bf16.msra.mxu0 %v3423_v0  ;;  %v3497_v0 = vld [vmem:[%s4970_s1 + $0x5e4] ss:$8 sps:$4 sm:$0xff]  }
  0x5e   : > { %1969 = vmatprep.subr.bf16.mxu0 %v3431_v2  ;;  %892 = vmatpush1.bf16.msra.mxu1 %v3426_v1  ;;  %v3500_v1 = vld [vmem:[%s4970_s1 + $0xf4] ss:$8 sps:$4 sm:$0xff]   ;;  %v980_v2 = vcombine.low %v4208_v43, %v4217_v29 }
  0x5f   : > { %893 = vmatprep.subr.bf16.mxu1 %v3434_v4  ;;  %v979_v4 = vcombine.low %v4254_v60, %v4195_v10  ;;  %v3506_v10 = vld [vmem:[%s4970_s1 + $0x204] ss:$8 sps:$4 sm:$0xff]   ;;  %v3501_v60 = vld [vmem:[%s4970_s1 + $0x5f0] ss:$8 sps:$4 sm:$0xff]  }
  0x60   : > { %v4431_v29 = vrot.slane %v980_v2, %v4101_v15  ;;  %v3572_v2 = vld [vmem:[%s4970_s1 + $0x2b4] ss:$8 sps:$4 sm:$0xff]  }
  0x61   : > { %1970 = vmatpush1.bf16.msra.mxu0 %v3429_v5  ;;  %v3495_v5 = vld [vmem:[%s4970_s1 + $0x5e0] ss:$8 sps:$4 sm:$0xff]   ;;  %v4428_v43 = vrot.slane %v979_v4, %v4101_v15 }
  0x62   : > { %1971 = vmatprep.subr.bf16.mxu0 %v3437_v8  ;;  %894 = vmatpush1.bf16.msra.mxu1 %v3432_v6  ;;  %v3498_v6 = vld [vmem:[%s4970_s1 + $0xf0] ss:$8 sps:$4 sm:$0xff]   ;;  %v3503_v8 = vld [vmem:[%s4970_s1 + $0x5f4] ss:$8 sps:$4 sm:$0xff]   ;;  %v3567_v4 = vld [vmem:[%s4970_s1 + $0x6a0] ss:$8 sps:$4 sm:$0xff]  }
  0x63   : > { %895 = vmatprep.subr.bf16.mxu1 %v3440_v9  ;;  %v3504_v9 = vld [vmem:[%s4970_s1 + $0x200] ss:$8 sps:$4 sm:$0xff]  }
  0x65   : > { %1972 = vmatpush1.bf16.msra.mxu0 %v3435_v12  ;;  %v3509_v12 = vld [vmem:[%s4970_s1 + $0x604] ss:$8 sps:$4 sm:$0xff]  }
  0x66   : > { %1973 = vmatprep.subr.bf16.mxu0 %v3443_v18  ;;  %896 = vmatpush1.bf16.msra.mxu1 %v3438_v17  ;;  %v3512_v17 = vld [vmem:[%s4970_s1 + $0x214] ss:$8 sps:$4 sm:$0xff]   ;;  %v996_v18 = vcombine.high %v4428_v43, %v4431_v29 }
  0x67   : > { %897 = vmatprep.subr.bf16.mxu1 %v3446_v21  ;;  %v1799_v21 = vcombine.low %v4241_v55, %v4250_v59  ;;  %v3515_v55 = vld [vmem:[%s4970_s1 + $0x614] ss:$8 sps:$4 sm:$0xff]   ;;  %v3518_v59 = vld [vmem:[%s4970_s1 + $0x224] ss:$8 sps:$4 sm:$0xff]  }
  0x69   : > { %1974 = vmatpush1.bf16.msra.mxu0 %v3441_v22  ;;  %v3507_v22 = vld [vmem:[%s4970_s1 + $0x600] ss:$8 sps:$4 sm:$0xff]  }
  0x6a   : > { %1975 = vmatprep.subr.bf16.mxu0 %v3449_v30  ;;  %898 = vmatpush1.bf16.msra.mxu1 %v3444_v26  ;;  %v2059_v26 = vcombine.high %v4163_v11, %v4233_v51  ;;  %v3510_v30 = vld [vmem:[%s4970_s1 + $0x210] ss:$8 sps:$4 sm:$0xff]   ;;  %v3620_v11 = vld [vmem:[%s4970_s1 + $0x334] ss:$8 sps:$4 sm:$0xff]   ;;  %v3615_v51 = vld [vmem:[%s4970_s1 + $0x720] ss:$8 sps:$4 sm:$0xff]  }
  0x6b   : > { %899 = vmatprep.subr.bf16.mxu1 %v3452_v31  ;;  %v3521_v31 = vld [vmem:[%s4970_s1 + $0x624] ss:$8 sps:$4 sm:$0xff]  }
  0x6d   : > { %1976 = vmatpush1.bf16.msra.mxu0 %v3447_v32  ;;  %v3524_v32 = vld [vmem:[%s4970_s1 + $0x234] ss:$8 sps:$4 sm:$0xff]  }
  0x6e   : > { %1977 = vmatprep.subr.bf16.mxu0 %v3455_v14  ;;  %900 = vmatpush1.bf16.msra.mxu1 %v3450_v33  ;;  %v3519_v33 = vld [vmem:[%s4970_s1 + $0x620] ss:$8 sps:$4 sm:$0xff]   ;;  %v3522_v14 = vld [vmem:[%s4970_s1 + $0x230] ss:$8 sps:$4 sm:$0xff]  }
  0x6f   : > { %901 = vmatprep.subr.bf16.mxu1 %v3458_v35  ;;  %v3527_v35 = vld [vmem:[%s4970_s1 + $0x634] ss:$8 sps:$4 sm:$0xff]  }
  0x71   : > { %1978 = vmatpush1.bf16.msra.mxu0 %v3453_v36  ;;  %v3530_v36 = vld [vmem:[%s4970_s1 + $0x244] ss:$8 sps:$4 sm:$0xff]  }
  0x72   : > { %1979 = vmatprep.subr.bf16.mxu0 %v3461_v38  ;;  %902 = vmatpush1.bf16.msra.mxu1 %v3456_v37  ;;  %v3525_v37 = vld [vmem:[%s4970_s1 + $0x630] ss:$8 sps:$4 sm:$0xff]   ;;  %v3528_v38 = vld [vmem:[%s4970_s1 + $0x240] ss:$8 sps:$4 sm:$0xff]  }
  0x73   : > { %903 = vmatprep.subr.bf16.mxu1 %v3464_v20  ;;  %v3533_v20 = vld [vmem:[%s4970_s1 + $0x644] ss:$8 sps:$4 sm:$0xff]  }
  0x75   : > { %1980 = vmatpush1.bf16.msra.mxu0 %v3459_v39  ;;  %v3536_v39 = vld [vmem:[%s4970_s1 + $0x254] ss:$8 sps:$4 sm:$0xff]  }
  0x76   : > { %1981 = vmatprep.subr.bf16.mxu0 %v3467_v40  ;;  %904 = vmatpush1.bf16.msra.mxu1 %v3462_v19  ;;  %v3531_v19 = vld [vmem:[%s4970_s1 + $0x640] ss:$8 sps:$4 sm:$0xff]   ;;  %v3534_v40 = vld [vmem:[%s4970_s1 + $0x250] ss:$8 sps:$4 sm:$0xff]  }
  0x77   : > { %905 = vmatprep.subr.bf16.mxu1 %v3470_v41  ;;  %v3539_v41 = vld [vmem:[%s4970_s1 + $0x654] ss:$8 sps:$4 sm:$0xff]  }
  0x79   : > { %1982 = vmatpush1.bf16.msra.mxu0 %v3465_v42  ;;  %v3542_v42 = vld [vmem:[%s4970_s1 + $0x264] ss:$8 sps:$4 sm:$0xff]  }
  0x7a   : > { %1983 = vmatprep.subr.bf16.mxu0 %v3473_v45  ;;  %906 = vmatpush1.bf16.msra.mxu1 %v3468_v25  ;;  %v3537_v25 = vld [vmem:[%s4970_s1 + $0x650] ss:$8 sps:$4 sm:$0xff]   ;;  %v3540_v45 = vld [vmem:[%s4970_s1 + $0x260] ss:$8 sps:$4 sm:$0xff]  }
  0x7b   : > { %907 = vmatprep.subr.bf16.mxu1 %v3476_v46  ;;  %v3545_v46 = vld [vmem:[%s4970_s1 + $0x664] ss:$8 sps:$4 sm:$0xff]  }
  0x7d   : > { %1984 = vmatpush1.bf16.msra.mxu0 %v3471_v47  ;;  %v3548_v47 = vld [vmem:[%s4970_s1 + $0x274] ss:$8 sps:$4 sm:$0xff]  }
  0x7e   : > { %1985 = vmatprep.subr.bf16.mxu0 %v3479_v13  ;;  %908 = vmatpush1.bf16.msra.mxu1 %v3474_v24  ;;  %v3543_v24 = vld [vmem:[%s4970_s1 + $0x660] ss:$8 sps:$4 sm:$0xff]   ;;  %v3546_v13 = vld [vmem:[%s4970_s1 + $0x270] ss:$8 sps:$4 sm:$0xff]  }
  0x7f   : > { %909 = vmatprep.subr.bf16.mxu1 %v3482_v44  ;;  %v3551_v44 = vld [vmem:[%s4970_s1 + $0x674] ss:$8 sps:$4 sm:$0xff]  }
  0x81   : > { %1986 = vmatpush1.bf16.msra.mxu0 %v3477_v48  ;;  %v3554_v48 = vld [vmem:[%s4970_s1 + $0x284] ss:$8 sps:$4 sm:$0xff]  }
  0x82   : > { %1987 = vmatprep.subr.bf16.mxu0 %v3485_v52  ;;  %910 = vmatpush1.bf16.msra.mxu1 %v3480_v50  ;;  %v3549_v50 = vld [vmem:[%s4970_s1 + $0x670] ss:$8 sps:$4 sm:$0xff]   ;;  %v3552_v52 = vld [vmem:[%s4970_s1 + $0x280] ss:$8 sps:$4 sm:$0xff]  }
  0x83   : > { %911 = vmatprep.subr.bf16.mxu1 %v3488_v54  ;;  %v3557_v54 = vld [vmem:[%s4970_s1 + $0x684] ss:$8 sps:$4 sm:$0xff]  }
  0x85   : > { %1988 = vmatpush1.bf16.msra.mxu0 %v3483_v57  ;;  %v3560_v57 = vld [vmem:[%s4970_s1 + $0x294] ss:$8 sps:$4 sm:$0xff]  }
  0x86   : > { %1989 = vmatprep.subr.bf16.mxu0 %v3491_v56  ;;  %912 = vmatpush1.bf16.msra.mxu1 %v3486_v58  ;;  %v3555_v58 = vld [vmem:[%s4970_s1 + $0x680] ss:$8 sps:$4 sm:$0xff]   ;;  %v3558_v56 = vld [vmem:[%s4970_s1 + $0x290] ss:$8 sps:$4 sm:$0xff]  }
  0x87   : > { %913 = vmatprep.subr.bf16.mxu1 %v3494_v61  ;;  %v3563_v61 = vld [vmem:[%s4970_s1 + $0x694] ss:$8 sps:$4 sm:$0xff]  }
  0x89   : > { %1990 = vmatpush1.bf16.msra.mxu0 %v3489_v62  ;;  %v3566_v62 = vld [vmem:[%s4970_s1 + $0x2a4] ss:$8 sps:$4 sm:$0xff]  }
  0x8a   : > { %1991 = vmatprep.subr.bf16.mxu0 %v3497_v0  ;;  %914 = vmatpush1.bf16.msra.mxu1 %v3492_v63  ;;  %v3561_v63 = vld [vmem:[%s4970_s1 + $0x690] ss:$8 sps:$4 sm:$0xff]   ;;  %v3564_v0 = vld [vmem:[%s4970_s1 + $0x2a0] ss:$8 sps:$4 sm:$0xff]  }
  0x8b   : > { %915 = vmatprep.subr.bf16.mxu1 %v3500_v1  ;;  %v3569_v1 = vld [vmem:[%s4970_s1 + $0x6a4] ss:$8 sps:$4 sm:$0xff]  }
  0x8d   : > { %1992 = vmatpush1.bf16.msra.mxu0 %v3495_v5  ;;  %v3570_v5 = vld [vmem:[%s4970_s1 + $0x2b0] ss:$8 sps:$4 sm:$0xff]  }
  0x8e   : > { %1993 = vmatprep.subr.bf16.mxu0 %v3503_v8  ;;  %916 = vmatpush1.bf16.msra.mxu1 %v3498_v6  ;;  %v3575_v6 = vld [vmem:[%s4970_s1 + $0x6b4] ss:$8 sps:$4 sm:$0xff]   ;;  %v3578_v8 = vld [vmem:[%s4970_s1 + $0x2c4] ss:$8 sps:$4 sm:$0xff]  }
  0x8f   : > { %1159 = vmatprep.subr.bf16.mxu1 %v3506_v10  ;;  %v3573_v10 = vld [vmem:[%s4970_s1 + $0x6b0] ss:$8 sps:$4 sm:$0xff]  }
  0x91   : > { %1994 = vmatpush1.bf16.msra.mxu0 %v3501_v60  ;;  %918 = vmatmul.mubr.bf16.vlgmr.msra.gmra.mrb[0].mxu1 %v721_v27  ;;  %v3516_v27 = vld [vmem:[%s4970_s1 + $0x220] ss:$8 sps:$4 sm:$0xff]  }
  0x92   : > { %2222 = vmatprep.subr.bf16.mxu0 %v3509_v12  ;;  %1160 = vmatpush1.bf16.msra.mxu1 %v3504_v9  ;;  %v3576_v60 = vld [vmem:[%s4970_s1 + $0x2c0] ss:$8 sps:$4 sm:$0xff]   ;;  %v3581_v9 = vld [vmem:[%s4970_s1 + $0x6c4] ss:$8 sps:$4 sm:$0xff]   ;;  %v3584_v12 = vld [vmem:[%s4970_s1 + $0x2d4] ss:$8 sps:$4 sm:$0xff]  }
  0x93   : > { %1161 = vmatprep.subr.bf16.mxu1 %v3512_v17  ;;  %1191 = vmatprep.mubr.bf16.mxu1 %v996_v18  ;;  %v3579_v17 = vld [vmem:[%s4970_s1 + $0x6c0] ss:$8 sps:$4 sm:$0xff]   ;;  %v3582_v18 = vld [vmem:[%s4970_s1 + $0x2d0] ss:$8 sps:$4 sm:$0xff]  }
  0x94   : > { %1996 = vmatmul.mubr.bf16.vlgmr.msra.gmra.mrb[0].mxu0 %v1799_v21  ;;  %v3587_v21 = vld [vmem:[%s4970_s1 + $0x6d4] ss:$8 sps:$4 sm:$0xff]  }
  0x95   : > { %2223 = vmatpush1.bf16.msra.mxu0 %v3507_v22  ;;  %2254 = vmatprep.mubr.bf16.mxu0 %v2059_v26  ;;  %v3590_v22 = vld [vmem:[%s4970_s1 + $0x2e4] ss:$8 sps:$4 sm:$0xff]   ;;  %v3585_v26 = vld [vmem:[%s4970_s1 + $0x6d0] ss:$8 sps:$4 sm:$0xff]  }
  0x96   : > { %2224 = vmatprep.subr.bf16.mxu0 %v3515_v55  ;;  %1162 = vmatpush1.bf16.msra.mxu1 %v3510_v30  ;;  %v3588_v30 = vld [vmem:[%s4970_s1 + $0x2e0] ss:$8 sps:$4 sm:$0xff]   ;;  %v3593_v55 = vld [vmem:[%s4970_s1 + $0x6e4] ss:$8 sps:$4 sm:$0xff]  }
  0x97   : > { %1163 = vmatprep.subr.bf16.mxu1 %v3518_v59  ;;  %v3596_v59 = vld [vmem:[%s4970_s1 + $0x2f4] ss:$8 sps:$4 sm:$0xff]  }
  0x99   : > { %2225 = vmatpush1.bf16.msra.mxu0 %v3513_v7  ;;  %v3744_v7 = vld.sshfl [vmem:[#allocation2 + $0x8] sm:$0x5f pattern:$0x76325410] }
  0x9a   : > { %2226 = vmatprep.subr.bf16.mxu0 %v3521_v31  ;;  %1164 = vmatpush1.bf16.msra.mxu1 %v3516_v27  ;;  %v3745_v27 = vld.sshfl [vmem:[#allocation2 + $0x10] sm:$0x5f pattern:$0x76325410] }
  0x9b   : > { %1165 = vmatprep.subr.bf16.mxu1 %v3524_v32  ;;  %v1246_v31 = vcombine.low %v3744_v7, %v3745_v27  ;;  %v3746_v32 = vld.sshfl [vmem:[#allocation2 + $0x18] sm:$0x5f pattern:$0x76325410]  ;;  %v3660_v7 = vld [vmem:[%s4970_s1 + $0x3a0] ss:$8 sps:$4 sm:$0xff]  }
  0x9c   : > { %v3665_v27 = vld [vmem:[%s4970_s1 + $0x7a4] ss:$8 sps:$4 sm:$0xff]  }
  0x9d   : > { %2227 = vmatpush1.bf16.msra.mxu0 %v3519_v33  ;;  %v3747_v33 = vld.sshfl [vmem:[#allocation2 + $0x20] sm:$0x5f pattern:$0x76325410] }
  0x9e   : > { %2228 = vmatprep.subr.bf16.mxu0 %v3527_v35  ;;  %1166 = vmatpush1.bf16.msra.mxu1 %v3522_v14  ;;  %v1247_v14 = vcombine.low %v3746_v32, %v3747_v33  ;;  %v3591_v35 = vld [vmem:[%s4970_s1 + $0x6e0] ss:$8 sps:$4 sm:$0xff]   ;;  %v3666_v33 = vld [vmem:[%s4970_s1 + $0x3b0] ss:$8 sps:$4 sm:$0xff]  }
  0x9f   : > { %1167 = vmatprep.subr.bf16.mxu1 %v3530_v36  ;;  %v3594_v36 = vld [vmem:[%s4970_s1 + $0x2f0] ss:$8 sps:$4 sm:$0xff]   ;;  %v3663_v32 = vld [vmem:[%s4970_s1 + $0x7a0] ss:$8 sps:$4 sm:$0xff]  }
  0xa1   : > { %2229 = vmatpush1.bf16.msra.mxu0 %v3525_v37  ;;  %v3599_v37 = vld [vmem:[%s4970_s1 + $0x6f4] ss:$8 sps:$4 sm:$0xff]  }
  0xa2   : > { %2230 = vmatprep.subr.bf16.mxu0 %v3533_v20  ;;  %1168 = vmatpush1.bf16.msra.mxu1 %v3528_v38  ;;  %v3602_v38 = vld [vmem:[%s4970_s1 + $0x304] ss:$8 sps:$4 sm:$0xff]   ;;  %v4635_v20 = vrot.slane %v1246_v31, %v4101_v15  ;;  %v3668_v31 = vld [vmem:[%s4970_s1 + $0x3b4] ss:$8 sps:$4 sm:$0xff]  }
  0xa3   : > { %1169 = vmatprep.subr.bf16.mxu1 %v3536_v39  ;;  %v4638_v39 = vrot.slane %v1247_v14, %v4101_v15  ;;  %v3671_v14 = vld [vmem:[%s4970_s1 + $0x7b4] ss:$8 sps:$4 sm:$0xff]  }
  0xa5   : > { %2231 = vmatpush1.bf16.msra.mxu0 %v3531_v19  ;;  %v3597_v19 = vld [vmem:[%s4970_s1 + $0x6f0] ss:$8 sps:$4 sm:$0xff]  }
  0xa6   : > { %2232 = vmatprep.subr.bf16.mxu0 %v3539_v41  ;;  %1170 = vmatpush1.bf16.msra.mxu1 %v3534_v40  ;;  %v995_v40 = vcombine.low %v4428_v43, %v4431_v29  ;;  %v4647_v41 = vrot.slane %v4183_v34, %v4101_v15  ;;  %v1263_v43 = vcombine.high %v4635_v20, %v4638_v39  ;;  %v3603_v34 = vld [vmem:[%s4970_s1 + $0x700] ss:$8 sps:$4 sm:$0xff]  }
  0xa7   : > { %1171 = vmatprep.subr.bf16.mxu1 %v3542_v42  ;;  %v3600_v42 = vld [vmem:[%s4970_s1 + $0x300] ss:$8 sps:$4 sm:$0xff]  }
  0xa9   : > { %2233 = vmatpush1.bf16.msra.mxu0 %v3537_v25  ;;  %v3605_v25 = vld [vmem:[%s4970_s1 + $0x704] ss:$8 sps:$4 sm:$0xff]  }
  0xaa   : > { %2234 = vmatprep.subr.bf16.mxu0 %v3545_v46  ;;  %1172 = vmatpush1.bf16.msra.mxu1 %v3540_v45  ;;  %v3608_v45 = vld [vmem:[%s4970_s1 + $0x314] ss:$8 sps:$4 sm:$0xff]   ;;  %v2325_v46 = vcombine.high %v4176_v28, %v4647_v41 }
  0xab   : > { %1173 = vmatprep.subr.bf16.mxu1 %v3548_v47  ;;  %v3606_v47 = vld [vmem:[%s4970_s1 + $0x310] ss:$8 sps:$4 sm:$0xff]  }
  0xad   : > { %2235 = vmatpush1.bf16.msra.mxu0 %v3543_v24  ;;  %v3611_v24 = vld [vmem:[%s4970_s1 + $0x714] ss:$8 sps:$4 sm:$0xff]  }
  0xae   : > { %2236 = vmatprep.subr.bf16.mxu0 %v3551_v44  ;;  %1174 = vmatpush1.bf16.msra.mxu1 %v3546_v13  ;;  %v3614_v13 = vld [vmem:[%s4970_s1 + $0x324] ss:$8 sps:$4 sm:$0xff]   ;;  %v3609_v44 = vld [vmem:[%s4970_s1 + $0x710] ss:$8 sps:$4 sm:$0xff]  }
  0xaf   : > { %1175 = vmatprep.subr.bf16.mxu1 %v3554_v48  ;;  %v3612_v48 = vld [vmem:[%s4970_s1 + $0x320] ss:$8 sps:$4 sm:$0xff]  }
  0xb1   : > { %2237 = vmatpush1.bf16.msra.mxu0 %v3549_v50  ;;  %v3617_v50 = vld [vmem:[%s4970_s1 + $0x724] ss:$8 sps:$4 sm:$0xff]  }
  0xb2   : > { %2238 = vmatprep.subr.bf16.mxu0 %v3557_v54  ;;  %1176 = vmatpush1.bf16.msra.mxu1 %v3552_v52  ;;  %v3623_v52 = vld [vmem:[%s4970_s1 + $0x734] ss:$8 sps:$4 sm:$0xff]   ;;  %v3626_v54 = vld [vmem:[%s4970_s1 + $0x344] ss:$8 sps:$4 sm:$0xff]  }
  0xb3   : > { %1177 = vmatprep.subr.bf16.mxu1 %v3560_v57  ;;  %v3621_v57 = vld [vmem:[%s4970_s1 + $0x730] ss:$8 sps:$4 sm:$0xff]  }
  0xb5   : > { %2239 = vmatpush1.bf16.msra.mxu0 %v3555_v58  ;;  %v3624_v58 = vld [vmem:[%s4970_s1 + $0x340] ss:$8 sps:$4 sm:$0xff]  }
  0xb6   : > { %2240 = vmatprep.subr.bf16.mxu0 %v3563_v61  ;;  %1178 = vmatpush1.bf16.msra.mxu1 %v3558_v56  ;;  %v3629_v56 = vld [vmem:[%s4970_s1 + $0x744] ss:$8 sps:$4 sm:$0xff]   ;;  %v3632_v61 = vld [vmem:[%s4970_s1 + $0x354] ss:$8 sps:$4 sm:$0xff]  }
  0xb7   : > { %1179 = vmatprep.subr.bf16.mxu1 %v3566_v62  ;;  %v3627_v62 = vld [vmem:[%s4970_s1 + $0x740] ss:$8 sps:$4 sm:$0xff]  }
  0xb9   : > { %2241 = vmatpush1.bf16.msra.mxu0 %v3561_v63  ;;  %v3630_v63 = vld [vmem:[%s4970_s1 + $0x350] ss:$8 sps:$4 sm:$0xff]  }
  0xba   : > { %2242 = vmatprep.subr.bf16.mxu0 %v3569_v1  ;;  %1180 = vmatpush1.bf16.msra.mxu1 %v3564_v0  ;;  %v3635_v0 = vld [vmem:[%s4970_s1 + $0x754] ss:$8 sps:$4 sm:$0xff]   ;;  %v3638_v1 = vld [vmem:[%s4970_s1 + $0x364] ss:$8 sps:$4 sm:$0xff]  }
  0xbb   : > { %1181 = vmatprep.subr.bf16.mxu1 %v3572_v2  ;;  %v3633_v2 = vld [vmem:[%s4970_s1 + $0x750] ss:$8 sps:$4 sm:$0xff]  }
  0xbd   : > { %2243 = vmatpush1.bf16.msra.mxu0 %v3567_v4  ;;  %v3636_v4 = vld [vmem:[%s4970_s1 + $0x360] ss:$8 sps:$4 sm:$0xff]  }
  0xbe   : > { %2244 = vmatprep.subr.bf16.mxu0 %v3575_v6  ;;  %1182 = vmatpush1.bf16.msra.mxu1 %v3570_v5  ;;  %v3641_v5 = vld [vmem:[%s4970_s1 + $0x764] ss:$8 sps:$4 sm:$0xff]   ;;  %v3644_v6 = vld [vmem:[%s4970_s1 + $0x374] ss:$8 sps:$4 sm:$0xff]  }
  0xbf   : > { %1183 = vmatprep.subr.bf16.mxu1 %v3578_v8  ;;  %v3639_v8 = vld [vmem:[%s4970_s1 + $0x760] ss:$8 sps:$4 sm:$0xff]  }
  0xc1   : > { %2245 = vmatpush1.bf16.msra.mxu0 %v3573_v10  ;;  %v3642_v10 = vld [vmem:[%s4970_s1 + $0x370] ss:$8 sps:$4 sm:$0xff]  }
  0xc2   : > { %2246 = vmatprep.subr.bf16.mxu0 %v3581_v9  ;;  %1184 = vmatpush1.bf16.msra.mxu1 %v3576_v60  ;;  %v3647_v60 = vld [vmem:[%s4970_s1 + $0x774] ss:$8 sps:$4 sm:$0xff]   ;;  %v3650_v9 = vld [vmem:[%s4970_s1 + $0x384] ss:$8 sps:$4 sm:$0xff]  }
  0xc3   : > { %1185 = vmatprep.subr.bf16.mxu1 %v3584_v12  ;;  %v3645_v12 = vld [vmem:[%s4970_s1 + $0x770] ss:$8 sps:$4 sm:$0xff]  }
  0xc5   : > { %2247 = vmatpush1.bf16.msra.mxu0 %v3579_v17  ;;  %v3648_v17 = vld [vmem:[%s4970_s1 + $0x380] ss:$8 sps:$4 sm:$0xff]  }
  0xc6   : > { %2248 = vmatprep.subr.bf16.mxu0 %v3587_v21  ;;  %1186 = vmatpush1.bf16.msra.mxu1 %v3582_v18  ;;  %v3653_v18 = vld [vmem:[%s4970_s1 + $0x784] ss:$8 sps:$4 sm:$0xff]   ;;  %v3656_v21 = vld [vmem:[%s4970_s1 + $0x394] ss:$8 sps:$4 sm:$0xff]  }
  0xc7   : > { %1187 = vmatprep.subr.bf16.mxu1 %v3590_v22  ;;  %v3651_v22 = vld [vmem:[%s4970_s1 + $0x780] ss:$8 sps:$4 sm:$0xff]  }
  0xc9   : > { %2249 = vmatpush1.bf16.msra.mxu0 %v3585_v26  ;;  %v3654_v26 = vld [vmem:[%s4970_s1 + $0x390] ss:$8 sps:$4 sm:$0xff]  }
  0xca   : > { %2250 = vmatprep.subr.bf16.mxu0 %v3593_v55  ;;  %1188 = vmatpush1.bf16.msra.mxu1 %v3588_v30  ;;  %v3659_v30 = vld [vmem:[%s4970_s1 + $0x794] ss:$8 sps:$4 sm:$0xff]   ;;  %v3662_v55 = vld [vmem:[%s4970_s1 + $0x3a4] ss:$8 sps:$4 sm:$0xff]  }
  0xcb   : > { %1189 = vmatprep.subr.bf16.mxu1 %v3596_v59  ;;  %v3657_v59 = vld [vmem:[%s4970_s1 + $0x790] ss:$8 sps:$4 sm:$0xff]  }
  0xcd   : > { %2251 = vmatpush1.bf16.msra.mxu0 %v3591_v35  ;;  %v3674_v35 = vld [vmem:[%s4970_s1 + $0x3c4] ss:$8 sps:$4 sm:$0xff]  }
  0xce   : > { %2252 = vmatprep.subr.bf16.mxu0 %v3599_v37  ;;  %1190 = vmatpush1.bf16.msra.mxu1 %v3594_v36  ;;  %v3669_v36 = vld [vmem:[%s4970_s1 + $0x7b0] ss:$8 sps:$4 sm:$0xff]   ;;  %v3672_v37 = vld [vmem:[%s4970_s1 + $0x3c0] ss:$8 sps:$4 sm:$0xff]  }
  0xcf   : > { %1426 = vmatprep.subr.bf16.mxu1 %v3602_v38  ;;  %v3677_v38 = vld [vmem:[%s4970_s1 + $0x7c4] ss:$8 sps:$4 sm:$0xff]  }
  0xd1   : > { %2253 = vmatpush1.bf16.msra.mxu0 %v3597_v19  ;;  %1192 = vmatmul.mubr.bf16.vlgmr.msra.gmra.mrb[0].mxu1 %v995_v40  ;;  %v3680_v19 = vld [vmem:[%s4970_s1 + $0x3d4] ss:$8 sps:$4 sm:$0xff]   ;;  %v3675_v40 = vld [vmem:[%s4970_s1 + $0x7c0] ss:$8 sps:$4 sm:$0xff]  }
  0xd2   : > { %2488 = vmatprep.subr.bf16.mxu0 %v3605_v25  ;;  %1427 = vmatpush1.bf16.msra.mxu1 %v3600_v42  ;;  %v3678_v42 = vld [vmem:[%s4970_s1 + $0x3d0] ss:$8 sps:$4 sm:$0xff]   ;;  %v3683_v25 = vld [vmem:[%s4970_s1 + $0x7d4] ss:$8 sps:$4 sm:$0xff]  }
  0xd3   : > { %1428 = vmatprep.subr.bf16.mxu1 %v3608_v45  ;;  %1458 = vmatprep.mubr.bf16.mxu1 %v1263_v43  ;;  %v3748_v45 = vld.sshfl [vmem:[#allocation2 + $0x28] sm:$0x5f pattern:$0x76325410] }
  0xd4   : > { %2255 = vmatmul.mubr.bf16.vlgmr.msra.gmra.mrb[0].mxu0 %v2058_v53  ;;  %v3618_v53 = vld [vmem:[%s4970_s1 + $0x330] ss:$8 sps:$4 sm:$0xff]   ;;  %v3221_v43 = vrot.slane %v3748_v45, 9 }
  0xd5   : > { %2489 = vmatpush1.bf16.msra.mxu0 %v3603_v34  ;;  %2520 = vmatprep.mubr.bf16.mxu0 %v2325_v46  ;;  %v2537_v34 = vrot.slane %v4105_v16, 7  ;;  %v3686_v46 = vld [vmem:[%s4970_s1 + $0x3e4] ss:$8 sps:$4 sm:$0xff]  }
  0xd6   : > { %2490 = vmatprep.subr.bf16.mxu0 %v3611_v24  ;;  %1429 = vmatpush1.bf16.msra.mxu1 %v3606_v47  ;;  %v3681_v47 = vld [vmem:[%s4970_s1 + $0x7d0] ss:$8 sps:$4 sm:$0xff]   ;;  %v3684_v24 = vld [vmem:[%s4970_s1 + $0x3e0] ss:$8 sps:$4 sm:$0xff]   ;;  %v3689_v16 = vld [vmem:[%s4970_s1 + $0x7e4] ss:$8 sps:$4 sm:$0xff]  }
  0xd7   : > { %1430 = vmatprep.subr.bf16.mxu1 %v3614_v13  ;;  %v2538_v13 = vsel %vm4168_vm0, %v3221_v43, %v2537_v34 }
  0xd9   : > { %2491 = vmatpush1.bf16.msra.mxu0 %v3609_v44  ;;  %v3692_v44 = vld [vmem:[%s4970_s1 + $0x3f4] ss:$8 sps:$4 sm:$0xff]  }
  0xda   : > { %2492 = vmatprep.subr.bf16.mxu0 %v3617_v50  ;;  %1431 = vmatpush1.bf16.msra.mxu1 %v3612_v48  ;;  %v3687_v48 = vld [vmem:[%s4970_s1 + $0x7e0] ss:$8 sps:$4 sm:$0xff]   ;;  %v2571_v50 = vcombine.low %v4229_v49, %v2538_v13 }
  0xdb   : > { %1432 = vmatprep.subr.bf16.mxu1 %v3620_v11  ;;  %v3690_v11 = vld [vmem:[%s4970_s1 + $0x3f0] ss:$8 sps:$4 sm:$0xff]  }
  0xdc   : > { %v4852_v49 = vrot.slane %v2571_v50, %v4101_v15  ;;  %v3701_v15 = vld [vmem:[%s4970_s1 + $0x814] ss:$8 sps:$4 sm:$0xff]  }
  0xdd   : > { %2493 = vmatpush1.bf16.msra.mxu0 %v3615_v51  ;;  %v3693_v51 = vld [vmem:[%s4970_s1 + $0x7f0] ss:$8 sps:$4 sm:$0xff]  }
  0xde   : > { %2494 = vmatprep.subr.bf16.mxu0 %v3623_v52  ;;  %1433 = vmatpush1.bf16.msra.mxu1 %v3618_v53  ;;  %v1262_v53 = vcombine.low %v4635_v20, %v4638_v39  ;;  %v3698_v52 = vld [vmem:[%s4970_s1 + $0x804] ss:$8 sps:$4 sm:$0xff]   ;;  %v2580_v20 = vcombine.high %v4431_v29, %v4852_v49 }
  0xdf   : > { %1434 = vmatprep.subr.bf16.mxu1 %v3626_v54  ;;  %v2324_v54 = vcombine.low %v4176_v28, %v4647_v41  ;;  %v3699_v28 = vld [vmem:[%s4970_s1 + $0x810] ss:$8 sps:$4 sm:$0xff]   ;;  %v3704_v39 = vld [vmem:[%s4970_s1 + $0x824] ss:$8 sps:$4 sm:$0xff]   ;;  %v3702_v41 = vld [vmem:[%s4970_s1 + $0x820] ss:$8 sps:$4 sm:$0xff]  }
  0xe1   : > { %2495 = vmatpush1.bf16.msra.mxu0 %v3621_v57  ;;  %v3696_v57 = vld [vmem:[%s4970_s1 + $0x800] ss:$8 sps:$4 sm:$0xff]  }
  0xe2   : > { %2496 = vmatprep.subr.bf16.mxu0 %v3629_v56  ;;  %1435 = vmatpush1.bf16.msra.mxu1 %v3624_v58  ;;  %v3707_v58 = vld [vmem:[%s4970_s1 + $0x834] ss:$8 sps:$4 sm:$0xff]   ;;  %v3705_v56 = vld [vmem:[%s4970_s1 + $0x830] ss:$8 sps:$4 sm:$0xff]  }
  0xe3   : > { %1436 = vmatprep.subr.bf16.mxu1 %v3632_v61  ;;  %v3710_v61 = vld [vmem:[%s4970_s1 + $0x844] ss:$8 sps:$4 sm:$0xff]  }
  0xe5   : > { %2497 = vmatpush1.bf16.msra.mxu0 %v3627_v62  ;;  %v3708_v62 = vld [vmem:[%s4970_s1 + $0x840] ss:$8 sps:$4 sm:$0xff]  }
  0xe6   : > { %2498 = vmatprep.subr.bf16.mxu0 %v3635_v0  ;;  %1437 = vmatpush1.bf16.msra.mxu1 %v3630_v63  ;;  %v3713_v63 = vld [vmem:[%s4970_s1 + $0x854] ss:$8 sps:$4 sm:$0xff]   ;;  %v3711_v0 = vld [vmem:[%s4970_s1 + $0x850] ss:$8 sps:$4 sm:$0xff]  }
  0xe7   : > { %1438 = vmatprep.subr.bf16.mxu1 %v3638_v1  ;;  %v3716_v1 = vld [vmem:[%s4970_s1 + $0x864] ss:$8 sps:$4 sm:$0xff]  }
  0xe9   : > { %2499 = vmatpush1.bf16.msra.mxu0 %v3633_v2  ;;  %v3714_v2 = vld [vmem:[%s4970_s1 + $0x860] ss:$8 sps:$4 sm:$0xff]  }
  0xea   : > { %2500 = vmatprep.subr.bf16.mxu0 %v3641_v5  ;;  %1439 = vmatpush1.bf16.msra.mxu1 %v3636_v4  ;;  %v3719_v4 = vld [vmem:[%s4970_s1 + $0x874] ss:$8 sps:$4 sm:$0xff]   ;;  %v3717_v5 = vld [vmem:[%s4970_s1 + $0x870] ss:$8 sps:$4 sm:$0xff]  }
  0xeb   : > { %1440 = vmatprep.subr.bf16.mxu1 %v3644_v6  ;;  %v3722_v6 = vld [vmem:[%s4970_s1 + $0x884] ss:$8 sps:$4 sm:$0xff]  }
  0xed   : > { %2501 = vmatpush1.bf16.msra.mxu0 %v3639_v8  ;;  %v3720_v8 = vld [vmem:[%s4970_s1 + $0x880] ss:$8 sps:$4 sm:$0xff]  }
  0xee   : > { %2502 = vmatprep.subr.bf16.mxu0 %v3647_v60  ;;  %1441 = vmatpush1.bf16.msra.mxu1 %v3642_v10  ;;  %v3725_v10 = vld [vmem:[%s4970_s1 + $0x894] ss:$8 sps:$4 sm:$0xff]   ;;  %v3723_v60 = vld [vmem:[%s4970_s1 + $0x890] ss:$8 sps:$4 sm:$0xff]  }
  0xef   : > { %1442 = vmatprep.subr.bf16.mxu1 %v3650_v9  ;;  %v3728_v9 = vld [vmem:[%s4970_s1 + $0x8a4] ss:$8 sps:$4 sm:$0xff]  }
  0xf1   : > { %2503 = vmatpush1.bf16.msra.mxu0 %v3645_v12  ;;  %v3726_v12 = vld [vmem:[%s4970_s1 + $0x8a0] ss:$8 sps:$4 sm:$0xff]  }
  0xf2   : > { %2504 = vmatprep.subr.bf16.mxu0 %v3653_v18  ;;  %1443 = vmatpush1.bf16.msra.mxu1 %v3648_v17  ;;  %v3731_v17 = vld [vmem:[%s4970_s1 + $0x8b4] ss:$8 sps:$4 sm:$0xff]   ;;  %v3729_v18 = vld [vmem:[%s4970_s1 + $0x8b0] ss:$8 sps:$4 sm:$0xff]  }
  0xf3   : > { %1444 = vmatprep.subr.bf16.mxu1 %v3656_v21  ;;  %v3734_v21 = vld [vmem:[%s4970_s1 + $0x8c4] ss:$8 sps:$4 sm:$0xff]  }
  0xf5   : > { %2505 = vmatpush1.bf16.msra.mxu0 %v3651_v22  ;;  %v3732_v22 = vld [vmem:[%s4970_s1 + $0x8c0] ss:$8 sps:$4 sm:$0xff]  }
  0xf6   : > { %2506 = vmatprep.subr.bf16.mxu0 %v3659_v30  ;;  %1445 = vmatpush1.bf16.msra.mxu1 %v3654_v26  ;;  %v3737_v26 = vld [vmem:[%s4970_s1 + $0x8d4] ss:$8 sps:$4 sm:$0xff]   ;;  %v3735_v30 = vld [vmem:[%s4970_s1 + $0x8d0] ss:$8 sps:$4 sm:$0xff]  }
  0xf7   : > { %1446 = vmatprep.subr.bf16.mxu1 %v3662_v55  ;;  %v3740_v55 = vld [vmem:[%s4970_s1 + $0x8e4] ss:$8 sps:$4 sm:$0xff]  }
  0xf9   : > { %2507 = vmatpush1.bf16.msra.mxu0 %v3657_v59  ;;  %v3738_v59 = vld [vmem:[%s4970_s1 + $0x8e0] ss:$8 sps:$4 sm:$0xff]  }
  0xfa   : > { %2508 = vmatprep.subr.bf16.mxu0 %v3665_v27  ;;  %1447 = vmatpush1.bf16.msra.mxu1 %v3660_v7  ;;  %v3743_v7 = vld [vmem:[%s4970_s1 + $0x8f4] ss:$8 sps:$4 sm:$0xff]   ;;  %v3741_v27 = vld [vmem:[%s4970_s1 + $0x8f0] ss:$8 sps:$4 sm:$0xff]  }
  0xfb   : > { %1448 = vmatprep.subr.bf16.mxu1 %v3668_v31  ;;  %v2579_v31 = vcombine.low %v4431_v29, %v4852_v49 }
  0xfd   : > { %2509 = vmatpush1.bf16.msra.mxu0 %v3663_v32 }
  0xfe   : > { %2510 = vmatprep.subr.bf16.mxu0 %v3671_v14  ;;  %1449 = vmatpush1.bf16.msra.mxu1 %v3666_v33 }
  0xff   : > { %1450 = vmatprep.subr.bf16.mxu1 %v3674_v35 }
 0x101   : > { %2511 = vmatpush1.bf16.msra.mxu0 %v3669_v36  ;;  %v2794_v36 = vsub.s32 0, %v4081_v3 }
 0x102   : > { %2512 = vmatprep.subr.bf16.mxu0 %v3677_v38  ;;  %1451 = vmatpush1.bf16.msra.mxu1 %v3672_v37  ;;  %v2790_v37 = vld [vmem:[%s4971_s2] sm:$0x3]  ;;  %v2798_v38 = vsub.s32 1, %v4081_v3 }
 0x103   : > { %1452 = vmatprep.subr.bf16.mxu1 %v3680_v19  ;;  %v2795_v19 = vrot.slane %v2790_v37, %v2794_v36 }
 0x105   : > { %2513 = vmatpush1.bf16.msra.mxu0 %v3675_v40 }
 0x106   : > { %2514 = vmatprep.subr.bf16.mxu0 %v3683_v25  ;;  %1453 = vmatpush1.bf16.msra.mxu1 %v3678_v42  ;;  %v2799_v42 = vrot.slane %v2790_v37, %v2798_v38 }
 0x107   : > { %1454 = vmatprep.subr.bf16.mxu1 %v3686_v46 }
 0x109   : > { %2515 = vmatpush1.bf16.msra.mxu0 %v3681_v47 }
 0x10a   : > { %2516 = vmatprep.subr.bf16.mxu0 %v3689_v16  ;;  %1455 = vmatpush1.bf16.msra.mxu1 %v3684_v24 }
 0x10b   : > { %1456 = vmatprep.subr.bf16.mxu1 %v3692_v44 }
 0x10d   : > { %2517 = vmatpush1.bf16.msra.mxu0 %v3687_v48 }
 0x10e   : > { %2518 = vmatprep.subr.bf16.mxu0 %v3695_v23  ;;  %1457 = vmatpush1.bf16.msra.mxu1 %v3690_v11 }
 0x111   : > { %2519 = vmatpush1.bf16.msra.mxu0 %v3693_v51  ;;  %1459 = vmatmul.mubr.bf16.vlgmr.msra.gmra.mrb[0].mxu1 %v1262_v53 }
 0x112   : > { %2743 = vmatprep.subr.bf16.mxu0 %v3698_v52 }
 0x114   : > { %2521 = vmatmul.mubr.bf16.vlgmr.msra.gmra.mrb[0].mxu0 %v2324_v54 }
 0x115   : > { %2744 = vmatpush1.bf16.msra.mxu0 %v3696_v57  ;;  %2775 = vmatprep.mubr.bf16.mxu0 %v2580_v20 }
 0x116   : > { %2745 = vmatprep.subr.bf16.mxu0 %v3701_v15 }
 0x119   : > { %2746 = vmatpush1.bf16.msra.mxu0 %v3699_v28 }
 0x11a   : > { %2747 = vmatprep.subr.bf16.mxu0 %v3704_v39 }
 0x11d   : > { %2748 = vmatpush1.bf16.msra.mxu0 %v3702_v41 }
 0x11e   : > { %2749 = vmatprep.subr.bf16.mxu0 %v3707_v58 }
 0x121   : > { %2750 = vmatpush1.bf16.msra.mxu0 %v3705_v56 }
 0x122   : > { %2751 = vmatprep.subr.bf16.mxu0 %v3710_v61 }
 0x125   : > { %2752 = vmatpush1.bf16.msra.mxu0 %v3708_v62 }
 0x126   : > { %2753 = vmatprep.subr.bf16.mxu0 %v3713_v63 }
 0x129   : > { %2754 = vmatpush1.bf16.msra.mxu0 %v3711_v0 }
 0x12a   : > { %2755 = vmatprep.subr.bf16.mxu0 %v3716_v1 }
 0x12d   : > { %2756 = vmatpush1.bf16.msra.mxu0 %v3714_v2 }
 0x12e   : > { %2757 = vmatprep.subr.bf16.mxu0 %v3719_v4 }
 0x131   : > { %2758 = vmatpush1.bf16.msra.mxu0 %v3717_v5 }
 0x132   : > { %2759 = vmatprep.subr.bf16.mxu0 %v3722_v6 }
 0x135   : > { %2760 = vmatpush1.bf16.msra.mxu0 %v3720_v8 }
 0x136   : > { %2761 = vmatprep.subr.bf16.mxu0 %v3725_v10 }
 0x139   : > { %2762 = vmatpush1.bf16.msra.mxu0 %v3723_v60 }
 0x13a   : > { %2763 = vmatprep.subr.bf16.mxu0 %v3728_v9 }
 0x13d   : > { %2764 = vmatpush1.bf16.msra.mxu0 %v3726_v12 }
 0x13e   : > { %2765 = vmatprep.subr.bf16.mxu0 %v3731_v17 }
 0x141   : > { %2766 = vmatpush1.bf16.msra.mxu0 %v3729_v18 }
 0x142   : > { %2767 = vmatprep.subr.bf16.mxu0 %v3734_v21 }
 0x145   : > { %2768 = vmatpush1.bf16.msra.mxu0 %v3732_v22 }
 0x146   : > { %2769 = vmatprep.subr.bf16.mxu0 %v3737_v26 }
 0x149   : > { %2770 = vmatpush1.bf16.msra.mxu0 %v3735_v30 }
 0x14a   : > { %2771 = vmatprep.subr.bf16.mxu0 %v3740_v55 }
 0x14d   : > { %2772 = vmatpush1.bf16.msra.mxu0 %v3738_v59 }
 0x14e   : > { %2773 = vmatprep.subr.bf16.mxu0 %v3743_v7 }
 0x151   : > { %2774 = vmatpush1.bf16.msra.mxu0 %v3741_v27 }
 0x154   : > { %2776 = vmatmul.mubr.bf16.vlgmr.msra.gmra.mrb[0].mxu0 %v2579_v31 }
 0x1e4   : > { %v1460_v32 = vpop.f32.mrb[0].mxu1 }
 0x1e5   : > { %v1462_v33 = vpop.f32.mrb[1].mxu1 }
 0x1e6   : > { %v1464_v14 = vpop.f32.mrb[2].mxu1 }
 0x1e7   : > { %v1466_v35 = vpop.f32.mrb[3].mxu1 }
 0x227   : > { %v2777_v40 = vpop.f32.mrb[0].mxu0 }
 0x228   : > { %v3270_v25 = vadd.f32 %v2777_v40, %v1460_v32  ;;  %v2779_v45 = vpop.f32.mrb[1].mxu0 }
 0x229   : > { %v3271_v29 = vadd.f32 %v2779_v45, %v1462_v33  ;;  %v2781_v43 = vpop.f32.mrb[2].mxu0 }
 0x22a   : > { %v2802_v34 = vadd.f32 %v3270_v25, %v2795_v19  ;;  %v3272_v46 = vadd.f32 %v2781_v43, %v1464_v14  ;;  %v2783_v47 = vpop.f32.mrb[3].mxu0 }
 0x22b   : > { %v2803_v24 = vadd.f32 %v3271_v29, %v2799_v42  ;;  %v3273_v16 = vadd.f32 %v2783_v47, %v1466_v35 }
 0x22c   : > { %v2806_v13 = vmax.f32 %v2802_v34, 0.0  ;;  %v2804_v44 = vadd.f32 %v3272_v46, %v2795_v19 }
 0x22d   : > { %v2807_v48 = vmax.f32 %v2803_v24, 0.0  ;;  %v2805_v50 = vadd.f32 %v3273_v16, %v2799_v42 }
 0x22e   : > { %v2808_v11 = vmax.f32 %v2804_v44, 0.0 }
 0x22f   : > { %v2814_v23 = vcombine.low %v2806_v13, %v2807_v48  ;;  %v2815_v3 = vcombine.high %v2806_v13, %v2807_v48  ;;  %v3254_v51 = vcombine.low %v2807_v48, %v2807_v48  ;;  %v3255_v53 = vcombine.high %v2807_v48, %v2807_v48 }
 0x230   : > { %v2809_v49 = vmax.f32 %v2805_v50, 0.0 }
 0x231   : > { %v3258_v52 = vpack.c.bf16 %v3254_v51, %v2814_v23  ;;  %v3259_v54 = vpack.c.bf16 %v3255_v53, %v2815_v3 }
 0x232   : > { %v2816_v57 = vcombine.low %v2808_v11, %v2809_v49  ;;  %v2817_v20 = vcombine.high %v2808_v11, %v2809_v49  ;;  %v3256_v15 = vcombine.low %v2809_v49, %v2809_v49  ;;  %v3257_v28 = vcombine.high %v2809_v49, %v2809_v49 }
 0x233   : > { %3262 = vst.sshfl [vmem:[%s170_s17] sm:$0x33 pattern:$0x76325410] %v3258_v52 }
 0x234   : > { %3263 = vst.sshfl [vmem:[%s170_s17 + $0x4] sm:$0x33 pattern:$0x76325410] %v3259_v54  ;;  %v3260_v39 = vpack.c.bf16 %v3256_v15, %v2816_v57  ;;  %v3261_v41 = vpack.c.bf16 %v3257_v28, %v2817_v20 }
 0x236   : > { %3264 = vst.sshfl [vmem:[%s170_s17 + $0x8] sm:$0x33 pattern:$0x76325410] %v3260_v39 }
 0x237   : > { %3265 = vst.sshfl [vmem:[%s170_s17 + $0xc] sm:$0x33 pattern:$0x76325410] %v3261_v41 }
 0x238 PF: > { %s13_s12 = sadd.s32 1, %s3755_s12  }
 0x239   : > { %p10_p4 = scmp.ge.s32.totalorder %s13_s12, 4  }
 0x23b   :  { %12 = sbr.rel (!%p10_p4) target bundleno = 1 (0x1), region = 64 }

</bundles_post_ra>
